<compile_context>
chip_gen: v7x
topology: tpu7x:2x2x1
jax: 0.10.0
libtpu: 0.0.40
codegen_flags: <defaults>
</compile_context>

<pallas_src>
import numpy as np
import jax
import jax.numpy as jnp
from jax.experimental import pallas as pl
from jax.experimental.pallas import tpu as pltpu


def _rup(x, m):
    return (x + m - 1) // m * m


# ----------------------- host-side 0/1 gather-matrix builders -----------------------
def _conv_gather(N, H, W, stride):
    """3x3 / pad=1 conv: rows (tap, n, oy, ox), cols (n, iy, ix). iy = s*oy + di - 1."""
    Ho = (H + 2 - 3) // stride + 1
    Wo = (W + 2 - 3) // stride + 1
    M, R = N * Ho * Wo, N * H * W
    G = np.zeros((9 * M, R), np.float32)
    for t in range(9):
        di, dj = divmod(t, 3)
        for n in range(N):
            for oy in range(Ho):
                for ox in range(Wo):
                    iy, ix = stride * oy + di - 1, stride * ox + dj - 1
                    if 0 <= iy < H and 0 <= ix < W:
                        G[t * M + (n * Ho + oy) * Wo + ox, (n * H + iy) * W + ix] = 1.0
    return G, Ho, Wo


def _convT_gather(N, H, W):
    """ConvTranspose2d(k=3, s=2, p=1, output_padding=1): oy = 2*iy - 1 + ky (Ho = 2H)."""
    Ho, Wo = 2 * H, 2 * W
    M, R = N * Ho * Wo, N * H * W
    G = np.zeros((9 * M, R), np.float32)
    for t in range(9):
        ky, kx = divmod(t, 3)
        for n in range(N):
            for oy in range(Ho):
                for ox in range(Wo):
                    ny, nx = oy + 1 - ky, ox + 1 - kx
                    if ny % 2 == 0 and nx % 2 == 0:
                        iy, ix = ny // 2, nx // 2
                        if 0 <= iy < H and 0 <= ix < W:
                            G[t * M + (n * Ho + oy) * Wo + ox, (n * H + iy) * W + ix] = 1.0
    return G, Ho, Wo


# ----------------------------------- parameters -------------------------------------
def build_model(key, *, B, H, W, in_channels, out_channels, latent_dim, hidden_dims):
    hidden_dims = list(hidden_dims)
    keys = iter(jax.random.split(key, 64))
    flat, enc_meta, dec_meta = [], [], []

    def conv_params(cin, k_in, cout, scale=0.05):
        npad = _rup(cout, 128)                       # lane-dense output block
        wk = jnp.zeros((9, k_in, npad), jnp.float32)
        wk = wk.at[:, :cin, :cout].set(
            jax.random.normal(next(keys), (9, cin, cout), jnp.float32) * scale)
        bias = jnp.zeros((1, npad), jnp.float32).at[0, :cout].set(
            jax.random.normal(next(keys), (cout,), jnp.float32) * scale)
        gamma = jnp.zeros((1, npad), jnp.float32).at[0, :cout].set(1.0)
        beta = jnp.zeros((1, npad), jnp.float32)
        return wk.astype(jnp.bfloat16), bias, gamma, beta, npad

    # ---- encoder: Conv2d(k=3, s=2, p=1) + BN + LeakyReLU per hidden dim ----
    cin, h, w = in_channels, H, W
    k_in0 = _rup(in_channels, 16)                    # K padded only to bf16 sublane (16)
    k_in = k_in0
    for hdim in hidden_dims:
        G, ho, wo = _conv_gather(B, h, w, 2)
        wk, bias, gamma, beta, npad = conv_params(cin, k_in, hdim)
        flat += [jnp.asarray(G, jnp.bfloat16), wk, bias, gamma, beta]
        enc_meta.append(dict(m_out=B * ho * wo, cout=hdim, npad=npad))
        cin, h, w, k_in = hdim, ho, wo, hdim

    feat_c = hidden_dims[-1]
    pos_n = h * w
    # decode() hard-codes .view(-1, 512, 2, 2): make the assumptions explicit.
    assert feat_c == 512 and pos_n == 4, "decoder expects a 512 x 2 x 2 encoder feature map"
    latent = latent_dim
    NL = 128
    assert 2 * latent <= NL
    Bp = _rup(B, 8)
    rows_e = B * pos_n
    assert rows_e == enc_meta[-1]["m_out"]

    # ---- fc_mu / fc_var in one matmul; torch flatten order (c, h, w) folded into weight ----
    wmu = jax.random.normal(next(keys), (feat_c * pos_n, latent), jnp.float32) * 0.02
    wvar = jax.random.normal(next(keys), (feat_c * pos_n, latent), jnp.float32) * 0.02
    wfc = jnp.zeros((feat_c, pos_n * NL), jnp.float32)
    wmu_r, wvar_r = wmu.reshape(feat_c, pos_n, latent), wvar.reshape(feat_c, pos_n, latent)
    for p in range(pos_n):
        wfc = wfc.at[:, p * NL:p * NL + latent].set(wmu_r[:, p, :])
        wfc = wfc.at[:, p * NL + latent:p * NL + 2 * latent].set(wvar_r[:, p, :])
    bfc = jnp.zeros((1, NL), jnp.float32)
    S = np.zeros((pos_n, Bp, rows_e), np.float32)    # per-position row-selection matrices
    Rm = np.zeros((pos_n, rows_e, Bp), np.float32)
    for b in range(B):
        for p in range(pos_n):
            S[p, b, b * pos_n + p] = 1.0
            Rm[p, b * pos_n + p, b] = 1.0
    flat += [wfc.astype(jnp.bfloat16), bfc, jnp.asarray(S)]

    # ---- decoder_input Linear; .view(-1,512,2,2) row layout folded into the weight ----
    wdec = jax.random.normal(next(keys), (latent, feat_c * pos_n), jnp.float32) * 0.02
    wdec_r = wdec.reshape(latent, feat_c, pos_n)
    wdec_cat = jnp.zeros((NL, pos_n * feat_c), jnp.float32)
    for p in range(pos_n):
        wdec_cat = wdec_cat.at[:latent, p * feat_c:(p + 1) * feat_c].set(wdec_r[:, :, p])
    bdec = jnp.zeros((1, pos_n * feat_c), jnp.float32)
    flat += [wdec_cat.astype(jnp.bfloat16), bdec, jnp.asarray(Rm)]

    # ---- decoder ConvTranspose blocks (+ final_layer ConvTranspose): sub-pixel gathers ----
    rev = hidden_dims[::-1]
    ct_specs = [(rev[i], rev[i + 1]) for i in range(len(rev) - 1)] + [(rev[-1], rev[-1])]
    cin, hd, wd = rev[0], h, w
    for (ci, co) in ct_specs:
        G, ho, wo = _convT_gather(B, hd, wd)
        wk, bias, gamma, beta, npad = conv_params(ci, ci, co)
        flat += [jnp.asarray(G, jnp.bfloat16), wk, bias, gamma, beta]
        dec_meta.append(dict(m_out=B * ho * wo, cout=co, npad=npad))
        cin, hd, wd = co, ho, wo

    # ---- final Conv2d(k=3, p=1) + Sigmoid ----
    G, ho, wo = _conv_gather(B, hd, wd, 1)
    wk, bias, _, _, npad = conv_params(cin, cin, out_channels)
    flat += [jnp.asarray(G, jnp.bfloat16), wk, bias]
    fin_meta = dict(m_out=B * ho * wo, cout=out_channels, npad=npad)

    meta = dict(B=B, H=H, W=W, Hf=ho, Wf=wo, in_channels=in_channels,
                out_channels=out_channels, latent=latent, NL=NL, Bp=Bp,
                pos_n=pos_n, feat_c=feat_c, k_in0=k_in0, rows_e=rows_e,
                enc=enc_meta, dec=dec_meta, final=fin_meta,
                m_final=fin_meta["m_out"], np_final=npad)
    return flat, meta


# ------------------------------------- kernel ---------------------------------------
def make_kernel(meta):
    enc_meta, dec_meta, fin_meta = meta["enc"], meta["dec"], meta["final"]
    latent, NL, Bp = meta["latent"], meta["NL"], meta["Bp"]
    pos_n, feat_c, rows_e = meta["pos_n"], meta["feat_c"], meta["rows_e"]

    def conv_unit(x_bf, g_ref, w_ref, b_ref, m_out):
        # 1 gather matmul (stacks the 9 shifted/strided taps) + 9 tap matmuls, f32 acc.
        stacked = jnp.dot(g_ref[...], x_bf, preferred_element_type=jnp.float32)
        stacked = stacked.astype(jnp.bfloat16)          # exact: 0/1 row selection
        npad = w_ref.shape[-1]
        acc = jnp.zeros((m_out, npad), jnp.float32)
        for t in range(9):
            acc = acc + jnp.dot(stacked[t * m_out:(t + 1) * m_out, :], w_ref[t],
                                preferred_element_type=jnp.float32)
        return acc + b_ref[...]

    def bn_lrelu(y, ga_ref, be_ref):
        # BatchNorm2d (training-mode batch stats, biased var) + LeakyReLU(0.01), one pass.
        inv_m = 1.0 / y.shape[0]
        mean = jnp.sum(y, axis=0, keepdims=True) * inv_m
        ex2 = jnp.sum(y * y, axis=0, keepdims=True) * inv_m
        var = ex2 - mean * mean
        yn = (y - mean) * jax.lax.rsqrt(var + 1e-5) * ga_ref[...] + be_ref[...]
        return jnp.where(yn >= 0.0, yn, 0.01 * yn)

    def kernel(*refs):
        it = iter(refs[:-2])
        recons_ref, muvar_ref = refs[-2], refs[-1]
        x_ref = next(it)
        eps_ref = next(it)

        # ---------------- encoder ----------------
        x = x_ref[...]                                   # (B*H*W, k_in0) bf16
        for lm in enc_meta:
            g_ref = next(it); w_ref = next(it); b_ref = next(it)
            ga_ref = next(it); be_ref = next(it)
            y = conv_unit(x, g_ref, w_ref, b_ref, lm["m_out"])
            a = bn_lrelu(y, ga_ref, be_ref)
            x = a[:, :lm["cout"]].astype(jnp.bfloat16)   # keep K small for the next layer
        e = x                                            # (rows_e, feat_c) bf16

        # ---------------- fc_mu / fc_var (flatten folded into the weight) ----------------
        wfc_ref = next(it); bfc_ref = next(it); s_ref = next(it)
        T = jnp.dot(e, wfc_ref[...], preferred_element_type=jnp.float32)
        mv = jnp.zeros((Bp, NL), jnp.float32)
        for p in range(pos_n):
            mv = mv + jnp.dot(s_ref[p], T[:, p * NL:(p + 1) * NL],
                              preferred_element_type=jnp.float32)
        mv = mv + bfc_ref[...]                           # lanes [0:L]=mu, [L:2L]=log_var
        muvar_ref[...] = mv

        # ---------------- reparameterize ----------------
        ii = jax.lax.broadcasted_iota(jnp.int32, (NL, NL), 0)
        jj = jax.lax.broadcasted_iota(jnp.int32, (NL, NL), 1)
        shift = (ii == jj + latent).astype(jnp.float32)  # lv[:, j] = mv[:, j + latent]
        lv = jnp.dot(mv, shift, preferred_element_type=jnp.float32)
        z = mv + eps_ref[...] * jnp.exp(0.5 * lv)
        z_bf = z.astype(jnp.bfloat16)

        # ------------- decoder_input (.view(-1,512,2,2) folded into the weight) -------------
        wd_ref = next(it); bd_ref = next(it); r_ref = next(it)
        U = jnp.dot(z_bf, wd_ref[...], preferred_element_type=jnp.float32) + bd_ref[...]
        xd = jnp.zeros((rows_e, feat_c), jnp.float32)
        for p in range(pos_n):
            xd = xd + jnp.dot(r_ref[p], U[:, p * feat_c:(p + 1) * feat_c],
                              preferred_element_type=jnp.float32)
        x = xd.astype(jnp.bfloat16)                      # (rows_e, feat_c)

        # --------- decoder ConvTranspose blocks (sub-pixel placement via gather mats) ---------
        for lm in dec_meta:
            g_ref = next(it); w_ref = next(it); b_ref = next(it)
            ga_ref = next(it); be_ref = next(it)
            y = conv_unit(x, g_ref, w_ref, b_ref, lm["m_out"])
            a = bn_lrelu(y, ga_ref, be_ref)
            x = a[:, :lm["cout"]].astype(jnp.bfloat16)

        # ---------------- final Conv2d + Sigmoid (lane-dense output block) ----------------
        g_ref = next(it); w_ref = next(it); b_ref = next(it)
        y = conv_unit(x, g_ref, w_ref, b_ref, fin_meta["m_out"])
        recons_ref[...] = jax.nn.sigmoid(y)

    return kernel


# ------------------------------------- forward --------------------------------------
def make_forward(meta, kernel):
    out_ch, latent = meta["out_channels"], meta["latent"]
    k_in0, NL, Bp = meta["k_in0"], meta["NL"], meta["Bp"]
    m_final, np_final = meta["m_final"], meta["np_final"]
    Hf, Wf = meta["Hf"], meta["Wf"]

    call = pl.pallas_call(
        kernel,
        out_shape=(jax.ShapeDtypeStruct((m_final, np_final), jnp.float32),
                   jax.ShapeDtypeStruct((Bp, NL), jnp.float32)),
        compiler_params=pltpu.CompilerParams(vmem_limit_bytes=32 * 1024 * 1024),
    )

    def forward(params_flat, x5, eps_key):
        b, c, f, h, w = x5.shape
        # 'b c f h w -> b (c f) h w', then NHWC rows (n, y, x) with channels on lanes.
        x = x5.reshape(b, c * f, h, w).transpose(0, 2, 3, 1).reshape(b * h * w, c * f)
        x = jnp.pad(x, ((0, 0), (0, k_in0 - c * f))).astype(jnp.bfloat16)
        eps = jax.random.normal(eps_key, (b, latent), jnp.float32)
        eps_p = jnp.zeros((Bp, NL), jnp.float32).at[:b, :latent].set(eps)

        recons_p, muvar_p = call(x, eps_p, *params_flat)

        recons = recons_p.reshape(b, Hf, Wf, np_final)[..., :out_ch]   # 'b h w c'
        mu = muvar_p[:b, :latent]
        log_var = muvar_p[:b, latent:2 * latent]
        return recons, mu, log_var

    return forward


# --------------------------------------- main ---------------------------------------
if __name__ == "__main__":
    key = jax.random.PRNGKey(0)
    pkey, xkey, ekey = jax.random.split(key, 3)

    # 5-D input (b, c, f, h, w); the torch model's in_channels = c * f.
    B, C, F, H, W = 2, 4, 2, 8, 8
    in_channels = C * F
    out_channels = 8
    latent_dim = 16
    hidden_dims = [32, 512]          # last hidden dim must be 512: decode() hard-codes it

    params, meta = build_model(pkey, B=B, H=H, W=W, in_channels=in_channels,
                               out_channels=out_channels, latent_dim=latent_dim,
                               hidden_dims=hidden_dims)
    kernel = make_kernel(meta)
    fwd = jax.jit(make_forward(meta, kernel))

    x = jax.random.normal(xkey, (B, C, F, H, W), jnp.float32)
    recons, mu, log_var = fwd(params, x, ekey)
    jax.block_until_ready((recons, mu, log_var))

    assert recons.shape == (B, H, W, out_channels)
    assert mu.shape == (B, latent_dim)
    assert log_var.shape == (B, latent_dim)
    assert bool(jnp.all(jnp.isfinite(recons)))
    assert bool(jnp.all(jnp.isfinite(mu))) and bool(jnp.all(jnp.isfinite(log_var)))
    print("KERNEL_OK")
</pallas_src>

<mosaic_0001>
module attributes {stable_mosaic.version = 11 : i64} {
  func.func @kernel(%arg0: memref<128x16xbf16, #tpu.memory_space<vmem>>, %arg1: memref<8x128xf32, #tpu.memory_space<vmem>>, %arg2: memref<288x128xbf16, #tpu.memory_space<vmem>>, %arg3: memref<9x16x128xbf16, #tpu.memory_space<vmem>>, %arg4: memref<1x128xf32, #tpu.memory_space<vmem>>, %arg5: memref<1x128xf32, #tpu.memory_space<vmem>>, %arg6: memref<1x128xf32, #tpu.memory_space<vmem>>, %arg7: memref<72x32xbf16, #tpu.memory_space<vmem>>, %arg8: memref<9x32x512xbf16, #tpu.memory_space<vmem>>, %arg9: memref<1x512xf32, #tpu.memory_space<vmem>>, %arg10: memref<1x512xf32, #tpu.memory_space<vmem>>, %arg11: memref<1x512xf32, #tpu.memory_space<vmem>>, %arg12: memref<512x512xbf16, #tpu.memory_space<vmem>>, %arg13: memref<1x128xf32, #tpu.memory_space<vmem>>, %arg14: memref<4x8x8xf32, #tpu.memory_space<vmem>>, %arg15: memref<128x2048xbf16, #tpu.memory_space<vmem>>, %arg16: memref<1x2048xf32, #tpu.memory_space<vmem>>, %arg17: memref<4x8x8xf32, #tpu.memory_space<vmem>>, %arg18: memref<288x8xbf16, #tpu.memory_space<vmem>>, %arg19: memref<9x512x128xbf16, #tpu.memory_space<vmem>>, %arg20: memref<1x128xf32, #tpu.memory_space<vmem>>, %arg21: memref<1x128xf32, #tpu.memory_space<vmem>>, %arg22: memref<1x128xf32, #tpu.memory_space<vmem>>, %arg23: memref<1152x32xbf16, #tpu.memory_space<vmem>>, %arg24: memref<9x32x128xbf16, #tpu.memory_space<vmem>>, %arg25: memref<1x128xf32, #tpu.memory_space<vmem>>, %arg26: memref<1x128xf32, #tpu.memory_space<vmem>>, %arg27: memref<1x128xf32, #tpu.memory_space<vmem>>, %arg28: memref<1152x128xbf16, #tpu.memory_space<vmem>>, %arg29: memref<9x32x128xbf16, #tpu.memory_space<vmem>>, %arg30: memref<1x128xf32, #tpu.memory_space<vmem>>, %arg31: memref<128x128xf32, #tpu.memory_space<vmem>>, %arg32: memref<8x128xf32, #tpu.memory_space<vmem>>) attributes {dimension_semantics = [], scalar_prefetch = 0 : i64, scratch_operands = 0 : i64, tpu.core_type = #tpu.core_type<tc>} {
    %c0 = arith.constant 0 : index
    %c0_0 = arith.constant 0 : index
    %0 = vector.load %arg0[%c0, %c0_0] : memref<128x16xbf16, #tpu.memory_space<vmem>>, vector<128x16xbf16>
    %c0_1 = arith.constant 0 : index
    %c0_2 = arith.constant 0 : index
    %1 = vector.load %arg2[%c0_1, %c0_2] : memref<288x128xbf16, #tpu.memory_space<vmem>>, vector<288x128xbf16>
    %cst = arith.constant dense<0.000000e+00> : vector<288x16xf32>
    %2 = tpu.matmul %1, %0, %cst {dimension_numbers = #tpu.dot_dimension_numbers<[1], [0], [0], [1], [0, 0, 1, 1], [], []>} : vector<288x128xbf16>, vector<128x16xbf16>, vector<288x16xf32> -> vector<288x16xf32>
    %3 = arith.truncf %2 : vector<288x16xf32> to vector<288x16xbf16>
    %cst_3 = arith.constant 0.000000e+00 : f32
    %4 = vector.broadcast %cst_3 : f32 to vector<32x128xf32>
    %5 = vector.extract_strided_slice %3 {offsets = [0, 0], sizes = [32, 16], strides = [1, 1]} : vector<288x16xbf16> to vector<32x16xbf16>
    %c0_4 = arith.constant 0 : index
    %c0_5 = arith.constant 0 : index
    %c0_6 = arith.constant 0 : index
    %6 = vector.load %arg3[%c0_4, %c0_5, %c0_6] : memref<9x16x128xbf16, #tpu.memory_space<vmem>>, vector<1x16x128xbf16>
    %7 = vector.shape_cast %6 : vector<1x16x128xbf16> to vector<16x128xbf16>
    %cst_7 = arith.constant dense<0.000000e+00> : vector<32x128xf32>
    %8 = tpu.matmul %5, %7, %cst_7 {dimension_numbers = #tpu.dot_dimension_numbers<[1], [0], [0], [1], [0, 0, 1, 1], [], []>} : vector<32x16xbf16>, vector<16x128xbf16>, vector<32x128xf32> -> vector<32x128xf32>
    %9 = arith.addf %4, %8 : vector<32x128xf32>
    %10 = vector.extract_strided_slice %3 {offsets = [32, 0], sizes = [32, 16], strides = [1, 1]} : vector<288x16xbf16> to vector<32x16xbf16>
    %c1 = arith.constant 1 : index
    %c0_8 = arith.constant 0 : index
    %c0_9 = arith.constant 0 : index
    %11 = vector.load %arg3[%c1, %c0_8, %c0_9] : memref<9x16x128xbf16, #tpu.memory_space<vmem>>, vector<1x16x128xbf16>
    %12 = vector.shape_cast %11 : vector<1x16x128xbf16> to vector<16x128xbf16>
    %cst_10 = arith.constant dense<0.000000e+00> : vector<32x128xf32>
    %13 = tpu.matmul %10, %12, %cst_10 {dimension_numbers = #tpu.dot_dimension_numbers<[1], [0], [0], [1], [0, 0, 1, 1], [], []>} : vector<32x16xbf16>, vector<16x128xbf16>, vector<32x128xf32> -> vector<32x128xf32>
    %14 = arith.addf %9, %13 : vector<32x128xf32>
    %15 = vector.extract_strided_slice %3 {offsets = [64, 0], sizes = [32, 16], strides = [1, 1]} : vector<288x16xbf16> to vector<32x16xbf16>
    %c2 = arith.constant 2 : index
    %c0_11 = arith.constant 0 : index
    %c0_12 = arith.constant 0 : index
    %16 = vector.load %arg3[%c2, %c0_11, %c0_12] : memref<9x16x128xbf16, #tpu.memory_space<vmem>>, vector<1x16x128xbf16>
    %17 = vector.shape_cast %16 : vector<1x16x128xbf16> to vector<16x128xbf16>
    %cst_13 = arith.constant dense<0.000000e+00> : vector<32x128xf32>
    %18 = tpu.matmul %15, %17, %cst_13 {dimension_numbers = #tpu.dot_dimension_numbers<[1], [0], [0], [1], [0, 0, 1, 1], [], []>} : vector<32x16xbf16>, vector<16x128xbf16>, vector<32x128xf32> -> vector<32x128xf32>
    %19 = arith.addf %14, %18 : vector<32x128xf32>
    %20 = vector.extract_strided_slice %3 {offsets = [96, 0], sizes = [32, 16], strides = [1, 1]} : vector<288x16xbf16> to vector<32x16xbf16>
    %c3 = arith.constant 3 : index
    %c0_14 = arith.constant 0 : index
    %c0_15 = arith.constant 0 : index
    %21 = vector.load %arg3[%c3, %c0_14, %c0_15] : memref<9x16x128xbf16, #tpu.memory_space<vmem>>, vector<1x16x128xbf16>
    %22 = vector.shape_cast %21 : vector<1x16x128xbf16> to vector<16x128xbf16>
    %cst_16 = arith.constant dense<0.000000e+00> : vector<32x128xf32>
    %23 = tpu.matmul %20, %22, %cst_16 {dimension_numbers = #tpu.dot_dimension_numbers<[1], [0], [0], [1], [0, 0, 1, 1], [], []>} : vector<32x16xbf16>, vector<16x128xbf16>, vector<32x128xf32> -> vector<32x128xf32>
    %24 = arith.addf %19, %23 : vector<32x128xf32>
    %25 = vector.extract_strided_slice %3 {offsets = [128, 0], sizes = [32, 16], strides = [1, 1]} : vector<288x16xbf16> to vector<32x16xbf16>
    %c4 = arith.constant 4 : index
    %c0_17 = arith.constant 0 : index
    %c0_18 = arith.constant 0 : index
    %26 = vector.load %arg3[%c4, %c0_17, %c0_18] : memref<9x16x128xbf16, #tpu.memory_space<vmem>>, vector<1x16x128xbf16>
    %27 = vector.shape_cast %26 : vector<1x16x128xbf16> to vector<16x128xbf16>
    %cst_19 = arith.constant dense<0.000000e+00> : vector<32x128xf32>
    %28 = tpu.matmul %25, %27, %cst_19 {dimension_numbers = #tpu.dot_dimension_numbers<[1], [0], [0], [1], [0, 0, 1, 1], [], []>} : vector<32x16xbf16>, vector<16x128xbf16>, vector<32x128xf32> -> vector<32x128xf32>
    %29 = arith.addf %24, %28 : vector<32x128xf32>
    %30 = vector.extract_strided_slice %3 {offsets = [160, 0], sizes = [32, 16], strides = [1, 1]} : vector<288x16xbf16> to vector<32x16xbf16>
    %c5 = arith.constant 5 : index
    %c0_20 = arith.constant 0 : index
    %c0_21 = arith.constant 0 : index
    %31 = vector.load %arg3[%c5, %c0_20, %c0_21] : memref<9x16x128xbf16, #tpu.memory_space<vmem>>, vector<1x16x128xbf16>
    %32 = vector.shape_cast %31 : vector<1x16x128xbf16> to vector<16x128xbf16>
    %cst_22 = arith.constant dense<0.000000e+00> : vector<32x128xf32>
    %33 = tpu.matmul %30, %32, %cst_22 {dimension_numbers = #tpu.dot_dimension_numbers<[1], [0], [0], [1], [0, 0, 1, 1], [], []>} : vector<32x16xbf16>, vector<16x128xbf16>, vector<32x128xf32> -> vector<32x128xf32>
    %34 = arith.addf %29, %33 : vector<32x128xf32>
    %35 = vector.extract_strided_slice %3 {offsets = [192, 0], sizes = [32, 16], strides = [1, 1]} : vector<288x16xbf16> to vector<32x16xbf16>
    %c6 = arith.constant 6 : index
    %c0_23 = arith.constant 0 : index
    %c0_24 = arith.constant 0 : index
    %36 = vector.load %arg3[%c6, %c0_23, %c0_24] : memref<9x16x128xbf16, #tpu.memory_space<vmem>>, vector<1x16x128xbf16>
    %37 = vector.shape_cast %36 : vector<1x16x128xbf16> to vector<16x128xbf16>
    %cst_25 = arith.constant dense<0.000000e+00> : vector<32x128xf32>
    %38 = tpu.matmul %35, %37, %cst_25 {dimension_numbers = #tpu.dot_dimension_numbers<[1], [0], [0], [1], [0, 0, 1, 1], [], []>} : vector<32x16xbf16>, vector<16x128xbf16>, vector<32x128xf32> -> vector<32x128xf32>
    %39 = arith.addf %34, %38 : vector<32x128xf32>
    %40 = vector.extract_strided_slice %3 {offsets = [224, 0], sizes = [32, 16], strides = [1, 1]} : vector<288x16xbf16> to vector<32x16xbf16>
    %c7 = arith.constant 7 : index
    %c0_26 = arith.constant 0 : index
    %c0_27 = arith.constant 0 : index
    %41 = vector.load %arg3[%c7, %c0_26, %c0_27] : memref<9x16x128xbf16, #tpu.memory_space<vmem>>, vector<1x16x128xbf16>
    %42 = vector.shape_cast %41 : vector<1x16x128xbf16> to vector<16x128xbf16>
    %cst_28 = arith.constant dense<0.000000e+00> : vector<32x128xf32>
    %43 = tpu.matmul %40, %42, %cst_28 {dimension_numbers = #tpu.dot_dimension_numbers<[1], [0], [0], [1], [0, 0, 1, 1], [], []>} : vector<32x16xbf16>, vector<16x128xbf16>, vector<32x128xf32> -> vector<32x128xf32>
    %44 = arith.addf %39, %43 : vector<32x128xf32>
    %45 = vector.extract_strided_slice %3 {offsets = [256, 0], sizes = [32, 16], strides = [1, 1]} : vector<288x16xbf16> to vector<32x16xbf16>
    %c8 = arith.constant 8 : index
    %c0_29 = arith.constant 0 : index
    %c0_30 = arith.constant 0 : index
    %46 = vector.load %arg3[%c8, %c0_29, %c0_30] : memref<9x16x128xbf16, #tpu.memory_space<vmem>>, vector<1x16x128xbf16>
    %47 = vector.shape_cast %46 : vector<1x16x128xbf16> to vector<16x128xbf16>
    %cst_31 = arith.constant dense<0.000000e+00> : vector<32x128xf32>
    %48 = tpu.matmul %45, %47, %cst_31 {dimension_numbers = #tpu.dot_dimension_numbers<[1], [0], [0], [1], [0, 0, 1, 1], [], []>} : vector<32x16xbf16>, vector<16x128xbf16>, vector<32x128xf32> -> vector<32x128xf32>
    %49 = arith.addf %44, %48 : vector<32x128xf32>
    %c0_32 = arith.constant 0 : index
    %c0_33 = arith.constant 0 : index
    %50 = vector.load %arg4[%c0_32, %c0_33] : memref<1x128xf32, #tpu.memory_space<vmem>>, vector<1x128xf32>
    %51 = vector.broadcast %50 : vector<1x128xf32> to vector<32x128xf32>
    %52 = arith.addf %49, %51 : vector<32x128xf32>
    %cst_34 = arith.constant dense<0.000000e+00> : vector<128xf32>
    %53 = vector.multi_reduction <add>, %52, %cst_34 [0] : vector<32x128xf32> to vector<128xf32>
    %54 = vector.shape_cast %53 : vector<128xf32> to vector<1x128xf32>
    %cst_35 = arith.constant 3.125000e-02 : f32
    %55 = vector.broadcast %cst_35 : f32 to vector<1x128xf32>
    %56 = arith.mulf %54, %55 : vector<1x128xf32>
    %57 = arith.mulf %52, %52 : vector<32x128xf32>
    %cst_36 = arith.constant dense<0.000000e+00> : vector<128xf32>
    %58 = vector.multi_reduction <add>, %57, %cst_36 [0] : vector<32x128xf32> to vector<128xf32>
    %59 = vector.shape_cast %58 : vector<128xf32> to vector<1x128xf32>
    %cst_37 = arith.constant 3.125000e-02 : f32
    %60 = vector.broadcast %cst_37 : f32 to vector<1x128xf32>
    %61 = arith.mulf %59, %60 : vector<1x128xf32>
    %62 = arith.mulf %56, %56 : vector<1x128xf32>
    %63 = arith.subf %61, %62 : vector<1x128xf32>
    %64 = vector.broadcast %56 : vector<1x128xf32> to vector<32x128xf32>
    %65 = arith.subf %52, %64 : vector<32x128xf32>
    %cst_38 = arith.constant 9.99999974E-6 : f32
    %66 = vector.broadcast %cst_38 : f32 to vector<1x128xf32>
    %67 = arith.addf %63, %66 : vector<1x128xf32>
    %68 = math.rsqrt %67 : vector<1x128xf32>
    %69 = vector.broadcast %68 : vector<1x128xf32> to vector<32x128xf32>
    %70 = arith.mulf %65, %69 : vector<32x128xf32>
    %c0_39 = arith.constant 0 : index
    %c0_40 = arith.constant 0 : index
    %71 = vector.load %arg5[%c0_39, %c0_40] : memref<1x128xf32, #tpu.memory_space<vmem>>, vector<1x128xf32>
    %72 = vector.broadcast %71 : vector<1x128xf32> to vector<32x128xf32>
    %73 = arith.mulf %70, %72 : vector<32x128xf32>
    %c0_41 = arith.constant 0 : index
    %c0_42 = arith.constant 0 : index
    %74 = vector.load %arg6[%c0_41, %c0_42] : memref<1x128xf32, #tpu.memory_space<vmem>>, vector<1x128xf32>
    %75 = vector.broadcast %74 : vector<1x128xf32> to vector<32x128xf32>
    %76 = arith.addf %73, %75 : vector<32x128xf32>
    %cst_43 = arith.constant 0.000000e+00 : f32
    %77 = vector.broadcast %cst_43 : f32 to vector<32x128xf32>
    %78 = arith.cmpf oge, %76, %77 : vector<32x128xf32>
    %cst_44 = arith.constant 0.00999999977 : f32
    %79 = vector.broadcast %cst_44 : f32 to vector<32x128xf32>
    %80 = arith.mulf %79, %76 : vector<32x128xf32>
    %81 = arith.select %78, %76, %80 : vector<32x128xi1>, vector<32x128xf32>
    %82 = vector.extract_strided_slice %81 {offsets = [0, 0], sizes = [32, 32], strides = [1, 1]} : vector<32x128xf32> to vector<32x32xf32>
    %83 = arith.truncf %82 : vector<32x32xf32> to vector<32x32xbf16>
    %c0_45 = arith.constant 0 : index
    %c0_46 = arith.constant 0 : index
    %84 = vector.load %arg7[%c0_45, %c0_46] : memref<72x32xbf16, #tpu.memory_space<vmem>>, vector<72x32xbf16>
    %cst_47 = arith.constant dense<0.000000e+00> : vector<72x32xf32>
    %85 = tpu.matmul %84, %83, %cst_47 {dimension_numbers = #tpu.dot_dimension_numbers<[1], [0], [0], [1], [0, 0, 1, 1], [], []>} : vector<72x32xbf16>, vector<32x32xbf16>, vector<72x32xf32> -> vector<72x32xf32>
    %86 = arith.truncf %85 : vector<72x32xf32> to vector<72x32xbf16>
    %cst_48 = arith.constant 0.000000e+00 : f32
    %87 = vector.broadcast %cst_48 : f32 to vector<8x512xf32>
    %88 = vector.extract_strided_slice %86 {offsets = [0, 0], sizes = [8, 32], strides = [1, 1]} : vector<72x32xbf16> to vector<8x32xbf16>
    %c0_49 = arith.constant 0 : index
    %c0_50 = arith.constant 0 : index
    %c0_51 = arith.constant 0 : index
    %89 = vector.load %arg8[%c0_49, %c0_50, %c0_51] : memref<9x32x512xbf16, #tpu.memory_space<vmem>>, vector<1x32x512xbf16>
    %90 = vector.shape_cast %89 : vector<1x32x512xbf16> to vector<32x512xbf16>
    %cst_52 = arith.constant dense<0.000000e+00> : vector<8x512xf32>
    %91 = tpu.matmul %88, %90, %cst_52 {dimension_numbers = #tpu.dot_dimension_numbers<[1], [0], [0], [1], [0, 0, 1, 1], [], []>} : vector<8x32xbf16>, vector<32x512xbf16>, vector<8x512xf32> -> vector<8x512xf32>
    %92 = arith.addf %87, %91 : vector<8x512xf32>
    %93 = vector.extract_strided_slice %86 {offsets = [8, 0], sizes = [8, 32], strides = [1, 1]} : vector<72x32xbf16> to vector<8x32xbf16>
    %c1_53 = arith.constant 1 : index
    %c0_54 = arith.constant 0 : index
    %c0_55 = arith.constant 0 : index
    %94 = vector.load %arg8[%c1_53, %c0_54, %c0_55] : memref<9x32x512xbf16, #tpu.memory_space<vmem>>, vector<1x32x512xbf16>
    %95 = vector.shape_cast %94 : vector<1x32x512xbf16> to vector<32x512xbf16>
    %cst_56 = arith.constant dense<0.000000e+00> : vector<8x512xf32>
    %96 = tpu.matmul %93, %95, %cst_56 {dimension_numbers = #tpu.dot_dimension_numbers<[1], [0], [0], [1], [0, 0, 1, 1], [], []>} : vector<8x32xbf16>, vector<32x512xbf16>, vector<8x512xf32> -> vector<8x512xf32>
    %97 = arith.addf %92, %96 : vector<8x512xf32>
    %98 = vector.extract_strided_slice %86 {offsets = [16, 0], sizes = [8, 32], strides = [1, 1]} : vector<72x32xbf16> to vector<8x32xbf16>
    %c2_57 = arith.constant 2 : index
    %c0_58 = arith.constant 0 : index
    %c0_59 = arith.constant 0 : index
    %99 = vector.load %arg8[%c2_57, %c0_58, %c0_59] : memref<9x32x512xbf16, #tpu.memory_space<vmem>>, vector<1x32x512xbf16>
    %100 = vector.shape_cast %99 : vector<1x32x512xbf16> to vector<32x512xbf16>
    %cst_60 = arith.constant dense<0.000000e+00> : vector<8x512xf32>
    %101 = tpu.matmul %98, %100, %cst_60 {dimension_numbers = #tpu.dot_dimension_numbers<[1], [0], [0], [1], [0, 0, 1, 1], [], []>} : vector<8x32xbf16>, vector<32x512xbf16>, vector<8x512xf32> -> vector<8x512xf32>
    %102 = arith.addf %97, %101 : vector<8x512xf32>
    %103 = vector.extract_strided_slice %86 {offsets = [24, 0], sizes = [8, 32], strides = [1, 1]} : vector<72x32xbf16> to vector<8x32xbf16>
    %c3_61 = arith.constant 3 : index
    %c0_62 = arith.constant 0 : index
    %c0_63 = arith.constant 0 : index
    %104 = vector.load %arg8[%c3_61, %c0_62, %c0_63] : memref<9x32x512xbf16, #tpu.memory_space<vmem>>, vector<1x32x512xbf16>
    %105 = vector.shape_cast %104 : vector<1x32x512xbf16> to vector<32x512xbf16>
    %cst_64 = arith.constant dense<0.000000e+00> : vector<8x512xf32>
    %106 = tpu.matmul %103, %105, %cst_64 {dimension_numbers = #tpu.dot_dimension_numbers<[1], [0], [0], [1], [0, 0, 1, 1], [], []>} : vector<8x32xbf16>, vector<32x512xbf16>, vector<8x512xf32> -> vector<8x512xf32>
    %107 = arith.addf %102, %106 : vector<8x512xf32>
    %108 = vector.extract_strided_slice %86 {offsets = [32, 0], sizes = [8, 32], strides = [1, 1]} : vector<72x32xbf16> to vector<8x32xbf16>
    %c4_65 = arith.constant 4 : index
    %c0_66 = arith.constant 0 : index
    %c0_67 = arith.constant 0 : index
    %109 = vector.load %arg8[%c4_65, %c0_66, %c0_67] : memref<9x32x512xbf16, #tpu.memory_space<vmem>>, vector<1x32x512xbf16>
    %110 = vector.shape_cast %109 : vector<1x32x512xbf16> to vector<32x512xbf16>
    %cst_68 = arith.constant dense<0.000000e+00> : vector<8x512xf32>
    %111 = tpu.matmul %108, %110, %cst_68 {dimension_numbers = #tpu.dot_dimension_numbers<[1], [0], [0], [1], [0, 0, 1, 1], [], []>} : vector<8x32xbf16>, vector<32x512xbf16>, vector<8x512xf32> -> vector<8x512xf32>
    %112 = arith.addf %107, %111 : vector<8x512xf32>
    %113 = vector.extract_strided_slice %86 {offsets = [40, 0], sizes = [8, 32], strides = [1, 1]} : vector<72x32xbf16> to vector<8x32xbf16>
    %c5_69 = arith.constant 5 : index
    %c0_70 = arith.constant 0 : index
    %c0_71 = arith.constant 0 : index
    %114 = vector.load %arg8[%c5_69, %c0_70, %c0_71] : memref<9x32x512xbf16, #tpu.memory_space<vmem>>, vector<1x32x512xbf16>
    %115 = vector.shape_cast %114 : vector<1x32x512xbf16> to vector<32x512xbf16>
    %cst_72 = arith.constant dense<0.000000e+00> : vector<8x512xf32>
    %116 = tpu.matmul %113, %115, %cst_72 {dimension_numbers = #tpu.dot_dimension_numbers<[1], [0], [0], [1], [0, 0, 1, 1], [], []>} : vector<8x32xbf16>, vector<32x512xbf16>, vector<8x512xf32> -> vector<8x512xf32>
    %117 = arith.addf %112, %116 : vector<8x512xf32>
    %118 = vector.extract_strided_slice %86 {offsets = [48, 0], sizes = [8, 32], strides = [1, 1]} : vector<72x32xbf16> to vector<8x32xbf16>
    %c6_73 = arith.constant 6 : index
    %c0_74 = arith.constant 0 : index
    %c0_75 = arith.constant 0 : index
    %119 = vector.load %arg8[%c6_73, %c0_74, %c0_75] : memref<9x32x512xbf16, #tpu.memory_space<vmem>>, vector<1x32x512xbf16>
    %120 = vector.shape_cast %119 : vector<1x32x512xbf16> to vector<32x512xbf16>
    %cst_76 = arith.constant dense<0.000000e+00> : vector<8x512xf32>
    %121 = tpu.matmul %118, %120, %cst_76 {dimension_numbers = #tpu.dot_dimension_numbers<[1], [0], [0], [1], [0, 0, 1, 1], [], []>} : vector<8x32xbf16>, vector<32x512xbf16>, vector<8x512xf32> -> vector<8x512xf32>
    %122 = arith.addf %117, %121 : vector<8x512xf32>
    %123 = vector.extract_strided_slice %86 {offsets = [56, 0], sizes = [8, 32], strides = [1, 1]} : vector<72x32xbf16> to vector<8x32xbf16>
    %c7_77 = arith.constant 7 : index
    %c0_78 = arith.constant 0 : index
    %c0_79 = arith.constant 0 : index
    %124 = vector.load %arg8[%c7_77, %c0_78, %c0_79] : memref<9x32x512xbf16, #tpu.memory_space<vmem>>, vector<1x32x512xbf16>
    %125 = vector.shape_cast %124 : vector<1x32x512xbf16> to vector<32x512xbf16>
    %cst_80 = arith.constant dense<0.000000e+00> : vector<8x512xf32>
    %126 = tpu.matmul %123, %125, %cst_80 {dimension_numbers = #tpu.dot_dimension_numbers<[1], [0], [0], [1], [0, 0, 1, 1], [], []>} : vector<8x32xbf16>, vector<32x512xbf16>, vector<8x512xf32> -> vector<8x512xf32>
    %127 = arith.addf %122, %126 : vector<8x512xf32>
    %128 = vector.extract_strided_slice %86 {offsets = [64, 0], sizes = [8, 32], strides = [1, 1]} : vector<72x32xbf16> to vector<8x32xbf16>
    %c8_81 = arith.constant 8 : index
    %c0_82 = arith.constant 0 : index
    %c0_83 = arith.constant 0 : index
    %129 = vector.load %arg8[%c8_81, %c0_82, %c0_83] : memref<9x32x512xbf16, #tpu.memory_space<vmem>>, vector<1x32x512xbf16>
    %130 = vector.shape_cast %129 : vector<1x32x512xbf16> to vector<32x512xbf16>
    %cst_84 = arith.constant dense<0.000000e+00> : vector<8x512xf32>
    %131 = tpu.matmul %128, %130, %cst_84 {dimension_numbers = #tpu.dot_dimension_numbers<[1], [0], [0], [1], [0, 0, 1, 1], [], []>} : vector<8x32xbf16>, vector<32x512xbf16>, vector<8x512xf32> -> vector<8x512xf32>
    %132 = arith.addf %127, %131 : vector<8x512xf32>
    %c0_85 = arith.constant 0 : index
    %c0_86 = arith.constant 0 : index
    %133 = vector.load %arg9[%c0_85, %c0_86] : memref<1x512xf32, #tpu.memory_space<vmem>>, vector<1x512xf32>
    %134 = vector.broadcast %133 : vector<1x512xf32> to vector<8x512xf32>
    %135 = arith.addf %132, %134 : vector<8x512xf32>
    %cst_87 = arith.constant dense<0.000000e+00> : vector<512xf32>
    %136 = vector.multi_reduction <add>, %135, %cst_87 [0] : vector<8x512xf32> to vector<512xf32>
    %137 = vector.shape_cast %136 : vector<512xf32> to vector<1x512xf32>
    %cst_88 = arith.constant 1.250000e-01 : f32
    %138 = vector.broadcast %cst_88 : f32 to vector<1x512xf32>
    %139 = arith.mulf %137, %138 : vector<1x512xf32>
    %140 = arith.mulf %135, %135 : vector<8x512xf32>
    %cst_89 = arith.constant dense<0.000000e+00> : vector<512xf32>
    %141 = vector.multi_reduction <add>, %140, %cst_89 [0] : vector<8x512xf32> to vector<512xf32>
    %142 = vector.shape_cast %141 : vector<512xf32> to vector<1x512xf32>
    %cst_90 = arith.constant 1.250000e-01 : f32
    %143 = vector.broadcast %cst_90 : f32 to vector<1x512xf32>
    %144 = arith.mulf %142, %143 : vector<1x512xf32>
    %145 = arith.mulf %139, %139 : vector<1x512xf32>
    %146 = arith.subf %144, %145 : vector<1x512xf32>
    %147 = vector.broadcast %139 : vector<1x512xf32> to vector<8x512xf32>
    %148 = arith.subf %135, %147 : vector<8x512xf32>
    %cst_91 = arith.constant 9.99999974E-6 : f32
    %149 = vector.broadcast %cst_91 : f32 to vector<1x512xf32>
    %150 = arith.addf %146, %149 : vector<1x512xf32>
    %151 = math.rsqrt %150 : vector<1x512xf32>
    %152 = vector.broadcast %151 : vector<1x512xf32> to vector<8x512xf32>
    %153 = arith.mulf %148, %152 : vector<8x512xf32>
    %c0_92 = arith.constant 0 : index
    %c0_93 = arith.constant 0 : index
    %154 = vector.load %arg10[%c0_92, %c0_93] : memref<1x512xf32, #tpu.memory_space<vmem>>, vector<1x512xf32>
    %155 = vector.broadcast %154 : vector<1x512xf32> to vector<8x512xf32>
    %156 = arith.mulf %153, %155 : vector<8x512xf32>
    %c0_94 = arith.constant 0 : index
    %c0_95 = arith.constant 0 : index
    %157 = vector.load %arg11[%c0_94, %c0_95] : memref<1x512xf32, #tpu.memory_space<vmem>>, vector<1x512xf32>
    %158 = vector.broadcast %157 : vector<1x512xf32> to vector<8x512xf32>
    %159 = arith.addf %156, %158 : vector<8x512xf32>
    %cst_96 = arith.constant 0.000000e+00 : f32
    %160 = vector.broadcast %cst_96 : f32 to vector<8x512xf32>
    %161 = arith.cmpf oge, %159, %160 : vector<8x512xf32>
    %cst_97 = arith.constant 0.00999999977 : f32
    %162 = vector.broadcast %cst_97 : f32 to vector<8x512xf32>
    %163 = arith.mulf %162, %159 : vector<8x512xf32>
    %164 = arith.select %161, %159, %163 : vector<8x512xi1>, vector<8x512xf32>
    %165 = arith.truncf %164 : vector<8x512xf32> to vector<8x512xbf16>
    %c0_98 = arith.constant 0 : index
    %c0_99 = arith.constant 0 : index
    %166 = vector.load %arg12[%c0_98, %c0_99] : memref<512x512xbf16, #tpu.memory_space<vmem>>, vector<512x512xbf16>
    %cst_100 = arith.constant dense<0.000000e+00> : vector<8x512xf32>
    %167 = tpu.matmul %165, %166, %cst_100 {dimension_numbers = #tpu.dot_dimension_numbers<[1], [0], [0], [1], [0, 0, 1, 1], [], []>} : vector<8x512xbf16>, vector<512x512xbf16>, vector<8x512xf32> -> vector<8x512xf32>
    %cst_101 = arith.constant 0.000000e+00 : f32
    %168 = vector.broadcast %cst_101 : f32 to vector<8x128xf32>
    %c0_102 = arith.constant 0 : index
    %c0_103 = arith.constant 0 : index
    %c0_104 = arith.constant 0 : index
    %169 = vector.load %arg14[%c0_102, %c0_103, %c0_104] : memref<4x8x8xf32, #tpu.memory_space<vmem>>, vector<1x8x8xf32>
    %170 = vector.shape_cast %169 : vector<1x8x8xf32> to vector<8x8xf32>
    %171 = vector.extract_strided_slice %167 {offsets = [0, 0], sizes = [8, 128], strides = [1, 1]} : vector<8x512xf32> to vector<8x128xf32>
    %cst_105 = arith.constant dense<0.000000e+00> : vector<8x128xf32>
    %172 = tpu.matmul %170, %171, %cst_105 {dimension_numbers = #tpu.dot_dimension_numbers<[1], [0], [0], [1], [0, 0, 1, 1], [], []>} : vector<8x8xf32>, vector<8x128xf32>, vector<8x128xf32> -> vector<8x128xf32>
    %173 = arith.addf %168, %172 : vector<8x128xf32>
    %c1_106 = arith.constant 1 : index
    %c0_107 = arith.constant 0 : index
    %c0_108 = arith.constant 0 : index
    %174 = vector.load %arg14[%c1_106, %c0_107, %c0_108] : memref<4x8x8xf32, #tpu.memory_space<vmem>>, vector<1x8x8xf32>
    %175 = vector.shape_cast %174 : vector<1x8x8xf32> to vector<8x8xf32>
    %176 = vector.extract_strided_slice %167 {offsets = [0, 128], sizes = [8, 128], strides = [1, 1]} : vector<8x512xf32> to vector<8x128xf32>
    %cst_109 = arith.constant dense<0.000000e+00> : vector<8x128xf32>
    %177 = tpu.matmul %175, %176, %cst_109 {dimension_numbers = #tpu.dot_dimension_numbers<[1], [0], [0], [1], [0, 0, 1, 1], [], []>} : vector<8x8xf32>, vector<8x128xf32>, vector<8x128xf32> -> vector<8x128xf32>
    %178 = arith.addf %173, %177 : vector<8x128xf32>
    %c2_110 = arith.constant 2 : index
    %c0_111 = arith.constant 0 : index
    %c0_112 = arith.constant 0 : index
    %179 = vector.load %arg14[%c2_110, %c0_111, %c0_112] : memref<4x8x8xf32, #tpu.memory_space<vmem>>, vector<1x8x8xf32>
    %180 = vector.shape_cast %179 : vector<1x8x8xf32> to vector<8x8xf32>
    %181 = vector.extract_strided_slice %167 {offsets = [0, 256], sizes = [8, 128], strides = [1, 1]} : vector<8x512xf32> to vector<8x128xf32>
    %cst_113 = arith.constant dense<0.000000e+00> : vector<8x128xf32>
    %182 = tpu.matmul %180, %181, %cst_113 {dimension_numbers = #tpu.dot_dimension_numbers<[1], [0], [0], [1], [0, 0, 1, 1], [], []>} : vector<8x8xf32>, vector<8x128xf32>, vector<8x128xf32> -> vector<8x128xf32>
    %183 = arith.addf %178, %182 : vector<8x128xf32>
    %c3_114 = arith.constant 3 : index
    %c0_115 = arith.constant 0 : index
    %c0_116 = arith.constant 0 : index
    %184 = vector.load %arg14[%c3_114, %c0_115, %c0_116] : memref<4x8x8xf32, #tpu.memory_space<vmem>>, vector<1x8x8xf32>
    %185 = vector.shape_cast %184 : vector<1x8x8xf32> to vector<8x8xf32>
    %186 = vector.extract_strided_slice %167 {offsets = [0, 384], sizes = [8, 128], strides = [1, 1]} : vector<8x512xf32> to vector<8x128xf32>
    %cst_117 = arith.constant dense<0.000000e+00> : vector<8x128xf32>
    %187 = tpu.matmul %185, %186, %cst_117 {dimension_numbers = #tpu.dot_dimension_numbers<[1], [0], [0], [1], [0, 0, 1, 1], [], []>} : vector<8x8xf32>, vector<8x128xf32>, vector<8x128xf32> -> vector<8x128xf32>
    %188 = arith.addf %183, %187 : vector<8x128xf32>
    %c0_118 = arith.constant 0 : index
    %c0_119 = arith.constant 0 : index
    %189 = vector.load %arg13[%c0_118, %c0_119] : memref<1x128xf32, #tpu.memory_space<vmem>>, vector<1x128xf32>
    %190 = vector.broadcast %189 : vector<1x128xf32> to vector<8x128xf32>
    %191 = arith.addf %188, %190 : vector<8x128xf32>
    %c0_120 = arith.constant 0 : index
    %c0_121 = arith.constant 0 : index
    %192 = vector.load %arg32[%c0_120, %c0_121] : memref<8x128xf32, #tpu.memory_space<vmem>>, vector<8x128xf32>
    tpu.vector_store %arg32[%c0_120, %c0_121], %191 {strides = array<i32>} : memref<8x128xf32, #tpu.memory_space<vmem>>, vector<8x128xf32>,
    %193 = tpu.iota {dimensions = array<i32: 0>} : vector<128x128xi32>
    %194 = tpu.iota {dimensions = array<i32: 1>} : vector<128x128xi32>
    %c16_i32 = arith.constant 16 : i32
    %195 = vector.broadcast %c16_i32 : i32 to vector<128x128xi32>
    %196 = arith.addi %194, %195 : vector<128x128xi32>
    %197 = arith.cmpi eq, %193, %196 : vector<128x128xi32>
    %198 = arith.extui %197 : vector<128x128xi1> to vector<128x128xi32>
    %199 = arith.sitofp %198 : vector<128x128xi32> to vector<128x128xf32>
    %cst_122 = arith.constant dense<0.000000e+00> : vector<8x128xf32>
    %200 = tpu.matmul %191, %199, %cst_122 {dimension_numbers = #tpu.dot_dimension_numbers<[1], [0], [0], [1], [0, 0, 1, 1], [], []>} : vector<8x128xf32>, vector<128x128xf32>, vector<8x128xf32> -> vector<8x128xf32>
    %c0_123 = arith.constant 0 : index
    %c0_124 = arith.constant 0 : index
    %201 = vector.load %arg1[%c0_123, %c0_124] : memref<8x128xf32, #tpu.memory_space<vmem>>, vector<8x128xf32>
    %cst_125 = arith.constant 5.000000e-01 : f32
    %202 = vector.broadcast %cst_125 : f32 to vector<8x128xf32>
    %203 = arith.mulf %202, %200 : vector<8x128xf32>
    %204 = math.exp %203 : vector<8x128xf32>
    %205 = arith.mulf %201, %204 : vector<8x128xf32>
    %206 = arith.addf %191, %205 : vector<8x128xf32>
    %207 = arith.truncf %206 : vector<8x128xf32> to vector<8x128xbf16>
    %c0_126 = arith.constant 0 : index
    %c0_127 = arith.constant 0 : index
    %208 = vector.load %arg15[%c0_126, %c0_127] : memref<128x2048xbf16, #tpu.memory_space<vmem>>, vector<128x2048xbf16>
    %cst_128 = arith.constant dense<0.000000e+00> : vector<8x2048xf32>
    %209 = tpu.matmul %207, %208, %cst_128 {dimension_numbers = #tpu.dot_dimension_numbers<[1], [0], [0], [1], [0, 0, 1, 1], [], []>} : vector<8x128xbf16>, vector<128x2048xbf16>, vector<8x2048xf32> -> vector<8x2048xf32>
    %c0_129 = arith.constant 0 : index
    %c0_130 = arith.constant 0 : index
    %210 = vector.load %arg16[%c0_129, %c0_130] : memref<1x2048xf32, #tpu.memory_space<vmem>>, vector<1x2048xf32>
    %211 = vector.broadcast %210 : vector<1x2048xf32> to vector<8x2048xf32>
    %212 = arith.addf %209, %211 : vector<8x2048xf32>
    %cst_131 = arith.constant 0.000000e+00 : f32
    %213 = vector.broadcast %cst_131 : f32 to vector<8x512xf32>
    %c0_132 = arith.constant 0 : index
    %c0_133 = arith.constant 0 : index
    %c0_134 = arith.constant 0 : index
    %214 = vector.load %arg17[%c0_132, %c0_133, %c0_134] : memref<4x8x8xf32, #tpu.memory_space<vmem>>, vector<1x8x8xf32>
    %215 = vector.shape_cast %214 : vector<1x8x8xf32> to vector<8x8xf32>
    %216 = vector.extract_strided_slice %212 {offsets = [0, 0], sizes = [8, 512], strides = [1, 1]} : vector<8x2048xf32> to vector<8x512xf32>
    %cst_135 = arith.constant dense<0.000000e+00> : vector<8x512xf32>
    %217 = tpu.matmul %215, %216, %cst_135 {dimension_numbers = #tpu.dot_dimension_numbers<[1], [0], [0], [1], [0, 0, 1, 1], [], []>} : vector<8x8xf32>, vector<8x512xf32>, vector<8x512xf32> -> vector<8x512xf32>
    %218 = arith.addf %213, %217 : vector<8x512xf32>
    %c1_136 = arith.constant 1 : index
    %c0_137 = arith.constant 0 : index
    %c0_138 = arith.constant 0 : index
    %219 = vector.load %arg17[%c1_136, %c0_137, %c0_138] : memref<4x8x8xf32, #tpu.memory_space<vmem>>, vector<1x8x8xf32>
    %220 = vector.shape_cast %219 : vector<1x8x8xf32> to vector<8x8xf32>
    %221 = vector.extract_strided_slice %212 {offsets = [0, 512], sizes = [8, 512], strides = [1, 1]} : vector<8x2048xf32> to vector<8x512xf32>
    %cst_139 = arith.constant dense<0.000000e+00> : vector<8x512xf32>
    %222 = tpu.matmul %220, %221, %cst_139 {dimension_numbers = #tpu.dot_dimension_numbers<[1], [0], [0], [1], [0, 0, 1, 1], [], []>} : vector<8x8xf32>, vector<8x512xf32>, vector<8x512xf32> -> vector<8x512xf32>
    %223 = arith.addf %218, %222 : vector<8x512xf32>
    %c2_140 = arith.constant 2 : index
    %c0_141 = arith.constant 0 : index
    %c0_142 = arith.constant 0 : index
    %224 = vector.load %arg17[%c2_140, %c0_141, %c0_142] : memref<4x8x8xf32, #tpu.memory_space<vmem>>, vector<1x8x8xf32>
    %225 = vector.shape_cast %224 : vector<1x8x8xf32> to vector<8x8xf32>
    %226 = vector.extract_strided_slice %212 {offsets = [0, 1024], sizes = [8, 512], strides = [1, 1]} : vector<8x2048xf32> to vector<8x512xf32>
    %cst_143 = arith.constant dense<0.000000e+00> : vector<8x512xf32>
    %227 = tpu.matmul %225, %226, %cst_143 {dimension_numbers = #tpu.dot_dimension_numbers<[1], [0], [0], [1], [0, 0, 1, 1], [], []>} : vector<8x8xf32>, vector<8x512xf32>, vector<8x512xf32> -> vector<8x512xf32>
    %228 = arith.addf %223, %227 : vector<8x512xf32>
    %c3_144 = arith.constant 3 : index
    %c0_145 = arith.constant 0 : index
    %c0_146 = arith.constant 0 : index
    %229 = vector.load %arg17[%c3_144, %c0_145, %c0_146] : memref<4x8x8xf32, #tpu.memory_space<vmem>>, vector<1x8x8xf32>
    %230 = vector.shape_cast %229 : vector<1x8x8xf32> to vector<8x8xf32>
    %231 = vector.extract_strided_slice %212 {offsets = [0, 1536], sizes = [8, 512], strides = [1, 1]} : vector<8x2048xf32> to vector<8x512xf32>
    %cst_147 = arith.constant dense<0.000000e+00> : vector<8x512xf32>
    %232 = tpu.matmul %230, %231, %cst_147 {dimension_numbers = #tpu.dot_dimension_numbers<[1], [0], [0], [1], [0, 0, 1, 1], [], []>} : vector<8x8xf32>, vector<8x512xf32>, vector<8x512xf32> -> vector<8x512xf32>
    %233 = arith.addf %228, %232 : vector<8x512xf32>
    %234 = arith.truncf %233 : vector<8x512xf32> to vector<8x512xbf16>
    %c0_148 = arith.constant 0 : index
    %c0_149 = arith.constant 0 : index
    %235 = vector.load %arg18[%c0_148, %c0_149] : memref<288x8xbf16, #tpu.memory_space<vmem>>, vector<288x8xbf16>
    %cst_150 = arith.constant dense<0.000000e+00> : vector<288x512xf32>
    %236 = tpu.matmul %235, %234, %cst_150 {dimension_numbers = #tpu.dot_dimension_numbers<[1], [0], [0], [1], [0, 0, 1, 1], [], []>} : vector<288x8xbf16>, vector<8x512xbf16>, vector<288x512xf32> -> vector<288x512xf32>
    %237 = arith.truncf %236 : vector<288x512xf32> to vector<288x512xbf16>
    %cst_151 = arith.constant 0.000000e+00 : f32
    %238 = vector.broadcast %cst_151 : f32 to vector<32x128xf32>
    %239 = vector.extract_strided_slice %237 {offsets = [0, 0], sizes = [32, 512], strides = [1, 1]} : vector<288x512xbf16> to vector<32x512xbf16>
    %c0_152 = arith.constant 0 : index
    %c0_153 = arith.constant 0 : index
    %c0_154 = arith.constant 0 : index
    %240 = vector.load %arg19[%c0_152, %c0_153, %c0_154] : memref<9x512x128xbf16, #tpu.memory_space<vmem>>, vector<1x512x128xbf16>
    %241 = vector.shape_cast %240 : vector<1x512x128xbf16> to vector<512x128xbf16>
    %cst_155 = arith.constant dense<0.000000e+00> : vector<32x128xf32>
    %242 = tpu.matmul %239, %241, %cst_155 {dimension_numbers = #tpu.dot_dimension_numbers<[1], [0], [0], [1], [0, 0, 1, 1], [], []>} : vector<32x512xbf16>, vector<512x128xbf16>, vector<32x128xf32> -> vector<32x128xf32>
    %243 = arith.addf %238, %242 : vector<32x128xf32>
    %244 = vector.extract_strided_slice %237 {offsets = [32, 0], sizes = [32, 512], strides = [1, 1]} : vector<288x512xbf16> to vector<32x512xbf16>
    %c1_156 = arith.constant 1 : index
    %c0_157 = arith.constant 0 : index
    %c0_158 = arith.constant 0 : index
    %245 = vector.load %arg19[%c1_156, %c0_157, %c0_158] : memref<9x512x128xbf16, #tpu.memory_space<vmem>>, vector<1x512x128xbf16>
    %246 = vector.shape_cast %245 : vector<1x512x128xbf16> to vector<512x128xbf16>
    %cst_159 = arith.constant dense<0.000000e+00> : vector<32x128xf32>
    %247 = tpu.matmul %244, %246, %cst_159 {dimension_numbers = #tpu.dot_dimension_numbers<[1], [0], [0], [1], [0, 0, 1, 1], [], []>} : vector<32x512xbf16>, vector<512x128xbf16>, vector<32x128xf32> -> vector<32x128xf32>
    %248 = arith.addf %243, %247 : vector<32x128xf32>
    %249 = vector.extract_strided_slice %237 {offsets = [64, 0], sizes = [32, 512], strides = [1, 1]} : vector<288x512xbf16> to vector<32x512xbf16>
    %c2_160 = arith.constant 2 : index
    %c0_161 = arith.constant 0 : index
    %c0_162 = arith.constant 0 : index
    %250 = vector.load %arg19[%c2_160, %c0_161, %c0_162] : memref<9x512x128xbf16, #tpu.memory_space<vmem>>, vector<1x512x128xbf16>
    %251 = vector.shape_cast %250 : vector<1x512x128xbf16> to vector<512x128xbf16>
    %cst_163 = arith.constant dense<0.000000e+00> : vector<32x128xf32>
    %252 = tpu.matmul %249, %251, %cst_163 {dimension_numbers = #tpu.dot_dimension_numbers<[1], [0], [0], [1], [0, 0, 1, 1], [], []>} : vector<32x512xbf16>, vector<512x128xbf16>, vector<32x128xf32> -> vector<32x128xf32>
    %253 = arith.addf %248, %252 : vector<32x128xf32>
    %254 = vector.extract_strided_slice %237 {offsets = [96, 0], sizes = [32, 512], strides = [1, 1]} : vector<288x512xbf16> to vector<32x512xbf16>
    %c3_164 = arith.constant 3 : index
    %c0_165 = arith.constant 0 : index
    %c0_166 = arith.constant 0 : index
    %255 = vector.load %arg19[%c3_164, %c0_165, %c0_166] : memref<9x512x128xbf16, #tpu.memory_space<vmem>>, vector<1x512x128xbf16>
    %256 = vector.shape_cast %255 : vector<1x512x128xbf16> to vector<512x128xbf16>
    %cst_167 = arith.constant dense<0.000000e+00> : vector<32x128xf32>
    %257 = tpu.matmul %254, %256, %cst_167 {dimension_numbers = #tpu.dot_dimension_numbers<[1], [0], [0], [1], [0, 0, 1, 1], [], []>} : vector<32x512xbf16>, vector<512x128xbf16>, vector<32x128xf32> -> vector<32x128xf32>
    %258 = arith.addf %253, %257 : vector<32x128xf32>
    %259 = vector.extract_strided_slice %237 {offsets = [128, 0], sizes = [32, 512], strides = [1, 1]} : vector<288x512xbf16> to vector<32x512xbf16>
    %c4_168 = arith.constant 4 : index
    %c0_169 = arith.constant 0 : index
    %c0_170 = arith.constant 0 : index
    %260 = vector.load %arg19[%c4_168, %c0_169, %c0_170] : memref<9x512x128xbf16, #tpu.memory_space<vmem>>, vector<1x512x128xbf16>
    %261 = vector.shape_cast %260 : vector<1x512x128xbf16> to vector<512x128xbf16>
    %cst_171 = arith.constant dense<0.000000e+00> : vector<32x128xf32>
    %262 = tpu.matmul %259, %261, %cst_171 {dimension_numbers = #tpu.dot_dimension_numbers<[1], [0], [0], [1], [0, 0, 1, 1], [], []>} : vector<32x512xbf16>, vector<512x128xbf16>, vector<32x128xf32> -> vector<32x128xf32>
    %263 = arith.addf %258, %262 : vector<32x128xf32>
    %264 = vector.extract_strided_slice %237 {offsets = [160, 0], sizes = [32, 512], strides = [1, 1]} : vector<288x512xbf16> to vector<32x512xbf16>
    %c5_172 = arith.constant 5 : index
    %c0_173 = arith.constant 0 : index
    %c0_174 = arith.constant 0 : index
    %265 = vector.load %arg19[%c5_172, %c0_173, %c0_174] : memref<9x512x128xbf16, #tpu.memory_space<vmem>>, vector<1x512x128xbf16>
    %266 = vector.shape_cast %265 : vector<1x512x128xbf16> to vector<512x128xbf16>
    %cst_175 = arith.constant dense<0.000000e+00> : vector<32x128xf32>
    %267 = tpu.matmul %264, %266, %cst_175 {dimension_numbers = #tpu.dot_dimension_numbers<[1], [0], [0], [1], [0, 0, 1, 1], [], []>} : vector<32x512xbf16>, vector<512x128xbf16>, vector<32x128xf32> -> vector<32x128xf32>
    %268 = arith.addf %263, %267 : vector<32x128xf32>
    %269 = vector.extract_strided_slice %237 {offsets = [192, 0], sizes = [32, 512], strides = [1, 1]} : vector<288x512xbf16> to vector<32x512xbf16>
    %c6_176 = arith.constant 6 : index
    %c0_177 = arith.constant 0 : index
    %c0_178 = arith.constant 0 : index
    %270 = vector.load %arg19[%c6_176, %c0_177, %c0_178] : memref<9x512x128xbf16, #tpu.memory_space<vmem>>, vector<1x512x128xbf16>
    %271 = vector.shape_cast %270 : vector<1x512x128xbf16> to vector<512x128xbf16>
    %cst_179 = arith.constant dense<0.000000e+00> : vector<32x128xf32>
    %272 = tpu.matmul %269, %271, %cst_179 {dimension_numbers = #tpu.dot_dimension_numbers<[1], [0], [0], [1], [0, 0, 1, 1], [], []>} : vector<32x512xbf16>, vector<512x128xbf16>, vector<32x128xf32> -> vector<32x128xf32>
    %273 = arith.addf %268, %272 : vector<32x128xf32>
    %274 = vector.extract_strided_slice %237 {offsets = [224, 0], sizes = [32, 512], strides = [1, 1]} : vector<288x512xbf16> to vector<32x512xbf16>
    %c7_180 = arith.constant 7 : index
    %c0_181 = arith.constant 0 : index
    %c0_182 = arith.constant 0 : index
    %275 = vector.load %arg19[%c7_180, %c0_181, %c0_182] : memref<9x512x128xbf16, #tpu.memory_space<vmem>>, vector<1x512x128xbf16>
    %276 = vector.shape_cast %275 : vector<1x512x128xbf16> to vector<512x128xbf16>
    %cst_183 = arith.constant dense<0.000000e+00> : vector<32x128xf32>
    %277 = tpu.matmul %274, %276, %cst_183 {dimension_numbers = #tpu.dot_dimension_numbers<[1], [0], [0], [1], [0, 0, 1, 1], [], []>} : vector<32x512xbf16>, vector<512x128xbf16>, vector<32x128xf32> -> vector<32x128xf32>
    %278 = arith.addf %273, %277 : vector<32x128xf32>
    %279 = vector.extract_strided_slice %237 {offsets = [256, 0], sizes = [32, 512], strides = [1, 1]} : vector<288x512xbf16> to vector<32x512xbf16>
    %c8_184 = arith.constant 8 : index
    %c0_185 = arith.constant 0 : index
    %c0_186 = arith.constant 0 : index
    %280 = vector.load %arg19[%c8_184, %c0_185, %c0_186] : memref<9x512x128xbf16, #tpu.memory_space<vmem>>, vector<1x512x128xbf16>
    %281 = vector.shape_cast %280 : vector<1x512x128xbf16> to vector<512x128xbf16>
    %cst_187 = arith.constant dense<0.000000e+00> : vector<32x128xf32>
    %282 = tpu.matmul %279, %281, %cst_187 {dimension_numbers = #tpu.dot_dimension_numbers<[1], [0], [0], [1], [0, 0, 1, 1], [], []>} : vector<32x512xbf16>, vector<512x128xbf16>, vector<32x128xf32> -> vector<32x128xf32>
    %283 = arith.addf %278, %282 : vector<32x128xf32>
    %c0_188 = arith.constant 0 : index
    %c0_189 = arith.constant 0 : index
    %284 = vector.load %arg20[%c0_188, %c0_189] : memref<1x128xf32, #tpu.memory_space<vmem>>, vector<1x128xf32>
    %285 = vector.broadcast %284 : vector<1x128xf32> to vector<32x128xf32>
    %286 = arith.addf %283, %285 : vector<32x128xf32>
    %cst_190 = arith.constant dense<0.000000e+00> : vector<128xf32>
    %287 = vector.multi_reduction <add>, %286, %cst_190 [0] : vector<32x128xf32> to vector<128xf32>
    %288 = vector.shape_cast %287 : vector<128xf32> to vector<1x128xf32>
    %cst_191 = arith.constant 3.125000e-02 : f32
    %289 = vector.broadcast %cst_191 : f32 to vector<1x128xf32>
    %290 = arith.mulf %288, %289 : vector<1x128xf32>
    %291 = arith.mulf %286, %286 : vector<32x128xf32>
    %cst_192 = arith.constant dense<0.000000e+00> : vector<128xf32>
    %292 = vector.multi_reduction <add>, %291, %cst_192 [0] : vector<32x128xf32> to vector<128xf32>
    %293 = vector.shape_cast %292 : vector<128xf32> to vector<1x128xf32>
    %cst_193 = arith.constant 3.125000e-02 : f32
    %294 = vector.broadcast %cst_193 : f32 to vector<1x128xf32>
    %295 = arith.mulf %293, %294 : vector<1x128xf32>
    %296 = arith.mulf %290, %290 : vector<1x128xf32>
    %297 = arith.subf %295, %296 : vector<1x128xf32>
    %298 = vector.broadcast %290 : vector<1x128xf32> to vector<32x128xf32>
    %299 = arith.subf %286, %298 : vector<32x128xf32>
    %cst_194 = arith.constant 9.99999974E-6 : f32
    %300 = vector.broadcast %cst_194 : f32 to vector<1x128xf32>
    %301 = arith.addf %297, %300 : vector<1x128xf32>
    %302 = math.rsqrt %301 : vector<1x128xf32>
    %303 = vector.broadcast %302 : vector<1x128xf32> to vector<32x128xf32>
    %304 = arith.mulf %299, %303 : vector<32x128xf32>
    %c0_195 = arith.constant 0 : index
    %c0_196 = arith.constant 0 : index
    %305 = vector.load %arg21[%c0_195, %c0_196] : memref<1x128xf32, #tpu.memory_space<vmem>>, vector<1x128xf32>
    %306 = vector.broadcast %305 : vector<1x128xf32> to vector<32x128xf32>
    %307 = arith.mulf %304, %306 : vector<32x128xf32>
    %c0_197 = arith.constant 0 : index
    %c0_198 = arith.constant 0 : index
    %308 = vector.load %arg22[%c0_197, %c0_198] : memref<1x128xf32, #tpu.memory_space<vmem>>, vector<1x128xf32>
    %309 = vector.broadcast %308 : vector<1x128xf32> to vector<32x128xf32>
    %310 = arith.addf %307, %309 : vector<32x128xf32>
    %cst_199 = arith.constant 0.000000e+00 : f32
    %311 = vector.broadcast %cst_199 : f32 to vector<32x128xf32>
    %312 = arith.cmpf oge, %310, %311 : vector<32x128xf32>
    %cst_200 = arith.constant 0.00999999977 : f32
    %313 = vector.broadcast %cst_200 : f32 to vector<32x128xf32>
    %314 = arith.mulf %313, %310 : vector<32x128xf32>
    %315 = arith.select %312, %310, %314 : vector<32x128xi1>, vector<32x128xf32>
    %316 = vector.extract_strided_slice %315 {offsets = [0, 0], sizes = [32, 32], strides = [1, 1]} : vector<32x128xf32> to vector<32x32xf32>
    %317 = arith.truncf %316 : vector<32x32xf32> to vector<32x32xbf16>
    %c0_201 = arith.constant 0 : index
    %c0_202 = arith.constant 0 : index
    %318 = vector.load %arg23[%c0_201, %c0_202] : memref<1152x32xbf16, #tpu.memory_space<vmem>>, vector<1152x32xbf16>
    %cst_203 = arith.constant dense<0.000000e+00> : vector<1152x32xf32>
    %319 = tpu.matmul %318, %317, %cst_203 {dimension_numbers = #tpu.dot_dimension_numbers<[1], [0], [0], [1], [0, 0, 1, 1], [], []>} : vector<1152x32xbf16>, vector<32x32xbf16>, vector<1152x32xf32> -> vector<1152x32xf32>
    %320 = arith.truncf %319 : vector<1152x32xf32> to vector<1152x32xbf16>
    %cst_204 = arith.constant 0.000000e+00 : f32
    %321 = vector.broadcast %cst_204 : f32 to vector<128x128xf32>
    %322 = vector.extract_strided_slice %320 {offsets = [0, 0], sizes = [128, 32], strides = [1, 1]} : vector<1152x32xbf16> to vector<128x32xbf16>
    %c0_205 = arith.constant 0 : index
    %c0_206 = arith.constant 0 : index
    %c0_207 = arith.constant 0 : index
    %323 = vector.load %arg24[%c0_205, %c0_206, %c0_207] : memref<9x32x128xbf16, #tpu.memory_space<vmem>>, vector<1x32x128xbf16>
    %324 = vector.shape_cast %323 : vector<1x32x128xbf16> to vector<32x128xbf16>
    %cst_208 = arith.constant dense<0.000000e+00> : vector<128x128xf32>
    %325 = tpu.matmul %322, %324, %cst_208 {dimension_numbers = #tpu.dot_dimension_numbers<[1], [0], [0], [1], [0, 0, 1, 1], [], []>} : vector<128x32xbf16>, vector<32x128xbf16>, vector<128x128xf32> -> vector<128x128xf32>
    %326 = arith.addf %321, %325 : vector<128x128xf32>
    %327 = vector.extract_strided_slice %320 {offsets = [128, 0], sizes = [128, 32], strides = [1, 1]} : vector<1152x32xbf16> to vector<128x32xbf16>
    %c1_209 = arith.constant 1 : index
    %c0_210 = arith.constant 0 : index
    %c0_211 = arith.constant 0 : index
    %328 = vector.load %arg24[%c1_209, %c0_210, %c0_211] : memref<9x32x128xbf16, #tpu.memory_space<vmem>>, vector<1x32x128xbf16>
    %329 = vector.shape_cast %328 : vector<1x32x128xbf16> to vector<32x128xbf16>
    %cst_212 = arith.constant dense<0.000000e+00> : vector<128x128xf32>
    %330 = tpu.matmul %327, %329, %cst_212 {dimension_numbers = #tpu.dot_dimension_numbers<[1], [0], [0], [1], [0, 0, 1, 1], [], []>} : vector<128x32xbf16>, vector<32x128xbf16>, vector<128x128xf32> -> vector<128x128xf32>
    %331 = arith.addf %326, %330 : vector<128x128xf32>
    %332 = vector.extract_strided_slice %320 {offsets = [256, 0], sizes = [128, 32], strides = [1, 1]} : vector<1152x32xbf16> to vector<128x32xbf16>
    %c2_213 = arith.constant 2 : index
    %c0_214 = arith.constant 0 : index
    %c0_215 = arith.constant 0 : index
    %333 = vector.load %arg24[%c2_213, %c0_214, %c0_215] : memref<9x32x128xbf16, #tpu.memory_space<vmem>>, vector<1x32x128xbf16>
    %334 = vector.shape_cast %333 : vector<1x32x128xbf16> to vector<32x128xbf16>
    %cst_216 = arith.constant dense<0.000000e+00> : vector<128x128xf32>
    %335 = tpu.matmul %332, %334, %cst_216 {dimension_numbers = #tpu.dot_dimension_numbers<[1], [0], [0], [1], [0, 0, 1, 1], [], []>} : vector<128x32xbf16>, vector<32x128xbf16>, vector<128x128xf32> -> vector<128x128xf32>
    %336 = arith.addf %331, %335 : vector<128x128xf32>
    %337 = vector.extract_strided_slice %320 {offsets = [384, 0], sizes = [128, 32], strides = [1, 1]} : vector<1152x32xbf16> to vector<128x32xbf16>
    %c3_217 = arith.constant 3 : index
    %c0_218 = arith.constant 0 : index
    %c0_219 = arith.constant 0 : index
    %338 = vector.load %arg24[%c3_217, %c0_218, %c0_219] : memref<9x32x128xbf16, #tpu.memory_space<vmem>>, vector<1x32x128xbf16>
    %339 = vector.shape_cast %338 : vector<1x32x128xbf16> to vector<32x128xbf16>
    %cst_220 = arith.constant dense<0.000000e+00> : vector<128x128xf32>
    %340 = tpu.matmul %337, %339, %cst_220 {dimension_numbers = #tpu.dot_dimension_numbers<[1], [0], [0], [1], [0, 0, 1, 1], [], []>} : vector<128x32xbf16>, vector<32x128xbf16>, vector<128x128xf32> -> vector<128x128xf32>
    %341 = arith.addf %336, %340 : vector<128x128xf32>
    %342 = vector.extract_strided_slice %320 {offsets = [512, 0], sizes = [128, 32], strides = [1, 1]} : vector<1152x32xbf16> to vector<128x32xbf16>
    %c4_221 = arith.constant 4 : index
    %c0_222 = arith.constant 0 : index
    %c0_223 = arith.constant 0 : index
    %343 = vector.load %arg24[%c4_221, %c0_222, %c0_223] : memref<9x32x128xbf16, #tpu.memory_space<vmem>>, vector<1x32x128xbf16>
    %344 = vector.shape_cast %343 : vector<1x32x128xbf16> to vector<32x128xbf16>
    %cst_224 = arith.constant dense<0.000000e+00> : vector<128x128xf32>
    %345 = tpu.matmul %342, %344, %cst_224 {dimension_numbers = #tpu.dot_dimension_numbers<[1], [0], [0], [1], [0, 0, 1, 1], [], []>} : vector<128x32xbf16>, vector<32x128xbf16>, vector<128x128xf32> -> vector<128x128xf32>
    %346 = arith.addf %341, %345 : vector<128x128xf32>
    %347 = vector.extract_strided_slice %320 {offsets = [640, 0], sizes = [128, 32], strides = [1, 1]} : vector<1152x32xbf16> to vector<128x32xbf16>
    %c5_225 = arith.constant 5 : index
    %c0_226 = arith.constant 0 : index
    %c0_227 = arith.constant 0 : index
    %348 = vector.load %arg24[%c5_225, %c0_226, %c0_227] : memref<9x32x128xbf16, #tpu.memory_space<vmem>>, vector<1x32x128xbf16>
    %349 = vector.shape_cast %348 : vector<1x32x128xbf16> to vector<32x128xbf16>
    %cst_228 = arith.constant dense<0.000000e+00> : vector<128x128xf32>
    %350 = tpu.matmul %347, %349, %cst_228 {dimension_numbers = #tpu.dot_dimension_numbers<[1], [0], [0], [1], [0, 0, 1, 1], [], []>} : vector<128x32xbf16>, vector<32x128xbf16>, vector<128x128xf32> -> vector<128x128xf32>
    %351 = arith.addf %346, %350 : vector<128x128xf32>
    %352 = vector.extract_strided_slice %320 {offsets = [768, 0], sizes = [128, 32], strides = [1, 1]} : vector<1152x32xbf16> to vector<128x32xbf16>
    %c6_229 = arith.constant 6 : index
    %c0_230 = arith.constant 0 : index
    %c0_231 = arith.constant 0 : index
    %353 = vector.load %arg24[%c6_229, %c0_230, %c0_231] : memref<9x32x128xbf16, #tpu.memory_space<vmem>>, vector<1x32x128xbf16>
    %354 = vector.shape_cast %353 : vector<1x32x128xbf16> to vector<32x128xbf16>
    %cst_232 = arith.constant dense<0.000000e+00> : vector<128x128xf32>
    %355 = tpu.matmul %352, %354, %cst_232 {dimension_numbers = #tpu.dot_dimension_numbers<[1], [0], [0], [1], [0, 0, 1, 1], [], []>} : vector<128x32xbf16>, vector<32x128xbf16>, vector<128x128xf32> -> vector<128x128xf32>
    %356 = arith.addf %351, %355 : vector<128x128xf32>
    %357 = vector.extract_strided_slice %320 {offsets = [896, 0], sizes = [128, 32], strides = [1, 1]} : vector<1152x32xbf16> to vector<128x32xbf16>
    %c7_233 = arith.constant 7 : index
    %c0_234 = arith.constant 0 : index
    %c0_235 = arith.constant 0 : index
    %358 = vector.load %arg24[%c7_233, %c0_234, %c0_235] : memref<9x32x128xbf16, #tpu.memory_space<vmem>>, vector<1x32x128xbf16>
    %359 = vector.shape_cast %358 : vector<1x32x128xbf16> to vector<32x128xbf16>
    %cst_236 = arith.constant dense<0.000000e+00> : vector<128x128xf32>
    %360 = tpu.matmul %357, %359, %cst_236 {dimension_numbers = #tpu.dot_dimension_numbers<[1], [0], [0], [1], [0, 0, 1, 1], [], []>} : vector<128x32xbf16>, vector<32x128xbf16>, vector<128x128xf32> -> vector<128x128xf32>
    %361 = arith.addf %356, %360 : vector<128x128xf32>
    %362 = vector.extract_strided_slice %320 {offsets = [1024, 0], sizes = [128, 32], strides = [1, 1]} : vector<1152x32xbf16> to vector<128x32xbf16>
    %c8_237 = arith.constant 8 : index
    %c0_238 = arith.constant 0 : index
    %c0_239 = arith.constant 0 : index
    %363 = vector.load %arg24[%c8_237, %c0_238, %c0_239] : memref<9x32x128xbf16, #tpu.memory_space<vmem>>, vector<1x32x128xbf16>
    %364 = vector.shape_cast %363 : vector<1x32x128xbf16> to vector<32x128xbf16>
    %cst_240 = arith.constant dense<0.000000e+00> : vector<128x128xf32>
    %365 = tpu.matmul %362, %364, %cst_240 {dimension_numbers = #tpu.dot_dimension_numbers<[1], [0], [0], [1], [0, 0, 1, 1], [], []>} : vector<128x32xbf16>, vector<32x128xbf16>, vector<128x128xf32> -> vector<128x128xf32>
    %366 = arith.addf %361, %365 : vector<128x128xf32>
    %c0_241 = arith.constant 0 : index
    %c0_242 = arith.constant 0 : index
    %367 = vector.load %arg25[%c0_241, %c0_242] : memref<1x128xf32, #tpu.memory_space<vmem>>, vector<1x128xf32>
    %368 = vector.broadcast %367 : vector<1x128xf32> to vector<128x128xf32>
    %369 = arith.addf %366, %368 : vector<128x128xf32>
    %cst_243 = arith.constant dense<0.000000e+00> : vector<128xf32>
    %370 = vector.multi_reduction <add>, %369, %cst_243 [0] : vector<128x128xf32> to vector<128xf32>
    %371 = vector.shape_cast %370 : vector<128xf32> to vector<1x128xf32>
    %cst_244 = arith.constant 7.812500e-03 : f32
    %372 = vector.broadcast %cst_244 : f32 to vector<1x128xf32>
    %373 = arith.mulf %371, %372 : vector<1x128xf32>
    %374 = arith.mulf %369, %369 : vector<128x128xf32>
    %cst_245 = arith.constant dense<0.000000e+00> : vector<128xf32>
    %375 = vector.multi_reduction <add>, %374, %cst_245 [0] : vector<128x128xf32> to vector<128xf32>
    %376 = vector.shape_cast %375 : vector<128xf32> to vector<1x128xf32>
    %cst_246 = arith.constant 7.812500e-03 : f32
    %377 = vector.broadcast %cst_246 : f32 to vector<1x128xf32>
    %378 = arith.mulf %376, %377 : vector<1x128xf32>
    %379 = arith.mulf %373, %373 : vector<1x128xf32>
    %380 = arith.subf %378, %379 : vector<1x128xf32>
    %381 = vector.broadcast %373 : vector<1x128xf32> to vector<128x128xf32>
    %382 = arith.subf %369, %381 : vector<128x128xf32>
    %cst_247 = arith.constant 9.99999974E-6 : f32
    %383 = vector.broadcast %cst_247 : f32 to vector<1x128xf32>
    %384 = arith.addf %380, %383 : vector<1x128xf32>
    %385 = math.rsqrt %384 : vector<1x128xf32>
    %386 = vector.broadcast %385 : vector<1x128xf32> to vector<128x128xf32>
    %387 = arith.mulf %382, %386 : vector<128x128xf32>
    %c0_248 = arith.constant 0 : index
    %c0_249 = arith.constant 0 : index
    %388 = vector.load %arg26[%c0_248, %c0_249] : memref<1x128xf32, #tpu.memory_space<vmem>>, vector<1x128xf32>
    %389 = vector.broadcast %388 : vector<1x128xf32> to vector<128x128xf32>
    %390 = arith.mulf %387, %389 : vector<128x128xf32>
    %c0_250 = arith.constant 0 : index
    %c0_251 = arith.constant 0 : index
    %391 = vector.load %arg27[%c0_250, %c0_251] : memref<1x128xf32, #tpu.memory_space<vmem>>, vector<1x128xf32>
    %392 = vector.broadcast %391 : vector<1x128xf32> to vector<128x128xf32>
    %393 = arith.addf %390, %392 : vector<128x128xf32>
    %cst_252 = arith.constant 0.000000e+00 : f32
    %394 = vector.broadcast %cst_252 : f32 to vector<128x128xf32>
    %395 = arith.cmpf oge, %393, %394 : vector<128x128xf32>
    %cst_253 = arith.constant 0.00999999977 : f32
    %396 = vector.broadcast %cst_253 : f32 to vector<128x128xf32>
    %397 = arith.mulf %396, %393 : vector<128x128xf32>
    %398 = arith.select %395, %393, %397 : vector<128x128xi1>, vector<128x128xf32>
    %399 = vector.extract_strided_slice %398 {offsets = [0, 0], sizes = [128, 32], strides = [1, 1]} : vector<128x128xf32> to vector<128x32xf32>
    %400 = arith.truncf %399 : vector<128x32xf32> to vector<128x32xbf16>
    %c0_254 = arith.constant 0 : index
    %c0_255 = arith.constant 0 : index
    %401 = vector.load %arg28[%c0_254, %c0_255] : memref<1152x128xbf16, #tpu.memory_space<vmem>>, vector<1152x128xbf16>
    %cst_256 = arith.constant dense<0.000000e+00> : vector<1152x32xf32>
    %402 = tpu.matmul %401, %400, %cst_256 {dimension_numbers = #tpu.dot_dimension_numbers<[1], [0], [0], [1], [0, 0, 1, 1], [], []>} : vector<1152x128xbf16>, vector<128x32xbf16>, vector<1152x32xf32> -> vector<1152x32xf32>
    %403 = arith.truncf %402 : vector<1152x32xf32> to vector<1152x32xbf16>
    %cst_257 = arith.constant 0.000000e+00 : f32
    %404 = vector.broadcast %cst_257 : f32 to vector<128x128xf32>
    %405 = vector.extract_strided_slice %403 {offsets = [0, 0], sizes = [128, 32], strides = [1, 1]} : vector<1152x32xbf16> to vector<128x32xbf16>
    %c0_258 = arith.constant 0 : index
    %c0_259 = arith.constant 0 : index
    %c0_260 = arith.constant 0 : index
    %406 = vector.load %arg29[%c0_258, %c0_259, %c0_260] : memref<9x32x128xbf16, #tpu.memory_space<vmem>>, vector<1x32x128xbf16>
    %407 = vector.shape_cast %406 : vector<1x32x128xbf16> to vector<32x128xbf16>
    %cst_261 = arith.constant dense<0.000000e+00> : vector<128x128xf32>
    %408 = tpu.matmul %405, %407, %cst_261 {dimension_numbers = #tpu.dot_dimension_numbers<[1], [0], [0], [1], [0, 0, 1, 1], [], []>} : vector<128x32xbf16>, vector<32x128xbf16>, vector<128x128xf32> -> vector<128x128xf32>
    %409 = arith.addf %404, %408 : vector<128x128xf32>
    %410 = vector.extract_strided_slice %403 {offsets = [128, 0], sizes = [128, 32], strides = [1, 1]} : vector<1152x32xbf16> to vector<128x32xbf16>
    %c1_262 = arith.constant 1 : index
    %c0_263 = arith.constant 0 : index
    %c0_264 = arith.constant 0 : index
    %411 = vector.load %arg29[%c1_262, %c0_263, %c0_264] : memref<9x32x128xbf16, #tpu.memory_space<vmem>>, vector<1x32x128xbf16>
    %412 = vector.shape_cast %411 : vector<1x32x128xbf16> to vector<32x128xbf16>
    %cst_265 = arith.constant dense<0.000000e+00> : vector<128x128xf32>
    %413 = tpu.matmul %410, %412, %cst_265 {dimension_numbers = #tpu.dot_dimension_numbers<[1], [0], [0], [1], [0, 0, 1, 1], [], []>} : vector<128x32xbf16>, vector<32x128xbf16>, vector<128x128xf32> -> vector<128x128xf32>
    %414 = arith.addf %409, %413 : vector<128x128xf32>
    %415 = vector.extract_strided_slice %403 {offsets = [256, 0], sizes = [128, 32], strides = [1, 1]} : vector<1152x32xbf16> to vector<128x32xbf16>
    %c2_266 = arith.constant 2 : index
    %c0_267 = arith.constant 0 : index
    %c0_268 = arith.constant 0 : index
    %416 = vector.load %arg29[%c2_266, %c0_267, %c0_268] : memref<9x32x128xbf16, #tpu.memory_space<vmem>>, vector<1x32x128xbf16>
    %417 = vector.shape_cast %416 : vector<1x32x128xbf16> to vector<32x128xbf16>
    %cst_269 = arith.constant dense<0.000000e+00> : vector<128x128xf32>
    %418 = tpu.matmul %415, %417, %cst_269 {dimension_numbers = #tpu.dot_dimension_numbers<[1], [0], [0], [1], [0, 0, 1, 1], [], []>} : vector<128x32xbf16>, vector<32x128xbf16>, vector<128x128xf32> -> vector<128x128xf32>
    %419 = arith.addf %414, %418 : vector<128x128xf32>
    %420 = vector.extract_strided_slice %403 {offsets = [384, 0], sizes = [128, 32], strides = [1, 1]} : vector<1152x32xbf16> to vector<128x32xbf16>
    %c3_270 = arith.constant 3 : index
    %c0_271 = arith.constant 0 : index
    %c0_272 = arith.constant 0 : index
    %421 = vector.load %arg29[%c3_270, %c0_271, %c0_272] : memref<9x32x128xbf16, #tpu.memory_space<vmem>>, vector<1x32x128xbf16>
    %422 = vector.shape_cast %421 : vector<1x32x128xbf16> to vector<32x128xbf16>
    %cst_273 = arith.constant dense<0.000000e+00> : vector<128x128xf32>
    %423 = tpu.matmul %420, %422, %cst_273 {dimension_numbers = #tpu.dot_dimension_numbers<[1], [0], [0], [1], [0, 0, 1, 1], [], []>} : vector<128x32xbf16>, vector<32x128xbf16>, vector<128x128xf32> -> vector<128x128xf32>
    %424 = arith.addf %419, %423 : vector<128x128xf32>
    %425 = vector.extract_strided_slice %403 {offsets = [512, 0], sizes = [128, 32], strides = [1, 1]} : vector<1152x32xbf16> to vector<128x32xbf16>
    %c4_274 = arith.constant 4 : index
    %c0_275 = arith.constant 0 : index
    %c0_276 = arith.constant 0 : index
    %426 = vector.load %arg29[%c4_274, %c0_275, %c0_276] : memref<9x32x128xbf16, #tpu.memory_space<vmem>>, vector<1x32x128xbf16>
    %427 = vector.shape_cast %426 : vector<1x32x128xbf16> to vector<32x128xbf16>
    %cst_277 = arith.constant dense<0.000000e+00> : vector<128x128xf32>
    %428 = tpu.matmul %425, %427, %cst_277 {dimension_numbers = #tpu.dot_dimension_numbers<[1], [0], [0], [1], [0, 0, 1, 1], [], []>} : vector<128x32xbf16>, vector<32x128xbf16>, vector<128x128xf32> -> vector<128x128xf32>
    %429 = arith.addf %424, %428 : vector<128x128xf32>
    %430 = vector.extract_strided_slice %403 {offsets = [640, 0], sizes = [128, 32], strides = [1, 1]} : vector<1152x32xbf16> to vector<128x32xbf16>
    %c5_278 = arith.constant 5 : index
    %c0_279 = arith.constant 0 : index
    %c0_280 = arith.constant 0 : index
    %431 = vector.load %arg29[%c5_278, %c0_279, %c0_280] : memref<9x32x128xbf16, #tpu.memory_space<vmem>>, vector<1x32x128xbf16>
    %432 = vector.shape_cast %431 : vector<1x32x128xbf16> to vector<32x128xbf16>
    %cst_281 = arith.constant dense<0.000000e+00> : vector<128x128xf32>
    %433 = tpu.matmul %430, %432, %cst_281 {dimension_numbers = #tpu.dot_dimension_numbers<[1], [0], [0], [1], [0, 0, 1, 1], [], []>} : vector<128x32xbf16>, vector<32x128xbf16>, vector<128x128xf32> -> vector<128x128xf32>
    %434 = arith.addf %429, %433 : vector<128x128xf32>
    %435 = vector.extract_strided_slice %403 {offsets = [768, 0], sizes = [128, 32], strides = [1, 1]} : vector<1152x32xbf16> to vector<128x32xbf16>
    %c6_282 = arith.constant 6 : index
    %c0_283 = arith.constant 0 : index
    %c0_284 = arith.constant 0 : index
    %436 = vector.load %arg29[%c6_282, %c0_283, %c0_284] : memref<9x32x128xbf16, #tpu.memory_space<vmem>>, vector<1x32x128xbf16>
    %437 = vector.shape_cast %436 : vector<1x32x128xbf16> to vector<32x128xbf16>
    %cst_285 = arith.constant dense<0.000000e+00> : vector<128x128xf32>
    %438 = tpu.matmul %435, %437, %cst_285 {dimension_numbers = #tpu.dot_dimension_numbers<[1], [0], [0], [1], [0, 0, 1, 1], [], []>} : vector<128x32xbf16>, vector<32x128xbf16>, vector<128x128xf32> -> vector<128x128xf32>
    %439 = arith.addf %434, %438 : vector<128x128xf32>
    %440 = vector.extract_strided_slice %403 {offsets = [896, 0], sizes = [128, 32], strides = [1, 1]} : vector<1152x32xbf16> to vector<128x32xbf16>
    %c7_286 = arith.constant 7 : index
    %c0_287 = arith.constant 0 : index
    %c0_288 = arith.constant 0 : index
    %441 = vector.load %arg29[%c7_286, %c0_287, %c0_288] : memref<9x32x128xbf16, #tpu.memory_space<vmem>>, vector<1x32x128xbf16>
    %442 = vector.shape_cast %441 : vector<1x32x128xbf16> to vector<32x128xbf16>
    %cst_289 = arith.constant dense<0.000000e+00> : vector<128x128xf32>
    %443 = tpu.matmul %440, %442, %cst_289 {dimension_numbers = #tpu.dot_dimension_numbers<[1], [0], [0], [1], [0, 0, 1, 1], [], []>} : vector<128x32xbf16>, vector<32x128xbf16>, vector<128x128xf32> -> vector<128x128xf32>
    %444 = arith.addf %439, %443 : vector<128x128xf32>
    %445 = vector.extract_strided_slice %403 {offsets = [1024, 0], sizes = [128, 32], strides = [1, 1]} : vector<1152x32xbf16> to vector<128x32xbf16>
    %c8_290 = arith.constant 8 : index
    %c0_291 = arith.constant 0 : index
    %c0_292 = arith.constant 0 : index
    %446 = vector.load %arg29[%c8_290, %c0_291, %c0_292] : memref<9x32x128xbf16, #tpu.memory_space<vmem>>, vector<1x32x128xbf16>
    %447 = vector.shape_cast %446 : vector<1x32x128xbf16> to vector<32x128xbf16>
    %cst_293 = arith.constant dense<0.000000e+00> : vector<128x128xf32>
    %448 = tpu.matmul %445, %447, %cst_293 {dimension_numbers = #tpu.dot_dimension_numbers<[1], [0], [0], [1], [0, 0, 1, 1], [], []>} : vector<128x32xbf16>, vector<32x128xbf16>, vector<128x128xf32> -> vector<128x128xf32>
    %449 = arith.addf %444, %448 : vector<128x128xf32>
    %c0_294 = arith.constant 0 : index
    %c0_295 = arith.constant 0 : index
    %450 = vector.load %arg30[%c0_294, %c0_295] : memref<1x128xf32, #tpu.memory_space<vmem>>, vector<1x128xf32>
    %451 = vector.broadcast %450 : vector<1x128xf32> to vector<128x128xf32>
    %452 = arith.addf %449, %451 : vector<128x128xf32>
    %453 = arith.negf %452 : vector<128x128xf32>
    %454 = math.exp %453 : vector<128x128xf32>
    %cst_296 = arith.constant 1.000000e+00 : f32
    %455 = vector.broadcast %cst_296 : f32 to vector<128x128xf32>
    %456 = arith.addf %455, %454 : vector<128x128xf32>
    %457 = arith.divf %455, %456 : vector<128x128xf32>
    %c0_297 = arith.constant 0 : index
    %c0_298 = arith.constant 0 : index
    %458 = vector.load %arg31[%c0_297, %c0_298] : memref<128x128xf32, #tpu.memory_space<vmem>>, vector<128x128xf32>
    tpu.vector_store %arg31[%c0_297, %c0_298], %457 {strides = array<i32>} : memref<128x128xf32, #tpu.memory_space<vmem>>, vector<128x128xf32>,
    return
  }
}

</mosaic_0001>

<bundles_post_ra>
// kernel: forward.1
= control target key start
LH: loop header
LB: loop body
LE: loop exit
PB: predicated region body
PF: predicated region fallthrough
CT: control target
= control target key end

     0   :  { %s20964_s6 = smov 1   ;;  %s20965_s10 = smov 2   ;;  %s23013_s0 = inlined_call_operand.smem [shape: u32[33], index: -1, kind: input, shape index: {}] }
   0x1   :  { %s21043_s5 = sld [smem:[%s23013_s0]]   ;;  %s20966_s14 = smov 3  }
   0x2   :  { %s21048_s9 = sld [smem:[%s23013_s0 + %s20964_s6]]   ;;  %s20967_s18 = smov 4  }
   0x3   :  { %s21053_s13 = sld [smem:[%s23013_s0 + %s20965_s10]]   ;;  %s20968_s22 = smov 5  }
   0x4   :  { %s21058_s17 = sld [smem:[%s23013_s0 + %s20966_s14]]   ;;  %s20969_s26 = smov 6  }
   0x5   :  { %s21063_s21 = sld [smem:[%s23013_s0 + %s20967_s18]]   ;;  %s20970_s30 = smov 7  }
   0x6   :  { %s21068_s25 = sld [smem:[%s23013_s0 + %s20968_s22]]   ;;  %s20971_s4 = smov 8  }
   0x7   :  { %23053 = sst [smem:[#allocation59_spill]] %s21043_s5  ;;  %s20972_s10 = smov 9  }
   0x8   :  { %23054 = sst [smem:[#allocation60_spill]] %s21048_s9  ;;  %s20973_s15 = smov 10  }
   0x9   :  { %s21073_s29 = sld [smem:[%s23013_s0 + %s20969_s26]]   ;;  %s20974_s20 = smov 11  }
   0xa   :  { %s21078_s3 = sld [smem:[%s23013_s0 + %s20970_s30]]   ;;  %s20975_s26 = smov 12  }
   0xb   :  { %s21083_s8 = sld [smem:[%s23013_s0 + %s20971_s4]]   ;;  %s20976_s1 = smov 13  }
   0xc   :  { %s21088_s14 = sld [smem:[%s23013_s0 + %s20972_s10]]   ;;  %s20977_s7 = smov 14  }
   0xd   :  { %s21093_s19 = sld [smem:[%s23013_s0 + %s20973_s15]]   ;;  %s20978_s15 = smov 15  }
   0xe   :  { %s21098_s24 = sld [smem:[%s23013_s0 + %s20974_s20]]   ;;  %s20979_s22 = smov 16  }
   0xf   :  { %23055 = sst [smem:[#allocation61_spill]] %s21073_s29  ;;  %s20980_s28 = smov 17  }
  0x10   :  { %23056 = sst [smem:[#allocation62_spill]] %s21078_s3 }
  0x11   :  { %s21103_s30 = sld [smem:[%s23013_s0 + %s20975_s26]]  }
  0x12   :  { %23057 = sst [smem:[#allocation63_spill]] %s21088_s14 }
  0x13   :  { %s21108_s6 = sld [smem:[%s23013_s0 + %s20976_s1]]  }
  0x14   :  { %23058 = sst [smem:[#allocation64_spill]] %s21098_s24 }
  0x15   :  { %s21113_s12 = sld [smem:[%s23013_s0 + %s20977_s7]]   ;;  %s20981_s7 = smov 18  }
  0x16   :  { %s21118_s20 = sld [smem:[%s23013_s0 + %s20978_s15]]   ;;  %s20982_s15 = smov 19  }
  0x17   :  { %s21123_s27 = sld [smem:[%s23013_s0 + %s20979_s22]]   ;;  %s20983_s22 = smov 20  }
  0x18   :  { %s21128_s4 = sld [smem:[%s23013_s0 + %s20980_s28]]   ;;  %s20984_s28 = smov 21  }
  0x19   :  { %23059 = sst [smem:[#allocation65_spill]] %s21108_s6 }
  0x1a   :  { %s21133_s9 = sld [smem:[%s23013_s0 + %s20981_s7]]   ;;  %s20985_s7 = smov 22  }
  0x1b   :  { %s21138_s3 = sld [smem:[%s23013_s0 + %s20982_s15]]   ;;  %s20986_s15 = smov 23  }
  0x1c   :  { %23060 = sst [smem:[#allocation66_spill]] %s21118_s20 }
  0x1d   :  { %s21143_s5 = sld [smem:[%s23013_s0 + %s20983_s22]]   ;;  %s20987_s22 = smov 24  }
  0x1e   :  { %23061 = sst [smem:[#allocation67_spill]] %s21128_s4 }
  0x1f   :  { %s21148_s4 = sld [smem:[%s23013_s0 + %s20984_s28]]   ;;  %s20988_s28 = smov 25  }
  0x20   :  { %23062 = sst [smem:[#allocation68_spill]] %s21133_s9 }
  0x21   :  { %s21153_s9 = sld [smem:[%s23013_s0 + %s20985_s7]]   ;;  %s20989_s7 = smov 26  }
  0x22   :  { %s21158_s20 = sld [smem:[%s23013_s0 + %s20986_s15]]   ;;  %s20990_s15 = smov 27  }
  0x23   :  { %23063 = sst [smem:[#allocation69_spill]] %s21143_s5 }
  0x24   :  { %s21163_s5 = sld [smem:[%s23013_s0 + %s20987_s22]]   ;;  %s20991_s22 = smov 28  }
  0x25   :  { %s21168_s6 = sld [smem:[%s23013_s0 + %s20988_s28]]   ;;  %s20992_s28 = smov 29  }
  0x26   :  { %s21183_s24 = sld [smem:[%s23013_s0 + %s20991_s22]]   ;;  %s20995_s22 = smov 32  }
  0x27   :  { %23064 = sst [smem:[#allocation70_spill]] %s21153_s9 }
  0x28   :  { %23065 = sst [smem:[#allocation71_spill]] %s21158_s20 }
  0x29   :  { %s21173_s9 = sld [smem:[%s23013_s0 + %s20989_s7]]   ;;  %s20993_s7 = smov 30  }
  0x2a   :  { %s21178_s20 = sld [smem:[%s23013_s0 + %s20990_s15]]   ;;  %s20994_s15 = smov 31  }
  0x2b   :  { %23066 = sst [smem:[#allocation72_spill]] %s21168_s6 }
  0x2c   :  { %s21188_s6 = sld [smem:[%s23013_s0 + %s20992_s28]]  }
  0x2d   :  { %s21193_s14 = sld [smem:[%s23013_s0 + %s20993_s7]]  }
  0x2e   :  { %s21203_s29 = sld [smem:[%s23013_s0 + %s20995_s22]]  }
  0x30   :  { %23067 = sst [smem:[#allocation73_spill]] %s21178_s20 }
  0x31   :  { %s21198_s20 = sld [smem:[%s23013_s0 + %s20994_s15]]  }
  0x32   :  { %71 = vsyncpa [#allocation3], 0 }
  0x33   :  { %72 = vsyncpa [#allocation6], 0 }
  0x34   :  { %73 = vsyncpa [#allocation9], 0 }
  0x35   :  { %74 = vsyncpa [#allocation12], 0 }
  0x36   :  { %75 = vsyncpa [#allocation15], 0 }
  0x37   :  { %76 = vsyncpa [#allocation18], 0 }
  0x38   :  { %77 = vsyncpa [#allocation21], 0 }
  0x39   :  { %78 = vsyncpa [#allocation24], 0 }
  0x3a   :  { %79 = vsyncpa [#allocation27], 0 }
  0x3b   :  { %80 = vsyncpa [#allocation30], 0 }
  0x3c   :  { %81 = vsyncpa [#allocation33], 0 }
  0x3d   :  { %82 = vsyncpa [#allocation36], 0 }
  0x3e   :  { %83 = vsyncpa [#allocation39], 0 }
  0x3f   :  { %84 = vsyncpa [#allocation42], 0 }
  0x40   :  { %85 = vsyncpa [#allocation4], 0  ;;  %s20996_s0 = smov [#allocation5]   ;;  %s20997_s1 = smov [#allocation8]  }
  0x41   :  { %s107_s28 = sshll.u32 %s20996_s0, 4  ;;  %s130_s2 = sshll.u32 %s20997_s1, 4  ;;  %s108_s28 = int_to_ptr.vmem [resolvable:$true] %s107_s28  ;;  %s21205_s2 = int_to_ptr.vmem [resolvable:$true] %s130_s2 }
  0x42   :  { %s20340_s7 = scalar_lea.hbm %s21058_s17, 1152 }
  0x43   :  { %p20341_p0 = scmp.ne.s32.totalorder %s21058_s17, %s20340_s7  ;;  %p20344_p1 = scmp.lt.u32.totalorder %s20340_s7, %s21058_s17 }
  0x45   :  { %p20346_p2 = pnand %p20344_p1, %p20341_p0 }
  0x47   :  { %20349 = shalt.err (!%p20346_p2)
}
  0x48   :  { %s20350_s10 = scalar_lea.vmem %s108_s28, 1152  ;;  %p20355_p4 = scmp.lt.s32.totalorder %s108_s28, %s108_s28 }
  0x49   :  { %p20351_p3 = scmp.ne.s32.totalorder %s108_s28, %s20350_s10  ;;  %p20356_p5 = scmp.lt.s32.totalorder %s20350_s10, %s20350_s10 }
  0x4b   :  { %p20357_p6 = por %p20356_p5, %p20355_p4 }
  0x4d   :  { %p20358_p7 = pnand %p20357_p6, %p20351_p3 }
  0x4f   :  { %20361 = shalt.err (!%p20358_p7)
}
  0x50   :  { %s20998_s11 = smov 64   ;;  %s20999_s15 = smov 4  }
  0x51   :  { %113 = dma.hbm_to_vmem [thread:$0]  %s21058_s17, 1152, %s108_s28, [#allocation6], %s20998_s11, %s20998_s11, %s20999_s15  }
  0x52   :  { %s20362_s16 = scalar_lea.hbm %s21068_s25, 16 }
  0x53   :  { %p20363_p8 = scmp.ne.s32.totalorder %s21068_s25, %s20362_s16  ;;  %p20366_p9 = scmp.lt.u32.totalorder %s20362_s16, %s21068_s25 }
  0x55   :  { %p20368_p10 = pnand %p20366_p9, %p20363_p8 }
  0x57   :  { %20371 = shalt.err (!%p20368_p10)
}
  0x58   :  { %s20372_s18 = scalar_lea.vmem %s21205_s2, 16  ;;  %s20376_s22 = scalar_lea.vmem %s21205_s2, 32 }
  0x59   :  { %p20373_p11 = scmp.ne.s32.totalorder %s21205_s2, %s20372_s18  ;;  %p20377_p12 = scmp.lt.s32.totalorder %s21205_s2, %s21205_s2 }
  0x5a   :  { %p20378_p13 = scmp.lt.s32.totalorder %s20376_s22, %s20372_s18 }
  0x5c   :  { %p20379_p0 = por %p20378_p13, %p20377_p12 }
  0x5e   :  { %p20380_p1 = pnand %p20379_p0, %p20373_p11 }
  0x60   :  { %20383 = shalt.err (!%p20380_p1)
}
  0x61   :  { %133 = dma.hbm_to_vmem [thread:$0]  %s21068_s25, 16, %s21205_s2, [#allocation9]  }
  0x62   :  { %s21000_s17 = smov [#allocation11]   ;;  %s20384_s26 = scalar_lea.hbm %s21083_s8, 9216 }
  0x63   :  { %s151_s23 = sshll.u32 %s21000_s17, 4  ;;  %p20385_p2 = scmp.ne.s32.totalorder %s21083_s8, %s20384_s26  ;;  %s152_s23 = int_to_ptr.vmem [resolvable:$true] %s151_s23 }
  0x64   :  { %p20388_p3 = scmp.lt.u32.totalorder %s20384_s26, %s21083_s8 }
  0x66   :  { %p20390_p4 = pnand %p20388_p3, %p20385_p2 }
  0x68   :  { %20393 = shalt.err (!%p20390_p4)
}
  0x69   :  { %s20394_s0 = scalar_lea.vmem %s152_s23, 9216  ;;  %p20399_p6 = scmp.lt.s32.totalorder %s152_s23, %s152_s23 }
  0x6a   :  { %p20395_p5 = scmp.ne.s32.totalorder %s152_s23, %s20394_s0  ;;  %p20400_p7 = scmp.lt.s32.totalorder %s20394_s0, %s20394_s0 }
  0x6c   :  { %p20401_p8 = por %p20400_p7, %p20399_p6 }
  0x6e   :  { %p20402_p9 = pnand %p20401_p8, %p20395_p5 }
  0x70   :  { %20405 = shalt.err (!%p20402_p9)
}
  0x71   :  { %s21001_s28 = smov 256   ;;  %s21002_s25 = smov 16  }
  0x72   :  { %157 = dma.hbm_to_vmem [thread:$0]  %s21083_s8, 9216, %s152_s23, [#allocation12], %s21001_s28, %s21001_s28, %s21002_s25  }
  0x73   :  { %s21003_s1 = smov [#allocation14]   ;;  %s21004_s7 = smov [#allocation17]  }
  0x74   :  { %s174_s2 = sshll.u32 %s21003_s1, 4  ;;  %s193_s10 = sshll.u32 %s21004_s7, 4  ;;  %s175_s2 = int_to_ptr.vmem [resolvable:$true] %s174_s2  ;;  %s194_s10 = int_to_ptr.vmem [resolvable:$true] %s193_s10 }
  0x75   :  { %s20406_s16 = scalar_lea.hbm %s21093_s19, 64 }
  0x76   :  { %p20407_p10 = scmp.ne.s32.totalorder %s21093_s19, %s20406_s16  ;;  %p20410_p11 = scmp.lt.u32.totalorder %s20406_s16, %s21093_s19 }
  0x78   :  { %p20412_p12 = pnand %p20410_p11, %p20407_p10 }
  0x7a   :  { %20415 = shalt.err (!%p20412_p12)
}
  0x7b   :  { %s20416_s18 = scalar_lea.vmem %s175_s2, 64  ;;  %p20421_p0 = scmp.lt.s32.totalorder %s175_s2, %s175_s2 }
  0x7c   :  { %p20417_p13 = scmp.ne.s32.totalorder %s175_s2, %s20416_s18  ;;  %p20422_p1 = scmp.lt.s32.totalorder %s20416_s18, %s20416_s18 }
  0x7e   :  { %p20423_p2 = por %p20422_p1, %p20421_p0 }
  0x80   :  { %p20424_p3 = pnand %p20423_p2, %p20417_p13 }
  0x82   :  { %20427 = shalt.err (!%p20424_p3)
}
  0x83   :  { %177 = dma.hbm_to_vmem [thread:$0]  %s21093_s19, 64, %s175_s2, [#allocation15]  }
  0x84   :  { %s20428_s8 = scalar_lea.hbm %s21103_s30, 16384 }
  0x85   :  { %p20429_p4 = scmp.ne.s32.totalorder %s21103_s30, %s20428_s8  ;;  %p20432_p5 = scmp.lt.u32.totalorder %s20428_s8, %s21103_s30 }
  0x87   :  { %p20434_p6 = pnand %p20432_p5, %p20429_p4 }
  0x89   :  { %20437 = shalt.err (!%p20434_p6)
}
  0x8a   :  { %s20438_s22 = scalar_lea.vmem %s194_s10, 16384  ;;  %p20443_p8 = scmp.lt.s32.totalorder %s194_s10, %s194_s10 }
  0x8b   :  { %p20439_p7 = scmp.ne.s32.totalorder %s194_s10, %s20438_s22  ;;  %p20444_p9 = scmp.lt.s32.totalorder %s20438_s22, %s20438_s22 }
  0x8d   :  { %p20445_p10 = por %p20444_p9, %p20443_p8 }
  0x8f   :  { %p20446_p11 = pnand %p20445_p10, %p20439_p7 }
  0x91   :  { %20449 = shalt.err (!%p20446_p11)
}
  0x92   :  { %199 = dma.hbm_to_vmem [thread:$0]  %s21103_s30, 16384, %s194_s10, [#allocation18], %s21001_s28, %s21001_s28, %s21002_s25  }
  0x93   :  { %s21005_s19 = smov [#allocation20]   ;;  %s20450_s23 = scalar_lea.hbm %s21113_s12, 512 }
  0x94   :  { %s215_s17 = sshll.u32 %s21005_s19, 4  ;;  %p20451_p12 = scmp.ne.s32.totalorder %s21113_s12, %s20450_s23  ;;  %s216_s17 = int_to_ptr.vmem [resolvable:$true] %s215_s17 }
  0x95   :  { %p20454_p13 = scmp.lt.u32.totalorder %s20450_s23, %s21113_s12 }
  0x97   :  { %p20456_p0 = pnand %p20454_p13, %p20451_p12 }
  0x99   :  { %20459 = shalt.err (!%p20456_p0)
}
  0x9a   :  { %s20460_s26 = scalar_lea.vmem %s216_s17, 512  ;;  %p20465_p2 = scmp.lt.s32.totalorder %s216_s17, %s216_s17 }
  0x9b   :  { %p20461_p1 = scmp.ne.s32.totalorder %s216_s17, %s20460_s26  ;;  %p20466_p3 = scmp.lt.s32.totalorder %s20460_s26, %s20460_s26 }
  0x9d   :  { %p20467_p4 = por %p20466_p3, %p20465_p2 }
  0x9f   :  { %p20468_p5 = pnand %p20467_p4, %p20461_p1 }
  0xa1   :  { %20471 = shalt.err (!%p20468_p5)
}
  0xa2   :  { %s21006_s0 = smov 128   ;;  %s21007_s30 = smov 8  }
  0xa3   :  { %221 = dma.hbm_to_vmem [thread:$0]  %s21113_s12, 512, %s216_s17, [#allocation21], %s21006_s0, %s21006_s0, %s21007_s30  }
  0xa4   :  { %s21008_s28 = smov [#allocation23]   ;;  %s21009_s1 = smov [#allocation26]  }
  0xa5   :  { %s240_s25 = sshll.u32 %s21008_s28, 4  ;;  %s263_s2 = sshll.u32 %s21009_s1, 4  ;;  %s241_s25 = int_to_ptr.vmem [resolvable:$true] %s240_s25  ;;  %s21249_s2 = int_to_ptr.vmem [resolvable:$true] %s263_s2 }
  0xa6   :  { %s20472_s7 = scalar_lea.hbm %s21123_s27, 256 }
  0xa7   :  { %p20473_p6 = scmp.ne.s32.totalorder %s21123_s27, %s20472_s7  ;;  %p20476_p7 = scmp.lt.u32.totalorder %s20472_s7, %s21123_s27 }
  0xa9   :  { %p20478_p8 = pnand %p20476_p7, %p20473_p6 }
  0xab   :  { %20481 = shalt.err (!%p20478_p8)
}
  0xac   :  { %s20482_s10 = scalar_lea.vmem %s241_s25, 256  ;;  %p20487_p10 = scmp.lt.s32.totalorder %s241_s25, %s241_s25 }
  0xad   :  { %p20483_p9 = scmp.ne.s32.totalorder %s241_s25, %s20482_s10  ;;  %p20488_p11 = scmp.lt.s32.totalorder %s20482_s10, %s20482_s10 }
  0xaf   :  { %p20489_p12 = por %p20488_p11, %p20487_p10 }
  0xb1   :  { %p20490_p13 = pnand %p20489_p12, %p20483_p9 }
  0xb3   :  { %20493 = shalt.err (!%p20490_p13)
}
  0xb4   :  { %243 = dma.hbm_to_vmem [thread:$0]  %s21123_s27, 256, %s241_s25, [#allocation24]  }
  0xb5   :  { %s20494_s12 = scalar_lea.hbm %s21138_s3, 36864 }
  0xb6   :  { %p20495_p0 = scmp.ne.s32.totalorder %s21138_s3, %s20494_s12  ;;  %p20498_p1 = scmp.lt.u32.totalorder %s20494_s12, %s21138_s3 }
  0xb8   :  { %p20500_p2 = pnand %p20498_p1, %p20495_p0 }
  0xba   :  { %20503 = shalt.err (!%p20500_p2)
}
  0xbb   :  { %s20504_s16 = scalar_lea.vmem %s21249_s2, 36864  ;;  %p20509_p4 = scmp.lt.s32.totalorder %s21249_s2, %s21249_s2 }
  0xbc   :  { %p20505_p3 = scmp.ne.s32.totalorder %s21249_s2, %s20504_s16  ;;  %p20510_p5 = scmp.lt.s32.totalorder %s20504_s16, %s20504_s16 }
  0xbe   :  { %p20511_p6 = por %p20510_p5, %p20509_p4 }
  0xc0   :  { %p20512_p7 = pnand %p20511_p6, %p20505_p3 }
  0xc2   :  { %20515 = shalt.err (!%p20512_p7)
}
  0xc3   :  { %269 = dma.hbm_to_vmem [thread:$0]  %s21138_s3, 36864, %s21249_s2, [#allocation27], %s20998_s11, %s20998_s11, %s20999_s15  }
  0xc4   :  { %s21010_s27 = smov [#allocation29]   ;;  %s21011_s8 = smov [#allocation32]  }
  0xc5   :  { %s286_s18 = sshll.u32 %s21010_s27, 4  ;;  %s307_s22 = sshll.u32 %s21011_s8, 4  ;;  %s287_s18 = int_to_ptr.vmem [resolvable:$true] %s286_s18  ;;  %s21267_s22 = int_to_ptr.vmem [resolvable:$true] %s307_s22 }
  0xc6   :  { %s20516_s19 = scalar_lea.hbm %s21148_s4, 16 }
  0xc7   :  { %p20517_p8 = scmp.ne.s32.totalorder %s21148_s4, %s20516_s19  ;;  %p20520_p9 = scmp.lt.u32.totalorder %s20516_s19, %s21148_s4 }
  0xc9   :  { %p20522_p10 = pnand %p20520_p9, %p20517_p8 }
  0xcb   :  { %20525 = shalt.err (!%p20522_p10)
}
  0xcc   :  { %s20526_s17 = scalar_lea.vmem %s287_s18, 16  ;;  %s20530_s23 = scalar_lea.vmem %s287_s18, 32 }
  0xcd   :  { %p20527_p11 = scmp.ne.s32.totalorder %s287_s18, %s20526_s17  ;;  %p20531_p12 = scmp.lt.s32.totalorder %s287_s18, %s287_s18 }
  0xce   :  { %p20532_p13 = scmp.lt.s32.totalorder %s20530_s23, %s20526_s17 }
  0xd0   :  { %p20533_p0 = por %p20532_p13, %p20531_p12 }
  0xd2   :  { %p20534_p1 = pnand %p20533_p0, %p20527_p11 }
  0xd4   :  { %20537 = shalt.err (!%p20534_p1)
}
  0xd5   :  { %289 = dma.hbm_to_vmem [thread:$0]  %s21148_s4, 16, %s287_s18, [#allocation30]  }
  0xd6   :  { %s20538_s3 = scalar_lea.hbm %s21163_s5, 2304 }
  0xd7   :  { %p20539_p2 = scmp.ne.s32.totalorder %s21163_s5, %s20538_s3  ;;  %p20542_p3 = scmp.lt.u32.totalorder %s20538_s3, %s21163_s5 }
  0xd9   :  { %p20544_p4 = pnand %p20542_p3, %p20539_p2 }
  0xdb   :  { %20547 = shalt.err (!%p20544_p4)
}
  0xdc   :  { %s20548_s26 = scalar_lea.vmem %s21267_s22, 2304  ;;  %p20553_p6 = scmp.lt.s32.totalorder %s21267_s22, %s21267_s22 }
  0xdd   :  { %p20549_p5 = scmp.ne.s32.totalorder %s21267_s22, %s20548_s26  ;;  %p20554_p7 = scmp.lt.s32.totalorder %s20548_s26, %s20548_s26 }
  0xdf   :  { %p20555_p8 = por %p20554_p7, %p20553_p6 }
  0xe1   :  { %p20556_p9 = pnand %p20555_p8, %p20549_p5 }
  0xe3   :  { %20559 = shalt.err (!%p20556_p9)
}
  0xe4   :  { %313 = dma.hbm_to_vmem [thread:$0]  %s21163_s5, 2304, %s21267_s22, [#allocation33], %s20998_s11, %s20998_s11, %s20999_s15  }
  0xe5   :  { %s21012_s4 = smov [#allocation35]   ;;  %s21013_s25 = smov [#allocation38]  }
  0xe6   :  { %s330_s28 = sshll.u32 %s21012_s4, 4  ;;  %s349_s1 = sshll.u32 %s21013_s25, 4  ;;  %s331_s28 = int_to_ptr.vmem [resolvable:$true] %s330_s28  ;;  %s21285_s1 = int_to_ptr.vmem [resolvable:$true] %s349_s1 }
  0xe7   :  { %s20560_s2 = scalar_lea.hbm %s21173_s9, 16 }
  0xe8   :  { %p20561_p10 = scmp.ne.s32.totalorder %s21173_s9, %s20560_s2  ;;  %p20564_p11 = scmp.lt.u32.totalorder %s20560_s2, %s21173_s9 }
  0xea   :  { %p20566_p12 = pnand %p20564_p11, %p20561_p10 }
  0xec   :  { %20569 = shalt.err (!%p20566_p12)
}
  0xed   :  { %s20570_s7 = scalar_lea.vmem %s331_s28, 16  ;;  %s20574_s10 = scalar_lea.vmem %s331_s28, 32 }
  0xee   :  { %p20571_p13 = scmp.ne.s32.totalorder %s331_s28, %s20570_s7  ;;  %p20575_p0 = scmp.lt.s32.totalorder %s331_s28, %s331_s28 }
  0xef   :  { %p20576_p1 = scmp.lt.s32.totalorder %s20574_s10, %s20570_s7 }
  0xf1   :  { %p20577_p2 = por %p20576_p1, %p20575_p0 }
  0xf3   :  { %p20578_p3 = pnand %p20577_p2, %p20571_p13 }
  0xf5   :  { %20581 = shalt.err (!%p20578_p3)
}
  0xf6   :  { %333 = dma.hbm_to_vmem [thread:$0]  %s21173_s9, 16, %s331_s28, [#allocation36]  }
  0xf7   :  { %s20582_s5 = scalar_lea.hbm %s21183_s24, 9216 }
  0xf8   :  { %p20583_p4 = scmp.ne.s32.totalorder %s21183_s24, %s20582_s5  ;;  %p20586_p5 = scmp.lt.u32.totalorder %s20582_s5, %s21183_s24 }
  0xfa   :  { %p20588_p6 = pnand %p20586_p5, %p20583_p4 }
  0xfc   :  { %20591 = shalt.err (!%p20588_p6)
}
  0xfd   :  { %s20592_s12 = scalar_lea.vmem %s21285_s1, 9216  ;;  %p20597_p8 = scmp.lt.s32.totalorder %s21285_s1, %s21285_s1 }
  0xfe   :  { %p20593_p7 = scmp.ne.s32.totalorder %s21285_s1, %s20592_s12  ;;  %p20598_p9 = scmp.lt.s32.totalorder %s20592_s12, %s20592_s12 }
 0x100   :  { %p20599_p10 = por %p20598_p9, %p20597_p8 }
 0x102   :  { %p20600_p11 = pnand %p20599_p10, %p20593_p7 }
 0x104   :  { %20603 = shalt.err (!%p20600_p11)
}
 0x105   :  { %355 = dma.hbm_to_vmem [thread:$0]  %s21183_s24, 9216, %s21285_s1, [#allocation39], %s20998_s11, %s20998_s11, %s20999_s15  }
 0x106   :  { %s21014_s9 = smov [#allocation2]   ;;  %s21015_s27 = smov [#allocation7]  }
 0x107   :  { %s95_s16 = sshll.u32 %s21014_s9, 4  ;;  %s120_s18 = sshll.u32 %s21015_s27, 4  ;;  %s96_s16 = int_to_ptr.vmem [resolvable:$true] %s95_s16  ;;  %s121_s18 = int_to_ptr.vmem [resolvable:$true] %s120_s18 }
 0x108   :  { %s20604_s8 = scalar_lea.hbm %s21053_s13, 2304 }
 0x109   :  { %p20605_p12 = scmp.ne.s32.totalorder %s21053_s13, %s20604_s8  ;;  %p20608_p13 = scmp.lt.u32.totalorder %s20604_s8, %s21053_s13 }
 0x10b   :  { %p20610_p0 = pnand %p20608_p13, %p20605_p12 }
 0x10d   :  { %20613 = shalt.err (!%p20610_p0)
}
 0x10e   :  { %s20614_s22 = scalar_lea.vmem %s96_s16, 2304  ;;  %p20619_p2 = scmp.lt.s32.totalorder %s96_s16, %s96_s16 }
 0x10f   :  { %p20615_p1 = scmp.ne.s32.totalorder %s96_s16, %s20614_s22  ;;  %p20620_p3 = scmp.lt.s32.totalorder %s20614_s22, %s20614_s22 }
 0x111   :  { %p20621_p4 = por %p20620_p3, %p20619_p2 }
 0x113   :  { %p20622_p5 = pnand %p20621_p4, %p20615_p1 }
 0x115   :  { %20625 = shalt.err (!%p20622_p5)
}
 0x116   :  { %101 = dma.hbm_to_vmem [thread:$0]  %s21053_s13, 2304, %s96_s16, [#allocation3], %s20998_s11, %s20998_s11, %s20999_s15  }
 0x117   :  { %s20626_s24 = scalar_lea.hbm %s21063_s21, 16 }
 0x118   :  { %p20627_p6 = scmp.ne.s32.totalorder %s21063_s21, %s20626_s24  ;;  %p20630_p7 = scmp.lt.u32.totalorder %s20626_s24, %s21063_s21 }
 0x11a   :  { %p20632_p8 = pnand %p20630_p7, %p20627_p6 }
 0x11c   :  { %20635 = shalt.err (!%p20632_p8)
}
 0x11d   :  { %s20636_s19 = scalar_lea.vmem %s121_s18, 16  ;;  %s20640_s17 = scalar_lea.vmem %s121_s18, 32 }
 0x11e   :  { %p20637_p9 = scmp.ne.s32.totalorder %s121_s18, %s20636_s19  ;;  %p20641_p10 = scmp.lt.s32.totalorder %s121_s18, %s121_s18 }
 0x11f   :  { %p20642_p11 = scmp.lt.s32.totalorder %s20640_s17, %s20636_s19 }
 0x121   :  { %p20643_p12 = por %p20642_p11, %p20641_p10 }
 0x123   :  { %p20644_p13 = pnand %p20643_p12, %p20637_p9 }
 0x125   :  { %20647 = shalt.err (!%p20644_p13)
}
 0x126   :  { %s23068_s23 = sld [smem:[#allocation61_spill]]  ;;  %s21016_s3 = smov [#allocation10]  }
 0x127   :  { %123 = dma.hbm_to_vmem [thread:$0]  %s21063_s21, 16, %s121_s18, [#allocation6]  }
 0x128   :  { %s140_s13 = sshll.u32 %s21016_s3, 4  ;;  %s21017_s26 = smov [#allocation13]   ;;  %s141_s13 = int_to_ptr.vmem [resolvable:$true] %s140_s13 }
 0x129   :  { %s164_s4 = sshll.u32 %s21017_s26, 4  ;;  %s165_s4 = int_to_ptr.vmem [resolvable:$true] %s164_s4 }
 0x12c   :  { %s20648_s28 = scalar_lea.hbm %s23068_s23, 16 }
 0x12d   :  { %p20649_p0 = scmp.ne.s32.totalorder %s23068_s23, %s20648_s28  ;;  %p20652_p1 = scmp.lt.u32.totalorder %s20648_s28, %s23068_s23 }
 0x12f   :  { %p20654_p2 = pnand %p20652_p1, %p20649_p0 }
 0x131   :  { %20657 = shalt.err (!%p20654_p2)
}
 0x132   :  { %s20658_s25 = scalar_lea.vmem %s141_s13, 16  ;;  %s20662_s1 = scalar_lea.vmem %s141_s13, 32 }
 0x133   :  { %p20659_p3 = scmp.ne.s32.totalorder %s141_s13, %s20658_s25  ;;  %p20663_p4 = scmp.lt.s32.totalorder %s141_s13, %s141_s13 }
 0x134   :  { %p20664_p5 = scmp.lt.s32.totalorder %s20662_s1, %s20658_s25 }
 0x136   :  { %p20665_p6 = por %p20664_p5, %p20663_p4 }
 0x138   :  { %p20666_p7 = pnand %p20665_p6, %p20659_p3 }
 0x13a   :  { %20669 = shalt.err (!%p20666_p7)
}
 0x13b   :  { %s23069_s21 = sld [smem:[#allocation63_spill]] }
 0x13c   :  { %143 = dma.hbm_to_vmem [thread:$0]  %s23068_s23, 16, %s141_s13, [#allocation9]  }
 0x141   :  { %s20670_s2 = scalar_lea.hbm %s23069_s21, 64 }
 0x142   :  { %p20671_p8 = scmp.ne.s32.totalorder %s23069_s21, %s20670_s2  ;;  %p20674_p9 = scmp.lt.u32.totalorder %s20670_s2, %s23069_s21 }
 0x144   :  { %p20676_p10 = pnand %p20674_p9, %p20671_p8 }
 0x146   :  { %20679 = shalt.err (!%p20676_p10)
}
 0x147   :  { %s20680_s7 = scalar_lea.vmem %s165_s4, 64  ;;  %p20685_p12 = scmp.lt.s32.totalorder %s165_s4, %s165_s4 }
 0x148   :  { %p20681_p11 = scmp.ne.s32.totalorder %s165_s4, %s20680_s7  ;;  %p20686_p13 = scmp.lt.s32.totalorder %s20680_s7, %s20680_s7 }
 0x14a   :  { %p20687_p0 = por %p20686_p13, %p20685_p12 }
 0x14c   :  { %p20688_p1 = pnand %p20687_p0, %p20681_p11 }
 0x14e   :  { %20691 = shalt.err (!%p20688_p1)
}
 0x14f   :  { %s23070_s10 = sld [smem:[#allocation64_spill]]  ;;  %s21018_s5 = smov [#allocation16]  }
 0x150   :  { %167 = dma.hbm_to_vmem [thread:$0]  %s23069_s21, 64, %s165_s4, [#allocation12]  }
 0x151   :  { %s184_s12 = sshll.u32 %s21018_s5, 4  ;;  %s21019_s9 = smov [#allocation19]   ;;  %s185_s12 = int_to_ptr.vmem [resolvable:$true] %s184_s12 }
 0x152   :  { %s206_s16 = sshll.u32 %s21019_s9, 4  ;;  %s207_s16 = int_to_ptr.vmem [resolvable:$true] %s206_s16 }
 0x155   :  { %s20692_s27 = scalar_lea.hbm %s23070_s10, 64 }
 0x156   :  { %p20693_p2 = scmp.ne.s32.totalorder %s23070_s10, %s20692_s27  ;;  %p20696_p3 = scmp.lt.u32.totalorder %s20692_s27, %s23070_s10 }
 0x158   :  { %p20698_p4 = pnand %p20696_p3, %p20693_p2 }
 0x15a   :  { %20701 = shalt.err (!%p20698_p4)
}
 0x15b   :  { %s20702_s18 = scalar_lea.vmem %s185_s12, 64  ;;  %p20707_p6 = scmp.lt.s32.totalorder %s185_s12, %s185_s12 }
 0x15c   :  { %p20703_p5 = scmp.ne.s32.totalorder %s185_s12, %s20702_s18  ;;  %p20708_p7 = scmp.lt.s32.totalorder %s20702_s18, %s20702_s18 }
 0x15e   :  { %p20709_p8 = por %p20708_p7, %p20707_p6 }
 0x160   :  { %p20710_p9 = pnand %p20709_p8, %p20703_p5 }
 0x162   :  { %20713 = shalt.err (!%p20710_p9)
}
 0x163   :  { %s23071_s8 = sld [smem:[#allocation65_spill]] }
 0x164   :  { %187 = dma.hbm_to_vmem [thread:$0]  %s23070_s10, 64, %s185_s12, [#allocation15]  }
 0x169   :  { %s20714_s22 = scalar_lea.hbm %s23071_s8, 16 }
 0x16a   :  { %p20715_p10 = scmp.ne.s32.totalorder %s23071_s8, %s20714_s22  ;;  %p20718_p11 = scmp.lt.u32.totalorder %s20714_s22, %s23071_s8 }
 0x16c   :  { %p20720_p12 = pnand %p20718_p11, %p20715_p10 }
 0x16e   :  { %20723 = shalt.err (!%p20720_p12)
}
 0x16f   :  { %s20724_s24 = scalar_lea.vmem %s207_s16, 16  ;;  %s20728_s19 = scalar_lea.vmem %s207_s16, 32 }
 0x170   :  { %p20725_p13 = scmp.ne.s32.totalorder %s207_s16, %s20724_s24  ;;  %p20729_p0 = scmp.lt.s32.totalorder %s207_s16, %s207_s16 }
 0x171   :  { %p20730_p1 = scmp.lt.s32.totalorder %s20728_s19, %s20724_s24 }
 0x173   :  { %p20731_p2 = por %p20730_p1, %p20729_p0 }
 0x175   :  { %p20732_p3 = pnand %p20731_p2, %p20725_p13 }
 0x177   :  { %20735 = shalt.err (!%p20732_p3)
}
 0x178   :  { %s23072_s17 = sld [smem:[#allocation66_spill]]  ;;  %s21020_s23 = smov [#allocation22]  }
 0x179   :  { %209 = dma.hbm_to_vmem [thread:$0]  %s23071_s8, 16, %s207_s16, [#allocation18]  }
 0x17a   :  { %s227_s3 = sshll.u32 %s21020_s23, 4  ;;  %s21021_s13 = smov [#allocation25]   ;;  %s228_s3 = int_to_ptr.vmem [resolvable:$true] %s227_s3 }
 0x17b   :  { %s249_s26 = sshll.u32 %s21021_s13, 4  ;;  %s250_s26 = int_to_ptr.vmem [resolvable:$true] %s249_s26 }
 0x17e   :  { %s20736_s4 = scalar_lea.hbm %s23072_s17, 16384 }
 0x17f   :  { %p20737_p4 = scmp.ne.s32.totalorder %s23072_s17, %s20736_s4  ;;  %p20740_p5 = scmp.lt.u32.totalorder %s20736_s4, %s23072_s17 }
 0x181   :  { %p20742_p6 = pnand %p20740_p5, %p20737_p4 }
 0x183   :  { %20745 = shalt.err (!%p20742_p6)
}
 0x184   :  { %s20746_s28 = scalar_lea.vmem %s228_s3, 16384  ;;  %p20751_p8 = scmp.lt.s32.totalorder %s228_s3, %s228_s3 }
 0x185   :  { %p20747_p7 = scmp.ne.s32.totalorder %s228_s3, %s20746_s28  ;;  %p20752_p9 = scmp.lt.s32.totalorder %s20746_s28, %s20746_s28 }
 0x187   :  { %p20753_p10 = por %p20752_p9, %p20751_p8 }
 0x189   :  { %p20754_p11 = pnand %p20753_p10, %p20747_p7 }
 0x18b   :  { %20757 = shalt.err (!%p20754_p11)
}
 0x18c   :  { %s21022_s25 = smov 1024   ;;  %s23073_s1 = sld [smem:[#allocation67_spill]] }
 0x18d   :  { %233 = dma.hbm_to_vmem [thread:$0]  %s23072_s17, 16384, %s228_s3, [#allocation21], %s21022_s25, %s21022_s25, %s20998_s11  }
 0x192   :  { %s20758_s21 = scalar_lea.hbm %s23073_s1, 512 }
 0x193   :  { %p20759_p12 = scmp.ne.s32.totalorder %s23073_s1, %s20758_s21  ;;  %p20762_p13 = scmp.lt.u32.totalorder %s20758_s21, %s23073_s1 }
 0x195   :  { %p20764_p0 = pnand %p20762_p13, %p20759_p12 }
 0x197   :  { %20767 = shalt.err (!%p20764_p0)
}
 0x198   :  { %s20768_s2 = scalar_lea.vmem %s250_s26, 512  ;;  %p20773_p2 = scmp.lt.s32.totalorder %s250_s26, %s250_s26 }
 0x199   :  { %p20769_p1 = scmp.ne.s32.totalorder %s250_s26, %s20768_s2  ;;  %p20774_p3 = scmp.lt.s32.totalorder %s20768_s2, %s20768_s2 }
 0x19b   :  { %p20775_p4 = por %p20774_p3, %p20773_p2 }
 0x19d   :  { %p20776_p5 = pnand %p20775_p4, %p20769_p1 }
 0x19f   :  { %20779 = shalt.err (!%p20776_p5)
}
 0x1a0   :  { %s23074_s7 = sld [smem:[#allocation69_spill]]  ;;  %s21023_s10 = smov [#allocation28]  }
 0x1a1   :  { %255 = dma.hbm_to_vmem [thread:$0]  %s23073_s1, 512, %s250_s26, [#allocation24], %s21006_s0, %s21006_s0, %s21007_s30  }
 0x1a2   :  { %s276_s5 = sshll.u32 %s21023_s10, 4  ;;  %s21024_s12 = smov [#allocation31]   ;;  %s277_s5 = int_to_ptr.vmem [resolvable:$true] %s276_s5 }
 0x1a3   :  { %s296_s9 = sshll.u32 %s21024_s12, 4  ;;  %s297_s9 = int_to_ptr.vmem [resolvable:$true] %s296_s9 }
 0x1a6   :  { %s20780_s16 = scalar_lea.hbm %s23074_s7, 16 }
 0x1a7   :  { %p20781_p6 = scmp.ne.s32.totalorder %s23074_s7, %s20780_s16  ;;  %p20784_p7 = scmp.lt.u32.totalorder %s20780_s16, %s23074_s7 }
 0x1a9   :  { %p20786_p8 = pnand %p20784_p7, %p20781_p6 }
 0x1ab   :  { %20789 = shalt.err (!%p20786_p8)
}
 0x1ac   :  { %s20790_s27 = scalar_lea.vmem %s277_s5, 16  ;;  %s20794_s18 = scalar_lea.vmem %s277_s5, 32 }
 0x1ad   :  { %p20791_p9 = scmp.ne.s32.totalorder %s277_s5, %s20790_s27  ;;  %p20795_p10 = scmp.lt.s32.totalorder %s277_s5, %s277_s5 }
 0x1ae   :  { %p20796_p11 = scmp.lt.s32.totalorder %s20794_s18, %s20790_s27 }
 0x1b0   :  { %p20797_p12 = por %p20796_p11, %p20795_p10 }
 0x1b2   :  { %p20798_p13 = pnand %p20797_p12, %p20791_p9 }
 0x1b4   :  { %20801 = shalt.err (!%p20798_p13)
}
 0x1b5   :  { %s23075_s8 = sld [smem:[#allocation70_spill]] }
 0x1b6   :  { %279 = dma.hbm_to_vmem [thread:$0]  %s23074_s7, 16, %s277_s5, [#allocation27]  }
 0x1bb   :  { %s20802_s22 = scalar_lea.hbm %s23075_s8, 16 }
 0x1bc   :  { %p20803_p0 = scmp.ne.s32.totalorder %s23075_s8, %s20802_s22  ;;  %p20806_p1 = scmp.lt.u32.totalorder %s20802_s22, %s23075_s8 }
 0x1be   :  { %p20808_p2 = pnand %p20806_p1, %p20803_p0 }
 0x1c0   :  { %20811 = shalt.err (!%p20808_p2)
}
 0x1c1   :  { %s20812_s24 = scalar_lea.vmem %s297_s9, 16  ;;  %s20816_s19 = scalar_lea.vmem %s297_s9, 32 }
 0x1c2   :  { %p20813_p3 = scmp.ne.s32.totalorder %s297_s9, %s20812_s24  ;;  %p20817_p4 = scmp.lt.s32.totalorder %s297_s9, %s297_s9 }
 0x1c3   :  { %p20818_p5 = scmp.lt.s32.totalorder %s20816_s19, %s20812_s24 }
 0x1c5   :  { %p20819_p6 = por %p20818_p5, %p20817_p4 }
 0x1c7   :  { %p20820_p7 = pnand %p20819_p6, %p20813_p3 }
 0x1c9   :  { %20823 = shalt.err (!%p20820_p7)
}
 0x1ca   :  { %s23076_s17 = sld [smem:[#allocation72_spill]]  ;;  %s21025_s23 = smov [#allocation34]  }
 0x1cb   :  { %299 = dma.hbm_to_vmem [thread:$0]  %s23075_s8, 16, %s297_s9, [#allocation30]  }
 0x1cc   :  { %s320_s3 = sshll.u32 %s21025_s23, 4  ;;  %s21026_s13 = smov [#allocation37]   ;;  %s321_s3 = int_to_ptr.vmem [resolvable:$true] %s320_s3 }
 0x1cd   :  { %s340_s26 = sshll.u32 %s21026_s13, 4  ;;  %s341_s26 = int_to_ptr.vmem [resolvable:$true] %s340_s26 }
 0x1d0   :  { %s20824_s4 = scalar_lea.hbm %s23076_s17, 16 }
 0x1d1   :  { %p20825_p8 = scmp.ne.s32.totalorder %s23076_s17, %s20824_s4  ;;  %p20828_p9 = scmp.lt.u32.totalorder %s20824_s4, %s23076_s17 }
 0x1d3   :  { %p20830_p10 = pnand %p20828_p9, %p20825_p8 }
 0x1d5   :  { %20833 = shalt.err (!%p20830_p10)
}
 0x1d6   :  { %s20834_s28 = scalar_lea.vmem %s321_s3, 16  ;;  %s20838_s25 = scalar_lea.vmem %s321_s3, 32 }
 0x1d7   :  { %p20835_p11 = scmp.ne.s32.totalorder %s321_s3, %s20834_s28  ;;  %p20839_p12 = scmp.lt.s32.totalorder %s321_s3, %s321_s3 }
 0x1d8   :  { %p20840_p13 = scmp.lt.s32.totalorder %s20838_s25, %s20834_s28 }
 0x1da   :  { %p20841_p0 = por %p20840_p13, %p20839_p12 }
 0x1dc   :  { %p20842_p1 = pnand %p20841_p0, %p20835_p11 }
 0x1de   :  { %20845 = shalt.err (!%p20842_p1)
}
 0x1df   :  { %s23077_s1 = sld [smem:[#allocation73_spill]] }
 0x1e0   :  { %323 = dma.hbm_to_vmem [thread:$0]  %s23076_s17, 16, %s321_s3, [#allocation33]  }
 0x1e5   :  { %s20846_s21 = scalar_lea.hbm %s23077_s1, 16 }
 0x1e6   :  { %p20847_p2 = scmp.ne.s32.totalorder %s23077_s1, %s20846_s21  ;;  %p20850_p3 = scmp.lt.u32.totalorder %s20846_s21, %s23077_s1 }
 0x1e8   :  { %p20852_p4 = pnand %p20850_p3, %p20847_p2 }
 0x1ea   :  { %20855 = shalt.err (!%p20852_p4)
}
 0x1eb   :  { %s20856_s2 = scalar_lea.vmem %s341_s26, 16  ;;  %s20860_s7 = scalar_lea.vmem %s341_s26, 32 }
 0x1ec   :  { %p20857_p5 = scmp.ne.s32.totalorder %s341_s26, %s20856_s2  ;;  %p20861_p6 = scmp.lt.s32.totalorder %s341_s26, %s341_s26 }
 0x1ed   :  { %p20862_p7 = scmp.lt.s32.totalorder %s20860_s7, %s20856_s2 }
 0x1ef   :  { %p20863_p8 = por %p20862_p7, %p20861_p6 }
 0x1f1   :  { %p20864_p9 = pnand %p20863_p8, %p20857_p5 }
 0x1f3   :  { %20867 = shalt.err (!%p20864_p9)
}
 0x1f4   :  { %343 = dma.hbm_to_vmem [thread:$0]  %s23077_s1, 16, %s341_s26, [#allocation36]  }
 0x1f5   :  { %s21027_s10 = smov [#allocation40]   ;;  %s21028_s12 = smov [#allocation41]  }
 0x1f6   :  { %s361_s5 = sshll.u32 %s21027_s10, 4  ;;  %s374_s9 = sshll.u32 %s21028_s12, 4  ;;  %s362_s5 = int_to_ptr.vmem [resolvable:$true] %s361_s5  ;;  %s375_s9 = int_to_ptr.vmem [resolvable:$true] %s374_s9 }
 0x1f7   :  { %s20868_s16 = scalar_lea.hbm %s21188_s6, 2304 }
 0x1f8   :  { %p20869_p10 = scmp.ne.s32.totalorder %s21188_s6, %s20868_s16  ;;  %p20872_p11 = scmp.lt.u32.totalorder %s20868_s16, %s21188_s6 }
 0x1fa   :  { %p20874_p12 = pnand %p20872_p11, %p20869_p10 }
 0x1fc   :  { %20877 = shalt.err (!%p20874_p12)
}
 0x1fd   :  { %s20878_s27 = scalar_lea.vmem %s362_s5, 2304  ;;  %p20883_p0 = scmp.lt.s32.totalorder %s362_s5, %s362_s5 }
 0x1fe   :  { %p20879_p13 = scmp.ne.s32.totalorder %s362_s5, %s20878_s27  ;;  %p20884_p1 = scmp.lt.s32.totalorder %s20878_s27, %s20878_s27 }
 0x200   :  { %p20885_p2 = por %p20884_p1, %p20883_p0 }
 0x202   :  { %p20886_p3 = pnand %p20885_p2, %p20879_p13 }
 0x204   :  { %20889 = shalt.err (!%p20886_p3)
}
 0x205   :  { %367 = dma.hbm_to_vmem [thread:$0]  %s21188_s6, 2304, %s362_s5, [#allocation39], %s20998_s11, %s20998_s11, %s20999_s15  }
 0x206   :  { %s20890_s18 = scalar_lea.hbm %s21193_s14, 16 }
 0x207   :  { %p20891_p4 = scmp.ne.s32.totalorder %s21193_s14, %s20890_s18  ;;  %p20894_p5 = scmp.lt.u32.totalorder %s20890_s18, %s21193_s14 }
 0x209   :  { %p20896_p6 = pnand %p20894_p5, %p20891_p4 }
 0x20b   :  { %20899 = shalt.err (!%p20896_p6)
}
 0x20c   :  { %s20900_s8 = scalar_lea.vmem %s375_s9, 16  ;;  %s20904_s22 = scalar_lea.vmem %s375_s9, 32 }
 0x20d   :  { %p20901_p7 = scmp.ne.s32.totalorder %s375_s9, %s20900_s8  ;;  %p20905_p8 = scmp.lt.s32.totalorder %s375_s9, %s375_s9 }
 0x20e   :  { %p20906_p9 = scmp.lt.s32.totalorder %s20904_s22, %s20900_s8 }
 0x210   :  { %p20907_p10 = por %p20906_p9, %p20905_p8 }
 0x212   :  { %p20908_p11 = pnand %p20907_p10, %p20901_p7 }
 0x214   :  { %20911 = shalt.err (!%p20908_p11)
}
 0x215   :  { %377 = dma.hbm_to_vmem [thread:$0]  %s21193_s14, 16, %s375_s9, [#allocation42]  }
 0x216   :  { %20934 = dma.done.wait [#allocation3], 2304  }
 0x217   :  { %20935 = vsyncadd [#allocation3], 4294964992 }
 0x218   :  { %20936 = dma.done.wait [#allocation6], 1168  }
 0x219   :  { %20937 = vsyncadd [#allocation6], 4294966128 }
 0x21a   :  { %20938 = dma.done.wait [#allocation9], 32  }
 0x21b   :  { %20939 = vsyncadd [#allocation9], 4294967264 }
 0x21c   :  { %20940 = dma.done.wait [#allocation12], 9280  }
 0x21d   :  { %20941 = vsyncadd [#allocation12], 4294958016 }
 0x21e   :  { %20942 = dma.done.wait [#allocation15], 128  }
 0x21f   :  { %20943 = vsyncadd [#allocation15], 4294967168 }
 0x220   :  { %20944 = dma.done.wait [#allocation18], 16400  }
 0x221   :  { %20945 = vsyncadd [#allocation18], 4294950896 }
 0x222   :  { %20946 = dma.done.wait [#allocation21], 16896  }
 0x223   :  { %20947 = vsyncadd [#allocation21], 4294950400 }
 0x224   :  { %20948 = dma.done.wait [#allocation24], 768  }
 0x225   :  { %20949 = vsyncadd [#allocation24], 4294966528 }
 0x226   :  { %20950 = dma.done.wait [#allocation27], 36880  }
 0x227   :  { %20951 = vsyncadd [#allocation27], 4294930416 }
 0x228   :  { %20952 = dma.done.wait [#allocation30], 32  }
 0x229   :  { %20953 = vsyncadd [#allocation30], 4294967264 }
 0x22a   :  { %20954 = dma.done.wait [#allocation33], 2320  }
 0x22b   :  { %20955 = vsyncadd [#allocation33], 4294964976 }
 0x22c   :  { %20956 = dma.done.wait [#allocation36], 32  }
 0x22d   :  { %20957 = vsyncadd [#allocation36], 4294967264 }
 0x22e   :  { %20958 = dma.done.wait [#allocation39], 11520  }
 0x22f   :  { %20959 = vsyncadd [#allocation39], 4294955776 }
 0x230   :  { %20960 = dma.done.wait [#allocation42], 16  }
 0x231   :  { %20961 = vsyncadd [#allocation42], 4294967280  ;;  %s23078_s14 = sld [smem:[#allocation59_spill]]  ;;  %v19442_v4 = vld [vmem:[#allocation2] sm:$0xff]   ;;  %v19443_v9 = vld [vmem:[#allocation2 + $0x8] sm:$0xff]   ;;  %vm871_vm0 = vcmask 130048  }
 0x232   :  { %18195 = vmatprep.mubr.bf16.mxu0 %v19442_v4  ;;  %v19444_v10 = vld [vmem:[#allocation2 + $0x10] sm:$0xff]   ;;  %v19445_v11 = vld [vmem:[#allocation2 + $0x18] sm:$0xff]   ;;  %v19446_v12 = vld [vmem:[#allocation2 + $0x20] sm:$0xff]   ;;  %vm21030_vm1 = vmmov 0   ;;  %s23079_s6 = sld [smem:[#allocation62_spill]]  ;;  %vm1579_vm6 = vcmask 261120  }
 0x233   :  { %v19447_v13 = vld [vmem:[#allocation2 + $0x28] sm:$0xff]   ;;  %v19448_v14 = vld [vmem:[#allocation2 + $0x30] sm:$0xff]   ;;  %v19449_v15 = vld [vmem:[#allocation2 + $0x38] sm:$0xff]   ;;  %vm4026_vm11 = vcmask 64512   ;;  %s23081_s11 = sld [smem:[#allocation68_spill]]  ;;  %s23185_s15 = sld [smem:[#allocation71_spill]] }
 0x234   :  { %v19450_v16 = vld [vmem:[#allocation2 + $0x40] sm:$0xff]   ;;  %v19451_v17 = vld [vmem:[#allocation2 + $0x48] sm:$0xff]   ;;  %v19452_v18 = vld [vmem:[#allocation2 + $0x50] sm:$0xff]   ;;  %s21034_s24 = smov [#allocation43]  }
 0x235   :  { %v19453_v19 = vld [vmem:[#allocation2 + $0x58] sm:$0xff]   ;;  %v19454_v20 = vld [vmem:[#allocation2 + $0x60] sm:$0xff]   ;;  %v19455_v21 = vld [vmem:[#allocation2 + $0x68] sm:$0xff]   ;;  %s15979_s19 = sshll.u32 %s21034_s24, 4  ;;  %s15980_s19 = int_to_ptr.vmem [resolvable:$true] %s15979_s19 }
 0x236   :  { %v19456_v22 = vld [vmem:[#allocation2 + $0x70] sm:$0xff]   ;;  %v19457_v23 = vld [vmem:[#allocation2 + $0x78] sm:$0xff]   ;;  %v19458_v24 = vld [vmem:[#allocation2 + $0x80] sm:$0xff]   ;;  %s20912_s17 = scalar_lea.vmem %s15980_s19, 2048  ;;  %p20917_p13 = scmp.lt.s32.totalorder %s15980_s19, %s15980_s19 }
 0x237   :  { %v19434_v0 = vld [vmem:[%s23078_s14] sm:$0xff]   ;;  %v19435_v1 = vld [vmem:[%s23078_s14 + $0x8] sm:$0xff]   ;;  %v19436_v2 = vld [vmem:[%s23078_s14 + $0x10] sm:$0xff]   ;;  %p20913_p12 = scmp.ne.s32.totalorder %s15980_s19, %s20912_s17  ;;  %p20918_p0 = scmp.lt.s32.totalorder %s20912_s17, %s20912_s17 }
 0x238   :  { %18179 = vmatprep.subr.bf16.mxu0 %v19434_v0  ;;  %v19437_v3 = vld [vmem:[%s23078_s14 + $0x18] sm:$0xff]   ;;  %v19438_v5 = vld [vmem:[%s23078_s14 + $0x20] sm:$0xff]   ;;  %v19439_v6 = vld [vmem:[%s23078_s14 + $0x28] sm:$0xff]  }
 0x239   :  { %18180 = vmatpush3.bf16.msra.mxu0 %v19434_v0  ;;  %v19440_v7 = vld [vmem:[%s23078_s14 + $0x30] sm:$0xff]   ;;  %v19441_v8 = vld [vmem:[%s23078_s14 + $0x38] sm:$0xff]   ;;  %v19459_v25 = vld [vmem:[#allocation2 + $0x88] sm:$0xff]   ;;  %p20919_p1 = por %p20918_p0, %p20917_p13 }
 0x23a   :  { %18181 = vmatprep.subr.bf16.mxu0 %v19435_v1  ;;  %v19460_v26 = vld [vmem:[#allocation5 + $0x8] sm:$0xff]   ;;  %v19461_v27 = vld [vmem:[#allocation5] sm:$0xff]   ;;  %v19462_v39 = vld [vmem:[#allocation5 + $0x10] sm:$0xff]  }
 0x23b   :  { %18231 = vmatprep.subr.bf16.mxu1 %v19460_v26  ;;  %v19463_v49 = vld [vmem:[#allocation5 + $0x18] sm:$0xff]   ;;  %v19464_v58 = vld [vmem:[#allocation5 + $0x20] sm:$0xff]   ;;  %v19465_v4 = vld [vmem:[#allocation5 + $0x28] sm:$0xff]   ;;  %p20920_p2 = pnand %p20919_p1, %p20913_p12 }
 0x23c   :  { %18232 = vmatpush3.bf16.msra.mxu1 %v19460_v26  ;;  %v19477_v26 = vld [vmem:[#allocation11 + $0x40] ss:$16 sps:$4 sm:$0xff]  }
 0x23d   :  { %18182 = vmatpush3.bf16.msra.mxu0 %v19435_v1  ;;  %18237 = vmatprep.subr.bf16.mxu1 %v19461_v27 }
 0x23e   :  { %18183 = vmatprep.subr.bf16.mxu0 %v19436_v2 }
 0x241   :  { %18184 = vmatpush3.bf16.msra.mxu0 %v19436_v2 }
 0x242   :  { %18185 = vmatprep.subr.bf16.mxu0 %v19437_v3 }
 0x245   :  { %18186 = vmatpush3.bf16.msra.mxu0 %v19437_v3 }
 0x246   :  { %18187 = vmatprep.subr.bf16.mxu0 %v19438_v5 }
 0x249   :  { %18188 = vmatpush3.bf16.msra.mxu0 %v19438_v5 }
 0x24a   :  { %18189 = vmatprep.subr.bf16.mxu0 %v19439_v6 }
 0x24d   :  { %18190 = vmatpush3.bf16.msra.mxu0 %v19439_v6 }
 0x24e   :  { %18191 = vmatprep.subr.bf16.mxu0 %v19440_v7 }
 0x251   :  { %18192 = vmatpush3.bf16.msra.mxu0 %v19440_v7 }
 0x252   :  { %18193 = vmatprep.subr.bf16.mxu0 %v19441_v8 }
 0x255   :  { %18194 = vmatpush3.bf16.msra.mxu0 %v19441_v8 }
 0x258   :  { %18196 = vmatmul.mubr.bf16.vlgmr.msra.gmra.mrb[0].mxu0 %v19443_v9 }
 0x259   :  { %18199 = vmatprep.mubr.bf16.mxu0 %v19444_v10 }
 0x260   :  { %18200 = vmatmul.mubr.bf16.gmra.mrb[4].mxu0 %v19445_v11 }
 0x261   :  { %18203 = vmatprep.mubr.bf16.mxu0 %v19446_v12 }
 0x268   :  { %18204 = vmatmul.mubr.bf16.gmra.mrb[8].mxu0 %v19447_v13  ;;  %v19466_v13 = vld [vmem:[#allocation5 + $0x30] sm:$0xff]  }
 0x269   :  { %18207 = vmatprep.mubr.bf16.mxu0 %v19448_v14 }
 0x270   :  { %18208 = vmatmul.mubr.bf16.gmra.mrb[12].mxu0 %v19449_v15 }
 0x271   :  { %18211 = vmatprep.mubr.bf16.mxu0 %v19450_v16 }
 0x278   :  { %18212 = vmatmul.mubr.bf16.gmra.mrb[16].mxu0 %v19451_v17 }
 0x279   :  { %18215 = vmatprep.mubr.bf16.mxu0 %v19452_v18 }
 0x280   :  { %18216 = vmatmul.mubr.bf16.gmra.mrb[20].mxu0 %v19453_v19 }
 0x281   :  { %18219 = vmatprep.mubr.bf16.mxu0 %v19454_v20 }
 0x288   :  { %18220 = vmatmul.mubr.bf16.gmra.mrb[24].mxu0 %v19455_v21 }
 0x289   :  { %18223 = vmatprep.mubr.bf16.mxu0 %v19456_v22 }
 0x290   :  { %18224 = vmatmul.mubr.bf16.gmra.mrb[28].mxu0 %v19457_v23  ;;  %v19467_v23 = vld [vmem:[#allocation5 + $0x38] sm:$0xff]  }
 0x291   :  { %18227 = vmatprep.mubr.bf16.mxu0 %v19458_v24  ;;  %v19468_v24 = vld [vmem:[#allocation5 + $0x40] sm:$0xff]  }
 0x298   :  { %18228 = vmatmul.mubr.bf16.gmra.mrb[32].mxu0 %v19459_v25  ;;  %v21029_v25 = vmov 0.0  }
 0x32b   :  { %v18197_v28 = vpop.f32.mrb[0].mxu0 }
 0x32c   :  { %v699_v29 = vpop.f32.mrb[1].mxu0 }
 0x32d   :  { %v18198_v30 = vpop.f32.mrb[2].mxu0 }
 0x32e   :  { %v702_v31 = vpop.f32.mrb[3].mxu0  ;;  %v843_v32 = vpack.c.bf16 %v18198_v30, %v18197_v28  ;;  %v16093_v28 = vld [vmem:[#allocation7] ss:$0 sm:$0xff] }
 0x32f   :  { %v842_v33 = vpack.c.bf16 %v702_v31, %v699_v29 }
 0x333   :  { %v18201_v34 = vpop.f32.mrb[4].mxu0 }
 0x334   :  { %v715_v35 = vpop.f32.mrb[5].mxu0 }
 0x335   :  { %v18202_v36 = vpop.f32.mrb[6].mxu0 }
 0x336   :  { %v718_v37 = vpop.f32.mrb[7].mxu0  ;;  %v845_v38 = vpack.c.bf16 %v18202_v36, %v18201_v34 }
 0x337   :  { %v844_v40 = vpack.c.bf16 %v718_v37, %v715_v35 }
 0x339   :  { %18233 = vmatprep.mubr.msk.bf16.mxu1 %vm871_vm0, %v844_v40 }
 0x33a   :  { %18234 = vmatmul.mubr.msk.bf16.vlgmr.msra.gmra.mrb[0].mxu1 %vm871_vm0, %v845_v38 }
 0x33b   :  { %18239 = vmatprep.mubr.msk.bf16.mxu1 %vm871_vm0, %v842_v33  ;;  %18238 = vmatpush3.bf16.msra.mxu1 %v19461_v27  ;;  %v18205_v41 = vpop.f32.mrb[8].mxu0  ;;  %v19479_v27 = vld [vmem:[#allocation11 + $0x44] ss:$16 sps:$4 sm:$0xff]  }
 0x33c   :  { %v731_v42 = vpop.f32.mrb[9].mxu0  ;;  %18243 = vmatprep.subr.bf16.mxu1 %v19462_v39  ;;  %1734 = vmatprep.subr.bf16.mxu0 %v19479_v27 }
 0x33d   :  { %v18206_v43 = vpop.f32.mrb[10].mxu0  ;;  %1735 = vmatpush1.bf16.msra.mxu0 %v19477_v26 }
 0x33e   :  { %v734_v44 = vpop.f32.mrb[11].mxu0  ;;  %v847_v45 = vpack.c.bf16 %v18206_v43, %v18205_v41 }
 0x33f   :  { %v846_v46 = vpack.c.bf16 %v734_v44, %v731_v42 }
 0x343   :  { %v18209_v47 = vpop.f32.mrb[12].mxu0 }
 0x344   :  { %v747_v48 = vpop.f32.mrb[13].mxu0 }
 0x345   :  { %v18210_v50 = vpop.f32.mrb[14].mxu0 }
 0x346   :  { %18240 = vmatmul.mubr.msk.bf16.vlgmr.msra.gmra.mrb[0].mxu1 %vm871_vm0, %v843_v32  ;;  %v750_v51 = vpop.f32.mrb[15].mxu0  ;;  %v849_v52 = vpack.c.bf16 %v18210_v50, %v18209_v47 }
 0x347   :  { %18245 = vmatprep.mubr.msk.bf16.mxu1 %vm871_vm0, %v846_v46  ;;  %18244 = vmatpush3.bf16.msra.mxu1 %v19462_v39  ;;  %v848_v53 = vpack.c.bf16 %v750_v51, %v747_v48 }
 0x348   :  { %18249 = vmatprep.subr.bf16.mxu1 %v19463_v49 }
 0x34b   :  { %v18213_v54 = vpop.f32.mrb[16].mxu0 }
 0x34c   :  { %v763_v55 = vpop.f32.mrb[17].mxu0 }
 0x34d   :  { %v18214_v56 = vpop.f32.mrb[18].mxu0 }
 0x34e   :  { %v766_v57 = vpop.f32.mrb[19].mxu0  ;;  %v851_v59 = vpack.c.bf16 %v18214_v56, %v18213_v54 }
 0x34f   :  { %v850_v60 = vpack.c.bf16 %v766_v57, %v763_v55 }
 0x352   :  { %18246 = vmatmul.mubr.msk.bf16.vlgmr.msra.gmra.mrb[0].mxu1 %vm871_vm0, %v847_v45 }
 0x353   :  { %18251 = vmatprep.mubr.msk.bf16.mxu1 %vm871_vm0, %v848_v53  ;;  %18250 = vmatpush3.bf16.msra.mxu1 %v19463_v49  ;;  %v18217_v61 = vpop.f32.mrb[20].mxu0 }
 0x354   :  { %18255 = vmatprep.subr.bf16.mxu1 %v19464_v58  ;;  %v779_v62 = vpop.f32.mrb[21].mxu0 }
 0x355   :  { %v18218_v63 = vpop.f32.mrb[22].mxu0 }
 0x356   :  { %v782_v0 = vpop.f32.mrb[23].mxu0  ;;  %v853_v1 = vpack.c.bf16 %v18218_v63, %v18217_v61 }
 0x357   :  { %v852_v2 = vpack.c.bf16 %v782_v0, %v779_v62 }
 0x35b   :  { %v18221_v3 = vpop.f32.mrb[24].mxu0 }
 0x35c   :  { %v795_v5 = vpop.f32.mrb[25].mxu0 }
 0x35d   :  { %v18222_v6 = vpop.f32.mrb[26].mxu0 }
 0x35e   :  { %18252 = vmatmul.mubr.msk.bf16.vlgmr.msra.gmra.mrb[0].mxu1 %vm871_vm0, %v849_v52  ;;  %v855_v7 = vpack.c.bf16 %v18222_v6, %v18221_v3  ;;  %v798_v8 = vpop.f32.mrb[27].mxu0 }
 0x35f   :  { %18257 = vmatprep.mubr.msk.bf16.mxu1 %vm871_vm0, %v850_v60  ;;  %18256 = vmatpush3.bf16.msra.mxu1 %v19464_v58  ;;  %v854_v9 = vpack.c.bf16 %v798_v8, %v795_v5  ;;  %v16094_v5 = vld [vmem:[#allocation8] ss:$0 sm:$0xff] }
 0x360   :  { %18261 = vmatprep.subr.bf16.mxu1 %v19465_v4 }
 0x363   :  { %v18225_v10 = vpop.f32.mrb[28].mxu0 }
 0x364   :  { %v811_v11 = vpop.f32.mrb[29].mxu0 }
 0x365   :  { %v18226_v12 = vpop.f32.mrb[30].mxu0 }
 0x366   :  { %v857_v14 = vpack.c.bf16 %v18226_v12, %v18225_v10  ;;  %v814_v15 = vpop.f32.mrb[31].mxu0  ;;  %v16095_v10 = vld [vmem:[#allocation10] ss:$0 sm:$0xff] }
 0x367   :  { %v856_v16 = vpack.c.bf16 %v814_v15, %v811_v11 }
 0x36a   :  { %18258 = vmatmul.mubr.msk.bf16.vlgmr.msra.gmra.mrb[0].mxu1 %vm871_vm0, %v851_v59 }
 0x36b   :  { %18263 = vmatprep.mubr.msk.bf16.mxu1 %vm871_vm0, %v852_v2  ;;  %18262 = vmatpush3.bf16.msra.mxu1 %v19465_v4  ;;  %v18229_v17 = vpop.f32.mrb[32].mxu0 }
 0x36c   :  { %18267 = vmatprep.subr.bf16.mxu1 %v19466_v13  ;;  %v827_v18 = vpop.f32.mrb[33].mxu0 }
 0x36d   :  { %v18230_v19 = vpop.f32.mrb[34].mxu0 }
 0x36e   :  { %v859_v20 = vpack.c.bf16 %v18230_v19, %v18229_v17  ;;  %v830_v21 = vpop.f32.mrb[35].mxu0 }
 0x36f   :  { %v858_v22 = vpack.c.bf16 %v830_v21, %v827_v18 }
 0x376   :  { %18264 = vmatmul.mubr.msk.bf16.vlgmr.msra.gmra.mrb[0].mxu1 %vm871_vm0, %v853_v1 }
 0x377   :  { %18269 = vmatprep.mubr.msk.bf16.mxu1 %vm871_vm0, %v854_v9  ;;  %18268 = vmatpush3.bf16.msra.mxu1 %v19466_v13 }
 0x378   :  { %18273 = vmatprep.subr.bf16.mxu1 %v19467_v23 }
 0x382   :  { %18270 = vmatmul.mubr.msk.bf16.vlgmr.msra.gmra.mrb[0].mxu1 %vm871_vm0, %v855_v7 }
 0x383   :  { %18275 = vmatprep.mubr.msk.bf16.mxu1 %vm871_vm0, %v856_v16  ;;  %18274 = vmatpush3.bf16.msra.mxu1 %v19467_v23 }
 0x384   :  { %18279 = vmatprep.subr.bf16.mxu1 %v19468_v24 }
 0x38e   :  { %18276 = vmatmul.mubr.msk.bf16.vlgmr.msra.gmra.mrb[0].mxu1 %vm871_vm0, %v857_v14 }
 0x38f   :  { %18281 = vmatprep.mubr.msk.bf16.mxu1 %vm871_vm0, %v858_v22  ;;  %18280 = vmatpush3.bf16.msra.mxu1 %v19468_v24 }
 0x390   :  { %18285 = vmatprep.subr.bf16.mxu1 %v21029_v25 }
 0x39a   :  { %18282 = vmatmul.mubr.msk.bf16.vlgmr.msra.gmra.mrb[0].mxu1 %vm871_vm0, %v859_v20 }
 0x39b   :  { %18289 = vmatprep.mubr.msk.bf16.mxu1 %vm21030_vm1, %v21029_v25 }
 0x46d   :  { %v18283_v29 = vpop.f32.mrb[0].mxu1 }
 0x46e   :  { %v1445_v30 = vpop.f32.mrb[1].mxu1  ;;  %v1473_v34 = vadd.f32 %v18283_v29, %v16093_v28 }
 0x46f   :  { %v1471_v31 = vadd.f32 %v16093_v28, %v1445_v30  ;;  %v18284_v32 = vpop.f32.mrb[2].mxu1  ;;  %v19476_v30 = vld [vmem:[#allocation11 + $0x4] ss:$16 sps:$4 sm:$0xff]  }
 0x470   :  { %v1448_v33 = vpop.f32.mrb[3].mxu1  ;;  %v1474_v37 = vadd.f32 %v18284_v32, %v16093_v28  ;;  %v1487_v40 = vmul.f32 %v1473_v34, %v1473_v34  ;;  %v19474_v32 = vld [vmem:[#allocation11] ss:$16 sps:$4 sm:$0xff]  }
 0x471   :  { %v1472_v35 = vadd.f32 %v16093_v28, %v1448_v33  ;;  %v1485_v36 = vmul.f32 %v1471_v31, %v1471_v31  ;;  %v19470_v33 = vld [vmem:[%s23079_s6 + $0x8] sm:$0xff]  }
 0x472   :  { %v1488_v43 = vmul.f32 %v1474_v37, %v1474_v37 }
 0x473   :  { %v1475_v38 = vadd.f32 %v1472_v35, %v1471_v31  ;;  %v1486_v39 = vmul.f32 %v1472_v35, %v1472_v35 }
 0x475   :  { %v1476_v41 = vadd.f32 %v1475_v38, %v1473_v34  ;;  %v1489_v42 = vadd.f32 %v1486_v39, %v1485_v36  ;;  %v19473_v36 = vld [vmem:[%s23079_s6 + $0x20] ss:$0 sps:$4 sm:$0xff]   ;;  %v19485_v39 = vld [vmem:[#allocation11 + $0x64] ss:$16 sps:$4 sm:$0xff]  }
 0x476   :  { %v19480_v38 = vld [vmem:[#allocation11 + $0x20] ss:$16 sps:$4 sm:$0xff]   ;;  %1736 = vmatprep.subr.bf16.mxu0 %v19485_v39 }
 0x477   :  { %v1477_v44 = vadd.f32 %v1476_v41, %v1474_v37  ;;  %v1490_v45 = vadd.f32 %v1489_v42, %v1487_v40  ;;  %v19483_v40 = vld [vmem:[#allocation11 + $0x60] ss:$16 sps:$4 sm:$0xff]   ;;  %v19488_v41 = vld [vmem:[#allocation11 + $0x84] ss:$16 sps:$4 sm:$0xff]   ;;  %v21031_v42 = vmov 0  }
 0x478   :  { %1737 = vmatpush1.bf16.msra.mxu0 %v19483_v40  ;;  %1766 = vmatprep.mubr.bf16.mxu0 %v21031_v42  ;;  %v19542_v40 = vld [vmem:[#allocation11 + $0x1a4] ss:$16 sps:$4 sm:$0xff]  }
 0x479   :  { %v1478_v46 = vrot.slane %v1477_v44, 4  ;;  %v1491_v47 = vadd.f32 %v1490_v45, %v1488_v43  ;;  %v19491_v43 = vld [vmem:[#allocation11 + $0x4c] ss:$16 sps:$4 sm:$0xff]  }
 0x47a   :  { %1775 = vmatprep.subr.bf16.mxu0 %v19491_v43  ;;  %v19537_v43 = vld [vmem:[#allocation11 + $0x108] ss:$16 sps:$4 sm:$0xff]  }
 0x47b   :  { %v1479_v48 = vadd.f32 %v1478_v46, %v1477_v44  ;;  %v1492_v49 = vrot.slane %v1491_v47, 4 }
 0x47d   :  { %v1480_v50 = vrot.slane %v1479_v48, 2  ;;  %v1493_v51 = vadd.f32 %v1492_v49, %v1491_v47  ;;  %v19486_v47 = vld [vmem:[#allocation11 + $0x80] ss:$16 sps:$4 sm:$0xff]  }
 0x47f   :  { %v1481_v52 = vadd.f32 %v1480_v50, %v1479_v48  ;;  %v1494_v53 = vrot.slane %v1493_v51, 2  ;;  %v19494_v50 = vld [vmem:[#allocation11 + $0xa4] ss:$16 sps:$4 sm:$0xff]  }
 0x481   :  { %v1482_v54 = vrot.slane %v1481_v52, 1  ;;  %v1495_v55 = vadd.f32 %v1494_v53, %v1493_v51  ;;  %v19489_v51 = vld [vmem:[#allocation11 + $0x48] ss:$16 sps:$4 sm:$0xff]   ;;  %v19497_v53 = vld [vmem:[#allocation11 + $0x6c] ss:$16 sps:$4 sm:$0xff]  }
 0x483   :  { %v1483_v56 = vadd.f32 %v1482_v54, %v1481_v52  ;;  %v1496_v57 = vrot.slane %v1495_v55, 1  ;;  %v19492_v54 = vld [vmem:[#allocation11 + $0xa0] ss:$16 sps:$4 sm:$0xff]  }
 0x485   :  { %v1484_v58 = vmul.f32 0.03125, %v1483_v56  ;;  %v1497_v59 = vadd.f32 %v1496_v57, %v1495_v55  ;;  %v19500_v55 = vld [vmem:[#allocation11 + $0xc4] ss:$16 sps:$4 sm:$0xff]   ;;  %v19495_v57 = vld [vmem:[#allocation11 + $0x68] ss:$16 sps:$4 sm:$0xff]  }
 0x487   :  { %v1498_v60 = vmul.f32 0.03125, %v1497_v59  ;;  %v1499_v61 = vmul.f32 %v1484_v58, %v1484_v58  ;;  %v1502_v62 = vsub.f32 %v1472_v35, %v1484_v58  ;;  %v1501_v63 = vsub.f32 %v1471_v31, %v1484_v58  ;;  %v19469_v31 = vld [vmem:[%s23079_s6] sm:$0xff]   ;;  %v19472_v35 = vld [vmem:[%s23079_s6 + $0x18] sm:$0xff]  }
 0x488   :  { %v1503_v0 = vsub.f32 %v1473_v34, %v1484_v58  ;;  %v1504_v1 = vsub.f32 %v1474_v37, %v1484_v58  ;;  %v19471_v34 = vld [vmem:[%s23079_s6 + $0x10] sm:$0xff]   ;;  %v19503_v59 = vld [vmem:[#allocation11 + $0xc] ss:$16 sps:$4 sm:$0xff]  }
 0x489   :  { %v1500_v2 = vsub.f32 %v1498_v60, %v1499_v61  ;;  %v19482_v37 = vld [vmem:[#allocation11 + $0x24] ss:$16 sps:$4 sm:$0xff]   ;;  %v19498_v61 = vld [vmem:[#allocation11 + $0xc0] ss:$16 sps:$4 sm:$0xff]  }
 0x48b   :  { %v1505_v3 = vadd.f32 1e-05, %v1500_v2  ;;  %v19509_v2 = vld [vmem:[#allocation11 + $0x2c] ss:$16 sps:$4 sm:$0xff]  }
 0x48d   :  { %20260 = vrsqrt.f32 %v1505_v3  ;;  %v19504_v3 = vld [vmem:[#allocation11 + $0xe0] ss:$16 sps:$4 sm:$0xff]  }
 0x497   :  { %v20261_v4 = vpop.eup %20260 }
 0x498   :  { %v1508_v6 = vmul.f32 %v20261_v4, %v1502_v62  ;;  %v1507_v7 = vmul.f32 %v20261_v4, %v1501_v63  ;;  %v1509_v8 = vmul.f32 %v20261_v4, %v1503_v0  ;;  %v1510_v9 = vmul.f32 %v20261_v4, %v1504_v1  ;;  %v19506_v0 = vld [vmem:[#allocation11 + $0xe4] ss:$16 sps:$4 sm:$0xff]   ;;  %v19501_v1 = vld [vmem:[#allocation11 + $0x8] ss:$16 sps:$4 sm:$0xff]  }
 0x499   :  { %v19512_v4 = vld [vmem:[#allocation11 + $0x104] ss:$16 sps:$4 sm:$0xff]  }
 0x49a   :  { %v1519_v11 = vmul.f32 %v16094_v5, %v1508_v6  ;;  %v1518_v12 = vmul.f32 %v16094_v5, %v1507_v7  ;;  %v1520_v13 = vmul.f32 %v16094_v5, %v1509_v8  ;;  %v1521_v14 = vmul.f32 %v16094_v5, %v1510_v9  ;;  %v19507_v5 = vld [vmem:[#allocation11 + $0x28] ss:$16 sps:$4 sm:$0xff]   ;;  %v19515_v8 = vld [vmem:[#allocation11 + $0x8c] ss:$16 sps:$4 sm:$0xff]   ;;  %v19510_v9 = vld [vmem:[#allocation11 + $0x100] ss:$16 sps:$4 sm:$0xff]  }
 0x49c   :  { %v1529_v15 = vadd.f32 %v16095_v10, %v1518_v12  ;;  %v1530_v16 = vadd.f32 %v16095_v10, %v1519_v11  ;;  %v1531_v17 = vadd.f32 %v16095_v10, %v1520_v13  ;;  %v1532_v18 = vadd.f32 %v16095_v10, %v1521_v14  ;;  %v19518_v14 = vld [vmem:[#allocation11 + $0x124] ss:$16 sps:$4 sm:$0xff]  }
 0x49e   :  { %vm1533_vm2 = vcmp.ge.f32.partialorder %v1529_v15, 0.0  ;;  %vm1534_vm3 = vcmp.ge.f32.partialorder %v1530_v16, 0.0  ;;  %v1537_v19 = vmul.f32 0.01, %v1529_v15  ;;  %v1538_v20 = vmul.f32 0.01, %v1530_v16 }
 0x49f   :  { %vm1535_vm4 = vcmp.ge.f32.partialorder %v1531_v17, 0.0  ;;  %vm1536_vm5 = vcmp.ge.f32.partialorder %v1532_v18, 0.0  ;;  %v1539_v21 = vmul.f32 0.01, %v1531_v17  ;;  %v1540_v22 = vmul.f32 0.01, %v1532_v18 }
 0x4a0   :  { %v1541_v23 = vsel %vm1533_vm2, %v1529_v15, %v1537_v19  ;;  %v1542_v24 = vsel %vm1534_vm3, %v1530_v16, %v1538_v20  ;;  %v19513_v15 = vld [vmem:[#allocation11 + $0x88] ss:$16 sps:$4 sm:$0xff]   ;;  %v19521_v16 = vld [vmem:[#allocation11 + $0xac] ss:$16 sps:$4 sm:$0xff]  }
 0x4a1   :  { %v1545_v26 = vpack.c.bf16 %v1542_v24, %v1541_v23  ;;  %v1543_v27 = vsel %vm1535_vm4, %v1531_v17, %v1539_v21  ;;  %v1544_v28 = vsel %vm1536_vm5, %v1532_v18, %v1540_v22  ;;  %v19516_v17 = vld [vmem:[#allocation11 + $0x120] ss:$16 sps:$4 sm:$0xff]   ;;  %v19524_v18 = vld [vmem:[#allocation11 + $0x144] ss:$16 sps:$4 sm:$0xff]   ;;  %v19519_v19 = vld [vmem:[#allocation11 + $0xa8] ss:$16 sps:$4 sm:$0xff]  }
 0x4a2   :  { %v1546_v29 = vpack.c.bf16 %v1544_v28, %v1543_v27  ;;  %v19527_v21 = vld [vmem:[#allocation11 + $0xcc] ss:$16 sps:$4 sm:$0xff]   ;;  %v19522_v23 = vld [vmem:[#allocation11 + $0x140] ss:$16 sps:$4 sm:$0xff]  }
 0x4a3   :  { %18286 = vmatpush3.bf16.msra.mxu1 %v1545_v26  ;;  %v19530_v26 = vld [vmem:[#allocation11 + $0x164] ss:$16 sps:$4 sm:$0xff]  }
 0x4a4   :  { %18287 = vmatprep.subr.bf16.mxu1 %v21029_v25 }
 0x4a7   :  { %18288 = vmatpush3.bf16.msra.mxu1 %v1546_v29  ;;  %v19525_v29 = vld [vmem:[#allocation11 + $0xc8] ss:$16 sps:$4 sm:$0xff]  }
 0x4a8   :  { %1859 = vmatprep.subr.bf16.mxu1 %v19476_v30  ;;  %v19533_v30 = vld [vmem:[#allocation11 + $0xec] ss:$16 sps:$4 sm:$0xff]  }
 0x4aa   :  { %18290 = vmatmul.mubr.msk.bf16.vlgmr.msra.gmra.mrb[4].mxu1 %vm1579_vm6, %v19469_v31  ;;  %v19528_v31 = vld [vmem:[#allocation11 + $0x160] ss:$16 sps:$4 sm:$0xff]  }
 0x4ab   :  { %18293 = vmatprep.mubr.msk.bf16.mxu1 %vm21030_vm1, %v21029_v25  ;;  %1860 = vmatpush1.bf16.msra.mxu1 %v19474_v32  ;;  %v19536_v32 = vld [vmem:[#allocation11 + $0x184] ss:$16 sps:$4 sm:$0xff]  }
 0x4ac   :  { %1861 = vmatprep.subr.bf16.mxu1 %v19482_v37  ;;  %v19534_v37 = vld [vmem:[#allocation11 + $0x180] ss:$16 sps:$4 sm:$0xff]  }
 0x4af   :  { %1862 = vmatpush1.bf16.msra.mxu1 %v19480_v38 }
 0x4b0   :  { %1993 = vmatprep.subr.bf16.mxu1 %v19488_v41 }
 0x4b2   :  { %18294 = vmatmul.mubr.msk.bf16.gmra.mrb[8].mxu1 %vm1579_vm6, %v19470_v33  ;;  %v19531_v33 = vld [vmem:[#allocation11 + $0xe8] ss:$16 sps:$4 sm:$0xff]  }
 0x4b3   :  { %18297 = vmatprep.mubr.msk.bf16.mxu1 %vm21030_vm1, %v21029_v25 }
 0x4ba   :  { %18298 = vmatmul.mubr.msk.bf16.gmra.mrb[12].mxu1 %vm1579_vm6, %v19471_v34 }
 0x4bb   :  { %18301 = vmatprep.mubr.msk.bf16.mxu1 %vm21030_vm1, %v21029_v25 }
 0x4c2   :  { %18302 = vmatmul.mubr.msk.bf16.gmra.mrb[16].mxu1 %vm1579_vm6, %v19472_v35  ;;  %v19539_v35 = vld [vmem:[#allocation11 + $0x10c] ss:$16 sps:$4 sm:$0xff]  }
 0x4c3   :  { %18305 = vmatprep.mubr.msk.bf16.mxu1 %vm21030_vm1, %v21029_v25 }
 0x4ca   :  { %18306 = vmatmul.mubr.msk.bf16.gmra.mrb[20].mxu1 %vm1579_vm6, %v19473_v36 }
 0x4cb   :  { %1891 = vmatprep.mubr.bf16.mxu1 %v21031_v42 }
 0x57d   :  { %v1629_v44 = vpop.f32.mrb[4].mxu1 }
 0x57e   :  { %v18291_v45 = vpop.f32.mrb[5].mxu1 }
 0x57f   :  { %v1632_v46 = vpop.f32.mrb[6].mxu1  ;;  %v19540_v45 = vld [vmem:[#allocation11 + $0x1a0] ss:$16 sps:$4 sm:$0xff]  }
 0x580   :  { %v1667_v48 = vpack.c.bf16 %v1632_v46, %v1629_v44  ;;  %v18292_v49 = vpop.f32.mrb[7].mxu1  ;;  %v19545_v44 = vld [vmem:[#allocation11 + $0x12c] ss:$16 sps:$4 sm:$0xff]   ;;  %v19548_v46 = vld [vmem:[#allocation11 + $0x1c4] ss:$16 sps:$4 sm:$0xff]  }
 0x581   :  { %v19546_v49 = vld [vmem:[#allocation11 + $0x1c0] ss:$16 sps:$4 sm:$0xff]  }
 0x582   :  { %v1690_v52 = vrot.slane %v1667_v48, 4  ;;  %16124 = vmatmul.mubr.msk.bf16.vlgmr.msra.gmra.mrb[24].mxu1 %vm1579_vm6, %v1667_v48 }
 0x583   :  { %1994 = vmatpush1.bf16.msra.mxu1 %v19486_v47  ;;  %2025 = vmatprep.mubr.bf16.mxu1 %v21031_v42  ;;  %v19543_v47 = vld [vmem:[#allocation11 + $0x128] ss:$16 sps:$4 sm:$0xff]  }
 0x584   :  { %16114 = vmatmul.mubr.msk.bf16.vlgmr.msra.gmra.mrb[36].mxu0 %vm1579_vm6, %v1690_v52  ;;  %1995 = vmatprep.subr.bf16.mxu1 %v19494_v50  ;;  %v19554_v50 = vld [vmem:[#allocation11 + $0x1e4] ss:$16 sps:$4 sm:$0xff]  }
 0x585   :  { %v1637_v56 = vpop.f32.mrb[8].mxu1  ;;  %1776 = vmatpush1.bf16.msra.mxu0 %v19489_v51  ;;  %1807 = vmatprep.mubr.bf16.mxu0 %v21031_v42  ;;  %v19549_v51 = vld [vmem:[#allocation11 + $0x148] ss:$16 sps:$4 sm:$0xff]  }
 0x586   :  { %v18295_v58 = vpop.f32.mrb[9].mxu1  ;;  %1777 = vmatprep.subr.bf16.mxu0 %v19497_v53  ;;  %v19552_v53 = vld [vmem:[#allocation11 + $0x1e0] ss:$16 sps:$4 sm:$0xff]  }
 0x587   :  { %v1640_v60 = vpop.f32.mrb[10].mxu1  ;;  %1996 = vmatpush1.bf16.msra.mxu1 %v19492_v54  ;;  %v19560_v54 = vld [vmem:[#allocation11 + $0x204] ss:$16 sps:$4 sm:$0xff]  }
 0x588   :  { %v21423_v62 = vpack.c.bf16 %v1640_v60, %v1637_v56  ;;  %v18296_v63 = vpop.f32.mrb[11].mxu1  ;;  %2133 = vmatprep.subr.bf16.mxu1 %v19500_v55  ;;  %v19555_v55 = vld [vmem:[#allocation11 + $0x168] ss:$16 sps:$4 sm:$0xff]   ;;  %v19563_v56 = vld [vmem:[#allocation11 + $0x18c] ss:$16 sps:$4 sm:$0xff]  }
 0x589   :  { %1778 = vmatpush1.bf16.msra.mxu0 %v19495_v57  ;;  %v19558_v57 = vld [vmem:[#allocation11 + $0x200] ss:$16 sps:$4 sm:$0xff]   ;;  %v19561_v60 = vld [vmem:[#allocation11 + $0x188] ss:$16 sps:$4 sm:$0xff]  }
 0x58a   :  { %16134 = vmatmul.mubr.msk.bf16.vlgmr.msra.gmra.mrb[28].mxu1 %vm1579_vm6, %v21423_v62  ;;  %1900 = vmatprep.subr.bf16.mxu0 %v19503_v59  ;;  %v2089_v11 = vrot.slane %v21423_v62, 4  ;;  %v19566_v59 = vld [vmem:[#allocation11 + $0x224] ss:$16 sps:$4 sm:$0xff]   ;;  %v19567_v63 = vld [vmem:[#allocation11 + $0x1a8] ss:$16 sps:$4 sm:$0xff]  }
 0x58b   :  { %2134 = vmatpush1.bf16.msra.mxu1 %v19498_v61  ;;  %2165 = vmatprep.mubr.bf16.mxu1 %v21031_v42  ;;  %v19569_v61 = vld [vmem:[#allocation11 + $0x1ac] ss:$16 sps:$4 sm:$0xff]  }
 0x58c   :  { %16115 = vmatmul.mubr.msk.bf16.vlgmr.msra.gmra.mrb[40].mxu0 %vm1579_vm6, %v1690_v52  ;;  %2135 = vmatprep.subr.bf16.mxu1 %v19506_v0  ;;  %v19557_v52 = vld [vmem:[#allocation11 + $0x16c] ss:$16 sps:$4 sm:$0xff]  }
 0x58d   :  { %1901 = vmatpush1.bf16.msra.mxu0 %v19501_v1  ;;  %v1645_v6 = vpop.f32.mrb[12].mxu1  ;;  %1932 = vmatprep.mubr.bf16.mxu0 %v21031_v42  ;;  %v19572_v1 = vld [vmem:[#allocation11 + $0x1cc] ss:$16 sps:$4 sm:$0xff]  }
 0x58e   :  { %1902 = vmatprep.subr.bf16.mxu0 %v19509_v2  ;;  %v18299_v7 = vpop.f32.mrb[13].mxu1  ;;  %v19570_v2 = vld [vmem:[#allocation11 + $0x1c8] ss:$16 sps:$4 sm:$0xff]  }
 0x58f   :  { %2136 = vmatpush1.bf16.msra.mxu1 %v19504_v3  ;;  %v1648_v10 = vpop.f32.mrb[14].mxu1  ;;  %v19575_v3 = vld [vmem:[#allocation11 + $0x1ec] ss:$16 sps:$4 sm:$0xff]  }
 0x590   :  { %2271 = vmatprep.subr.bf16.mxu1 %v19512_v4  ;;  %v21431_v12 = vpack.c.bf16 %v1648_v10, %v1645_v6  ;;  %v18300_v13 = vpop.f32.mrb[15].mxu1  ;;  %v19573_v4 = vld [vmem:[#allocation11 + $0x1e8] ss:$16 sps:$4 sm:$0xff]   ;;  %v19581_v7 = vld [vmem:[#allocation11 + $0x22c] ss:$16 sps:$4 sm:$0xff]  }
 0x591   :  { %1903 = vmatpush1.bf16.msra.mxu0 %v19507_v5  ;;  %v19578_v5 = vld [vmem:[#allocation11 + $0x20c] ss:$16 sps:$4 sm:$0xff]   ;;  %v19576_v6 = vld [vmem:[#allocation11 + $0x208] ss:$16 sps:$4 sm:$0xff]   ;;  %v19590_v13 = vld [vmem:[#allocation17 + $0x24] ss:$16 sps:$4 sm:$0xff]  }
 0x592   :  { %16144 = vmatmul.mubr.msk.bf16.vlgmr.msra.gmra.mrb[32].mxu1 %vm1579_vm6, %v2089_v11  ;;  %2034 = vmatprep.subr.bf16.mxu0 %v19515_v8  ;;  %v2367_v39 = vrot.slane %v21431_v12, 4  ;;  %v19579_v8 = vld [vmem:[#allocation11 + $0x228] ss:$16 sps:$4 sm:$0xff]  }
 0x593   :  { %2272 = vmatpush1.bf16.msra.mxu1 %v19510_v9  ;;  %2303 = vmatprep.mubr.bf16.mxu1 %v21031_v42  ;;  %v19584_v9 = vld [vmem:[#allocation17 + $0x4] ss:$16 sps:$4 sm:$0xff]   ;;  %v19587_v10 = vld [vmem:[#allocation17 + $0xc] ss:$16 sps:$4 sm:$0xff]  }
 0x594   :  { %16125 = vmatmul.mubr.msk.bf16.vlgmr.msra.gmra.mrb[44].mxu0 %vm1579_vm6, %v1667_v48  ;;  %2273 = vmatprep.subr.bf16.mxu1 %v19518_v14  ;;  %v19551_v48 = vld [vmem:[#allocation11 + $0x14c] ss:$16 sps:$4 sm:$0xff]   ;;  %v19593_v14 = vld [vmem:[#allocation17 + $0x2c] ss:$16 sps:$4 sm:$0xff]  }
 0x595   :  { %2035 = vmatpush1.bf16.msra.mxu0 %v19513_v15  ;;  %2066 = vmatprep.mubr.bf16.mxu0 %v21031_v42  ;;  %v1653_v20 = vpop.f32.mrb[16].mxu1  ;;  %v19588_v15 = vld [vmem:[#allocation17 + $0x20] ss:$16 sps:$4 sm:$0xff]  }
 0x596   :  { %2036 = vmatprep.subr.bf16.mxu0 %v19521_v16  ;;  %v18303_v22 = vpop.f32.mrb[17].mxu1  ;;  %v19591_v16 = vld [vmem:[#allocation17 + $0x28] ss:$16 sps:$4 sm:$0xff]  }
 0x597   :  { %2274 = vmatpush1.bf16.msra.mxu1 %v19516_v17  ;;  %v1656_v24 = vpop.f32.mrb[18].mxu1  ;;  %v19596_v17 = vld [vmem:[#allocation17 + $0x44] ss:$16 sps:$4 sm:$0xff]   ;;  %v19605_v22 = vld [vmem:[#allocation17 + $0x6c] ss:$16 sps:$4 sm:$0xff]  }
 0x598   :  { %2411 = vmatprep.subr.bf16.mxu1 %v19524_v18  ;;  %v21439_v27 = vpack.c.bf16 %v1656_v24, %v1653_v20  ;;  %v18304_v28 = vpop.f32.mrb[19].mxu1  ;;  %v19599_v18 = vld [vmem:[#allocation17 + $0x4c] ss:$16 sps:$4 sm:$0xff]   ;;  %v19597_v20 = vld [vmem:[#allocation17 + $0x48] ss:$16 sps:$4 sm:$0xff]  }
 0x599   :  { %2037 = vmatpush1.bf16.msra.mxu0 %v19519_v19  ;;  %v19594_v19 = vld [vmem:[#allocation17 + $0x40] ss:$16 sps:$4 sm:$0xff]   ;;  %v19603_v24 = vld [vmem:[#allocation17 + $0x68] ss:$16 sps:$4 sm:$0xff]  }
 0x59a   :  { %16154 = vmatmul.mubr.msk.bf16.vlgmr.msra.gmra.mrb[36].mxu1 %vm1579_vm6, %v21431_v12  ;;  %2174 = vmatprep.subr.bf16.mxu0 %v19527_v21  ;;  %v2645_v58 = vrot.slane %v21439_v27, 4  ;;  %v19602_v21 = vld [vmem:[#allocation17 + $0x64] ss:$16 sps:$4 sm:$0xff]   ;;  %v19606_v28 = vld [vmem:[#allocation17 + $0x80] ss:$16 sps:$4 sm:$0xff]  }
 0x59b   :  { %2412 = vmatpush1.bf16.msra.mxu1 %v19522_v23  ;;  %2443 = vmatprep.mubr.bf16.mxu1 %v21031_v42  ;;  %v19600_v23 = vld [vmem:[#allocation17 + $0x60] ss:$16 sps:$4 sm:$0xff]  }
 0x59c   :  { %16135 = vmatmul.mubr.msk.bf16.vlgmr.msra.gmra.mrb[48].mxu0 %vm1579_vm6, %v21423_v62  ;;  %2413 = vmatprep.subr.bf16.mxu1 %v19530_v26  ;;  %v19564_v62 = vld [vmem:[#allocation11 + $0x220] ss:$16 sps:$4 sm:$0xff]  }
 0x59d   :  { %2175 = vmatpush1.bf16.msra.mxu0 %v19525_v29  ;;  %2206 = vmatprep.mubr.bf16.mxu0 %v21031_v42  ;;  %v21447_v34 = vpop.f32.mrb[20].mxu1  ;;  %v19608_v26 = vld [vmem:[#allocation17 + $0x84] ss:$16 sps:$4 sm:$0xff]   ;;  %v19609_v29 = vld [vmem:[#allocation17 + $0x88] ss:$16 sps:$4 sm:$0xff]  }
 0x59e   :  { %2176 = vmatprep.subr.bf16.mxu0 %v19533_v30  ;;  %v18307_v36 = vpop.f32.mrb[21].mxu1  ;;  %v1671_v0 = vpack.c.bf16 %v21447_v34, %v21447_v34  ;;  %v19614_v30 = vld [vmem:[#allocation17 + $0xa4] ss:$16 sps:$4 sm:$0xff]  }
 0x59f   :  { %2414 = vmatpush1.bf16.msra.mxu1 %v19528_v31  ;;  %v1664_v38 = vpop.f32.mrb[22].mxu1  ;;  %v19617_v31 = vld [vmem:[#allocation17 + $0xac] ss:$16 sps:$4 sm:$0xff]   ;;  %v19620_v34 = vld [vmem:[#allocation17 + $0xc4] ss:$16 sps:$4 sm:$0xff]  }
 0x5a0   :  { %2549 = vmatprep.subr.bf16.mxu1 %v19536_v32  ;;  %v18308_v41 = vpop.f32.mrb[23].mxu1  ;;  %v19612_v32 = vld [vmem:[#allocation17 + $0xa0] ss:$16 sps:$4 sm:$0xff]   ;;  %v19626_v38 = vld [vmem:[#allocation17 + $0xe4] ss:$16 sps:$4 sm:$0xff]  }
 0x5a1   :  { %2177 = vmatpush1.bf16.msra.mxu0 %v19531_v33  ;;  %v19615_v33 = vld [vmem:[#allocation17 + $0xa8] ss:$16 sps:$4 sm:$0xff]   ;;  %v19618_v36 = vld [vmem:[#allocation17 + $0xc0] ss:$16 sps:$4 sm:$0xff]  }
 0x5a2   :  { %16164 = vmatmul.mubr.msk.bf16.vlgmr.msra.gmra.mrb[40].mxu1 %vm1579_vm6, %v2367_v39  ;;  %2312 = vmatprep.subr.bf16.mxu0 %v19539_v35  ;;  %v19623_v35 = vld [vmem:[#allocation17 + $0xcc] ss:$16 sps:$4 sm:$0xff]   ;;  %v19627_v41 = vld [vmem:[#allocation17 + $0xe8] ss:$16 sps:$4 sm:$0xff]  }
 0x5a3   :  { %2550 = vmatpush1.bf16.msra.mxu1 %v19534_v37  ;;  %2581 = vmatprep.mubr.bf16.mxu1 %v21031_v42  ;;  %v19621_v37 = vld [vmem:[#allocation17 + $0xc8] ss:$16 sps:$4 sm:$0xff]  }
 0x5a4   :  { %16145 = vmatmul.mubr.msk.bf16.vlgmr.msra.gmra.mrb[52].mxu0 %vm1579_vm6, %v2089_v11  ;;  %2551 = vmatprep.subr.bf16.mxu1 %v19542_v40  ;;  %v19582_v11 = vld [vmem:[#allocation17] ss:$16 sps:$4 sm:$0xff]  }
 0x5a5   :  { %2313 = vmatpush1.bf16.msra.mxu0 %v19537_v43  ;;  %2344 = vmatprep.mubr.bf16.mxu0 %v21031_v42  ;;  %v19624_v40 = vld [vmem:[#allocation17 + $0xe0] ss:$16 sps:$4 sm:$0xff]   ;;  %v19632_v43 = vld [vmem:[#allocation17 + $0x104] ss:$16 sps:$4 sm:$0xff]  }
 0x5a6   :  { %2314 = vmatprep.subr.bf16.mxu0 %v19545_v44  ;;  %v19635_v44 = vld [vmem:[#allocation17 + $0x10c] ss:$16 sps:$4 sm:$0xff]  }
 0x5a7   :  { %2552 = vmatpush1.bf16.msra.mxu1 %v19540_v45  ;;  %v19630_v45 = vld [vmem:[#allocation17 + $0x100] ss:$16 sps:$4 sm:$0xff]  }
 0x5a8   :  { %2689 = vmatprep.subr.bf16.mxu1 %v19548_v46  ;;  %v19633_v46 = vld [vmem:[#allocation17 + $0x108] ss:$16 sps:$4 sm:$0xff]  }
 0x5a9   :  { %2315 = vmatpush1.bf16.msra.mxu0 %v19543_v47  ;;  %v19638_v47 = vld [vmem:[#allocation17 + $0x124] ss:$16 sps:$4 sm:$0xff]  }
 0x5aa   :  { %16174 = vmatmul.mubr.msk.bf16.vlgmr.msra.gmra.mrb[44].mxu1 %vm1579_vm6, %v21439_v27  ;;  %2452 = vmatprep.subr.bf16.mxu0 %v19551_v48  ;;  %v19641_v48 = vld [vmem:[#allocation17 + $0x12c] ss:$16 sps:$4 sm:$0xff]  }
 0x5ab   :  { %2690 = vmatpush1.bf16.msra.mxu1 %v19546_v49  ;;  %2721 = vmatprep.mubr.bf16.mxu1 %v21031_v42  ;;  %v19636_v49 = vld [vmem:[#allocation17 + $0x120] ss:$16 sps:$4 sm:$0xff]  }
 0x5ac   :  { %16155 = vmatmul.mubr.msk.bf16.vlgmr.msra.gmra.mrb[56].mxu0 %vm1579_vm6, %v21431_v12  ;;  %2691 = vmatprep.subr.bf16.mxu1 %v19554_v50  ;;  %v19585_v12 = vld [vmem:[#allocation17 + $0x8] ss:$16 sps:$4 sm:$0xff]  }
 0x5ad   :  { %2453 = vmatpush1.bf16.msra.mxu0 %v19549_v51  ;;  %2484 = vmatprep.mubr.bf16.mxu0 %v21031_v42  ;;  %v19639_v50 = vld [vmem:[#allocation17 + $0x128] ss:$16 sps:$4 sm:$0xff]   ;;  %v19644_v51 = vld [vmem:[#allocation17 + $0x144] ss:$16 sps:$4 sm:$0xff]  }
 0x5ae   :  { %2454 = vmatprep.subr.bf16.mxu0 %v19557_v52  ;;  %v19647_v52 = vld [vmem:[#allocation17 + $0x14c] ss:$16 sps:$4 sm:$0xff]  }
 0x5af   :  { %2692 = vmatpush1.bf16.msra.mxu1 %v19552_v53  ;;  %v19642_v53 = vld [vmem:[#allocation17 + $0x140] ss:$16 sps:$4 sm:$0xff]  }
 0x5b0   :  { %2827 = vmatprep.subr.bf16.mxu1 %v19560_v54  ;;  %v19645_v54 = vld [vmem:[#allocation17 + $0x148] ss:$16 sps:$4 sm:$0xff]  }
 0x5b1   :  { %2455 = vmatpush1.bf16.msra.mxu0 %v19555_v55  ;;  %v19650_v55 = vld [vmem:[#allocation17 + $0x164] ss:$16 sps:$4 sm:$0xff]  }
 0x5b2   :  { %16184 = vmatmul.mubr.msk.bf16.vlgmr.msra.gmra.mrb[48].mxu1 %vm1579_vm6, %v2645_v58  ;;  %2590 = vmatprep.subr.bf16.mxu0 %v19563_v56  ;;  %v19653_v56 = vld [vmem:[#allocation17 + $0x16c] ss:$16 sps:$4 sm:$0xff]  }
 0x5b3   :  { %2828 = vmatpush1.bf16.msra.mxu1 %v19558_v57  ;;  %2859 = vmatprep.mubr.bf16.mxu1 %v21031_v42  ;;  %v19648_v57 = vld [vmem:[#allocation17 + $0x160] ss:$16 sps:$4 sm:$0xff]  }
 0x5b4   :  { %16165 = vmatmul.mubr.msk.bf16.vlgmr.msra.gmra.mrb[60].mxu0 %vm1579_vm6, %v2367_v39  ;;  %2829 = vmatprep.subr.bf16.mxu1 %v19566_v59  ;;  %v19629_v39 = vld [vmem:[#allocation17 + $0xec] ss:$16 sps:$4 sm:$0xff]   ;;  %v19656_v59 = vld [vmem:[#allocation17 + $0x184] ss:$16 sps:$4 sm:$0xff]  }
 0x5b5   :  { %2591 = vmatpush1.bf16.msra.mxu0 %v19561_v60  ;;  %2622 = vmatprep.mubr.bf16.mxu0 %v21031_v42  ;;  %v19659_v60 = vld [vmem:[#allocation17 + $0x18c] ss:$16 sps:$4 sm:$0xff]  }
 0x5b6   :  { %2592 = vmatprep.subr.bf16.mxu0 %v19569_v61  ;;  %v19654_v61 = vld [vmem:[#allocation17 + $0x180] ss:$16 sps:$4 sm:$0xff]  }
 0x5b7   :  { %2830 = vmatpush1.bf16.msra.mxu1 %v19564_v62  ;;  %v19657_v62 = vld [vmem:[#allocation17 + $0x188] ss:$16 sps:$4 sm:$0xff]  }
 0x5b8   :  { %3859 = vmatprep.subr.bf16.mxu1 %v19584_v9  ;;  %v19672_v9 = vld [vmem:[#allocation17 + $0x1e0] ss:$16 sps:$4 sm:$0xff]  }
 0x5b9   :  { %2593 = vmatpush1.bf16.msra.mxu0 %v19567_v63  ;;  %v19662_v63 = vld [vmem:[#allocation17 + $0x1a4] ss:$16 sps:$4 sm:$0xff]  }
 0x5ba   :  { %16194 = vmatmul.mubr.msk.bf16.vlgmr.msra.gmra.mrb[52].mxu1 %vm1579_vm6, %v1671_v0  ;;  %2730 = vmatprep.subr.bf16.mxu0 %v19572_v1  ;;  %v19660_v1 = vld [vmem:[#allocation17 + $0x1a0] ss:$16 sps:$4 sm:$0xff]  }
 0x5bb   :  { %3860 = vmatpush1.bf16.msra.mxu1 %v19582_v11  ;;  %v19680_v11 = vld [vmem:[#allocation17 + $0x204] ss:$16 sps:$4 sm:$0xff]  }
 0x5bc   :  { %16175 = vmatmul.mubr.msk.bf16.vlgmr.msra.gmra.mrb[64].mxu0 %vm1579_vm6, %v21439_v27  ;;  %3861 = vmatprep.subr.bf16.mxu1 %v19590_v13  ;;  %v19611_v27 = vld [vmem:[#allocation17 + $0x8c] ss:$16 sps:$4 sm:$0xff]  }
 0x5bd   :  { %2731 = vmatpush1.bf16.msra.mxu0 %v19570_v2  ;;  %2762 = vmatprep.mubr.bf16.mxu0 %v21031_v42  ;;  %v19663_v2 = vld [vmem:[#allocation17 + $0x1a8] ss:$16 sps:$4 sm:$0xff]  }
 0x5be   :  { %2732 = vmatprep.subr.bf16.mxu0 %v19575_v3  ;;  %v19668_v3 = vld [vmem:[#allocation17 + $0x1c4] ss:$16 sps:$4 sm:$0xff]  }
 0x5bf   :  { %3862 = vmatpush1.bf16.msra.mxu1 %v19588_v15 }
 0x5c0   :  { %3863 = vmatprep.subr.bf16.mxu1 %v19596_v17 }
 0x5c1   :  { %2733 = vmatpush1.bf16.msra.mxu0 %v19573_v4  ;;  %v19671_v4 = vld [vmem:[#allocation17 + $0x1cc] ss:$16 sps:$4 sm:$0xff]  }
 0x5c2   :  { %2868 = vmatprep.subr.bf16.mxu0 %v19578_v5  ;;  %v19666_v5 = vld [vmem:[#allocation17 + $0x1c0] ss:$16 sps:$4 sm:$0xff]  }
 0x5c3   :  { %3864 = vmatpush1.bf16.msra.mxu1 %v19594_v19 }
 0x5c4   :  { %16185 = vmatmul.mubr.msk.bf16.vlgmr.msra.gmra.mrb[68].mxu0 %vm1579_vm6, %v2645_v58  ;;  %3865 = vmatprep.subr.bf16.mxu1 %v19602_v21  ;;  %v19651_v58 = vld [vmem:[#allocation17 + $0x168] ss:$16 sps:$4 sm:$0xff]  }
 0x5c5   :  { %2869 = vmatpush1.bf16.msra.mxu0 %v19576_v6  ;;  %2900 = vmatprep.mubr.bf16.mxu0 %v21031_v42  ;;  %v19669_v6 = vld [vmem:[#allocation17 + $0x1c8] ss:$16 sps:$4 sm:$0xff]  }
 0x5c6   :  { %2870 = vmatprep.subr.bf16.mxu0 %v19581_v7  ;;  %v19674_v7 = vld [vmem:[#allocation17 + $0x1e4] ss:$16 sps:$4 sm:$0xff]  }
 0x5c7   :  { %3866 = vmatpush1.bf16.msra.mxu1 %v19600_v23 }
 0x5c8   :  { %3867 = vmatprep.subr.bf16.mxu1 %v19608_v26 }
 0x5c9   :  { %2871 = vmatpush1.bf16.msra.mxu0 %v19579_v8  ;;  %v19677_v8 = vld [vmem:[#allocation17 + $0x1ec] ss:$16 sps:$4 sm:$0xff]  }
 0x5ca   :  { %3941 = vmatprep.subr.bf16.mxu0 %v19587_v10  ;;  %v19675_v10 = vld [vmem:[#allocation17 + $0x1e8] ss:$16 sps:$4 sm:$0xff]  }
 0x5cb   :  { %3868 = vmatpush1.bf16.msra.mxu1 %v19606_v28 }
 0x5cc   :  { %16195 = vmatmul.mubr.msk.bf16.vlgmr.msra.gmra.mrb[72].mxu0 %vm1579_vm6, %v1671_v0  ;;  %3869 = vmatprep.subr.bf16.mxu1 %v19614_v30  ;;  %v19665_v0 = vld [vmem:[#allocation17 + $0x1ac] ss:$16 sps:$4 sm:$0xff]  }
 0x5cd   :  { %3942 = vmatpush1.bf16.msra.mxu0 %v19585_v12  ;;  %v19683_v12 = vld [vmem:[#allocation17 + $0x20c] ss:$16 sps:$4 sm:$0xff]  }
 0x5ce   :  { %3943 = vmatprep.subr.bf16.mxu0 %v19593_v14 }
 0x5cf   :  { %3870 = vmatpush1.bf16.msra.mxu1 %v19612_v32 }
 0x5d0   :  { %3871 = vmatprep.subr.bf16.mxu1 %v19620_v34 }
 0x5d1   :  { %3944 = vmatpush1.bf16.msra.mxu0 %v19591_v16 }
 0x5d2   :  { %3945 = vmatprep.subr.bf16.mxu0 %v19599_v18 }
 0x5d3   :  { %3872 = vmatpush1.bf16.msra.mxu1 %v19618_v36 }
 0x5d4   :  { %3873 = vmatprep.subr.bf16.mxu1 %v19626_v38 }
 0x5d5   :  { %3946 = vmatpush1.bf16.msra.mxu0 %v19597_v20 }
 0x5d6   :  { %3947 = vmatprep.subr.bf16.mxu0 %v19605_v22 }
 0x5d7   :  { %3874 = vmatpush1.bf16.msra.mxu1 %v19624_v40 }
 0x5d8   :  { %3875 = vmatprep.subr.bf16.mxu1 %v19632_v43 }
 0x5d9   :  { %3948 = vmatpush1.bf16.msra.mxu0 %v19603_v24 }
 0x5da   :  { %3949 = vmatprep.subr.bf16.mxu0 %v19611_v27 }
 0x5db   :  { %3876 = vmatpush1.bf16.msra.mxu1 %v19630_v45 }
 0x5dc   :  { %3877 = vmatprep.subr.bf16.mxu1 %v19638_v47 }
 0x5dd   :  { %3950 = vmatpush1.bf16.msra.mxu0 %v19609_v29 }
 0x5de   :  { %3951 = vmatprep.subr.bf16.mxu0 %v19617_v31 }
 0x5df   :  { %3878 = vmatpush1.bf16.msra.mxu1 %v19636_v49 }
 0x5e0   :  { %3879 = vmatprep.subr.bf16.mxu1 %v19644_v51 }
 0x5e1   :  { %3952 = vmatpush1.bf16.msra.mxu0 %v19615_v33 }
 0x5e2   :  { %3953 = vmatprep.subr.bf16.mxu0 %v19623_v35 }
 0x5e3   :  { %3880 = vmatpush1.bf16.msra.mxu1 %v19642_v53 }
 0x5e4   :  { %3881 = vmatprep.subr.bf16.mxu1 %v19650_v55 }
 0x5e5   :  { %3954 = vmatpush1.bf16.msra.mxu0 %v19621_v37 }
 0x5e6   :  { %3955 = vmatprep.subr.bf16.mxu0 %v19629_v39 }
 0x5e7   :  { %3882 = vmatpush1.bf16.msra.mxu1 %v19648_v57 }
 0x5e8   :  { %3883 = vmatprep.subr.bf16.mxu1 %v19656_v59 }
 0x5e9   :  { %3956 = vmatpush1.bf16.msra.mxu0 %v19627_v41 }
 0x5ea   :  { %3957 = vmatprep.subr.bf16.mxu0 %v19635_v44 }
 0x5eb   :  { %3884 = vmatpush1.bf16.msra.mxu1 %v19654_v61 }
 0x5ec   :  { %3885 = vmatprep.subr.bf16.mxu1 %v19662_v63 }
 0x5ed   :  { %3958 = vmatpush1.bf16.msra.mxu0 %v19633_v46 }
 0x5ee   :  { %3959 = vmatprep.subr.bf16.mxu0 %v19641_v48 }
 0x5ef   :  { %3886 = vmatpush1.bf16.msra.mxu1 %v19660_v1 }
 0x5f0   :  { %3887 = vmatprep.subr.bf16.mxu1 %v19668_v3 }
 0x5f1   :  { %3960 = vmatpush1.bf16.msra.mxu0 %v19639_v50 }
 0x5f2   :  { %3961 = vmatprep.subr.bf16.mxu0 %v19647_v52 }
 0x5f3   :  { %3888 = vmatpush1.bf16.msra.mxu1 %v19666_v5 }
 0x5f4   :  { %3889 = vmatprep.subr.bf16.mxu1 %v19674_v7 }
 0x5f5   :  { %3962 = vmatpush1.bf16.msra.mxu0 %v19645_v54 }
 0x5f6   :  { %3963 = vmatprep.subr.bf16.mxu0 %v19653_v56 }
 0x5f7   :  { %3890 = vmatpush1.bf16.msra.mxu1 %v19672_v9 }
 0x5f8   :  { %3900 = vmatprep.subr.bf16.mxu1 %v19680_v11 }
 0x5f9   :  { %3964 = vmatpush1.bf16.msra.mxu0 %v19651_v58 }
 0x5fa   :  { %3965 = vmatprep.subr.bf16.mxu0 %v19659_v60 }
 0x5fd   :  { %3966 = vmatpush1.bf16.msra.mxu0 %v19657_v62 }
 0x5fe   :  { %3967 = vmatprep.subr.bf16.mxu0 %v19665_v0 }
 0x601   :  { %3968 = vmatpush1.bf16.msra.mxu0 %v19663_v2 }
 0x602   :  { %3969 = vmatprep.subr.bf16.mxu0 %v19671_v4 }
 0x605   :  { %3970 = vmatpush1.bf16.msra.mxu0 %v19669_v6 }
 0x606   :  { %3971 = vmatprep.subr.bf16.mxu0 %v19677_v8 }
 0x609   :  { %3972 = vmatpush1.bf16.msra.mxu0 %v19675_v10 }
 0x60a   :  { %3982 = vmatprep.subr.bf16.mxu0 %v19683_v12 }
 0x655   :  { %v1893_v13 = vpop.f32.mrb[24].mxu1 }
 0x656   :  { %v1895_v14 = vpop.f32.mrb[25].mxu1 }
 0x657   :  { %v1768_v15 = vpop.f32.mrb[36].mxu0  ;;  %v1897_v16 = vpop.f32.mrb[26].mxu1 }
 0x658   :  { %v1894_v17 = vadd.f32 %v1893_v13, %v1768_v15  ;;  %v1770_v18 = vpop.f32.mrb[37].mxu0  ;;  %v1898_v19 = vpop.f32.mrb[27].mxu1  ;;  %v2915_v16 = vlaneseq }
 0x659   :  { %v1896_v20 = vadd.f32 %v1895_v14, %v1770_v18  ;;  %v1772_v21 = vpop.f32.mrb[38].mxu0 }
 0x65a   :  { %v1773_v22 = vpop.f32.mrb[39].mxu0 }
 0x65d   :  { %v2027_v23 = vpop.f32.mrb[28].mxu1 }
 0x65e   :  { %v2075_v24 = vadd.f32 %v2027_v23, %v1894_v17  ;;  %v2029_v26 = vpop.f32.mrb[29].mxu1 }
 0x65f   :  { %v2076_v27 = vadd.f32 %v2029_v26, %v1896_v20  ;;  %v1809_v28 = vpop.f32.mrb[40].mxu0  ;;  %v2031_v29 = vpop.f32.mrb[30].mxu1  ;;  %v21477_v20 = vshrl.u32 %v2915_v16, 7 }
 0x660   :  { %v1811_v30 = vpop.f32.mrb[41].mxu0  ;;  %v2032_v31 = vpop.f32.mrb[31].mxu1 }
 0x661   :  { %v1813_v32 = vpop.f32.mrb[42].mxu0  ;;  %v21480_v31 = vsub.s32 0, %v21477_v20 }
 0x662   :  { %v1814_v33 = vpop.f32.mrb[43].mxu0 }
 0x665   :  { %v2167_v34 = vpop.f32.mrb[32].mxu1 }
 0x666   :  { %v2215_v35 = vadd.f32 %v2167_v34, %v2075_v24  ;;  %v2169_v36 = vpop.f32.mrb[33].mxu1  ;;  %v21482_v34 = vld [vmem:[#allocation13] sm:$0xf] }
 0x667   :  { %v2216_v37 = vadd.f32 %v2169_v36, %v2076_v27  ;;  %v1934_v38 = vpop.f32.mrb[44].mxu0  ;;  %v2171_v39 = vpop.f32.mrb[34].mxu1 }
 0x668   :  { %v1935_v40 = vadd.f32 %v1934_v38, %v1809_v28  ;;  %v1936_v41 = vpop.f32.mrb[45].mxu0  ;;  %v2172_v43 = vpop.f32.mrb[35].mxu1 }
 0x669   :  { %v1937_v44 = vadd.f32 %v1936_v41, %v1811_v30  ;;  %v1938_v45 = vpop.f32.mrb[46].mxu0 }
 0x66a   :  { %v1939_v46 = vpop.f32.mrb[47].mxu0 }
 0x66d   :  { %v2305_v47 = vpop.f32.mrb[36].mxu1 }
 0x66e   :  { %v2353_v48 = vadd.f32 %v2305_v47, %v2215_v35  ;;  %v2307_v49 = vpop.f32.mrb[37].mxu1  ;;  %v21485_v35 = vsub.s32 1, %v21477_v20 }
 0x66f   :  { %v2354_v50 = vadd.f32 %v2307_v49, %v2216_v37  ;;  %v2068_v51 = vpop.f32.mrb[48].mxu0  ;;  %v2309_v52 = vpop.f32.mrb[38].mxu1  ;;  %v2918_v37 = vrot.slane %v21482_v34, %v21480_v31 }
 0x670   :  { %v2077_v53 = vadd.f32 %v2068_v51, %v1935_v40  ;;  %v2070_v54 = vpop.f32.mrb[49].mxu0  ;;  %v2310_v55 = vpop.f32.mrb[39].mxu1  ;;  %v2922_v39 = vrot.slane %v21482_v34, %v21485_v35 }
 0x671   :  { %v2078_v56 = vadd.f32 %v2070_v54, %v1937_v44  ;;  %v2072_v57 = vpop.f32.mrb[50].mxu0 }
 0x672   :  { %v2073_v58 = vpop.f32.mrb[51].mxu0 }
 0x675   :  { %v2445_v59 = vpop.f32.mrb[40].mxu1 }
 0x676   :  { %v2493_v60 = vadd.f32 %v2445_v59, %v2353_v48  ;;  %v2447_v61 = vpop.f32.mrb[41].mxu1 }
 0x677   :  { %v2494_v62 = vadd.f32 %v2447_v61, %v2354_v50  ;;  %v2208_v63 = vpop.f32.mrb[52].mxu0  ;;  %v2449_v0 = vpop.f32.mrb[42].mxu1 }
 0x678   :  { %v2217_v1 = vadd.f32 %v2208_v63, %v2077_v53  ;;  %v2210_v2 = vpop.f32.mrb[53].mxu0  ;;  %v2450_v3 = vpop.f32.mrb[43].mxu1 }
 0x679   :  { %v2218_v4 = vadd.f32 %v2210_v2, %v2078_v56  ;;  %v2212_v5 = vpop.f32.mrb[54].mxu0 }
 0x67a   :  { %v2213_v6 = vpop.f32.mrb[55].mxu0 }
 0x67d   :  { %v2583_v7 = vpop.f32.mrb[44].mxu1 }
 0x67e   :  { %v2631_v8 = vadd.f32 %v2583_v7, %v2493_v60  ;;  %v2585_v9 = vpop.f32.mrb[45].mxu1 }
 0x67f   :  { %v2632_v10 = vadd.f32 %v2585_v9, %v2494_v62  ;;  %v2346_v11 = vpop.f32.mrb[56].mxu0  ;;  %v2587_v12 = vpop.f32.mrb[46].mxu1 }
 0x680   :  { %v2355_v13 = vadd.f32 %v2346_v11, %v2217_v1  ;;  %v2348_v14 = vpop.f32.mrb[57].mxu0  ;;  %v2588_v15 = vpop.f32.mrb[47].mxu1 }
 0x681   :  { %v2356_v17 = vadd.f32 %v2348_v14, %v2218_v4  ;;  %v2350_v18 = vpop.f32.mrb[58].mxu0  ;;  %v21504_v14 = vsub.s32 2, %v21477_v20 }
 0x682   :  { %v2351_v19 = vpop.f32.mrb[59].mxu0  ;;  %v21507_v18 = vsub.s32 3, %v21477_v20 }
 0x685   :  { %v2723_v21 = vpop.f32.mrb[48].mxu1 }
 0x686   :  { %v2771_v22 = vadd.f32 %v2723_v21, %v2631_v8  ;;  %v2725_v23 = vpop.f32.mrb[49].mxu1 }
 0x687   :  { %v2772_v24 = vadd.f32 %v2725_v23, %v2632_v10  ;;  %v2486_v26 = vpop.f32.mrb[60].mxu0  ;;  %v2727_v27 = vpop.f32.mrb[50].mxu1 }
 0x688   :  { %v2495_v28 = vadd.f32 %v2486_v26, %v2355_v13  ;;  %v2488_v29 = vpop.f32.mrb[61].mxu0  ;;  %v2728_v30 = vpop.f32.mrb[51].mxu1  ;;  %v2926_v27 = vrot.slane %v21482_v34, %v21504_v14 }
 0x689   :  { %v2496_v32 = vadd.f32 %v2488_v29, %v2356_v17  ;;  %v2490_v33 = vpop.f32.mrb[62].mxu0 }
 0x68a   :  { %v2491_v36 = vpop.f32.mrb[63].mxu0 }
 0x68d   :  { %v2861_v38 = vpop.f32.mrb[52].mxu1 }
 0x68e   :  { %v2909_v40 = vadd.f32 %v2861_v38, %v2771_v22  ;;  %v2863_v41 = vpop.f32.mrb[53].mxu1 }
 0x68f   :  { %v2910_v43 = vadd.f32 %v2863_v41, %v2772_v24  ;;  %v2624_v44 = vpop.f32.mrb[64].mxu0  ;;  %v2865_v45 = vpop.f32.mrb[54].mxu1 }
 0x690   :  { %v21491_v46 = vadd.f32 %v2918_v37, %v2909_v40  ;;  %v2633_v47 = vadd.f32 %v2624_v44, %v2495_v28  ;;  %v2626_v48 = vpop.f32.mrb[65].mxu0  ;;  %v2866_v49 = vpop.f32.mrb[55].mxu1 }
 0x691   :  { %v21493_v50 = vadd.f32 %v2922_v39, %v2910_v43  ;;  %v2634_v51 = vadd.f32 %v2626_v48, %v2496_v32  ;;  %v2628_v52 = vpop.f32.mrb[66].mxu0  ;;  %v2930_v32 = vrot.slane %v21482_v34, %v21507_v18 }
 0x692   :  { %v2939_v53 = vrot.slane %v21491_v46, 4  ;;  %v2967_v54 = vmul.f32 %v21491_v46, %v21491_v46  ;;  %v2629_v55 = vpop.f32.mrb[67].mxu0 }
 0x693   :  { %v2945_v56 = vrot.slane %v21493_v50, 4  ;;  %v2968_v57 = vmul.f32 %v21493_v50, %v21493_v50 }
 0x694   :  { %v2940_v58 = vadd.f32 %v2939_v53, %v21491_v46  ;;  %v2971_v59 = vrot.slane %v2967_v54, 4 }
 0x695   :  { %v2946_v60 = vadd.f32 %v2945_v56, %v21493_v50  ;;  %v2977_v61 = vrot.slane %v2968_v57, 4 }
 0x696   :  { %v2941_v62 = vrot.slane %v2940_v58, 2  ;;  %v2972_v63 = vadd.f32 %v2971_v59, %v2967_v54 }
 0x697   :  { %v2947_v0 = vrot.slane %v2946_v60, 2  ;;  %v2978_v1 = vadd.f32 %v2977_v61, %v2968_v57  ;;  %v2764_v2 = vpop.f32.mrb[68].mxu0 }
 0x698   :  { %v2942_v3 = vadd.f32 %v2941_v62, %v2940_v58  ;;  %v2973_v4 = vrot.slane %v2972_v63, 2  ;;  %v2773_v5 = vadd.f32 %v2764_v2, %v2633_v47  ;;  %v2766_v6 = vpop.f32.mrb[69].mxu0 }
 0x699   :  { %v2948_v7 = vadd.f32 %v2947_v0, %v2946_v60  ;;  %v2979_v8 = vrot.slane %v2978_v1, 2  ;;  %v2774_v9 = vadd.f32 %v2766_v6, %v2634_v51  ;;  %v2768_v10 = vpop.f32.mrb[70].mxu0  ;;  %v21525_v6 = vld [vmem:[#allocation14] sm:$0xf] }
 0x69a   :  { %v2943_v11 = vrot.slane %v2942_v3, 1  ;;  %v2974_v12 = vadd.f32 %v2973_v4, %v2972_v63  ;;  %v2769_v13 = vpop.f32.mrb[71].mxu0 }
 0x69b   :  { %v2949_v15 = vrot.slane %v2948_v7, 1  ;;  %v2980_v17 = vadd.f32 %v2979_v8, %v2978_v1 }
 0x69c   :  { %v2944_v19 = vadd.f32 %v2943_v11, %v2942_v3  ;;  %v2975_v21 = vrot.slane %v2974_v12, 1  ;;  %v21527_v11 = vld [vmem:[#allocation16] sm:$0xf] }
 0x69d   :  { %v2950_v22 = vadd.f32 %v2949_v15, %v2948_v7  ;;  %v2981_v23 = vrot.slane %v2980_v17, 1 }
 0x69e   :  { %v2963_v24 = vmul.f32 0.125, %v2944_v19  ;;  %v2976_v26 = vadd.f32 %v2975_v21, %v2974_v12 }
 0x69f   :  { %v2964_v28 = vmul.f32 0.125, %v2950_v22  ;;  %v2982_v29 = vadd.f32 %v2981_v23, %v2980_v17  ;;  %v2902_v30 = vpop.f32.mrb[72].mxu0  ;;  %v3028_v17 = vrot.slane %v21525_v6, %v21480_v31 }
 0x6a0   :  { %v2995_v33 = vmul.f32 0.125, %v2976_v26  ;;  %v2999_v36 = vmul.f32 %v2963_v24, %v2963_v24  ;;  %v2911_v37 = vadd.f32 %v2902_v30, %v2773_v5  ;;  %v2904_v38 = vpop.f32.mrb[73].mxu0  ;;  %v3007_v12 = vsub.f32 %v21491_v46, %v2963_v24 }
 0x6a1   :  { %v2996_v39 = vmul.f32 0.125, %v2982_v29  ;;  %v3000_v40 = vmul.f32 %v2964_v28, %v2964_v28  ;;  %v2912_v41 = vadd.f32 %v2904_v38, %v2774_v9  ;;  %v2906_v43 = vpop.f32.mrb[74].mxu0  ;;  %v3008_v21 = vsub.f32 %v21493_v50, %v2964_v28 }
 0x6a2   :  { %v3003_v44 = vsub.f32 %v2995_v33, %v2999_v36  ;;  %v21513_v45 = vadd.f32 %v2926_v27, %v2911_v37  ;;  %v2907_v47 = vpop.f32.mrb[75].mxu0  ;;  %v3032_v26 = vrot.slane %v21525_v6, %v21485_v35  ;;  %v3054_v46 = vrot.slane %v21527_v11, %v21480_v31 }
 0x6a3   :  { %v3004_v48 = vsub.f32 %v2996_v39, %v3000_v40  ;;  %v21515_v49 = vadd.f32 %v2930_v32, %v2912_v41  ;;  %v3058_v37 = vrot.slane %v21527_v11, %v21485_v35 }
 0x6a4   :  { %v3011_v51 = vadd.f32 1e-05, %v3003_v44  ;;  %v2951_v52 = vrot.slane %v21513_v45, 4  ;;  %v2969_v34 = vmul.f32 %v21513_v45, %v21513_v45 }
 0x6a5   :  { %v3012_v53 = vadd.f32 1e-05, %v3004_v48  ;;  %v2957_v54 = vrot.slane %v21515_v49, 4  ;;  %v2970_v55 = vmul.f32 %v21515_v49, %v21515_v49 }
 0x6a6   :  { %20262 = vrsqrt.f32 %v3011_v51  ;;  %v2952_v56 = vadd.f32 %v2951_v52, %v21513_v45  ;;  %v2983_v57 = vrot.slane %v2969_v34, 4 }
 0x6a7   :  { %20264 = vrsqrt.f32 %v3012_v53  ;;  %v2958_v58 = vadd.f32 %v2957_v54, %v21515_v49  ;;  %v2989_v59 = vrot.slane %v2970_v55, 4 }
 0x6a8   :  { %v2953_v60 = vrot.slane %v2952_v56, 2  ;;  %v2984_v61 = vadd.f32 %v2983_v57, %v2969_v34 }
 0x6a9   :  { %v2959_v62 = vrot.slane %v2958_v58, 2  ;;  %v2990_v63 = vadd.f32 %v2989_v59, %v2970_v55  ;;  %v19678_v55 = vld [vmem:[#allocation17 + $0x200] ss:$16 sps:$4 sm:$0xff]   ;;  %v19689_v59 = vld [vmem:[#allocation17 + $0x22c] ss:$16 sps:$4 sm:$0xff]  }
 0x6aa   :  { %v2954_v0 = vadd.f32 %v2953_v60, %v2952_v56  ;;  %v2985_v1 = vrot.slane %v2984_v61, 2  ;;  %v19681_v56 = vld [vmem:[#allocation17 + $0x208] ss:$16 sps:$4 sm:$0xff]   ;;  %v19684_v60 = vld [vmem:[#allocation17 + $0x220] ss:$16 sps:$4 sm:$0xff]  }
 0x6ab   :  { %v2960_v2 = vadd.f32 %v2959_v62, %v2958_v58  ;;  %v2991_v3 = vrot.slane %v2990_v63, 2  ;;  %v19686_v58 = vld [vmem:[#allocation17 + $0x224] ss:$16 sps:$4 sm:$0xff]  }
 0x6ac   :  { %v2955_v4 = vrot.slane %v2954_v0, 1  ;;  %v2986_v5 = vadd.f32 %v2985_v1, %v2984_v61  ;;  %v19687_v61 = vld [vmem:[#allocation17 + $0x228] ss:$16 sps:$4 sm:$0xff]   ;;  %v19692_v62 = vld [vmem:[#allocation17 + $0x244] ss:$16 sps:$4 sm:$0xff]   ;;  %v3036_v1 = vrot.slane %v21525_v6, %v21504_v14 }
 0x6ad   :  { %v2961_v7 = vrot.slane %v2960_v2, 1  ;;  %v2992_v8 = vadd.f32 %v2991_v3, %v2990_v63  ;;  %v19695_v63 = vld [vmem:[#allocation17 + $0x24c] ss:$16 sps:$4 sm:$0xff]  }
 0x6ae   :  { %v2956_v9 = vadd.f32 %v2955_v4, %v2954_v0  ;;  %v2987_v10 = vrot.slane %v2986_v5, 1  ;;  %v3040_v4 = vrot.slane %v21525_v6, %v21507_v18  ;;  %v19696_v6 = vld [vmem:[#allocation17 + $0x260] ss:$16 sps:$4 sm:$0xff]  }
 0x6af   :  { %v2962_v13 = vadd.f32 %v2961_v7, %v2960_v2  ;;  %v2993_v15 = vrot.slane %v2992_v8, 1 }
 0x6b0   :  { %v20263_v19 = vpop.eup %20262  ;;  %v2965_v22 = vmul.f32 0.125, %v2956_v9  ;;  %v2988_v23 = vadd.f32 %v2987_v10, %v2986_v5  ;;  %v19693_v9 = vld [vmem:[#allocation17 + $0x248] ss:$16 sps:$4 sm:$0xff]   ;;  %v3062_v10 = vrot.slane %v21527_v11, %v21504_v14 }
 0x6b1   :  { %v20265_v27 = vpop.eup %20264  ;;  %v3019_v29 = vmul.f32 %v20263_v19, %v3007_v12  ;;  %v2966_v30 = vmul.f32 0.125, %v2962_v13  ;;  %v2994_v32 = vadd.f32 %v2993_v15, %v2992_v8  ;;  %v19690_v8 = vld [vmem:[#allocation17 + $0x240] ss:$16 sps:$4 sm:$0xff]   ;;  %v19701_v13 = vld [vmem:[#allocation17 + $0x26c] ss:$16 sps:$4 sm:$0xff]  }
 0x6b2   :  { %v2997_v24 = vmul.f32 0.125, %v2988_v23  ;;  %v3001_v33 = vmul.f32 %v2965_v22, %v2965_v22  ;;  %v3020_v36 = vmul.f32 %v20265_v27, %v3008_v21  ;;  %v3009_v0 = vsub.f32 %v21513_v45, %v2965_v22  ;;  %v19698_v45 = vld [vmem:[#allocation17 + $0x264] ss:$16 sps:$4 sm:$0xff]   ;;  %v19699_v19 = vld [vmem:[#allocation17 + $0x268] ss:$16 sps:$4 sm:$0xff]  }
 0x6b3   :  { %v2998_v38 = vmul.f32 0.125, %v2994_v32  ;;  %v3002_v50 = vmul.f32 %v2966_v30, %v2966_v30  ;;  %v3045_v28 = vmul.f32 %v3028_v17, %v3019_v29  ;;  %v3010_v3 = vsub.f32 %v21515_v49, %v2966_v30  ;;  %v19704_v22 = vld [vmem:[#allocation17 + $0x284] ss:$16 sps:$4 sm:$0xff]   ;;  %v19707_v23 = vld [vmem:[#allocation17 + $0x28c] ss:$16 sps:$4 sm:$0xff]  }
 0x6b4   :  { %v3005_v39 = vsub.f32 %v2997_v24, %v3001_v33  ;;  %v3046_v40 = vmul.f32 %v3032_v26, %v3020_v36  ;;  %v3066_v49 = vrot.slane %v21527_v11, %v21507_v18  ;;  %v19702_v29 = vld [vmem:[#allocation17 + $0x280] ss:$16 sps:$4 sm:$0xff]   ;;  %v19705_v30 = vld [vmem:[#allocation17 + $0x288] ss:$16 sps:$4 sm:$0xff]   ;;  %v19713_v24 = vld [vmem:[#allocation17 + $0x2ac] ss:$16 sps:$4 sm:$0xff]  }
 0x6b5   :  { %v3006_v41 = vsub.f32 %v2998_v38, %v3002_v50  ;;  %v3071_v43 = vadd.f32 %v3054_v46, %v3045_v28  ;;  %v19710_v46 = vld [vmem:[#allocation17 + $0x2a4] ss:$16 sps:$4 sm:$0xff]   ;;  %v19708_v33 = vld [vmem:[#allocation17 + $0x2a0] ss:$16 sps:$4 sm:$0xff]   ;;  %v19711_v36 = vld [vmem:[#allocation17 + $0x2a8] ss:$16 sps:$4 sm:$0xff]  }
 0x6b6   :  { %v3013_v44 = vadd.f32 1e-05, %v3005_v39  ;;  %v3072_v47 = vadd.f32 %v3058_v37, %v3046_v40  ;;  %v19716_v37 = vld [vmem:[#allocation17 + $0x2c4] ss:$16 sps:$4 sm:$0xff]   ;;  %v19719_v38 = vld [vmem:[#allocation17 + $0x2cc] ss:$16 sps:$4 sm:$0xff]  }
 0x6b7   :  { %v3014_v48 = vadd.f32 1e-05, %v3006_v41  ;;  %vm3075_vm7 = vcmp.ge.f32.partialorder %v3071_v43, 0.0  ;;  %v3079_v51 = vmul.f32 0.01, %v3071_v43 }
 0x6b8   :  { %20266 = vrsqrt.f32 %v3013_v44  ;;  %vm3076_vm8 = vcmp.ge.f32.partialorder %v3072_v47, 0.0  ;;  %v3080_v52 = vmul.f32 0.01, %v3072_v47  ;;  %v19714_v50 = vld [vmem:[#allocation17 + $0x2c0] ss:$16 sps:$4 sm:$0xff]  }
 0x6b9   :  { %20268 = vrsqrt.f32 %v3014_v48  ;;  %v3083_v34 = vsel %vm3075_vm7, %v3071_v43, %v3079_v51  ;;  %v19717_v28 = vld [vmem:[#allocation17 + $0x2c8] ss:$16 sps:$4 sm:$0xff]   ;;  %v19722_v39 = vld [vmem:[#allocation17 + $0x2e4] ss:$16 sps:$4 sm:$0xff]   ;;  %v19725_v40 = vld [vmem:[#allocation17 + $0x2ec] ss:$16 sps:$4 sm:$0xff]  }
 0x6ba   :  { %v3084_v53 = vsel %vm3076_vm8, %v3072_v47, %v3080_v52  ;;  %v3087_v57 = vpack.c.bf16 %v3083_v34, %v3083_v34  ;;  %v19720_v41 = vld [vmem:[#allocation17 + $0x2e0] ss:$16 sps:$4 sm:$0xff]   ;;  %v19723_v43 = vld [vmem:[#allocation17 + $0x2e8] ss:$16 sps:$4 sm:$0xff]   ;;  %v19728_v44 = vld [vmem:[#allocation17 + $0x304] ss:$16 sps:$4 sm:$0xff]  }
 0x6bb   :  { %v3088_v54 = vpack.c.bf16 %v3084_v53, %v3084_v53  ;;  %v19731_v47 = vld [vmem:[#allocation17 + $0x30c] ss:$16 sps:$4 sm:$0xff]   ;;  %v19726_v48 = vld [vmem:[#allocation17 + $0x300] ss:$16 sps:$4 sm:$0xff]   ;;  %v19729_v51 = vld [vmem:[#allocation17 + $0x308] ss:$16 sps:$4 sm:$0xff]  }
 0x6bc   :  { %v19734_v52 = vld [vmem:[#allocation17 + $0x324] ss:$16 sps:$4 sm:$0xff]   ;;  %v19737_v34 = vld [vmem:[#allocation17 + $0x32c] ss:$16 sps:$4 sm:$0xff]   ;;  %v19732_v53 = vld [vmem:[#allocation17 + $0x320] ss:$16 sps:$4 sm:$0xff]  }
 0x6bd   :  { %3891 = vmatprep.mubr.bf16.mxu1 %v3088_v54  ;;  %3973 = vmatprep.mubr.bf16.mxu0 %v3088_v54  ;;  %v19735_v54 = vld [vmem:[#allocation17 + $0x328] ss:$16 sps:$4 sm:$0xff]  }
 0x6be   :  { %3892 = vmatmul.mubr.bf16.vlgmr.msra.gmra.mrb[56].mxu1 %v3087_v57  ;;  %3974 = vmatmul.mubr.bf16.vlgmr.msra.gmra.mrb[76].mxu0 %v3087_v57  ;;  %v19738_v57 = vld [vmem:[#allocation17 + $0x340] ss:$16 sps:$4 sm:$0xff]  }
 0x6bf   :  { %3901 = vmatpush1.bf16.msra.mxu1 %v19678_v55  ;;  %3983 = vmatpush1.bf16.msra.mxu0 %v19681_v56  ;;  %v19740_v55 = vld [vmem:[#allocation17 + $0x344] ss:$16 sps:$4 sm:$0xff]   ;;  %v19743_v56 = vld [vmem:[#allocation17 + $0x34c] ss:$16 sps:$4 sm:$0xff]  }
 0x6c0   :  { %3902 = vmatprep.subr.bf16.mxu1 %v19686_v58  ;;  %3984 = vmatprep.subr.bf16.mxu0 %v19689_v59  ;;  %v19741_v58 = vld [vmem:[#allocation17 + $0x348] ss:$16 sps:$4 sm:$0xff]   ;;  %v19746_v59 = vld [vmem:[#allocation17 + $0x364] ss:$16 sps:$4 sm:$0xff]  }
 0x6c2   :  { %v20267_v2 = vpop.eup %20266 }
 0x6c3   :  { %v20269_v5 = vpop.eup %20268  ;;  %v3021_v7 = vmul.f32 %v20267_v2, %v3009_v0  ;;  %3903 = vmatpush1.bf16.msra.mxu1 %v19684_v60  ;;  %3985 = vmatpush1.bf16.msra.mxu0 %v19687_v61  ;;  %v19749_v60 = vld [vmem:[#allocation17 + $0x36c] ss:$16 sps:$4 sm:$0xff]   ;;  %v19744_v61 = vld [vmem:[#allocation17 + $0x360] ss:$16 sps:$4 sm:$0xff]   ;;  %v19753_v2 = vld [vmem:[#allocation17 + $0x388] ss:$16 sps:$4 sm:$0xff]  }
 0x6c4   :  { %v3022_v12 = vmul.f32 %v20269_v5, %v3010_v3  ;;  %3904 = vmatprep.subr.bf16.mxu1 %v19692_v62  ;;  %3986 = vmatprep.subr.bf16.mxu0 %v19695_v63  ;;  %v19747_v62 = vld [vmem:[#allocation17 + $0x368] ss:$16 sps:$4 sm:$0xff]   ;;  %v19752_v63 = vld [vmem:[#allocation17 + $0x384] ss:$16 sps:$4 sm:$0xff]   ;;  %v19755_v0 = vld [vmem:[#allocation17 + $0x38c] ss:$16 sps:$4 sm:$0xff]  }
 0x6c5   :  { %v3047_v15 = vmul.f32 %v3036_v1, %v3021_v7  ;;  %v19750_v1 = vld [vmem:[#allocation17 + $0x380] ss:$16 sps:$4 sm:$0xff]   ;;  %v19758_v3 = vld [vmem:[#allocation17 + $0x3a4] ss:$16 sps:$4 sm:$0xff]   ;;  %v19759_v7 = vld [vmem:[#allocation17 + $0x3a8] ss:$16 sps:$4 sm:$0xff]  }
 0x6c6   :  { %v3048_v17 = vmul.f32 %v3040_v4, %v3022_v12  ;;  %v19761_v4 = vld [vmem:[#allocation17 + $0x3ac] ss:$16 sps:$4 sm:$0xff]   ;;  %v19756_v5 = vld [vmem:[#allocation17 + $0x3a0] ss:$16 sps:$4 sm:$0xff]   ;;  %v19765_v12 = vld [vmem:[#allocation17 + $0x3c8] ss:$16 sps:$4 sm:$0xff]  }
 0x6c7   :  { %3905 = vmatpush1.bf16.msra.mxu1 %v19690_v8  ;;  %3987 = vmatpush1.bf16.msra.mxu0 %v19693_v9  ;;  %v21549_v21 = vadd.f32 %v3062_v10, %v3047_v15  ;;  %v19764_v8 = vld [vmem:[#allocation17 + $0x3c4] ss:$16 sps:$4 sm:$0xff]   ;;  %v19767_v9 = vld [vmem:[#allocation17 + $0x3cc] ss:$16 sps:$4 sm:$0xff]   ;;  %v19762_v10 = vld [vmem:[#allocation17 + $0x3c0] ss:$16 sps:$4 sm:$0xff]  }
 0x6c8   :  { %3906 = vmatprep.subr.bf16.mxu1 %v19698_v45  ;;  %3988 = vmatprep.subr.bf16.mxu0 %v19701_v13  ;;  %v3074_v26 = vadd.f32 %v3066_v49, %v3048_v17  ;;  %v19770_v45 = vld [vmem:[#allocation17 + $0x3e4] ss:$16 sps:$4 sm:$0xff]   ;;  %v19773_v13 = vld [vmem:[#allocation17 + $0x3ec] ss:$16 sps:$4 sm:$0xff]   ;;  %v19768_v15 = vld [vmem:[#allocation17 + $0x3e0] ss:$16 sps:$4 sm:$0xff]  }
 0x6c9   :  { %v3081_v49 = vmul.f32 0.01, %v21549_v21  ;;  %vm3077_vm10 = vcmp.ge.f32.partialorder %v21549_v21, 0.0  ;;  %v19771_v17 = vld [vmem:[#allocation17 + $0x3e8] ss:$16 sps:$4 sm:$0xff]  }
 0x6ca   :  { %vm3078_vm9 = vcmp.ge.f32.partialorder %v3074_v26, 0.0  ;;  %v3082_v27 = vmul.f32 0.01, %v3074_v26 }
 0x6cb   :  { %3907 = vmatpush1.bf16.msra.mxu1 %v19696_v6  ;;  %3989 = vmatpush1.bf16.msra.mxu0 %v19699_v19  ;;  %v3085_v6 = vsel %vm3077_vm10, %v21549_v21, %v3081_v49  ;;  %v4025_v21 = vld [vmem:[#allocation20 + $0x8] sm:$0xff] }
 0x6cc   :  { %3908 = vmatprep.subr.bf16.mxu1 %v19704_v22  ;;  %3990 = vmatprep.subr.bf16.mxu0 %v19707_v23  ;;  %v3086_v11 = vsel %vm3078_vm9, %v3074_v26, %v3082_v27  ;;  %v3089_v19 = vpack.c.bf16 %v3085_v6, %v3085_v6  ;;  %v4352_v22 = vand.u32 127, %v2915_v16  ;;  %v4023_v27 = vld [vmem:[#allocation20] sm:$0xff] }
 0x6cd   :  { %v3090_v32 = vpack.c.bf16 %v3086_v11, %v3086_v11 }
 0x6cf   :  { %3909 = vmatpush1.bf16.msra.mxu1 %v19702_v29  ;;  %3991 = vmatpush1.bf16.msra.mxu0 %v19705_v30 }
 0x6d0   :  { %3932 = vmatprep.mubr.bf16.mxu1 %v3090_v32  ;;  %4014 = vmatprep.mubr.bf16.mxu0 %v3090_v32 }
 0x6d1   :  { %3910 = vmatprep.subr.bf16.mxu1 %v19710_v46  ;;  %3992 = vmatprep.subr.bf16.mxu0 %v19713_v24  ;;  %v4337_v46 = vadd.s32 16, %v21477_v20  ;;  %v4338_v24 = vadd.s32 24, %v21477_v20 }
 0x6d3   :  { %3911 = vmatpush1.bf16.msra.mxu1 %v19708_v33  ;;  %3993 = vmatpush1.bf16.msra.mxu0 %v19711_v36  ;;  %v21564_v33 = vadd.s32 16, %v4352_v22  ;;  %v4496_v22 = vld [vmem:[#allocation22 + $0x88] sm:$0xff] }
 0x6d4   :  { %3912 = vmatprep.subr.bf16.mxu1 %v19716_v37  ;;  %3994 = vmatprep.subr.bf16.mxu0 %v19719_v38  ;;  %v4174_v37 = vld [vmem:[#allocation20 + $0x10] sm:$0xff]  ;;  %v4250_v38 = vld [vmem:[#allocation20 + $0x18] sm:$0xff] }
 0x6d5   :  { %vm4356_vm12 = vcmp.eq.s32.totalorder %v4337_v46, %v21564_v33  ;;  %vm4357_vm13 = vcmp.eq.s32.totalorder %v4338_v24, %v21564_v33  ;;  %v4527_v24 = vld [vmem:[#allocation22 + $0x180] sm:$0xff] }
 0x6d6   :  { %vm19035_vm14 = vmpackc.low %vm4357_vm13, %vm4356_vm12 }
 0x6d7   :  { %3913 = vmatpush1.bf16.msra.mxu1 %v19714_v50  ;;  %3995 = vmatpush1.bf16.msra.mxu0 %v19717_v28  ;;  %v21032_v50 = vmov 0.0|0.0   ;;  %v4339_v28 = vadd.s32 32, %v21477_v20 }
 0x6d8   :  { %3914 = vmatprep.subr.bf16.mxu1 %v19722_v39  ;;  %3996 = vmatprep.subr.bf16.mxu0 %v19725_v40  ;;  %v4340_v39 = vadd.s32 40, %v21477_v20  ;;  %v4341_v40 = vadd.s32 48, %v21477_v20 }
 0x6d9   :  { %vm4358_vm15 = vcmp.eq.s32.totalorder %v4339_v28, %v21564_v33 }
 0x6da   :  { %vm4359_vm0 = vcmp.eq.s32.totalorder %v4340_v39, %v21564_v33  ;;  %vm4360_vm3 = vcmp.eq.s32.totalorder %v4341_v40, %v21564_v33  ;;  %v4543_v39 = vld [vmem:[#allocation22 + $0x200] sm:$0xff] }
 0x6db   :  { %3915 = vmatpush1.bf16.msra.mxu1 %v19720_v41  ;;  %3997 = vmatpush1.bf16.msra.mxu0 %v19723_v43  ;;  %v4342_v41 = vadd.s32 56, %v21477_v20  ;;  %v21033_v43 = vmov 1.0|1.0   ;;  %vm19038_vm2 = vmpackc.low %vm4359_vm0, %vm4358_vm15  ;;  %v4551_v40 = vld [vmem:[#allocation22 + $0x240] sm:$0xff] }
 0x6dc   :  { %3916 = vmatprep.subr.bf16.mxu1 %v19728_v44  ;;  %3998 = vmatprep.subr.bf16.mxu0 %v19731_v47  ;;  %v4343_v44 = vadd.s32 64, %v21477_v20  ;;  %v4344_v47 = vadd.s32 72, %v21477_v20 }
 0x6de   :  { %vm4362_vm5 = vcmp.eq.s32.totalorder %v4343_v44, %v21564_v33  ;;  %vm4363_vm7 = vcmp.eq.s32.totalorder %v4344_v47, %v21564_v33  ;;  %v4552_v44 = vld [vmem:[#allocation22 + $0x248] sm:$0xff]  ;;  %v16421_v47 = vcombine.low %v4543_v39, %v4551_v40 }
 0x6df   :  { %3917 = vmatpush1.bf16.msra.mxu1 %v19726_v48  ;;  %3999 = vmatpush1.bf16.msra.mxu0 %v19729_v51  ;;  %vm19044_vm8 = vmpackc.low %vm4363_vm7, %vm4362_vm5  ;;  %v4345_v48 = vadd.s32 80, %v21477_v20  ;;  %v4346_v51 = vadd.s32 88, %v21477_v20 }
 0x6e0   :  { %3918 = vmatprep.subr.bf16.mxu1 %v19734_v52  ;;  %4000 = vmatprep.subr.bf16.mxu0 %v19737_v34  ;;  %v4347_v52 = vadd.s32 96, %v21477_v20  ;;  %v4348_v34 = vadd.s32 104, %v21477_v20 }
 0x6e1   :  { %vm4364_vm9 = vcmp.eq.s32.totalorder %v4345_v48, %v21564_v33  ;;  %vm4365_vm10 = vcmp.eq.s32.totalorder %v4346_v51, %v21564_v33 }
 0x6e2   :  { %vm19047_vm12 = vmpackc.low %vm4365_vm10, %vm4364_vm9  ;;  %vm4366_vm13 = vcmp.eq.s32.totalorder %v4347_v52, %v21564_v33  ;;  %v4559_v52 = vld [vmem:[#allocation22 + $0x280] sm:$0xff] }
 0x6e3   :  { %3919 = vmatpush1.bf16.msra.mxu1 %v19732_v53  ;;  %4001 = vmatpush1.bf16.msra.mxu0 %v19735_v54  ;;  %v4349_v53 = vadd.s32 112, %v21477_v20  ;;  %v4350_v54 = vadd.s32 120, %v21477_v20 }
 0x6e4   :  { %3920 = vmatprep.subr.bf16.mxu1 %v19740_v55  ;;  %4002 = vmatprep.subr.bf16.mxu0 %v19743_v56  ;;  %v4479_v55 = vld [vmem:[#allocation22] sm:$0xff] }
 0x6e5   :  { %vm4368_vm0 = vcmp.eq.s32.totalorder %v4349_v53, %v21564_v33  ;;  %v4487_v56 = vld [vmem:[#allocation22 + $0x40] sm:$0xff]  ;;  %v4560_v53 = vld [vmem:[#allocation22 + $0x288] sm:$0xff] }
 0x6e7   :  { %3921 = vmatpush1.bf16.msra.mxu1 %v19738_v57  ;;  %4003 = vmatpush1.bf16.msra.mxu0 %v19741_v58  ;;  %v4480_v57 = vld [vmem:[#allocation22 + $0x8] sm:$0xff]  ;;  %v16357_v58 = vcombine.low %v4479_v55, %v4487_v56 }
 0x6e8   :  { %3922 = vmatprep.subr.bf16.mxu1 %v19746_v59  ;;  %4004 = vmatprep.subr.bf16.mxu0 %v19749_v60  ;;  %v16358_v59 = vcombine.high %v4479_v55, %v4487_v56  ;;  %v4488_v60 = vld [vmem:[#allocation22 + $0x48] sm:$0xff] }
 0x6e9   :  { %v4568_v55 = vld [vmem:[#allocation22 + $0x2c8] sm:$0xff] }
 0x6eb   :  { %3923 = vmatpush1.bf16.msra.mxu1 %v19744_v61  ;;  %4005 = vmatpush1.bf16.msra.mxu0 %v19747_v62  ;;  %v4495_v61 = vld [vmem:[#allocation22 + $0x80] sm:$0xff] }
 0x6ec   :  { %3924 = vmatprep.subr.bf16.mxu1 %v19752_v63  ;;  %4006 = vmatprep.subr.bf16.mxu0 %v19755_v0  ;;  %v4503_v62 = vld [vmem:[#allocation22 + $0xc0] sm:$0xff]  ;;  %v16359_v63 = vcombine.low %v4480_v57, %v4488_v60  ;;  %v16360_v0 = vcombine.high %v4480_v57, %v4488_v60  ;;  %v16439_v57 = vcombine.low %v4560_v53, %v4568_v55 }
 0x6ed   :  { %v4583_v60 = vld [vmem:[#allocation22 + $0x340] sm:$0xff] }
 0x6ef   :  { %3925 = vmatpush1.bf16.msra.mxu1 %v19750_v1  ;;  %4007 = vmatpush1.bf16.msra.mxu0 %v19753_v2  ;;  %v16374_v1 = vcombine.high %v4495_v61, %v4503_v62  ;;  %v16373_v2 = vcombine.low %v4495_v61, %v4503_v62  ;;  %v4576_v61 = vld [vmem:[#allocation22 + $0x308] sm:$0xff] }
 0x6f0   :  { %3926 = vmatprep.subr.bf16.mxu1 %v19758_v3  ;;  %4008 = vmatprep.subr.bf16.mxu0 %v19761_v4  ;;  %v4511_v3 = vld [vmem:[#allocation22 + $0x100] sm:$0xff] }
 0x6f1   :  { %v4519_v4 = vld [vmem:[#allocation22 + $0x140] sm:$0xff] }
 0x6f3   :  { %3927 = vmatpush1.bf16.msra.mxu1 %v19756_v5  ;;  %4009 = vmatpush1.bf16.msra.mxu0 %v19759_v7  ;;  %v16390_v5 = vcombine.high %v4511_v3, %v4519_v4  ;;  %v16389_v7 = vcombine.low %v4511_v3, %v4519_v4  ;;  %v4591_v3 = vld [vmem:[#allocation22 + $0x380] sm:$0xff] }
 0x6f4   :  { %3928 = vmatprep.subr.bf16.mxu1 %v19764_v8  ;;  %4010 = vmatprep.subr.bf16.mxu0 %v19767_v9  ;;  %v4599_v4 = vld [vmem:[#allocation22 + $0x3c0] sm:$0xff] }
 0x6f7   :  { %3929 = vmatpush1.bf16.msra.mxu1 %v19762_v10  ;;  %4011 = vmatpush1.bf16.msra.mxu0 %v19765_v12 }
 0x6f8   :  { %3930 = vmatprep.subr.bf16.mxu1 %v19770_v45  ;;  %4012 = vmatprep.subr.bf16.mxu0 %v19773_v13 }
 0x6fb   :  { %3931 = vmatpush1.bf16.msra.mxu1 %v19768_v15  ;;  %4013 = vmatpush1.bf16.msra.mxu0 %v19771_v17 }
 0x6fc   :  { %18314 = vmatprep.subr.mxu0 %v21029_v25  ;;  %18309 = vmatprep.subr.mxu1 %v21029_v25 }
 0x6fe   :  { %3933 = vmatmul.mubr.bf16.vlgmr.msra.gmra.mrb[56].mxu1 %v3089_v19  ;;  %4015 = vmatmul.mubr.bf16.vlgmr.msra.gmra.mrb[76].mxu0 %v3089_v19  ;;  %v16328_v19 = vld [vmem:[#allocation19] ss:$0 sm:$0xff] }
 0x6ff   :  { %18311 = vmatprep.mubr.msk.f32.mxu1 %vm21030_vm1, %v21029_v25  ;;  %18316 = vmatprep.mubr.msk.f32.mxu0 %vm21030_vm1, %v21029_v25 }
 0x7d1   :  { %v3934_v23 = vpop.f32.mrb[56].mxu1  ;;  %v4016_v26 = vpop.f32.mrb[76].mxu0 }
 0x7d2   :  { %v3936_v29 = vpop.f32.mrb[57].mxu1  ;;  %v4018_v30 = vpop.f32.mrb[77].mxu0  ;;  %18315 = vmatpush3.msra.mxu0 %v3934_v23  ;;  %v4504_v23 = vld [vmem:[#allocation22 + $0xc8] sm:$0xff] }
 0x7d3   :  { %v3938_v11 = vpop.f32.mrb[58].mxu1  ;;  %v4020_v32 = vpop.f32.mrb[78].mxu0  ;;  %18310 = vmatpush3.msra.mxu1 %v3936_v29  ;;  %18324 = vmatprep.subr.mxu0 %v21029_v25  ;;  %v4512_v29 = vld [vmem:[#allocation22 + $0x108] sm:$0xff] }
 0x7d4   :  { %v3939_v16 = vpop.f32.mrb[59].mxu1  ;;  %v4021_v36 = vpop.f32.mrb[79].mxu0  ;;  %18312 = vmatmul.mubr.msk.f32.vlgmr.msra.gmra.mrb[60].mxu1 %vm4026_vm11, %v4025_v21  ;;  %18317 = vmatmul.mubr.msk.f32.vlgmr.msra.gmra.mrb[80].mxu0 %vm4026_vm11, %v4023_v27  ;;  %v16376_v27 = vcombine.high %v4496_v22, %v4504_v23  ;;  %v16375_v11 = vcombine.low %v4496_v22, %v4504_v23 }
 0x7d5   :  { %18319 = vmatprep.subr.mxu1 %v21029_v25  ;;  %18325 = vmatpush3.msra.mxu0 %v4018_v30  ;;  %v4520_v30 = vld [vmem:[#allocation22 + $0x148] sm:$0xff] }
 0x7d6   :  { %18320 = vmatpush3.msra.mxu1 %v4016_v26  ;;  %18321 = vmatprep.mubr.msk.f32.mxu1 %vm21030_vm1, %v21029_v25  ;;  %v16392_v32 = vcombine.high %v4512_v29, %v4520_v30  ;;  %v16391_v46 = vcombine.low %v4512_v29, %v4520_v30  ;;  %v4528_v16 = vld [vmem:[#allocation22 + $0x188] sm:$0xff] }
 0x7d7   :  { %18326 = vmatprep.mubr.msk.f32.mxu0 %vm21030_vm1, %v21029_v25  ;;  %19032 = vmatprep.subr.bf16.mxu1 %v21032_v50 }
 0x7d8   :  { %18322 = vmatmul.mubr.msk.f32.vlgmr.msra.gmra.mrb[62].mxu1 %vm4026_vm11, %v4174_v37  ;;  %18327 = vmatmul.mubr.msk.f32.vlgmr.msra.gmra.mrb[82].mxu0 %vm4026_vm11, %v4250_v38  ;;  %v4536_v37 = vld [vmem:[#allocation22 + $0x1c8] sm:$0xff] }
 0x7d9   :  { %19033 = vmatpush3.bf16.msra.mxu1 %v21032_v50  ;;  %18361 = vmatprep.mubr.msk.f32.mxu1 %vm21030_vm1, %v21029_v25  ;;  %vm4361_vm1 = vcmp.eq.s32.totalorder %v4342_v41, %v21564_v33  ;;  %v16408_v28 = vcombine.high %v4528_v16, %v4536_v37  ;;  %v4544_v41 = vld [vmem:[#allocation22 + $0x208] sm:$0xff] }
 0x7da   :  { %19034 = vmatprep.subr.bf16.mxu1 %v21032_v50  ;;  %5363 = vmatprep.mubr.bf16.mxu0 %v21031_v42  ;;  %vm19041_vm4 = vmpackc.low %vm4361_vm1, %vm4360_vm3  ;;  %v16423_v48 = vcombine.low %v4544_v41, %v4552_v44  ;;  %v16424_v51 = vcombine.high %v4544_v41, %v4552_v44  ;;  %v4522_v41 = vld [vmem:[#allocation22 + $0x158] sm:$0xff]  ;;  %vm6438_vm1 = vcmask 1043456  }
 0x7db   :  { %5331 = vmatprep.subr.bf16.mxu0 %v16358_v59  ;;  %v4575_v59 = vld [vmem:[#allocation22 + $0x300] sm:$0xff] }
 0x7dc   :  { %5332 = vmatpush1.bf16.msra.mxu0 %v16357_v58  ;;  %v16440_v58 = vcombine.high %v4560_v53, %v4568_v55  ;;  %v16454_v62 = vcombine.high %v4575_v59, %v4583_v60 }
 0x7dd   :  { %19036 = vmatpush3.bf16.msk.msra.mxu1 %vm19035_vm14, %v21033_v43  ;;  %vm4367_vm14 = vcmp.eq.s32.totalorder %v4348_v34, %v21564_v33  ;;  %5333 = vmatprep.subr.bf16.mxu0 %v16374_v1  ;;  %v4567_v34 = vld [vmem:[#allocation22 + $0x2c0] sm:$0xff] }
 0x7de   :  { %19037 = vmatprep.subr.bf16.mxu1 %v21032_v50  ;;  %vm19050_vm15 = vmpackc.low %vm4367_vm14, %vm4366_vm13  ;;  %v16437_v56 = vcombine.low %v4559_v52, %v4567_v34 }
 0x7e0   :  { %5334 = vmatpush1.bf16.msra.mxu0 %v16373_v2 }
 0x7e1   :  { %19039 = vmatpush3.bf16.msk.msra.mxu1 %vm19038_vm2, %v21033_v43  ;;  %vm4369_vm2 = vcmp.eq.s32.totalorder %v4350_v54, %v21564_v33  ;;  %5335 = vmatprep.subr.bf16.mxu0 %v16390_v5  ;;  %v4535_v33 = vld [vmem:[#allocation22 + $0x1c0] sm:$0xff]  ;;  %v16438_v54 = vcombine.high %v4559_v52, %v4567_v34  ;;  %v4592_v5 = vld [vmem:[#allocation22 + $0x388] sm:$0xff]  ;;  %v4530_v52 = vld [vmem:[#allocation22 + $0x198] sm:$0xff] }
 0x7e2   :  { %19040 = vmatprep.subr.bf16.mxu1 %v21032_v50  ;;  %vm19053_vm3 = vmpackc.low %vm4369_vm2, %vm4368_vm0  ;;  %v16406_v36 = vcombine.high %v4527_v24, %v4535_v33  ;;  %v16405_v38 = vcombine.low %v4527_v24, %v4535_v33  ;;  %v4505_v24 = vld [vmem:[#allocation22 + $0xd0] sm:$0xff]  ;;  %v4498_v33 = vld [vmem:[#allocation22 + $0x98] sm:$0xff] }
 0x7e3   :  { %v4538_v34 = vld [vmem:[#allocation22 + $0x1d8] sm:$0xff] }
 0x7e4   :  { %5336 = vmatpush1.bf16.msra.mxu0 %v16389_v7  ;;  %v16470_v7 = vcombine.high %v4591_v3, %v4599_v4 }
 0x7e5   :  { %19042 = vmatpush3.bf16.msk.msra.mxu1 %vm19041_vm4, %v21033_v43  ;;  %5337 = vmatprep.subr.bf16.mxu0 %v16406_v36 }
 0x7e6   :  { %19043 = vmatprep.subr.bf16.mxu1 %v21032_v50 }
 0x7e8   :  { %5338 = vmatpush1.bf16.msra.mxu0 %v16405_v38 }
 0x7e9   :  { %19045 = vmatpush3.bf16.msk.msra.mxu1 %vm19044_vm8, %v21033_v43 }
 0x7ea   :  { %19046 = vmatprep.subr.bf16.mxu1 %v21032_v50 }
 0x7ed   :  { %19048 = vmatpush3.bf16.msk.msra.mxu1 %vm19047_vm12, %v21033_v43 }
 0x7ee   :  { %19049 = vmatprep.subr.bf16.mxu1 %v21032_v50 }
 0x7f1   :  { %19051 = vmatpush3.bf16.msk.msra.mxu1 %vm19050_vm15, %v21033_v43 }
 0x7f2   :  { %19052 = vmatprep.subr.bf16.mxu1 %v21032_v50  ;;  %v16407_v50 = vcombine.low %v4528_v16, %v4536_v37  ;;  %v4506_v16 = vld [vmem:[#allocation22 + $0xd8] sm:$0xff] }
 0x7f3   :  { %v16379_v44 = vcombine.low %v4498_v33, %v4506_v16 }
 0x7f5   :  { %19054 = vmatpush3.bf16.msk.msra.mxu1 %vm19053_vm3, %v21033_v43  ;;  %v16422_v43 = vcombine.high %v4543_v39, %v4551_v40  ;;  %v4521_v39 = vld [vmem:[#allocation22 + $0x150] sm:$0xff]  ;;  %v4514_v40 = vld [vmem:[#allocation22 + $0x118] sm:$0xff] }
 0x7f6   :  { %5372 = vmatprep.subr.bf16.mxu1 %v16360_v0  ;;  %v16453_v0 = vcombine.low %v4575_v59, %v4583_v60  ;;  %v4546_v59 = vld [vmem:[#allocation22 + $0x218] sm:$0xff] }
 0x7f7   :  { %5339 = vmatprep.subr.bf16.mxu0 %v16422_v43  ;;  %v4554_v60 = vld [vmem:[#allocation22 + $0x258] sm:$0xff] }
 0x7f8   :  { %5340 = vmatpush1.bf16.msra.mxu0 %v16421_v47 }
 0x7f9   :  { %5341 = vmatprep.subr.bf16.mxu0 %v16438_v54  ;;  %v16395_v54 = vcombine.low %v4514_v40, %v4522_v41 }
 0x7fc   :  { %5342 = vmatpush1.bf16.msra.mxu0 %v16437_v56  ;;  %v16412_v56 = vcombine.high %v4530_v52, %v4538_v34 }
 0x7fd   :  { %5343 = vmatprep.subr.bf16.mxu0 %v16454_v62  ;;  %v16411_v62 = vcombine.low %v4530_v52, %v4538_v34  ;;  %v4516_v52 = vld [vmem:[#allocation22 + $0x128] sm:$0xff] }
 0x7fe   :  { %v4524_v34 = vld [vmem:[#allocation22 + $0x168] sm:$0xff] }
 0x800   :  { %5344 = vmatpush1.bf16.msra.mxu0 %v16453_v0  ;;  %v16428_v0 = vcombine.high %v4546_v59, %v4554_v60 }
 0x801   :  { %5345 = vmatprep.subr.bf16.mxu0 %v16470_v7  ;;  %v16427_v7 = vcombine.low %v4546_v59, %v4554_v60  ;;  %v4532_v59 = vld [vmem:[#allocation22 + $0x1a8] sm:$0xff] }
 0x802   :  { %v4540_v60 = vld [vmem:[#allocation22 + $0x1e8] sm:$0xff] }
 0x8a7   :  { %v4096_v8 = vpop.f32.mrb[60].mxu1  ;;  %v4169_v9 = vpop.f32.mrb[80].mxu0 }
 0x8a8   :  { %v4170_v10 = vadd.f32 %v4169_v9, %v4096_v8  ;;  %v18313_v12 = vpop.f32.mrb[61].mxu1  ;;  %v18318_v45 = vpop.f32.mrb[81].mxu0  ;;  %v4600_v8 = vld [vmem:[#allocation22 + $0x3c8] sm:$0xff]  ;;  %v16469_v9 = vcombine.low %v4591_v3, %v4599_v4  ;;  %v4562_v3 = vld [vmem:[#allocation22 + $0x298] sm:$0xff] }
 0x8a9   :  { %v16472_v12 = vcombine.high %v4592_v5, %v4600_v8  ;;  %v4481_v45 = vld [vmem:[#allocation22 + $0x10] sm:$0xff]  ;;  %v4570_v4 = vld [vmem:[#allocation22 + $0x2d8] sm:$0xff] }
 0x8aa   :  { %5346 = vmatpush1.bf16.msra.mxu0 %v16469_v9  ;;  %v16444_v9 = vcombine.high %v4562_v3, %v4570_v4 }
 0x8ab   :  { %v4244_v13 = vpop.f32.mrb[62].mxu1  ;;  %v4320_v49 = vpop.f32.mrb[82].mxu0 }
 0x8ac   :  { %v18323_v15 = vpop.f32.mrb[63].mxu1  ;;  %v4248_v17 = vadd.f32 %v4244_v13, %v4170_v10  ;;  %v18328_v6 = vpop.f32.mrb[83].mxu0  ;;  %v16471_v10 = vcombine.low %v4592_v5, %v4600_v8  ;;  %v4489_v13 = vld [vmem:[#allocation22 + $0x50] sm:$0xff] }
 0x8ad   :  { %v16361_v15 = vcombine.low %v4481_v45, %v4489_v13  ;;  %v4490_v6 = vld [vmem:[#allocation22 + $0x58] sm:$0xff] }
 0x8ae   :  { %v4324_v26 = vadd.f32 %v4320_v49, %v4248_v17  ;;  %v4482_v49 = vld [vmem:[#allocation22 + $0x18] sm:$0xff]  ;;  %v16362_v17 = vcombine.high %v4481_v45, %v4489_v13 }
 0x8af   :  { %v16364_v22 = vcombine.high %v4482_v49, %v4490_v6  ;;  %v4578_v45 = vld [vmem:[#allocation22 + $0x318] sm:$0xff] }
 0x8b0   :  { %v21604_v21 = vadd.f32 %v16328_v19, %v4324_v26  ;;  %v16363_v19 = vcombine.low %v4482_v49, %v4490_v6  ;;  %5413 = vmatprep.subr.bf16.mxu0 %v16362_v17  ;;  %v4586_v13 = vld [vmem:[#allocation22 + $0x358] sm:$0xff] }
 0x8b1   :  { %v16460_v6 = vcombine.high %v4578_v45, %v4586_v13 }
 0x8b2   :  { %4333 = vst [vmem:[%s21203_s29] sm:$0xff] %v21604_v21  ;;  %18362 = vmatmul.mubr.f32.vlgmr.msra.gmra.mrb[64].mxu1 %v21604_v21  ;;  %s23080_s29 = sld [smem:[#allocation60_spill]] }
 0x8b3   :  { %5373 = vmatpush1.bf16.msra.mxu1 %v16359_v63  ;;  %5404 = vmatprep.mubr.bf16.mxu1 %v21031_v42  ;;  %v4584_v63 = vld [vmem:[#allocation22 + $0x348] sm:$0xff] }
 0x8b4   :  { %5374 = vmatprep.subr.bf16.mxu1 %v16376_v27  ;;  %v16455_v1 = vcombine.low %v4576_v61, %v4584_v63  ;;  %v16456_v2 = vcombine.high %v4576_v61, %v4584_v63 }
 0x8b7   :  { %5375 = vmatpush1.bf16.msra.mxu1 %v16375_v11 }
 0x8b8   :  { %5376 = vmatprep.subr.bf16.mxu1 %v16392_v32  ;;  %v4472_v30 = vld [vmem:[%s23080_s29] sm:$0xff] }
 0x8bb   :  { %5377 = vmatpush1.bf16.msra.mxu1 %v16391_v46  ;;  %v4497_v46 = vld [vmem:[#allocation22 + $0x90] sm:$0xff] }
 0x8bc   :  { %5378 = vmatprep.subr.bf16.mxu1 %v16408_v28  ;;  %v16378_v38 = vcombine.high %v4497_v46, %v4505_v24  ;;  %v4513_v28 = vld [vmem:[#allocation22 + $0x110] sm:$0xff]  ;;  %v16377_v43 = vcombine.low %v4497_v46, %v4505_v24  ;;  %v4491_v46 = vld [vmem:[#allocation22 + $0x60] sm:$0xff]  ;;  %v4484_v24 = vld [vmem:[#allocation22 + $0x28] sm:$0xff] }
 0x8bd   :  { %v16394_v47 = vcombine.high %v4513_v28, %v4521_v39  ;;  %v16393_v53 = vcombine.low %v4513_v28, %v4521_v39  ;;  %v4499_v28 = vld [vmem:[#allocation22 + $0xa0] sm:$0xff] }
 0x8be   :  { %v4507_v39 = vld [vmem:[#allocation22 + $0xe0] sm:$0xff] }
 0x8bf   :  { %5379 = vmatpush1.bf16.msra.mxu1 %v16407_v50  ;;  %v16380_v50 = vcombine.high %v4498_v33, %v4506_v16  ;;  %v4492_v33 = vld [vmem:[#allocation22 + $0x68] sm:$0xff] }
 0x8c0   :  { %5380 = vmatprep.subr.bf16.mxu1 %v16424_v51  ;;  %v4537_v51 = vld [vmem:[#allocation22 + $0x1d0] sm:$0xff] }
 0x8c3   :  { %5381 = vmatpush1.bf16.msra.mxu1 %v16423_v48  ;;  %v4529_v48 = vld [vmem:[#allocation22 + $0x190] sm:$0xff] }
 0x8c4   :  { %5382 = vmatprep.subr.bf16.mxu1 %v16440_v58  ;;  %v16410_v55 = vcombine.high %v4529_v48, %v4537_v51  ;;  %v4553_v58 = vld [vmem:[#allocation22 + $0x250] sm:$0xff]  ;;  %v16409_v61 = vcombine.low %v4529_v48, %v4537_v51  ;;  %v4515_v48 = vld [vmem:[#allocation22 + $0x120] sm:$0xff] }
 0x8c5   :  { %v4523_v51 = vld [vmem:[#allocation22 + $0x160] sm:$0xff] }
 0x8c7   :  { %5383 = vmatpush1.bf16.msra.mxu1 %v16439_v57  ;;  %v4545_v57 = vld [vmem:[#allocation22 + $0x210] sm:$0xff] }
 0x8c8   :  { %5384 = vmatprep.subr.bf16.mxu1 %v16456_v2  ;;  %v16426_v63 = vcombine.high %v4545_v57, %v4553_v58  ;;  %v4569_v2 = vld [vmem:[#allocation22 + $0x2d0] sm:$0xff]  ;;  %v16425_v5 = vcombine.low %v4545_v57, %v4553_v58  ;;  %v4531_v57 = vld [vmem:[#allocation22 + $0x1a0] sm:$0xff] }
 0x8c9   :  { %v4539_v58 = vld [vmem:[#allocation22 + $0x1e0] sm:$0xff] }
 0x8cb   :  { %5385 = vmatpush1.bf16.msra.mxu1 %v16455_v1  ;;  %v4561_v1 = vld [vmem:[#allocation22 + $0x290] sm:$0xff] }
 0x8cc   :  { %5386 = vmatprep.subr.bf16.mxu1 %v16472_v12  ;;  %v16442_v8 = vcombine.high %v4561_v1, %v4569_v2  ;;  %v4585_v12 = vld [vmem:[#allocation22 + $0x350] sm:$0xff]  ;;  %v16441_v49 = vcombine.low %v4561_v1, %v4569_v2  ;;  %v4547_v1 = vld [vmem:[#allocation22 + $0x220] sm:$0xff] }
 0x8cd   :  { %v4555_v2 = vld [vmem:[#allocation22 + $0x260] sm:$0xff] }
 0x8cf   :  { %5387 = vmatpush1.bf16.msra.mxu1 %v16471_v10  ;;  %v4577_v10 = vld [vmem:[#allocation22 + $0x310] sm:$0xff] }
 0x8d0   :  { %5454 = vmatprep.subr.bf16.mxu1 %v16364_v22  ;;  %v16458_v17 = vcombine.high %v4577_v10, %v4585_v12  ;;  %v4601_v22 = vld [vmem:[#allocation22 + $0x3d0] sm:$0xff] }
 0x985   :  { %v4468_v23 = vpop.f32.mrb[64].mxu1 }
 0x986   :  { %v4473_v26 = vmul.f32 0.5, %v4468_v23  ;;  %v18363_v27 = vpop.f32.mrb[65].mxu1  ;;  %v4594_v23 = vld [vmem:[#allocation22 + $0x398] sm:$0xff] }
 0x987   :  { %v16457_v27 = vcombine.low %v4577_v10, %v4585_v12  ;;  %v4563_v10 = vld [vmem:[#allocation22 + $0x2a0] sm:$0xff] }
 0x988   :  { %v4474_v29 = vmul.f32 1.442695, %v4473_v26  ;;  %v4602_v26 = vld [vmem:[#allocation22 + $0x3d8] sm:$0xff]  ;;  %v4571_v12 = vld [vmem:[#allocation22 + $0x2e0] sm:$0xff] }
 0x98a   :  { %20270 = vpow2.f32 %v4474_v29  ;;  %v16459_v29 = vcombine.low %v4578_v45, %v4586_v13  ;;  %v4564_v45 = vld [vmem:[#allocation22 + $0x2a8] sm:$0xff] }
 0x98b   :  { %v4572_v13 = vld [vmem:[#allocation22 + $0x2e8] sm:$0xff] }
 0x994   :  { %v20271_v11 = vpop.eup %20270 }
 0x995   :  { %v4476_v32 = vmul.f32 %v20271_v11, %v4472_v30  ;;  %v16476_v11 = vcombine.high %v4594_v23, %v4602_v26 }
 0x997   :  { %v4477_v36 = vadd.f32 %v4476_v32, %v21604_v21  ;;  %v16396_v21 = vcombine.high %v4514_v40, %v4522_v41  ;;  %v4483_v32 = vld [vmem:[#allocation22 + $0x20] sm:$0xff]  ;;  %v4500_v40 = vld [vmem:[#allocation22 + $0xa8] sm:$0xff] }
 0x998   :  { %v4508_v41 = vld [vmem:[#allocation22 + $0xe8] sm:$0xff] }
 0x999   :  { %v21612_v37 = vpack.c.bf16 %v4477_v36, %v4477_v36  ;;  %v16475_v36 = vcombine.low %v4594_v23, %v4602_v26  ;;  %v4580_v23 = vld [vmem:[#allocation22 + $0x328] sm:$0xff] }
 0x99a   :  { %v4588_v26 = vld [vmem:[#allocation22 + $0x368] sm:$0xff] }
 0x99b   :  { %5364 = vmatmul.mubr.bf16.vlgmr.msra.gmra.mrb[84].mxu0 %v21612_v37  ;;  %5405 = vmatmul.mubr.bf16.vlgmr.msra.gmra.mrb[68].mxu1 %v21612_v37 }
 0x99c   :  { %5414 = vmatpush1.bf16.msra.mxu0 %v16361_v15  ;;  %5455 = vmatpush1.bf16.msra.mxu1 %v16363_v19  ;;  %v16443_v15 = vcombine.low %v4562_v3, %v4570_v4  ;;  %v4593_v19 = vld [vmem:[#allocation22 + $0x390] sm:$0xff]  ;;  %v4548_v3 = vld [vmem:[#allocation22 + $0x228] sm:$0xff] }
 0x99d   :  { %5415 = vmatprep.subr.bf16.mxu0 %v16378_v38  ;;  %5456 = vmatprep.subr.bf16.mxu1 %v16380_v50  ;;  %v16474_v30 = vcombine.high %v4593_v19, %v4601_v22  ;;  %v16473_v16 = vcombine.low %v4593_v19, %v4601_v22  ;;  %v16366_v38 = vcombine.high %v4483_v32, %v4491_v46  ;;  %v4556_v4 = vld [vmem:[#allocation22 + $0x268] sm:$0xff]  ;;  %v4579_v19 = vld [vmem:[#allocation22 + $0x320] sm:$0xff] }
 0x99e   :  { %5445 = vmatprep.mubr.bf16.mxu0 %v21031_v42  ;;  %5486 = vmatprep.mubr.bf16.mxu1 %v21031_v42  ;;  %v16368_v50 = vcombine.high %v4484_v24, %v4492_v33  ;;  %v4587_v22 = vld [vmem:[#allocation22 + $0x360] sm:$0xff] }
 0x9a0   :  { %5416 = vmatpush1.bf16.msra.mxu0 %v16377_v43  ;;  %5457 = vmatpush1.bf16.msra.mxu1 %v16379_v44  ;;  %v16365_v43 = vcombine.low %v4483_v32, %v4491_v46  ;;  %v16367_v44 = vcombine.low %v4484_v24, %v4492_v33  ;;  %v4595_v32 = vld [vmem:[#allocation22 + $0x3a0] sm:$0xff]  ;;  %v4596_v24 = vld [vmem:[#allocation22 + $0x3a8] sm:$0xff] }
 0x9a1   :  { %5417 = vmatprep.subr.bf16.mxu0 %v16394_v47  ;;  %5458 = vmatprep.subr.bf16.mxu1 %v16396_v21  ;;  %v16382_v47 = vcombine.high %v4499_v28, %v4507_v39  ;;  %v16384_v21 = vcombine.high %v4500_v40, %v4508_v41  ;;  %v4603_v46 = vld [vmem:[#allocation22 + $0x3e0] sm:$0xff]  ;;  %v4604_v33 = vld [vmem:[#allocation22 + $0x3e8] sm:$0xff] }
 0x9a4   :  { %5418 = vmatpush1.bf16.msra.mxu0 %v16393_v53  ;;  %5459 = vmatpush1.bf16.msra.mxu1 %v16395_v54  ;;  %v16381_v53 = vcombine.low %v4499_v28, %v4507_v39  ;;  %v16383_v54 = vcombine.low %v4500_v40, %v4508_v41  ;;  %v4485_v28 = vld [vmem:[#allocation22 + $0x30] sm:$0xff]  ;;  %v4486_v40 = vld [vmem:[#allocation22 + $0x38] sm:$0xff] }
 0x9a5   :  { %5419 = vmatprep.subr.bf16.mxu0 %v16410_v55  ;;  %5460 = vmatprep.subr.bf16.mxu1 %v16412_v56  ;;  %v16398_v55 = vcombine.high %v4515_v48, %v4523_v51  ;;  %v16400_v56 = vcombine.high %v4516_v52, %v4524_v34  ;;  %v4493_v39 = vld [vmem:[#allocation22 + $0x70] sm:$0xff]  ;;  %v4494_v41 = vld [vmem:[#allocation22 + $0x78] sm:$0xff] }
 0x9a8   :  { %5420 = vmatpush1.bf16.msra.mxu0 %v16409_v61  ;;  %5461 = vmatpush1.bf16.msra.mxu1 %v16411_v62  ;;  %v16397_v61 = vcombine.low %v4515_v48, %v4523_v51  ;;  %v16399_v62 = vcombine.low %v4516_v52, %v4524_v34  ;;  %v4501_v48 = vld [vmem:[#allocation22 + $0xb0] sm:$0xff]  ;;  %v4502_v52 = vld [vmem:[#allocation22 + $0xb8] sm:$0xff] }
 0x9a9   :  { %5421 = vmatprep.subr.bf16.mxu0 %v16426_v63  ;;  %5462 = vmatprep.subr.bf16.mxu1 %v16428_v0  ;;  %v16414_v63 = vcombine.high %v4531_v57, %v4539_v58  ;;  %v16416_v0 = vcombine.high %v4532_v59, %v4540_v60  ;;  %v4509_v51 = vld [vmem:[#allocation22 + $0xf0] sm:$0xff]  ;;  %v4510_v34 = vld [vmem:[#allocation22 + $0xf8] sm:$0xff] }
 0x9ac   :  { %5422 = vmatpush1.bf16.msra.mxu0 %v16425_v5  ;;  %5463 = vmatpush1.bf16.msra.mxu1 %v16427_v7  ;;  %v16413_v5 = vcombine.low %v4531_v57, %v4539_v58  ;;  %v16415_v7 = vcombine.low %v4532_v59, %v4540_v60  ;;  %v4517_v57 = vld [vmem:[#allocation22 + $0x130] sm:$0xff]  ;;  %v4518_v59 = vld [vmem:[#allocation22 + $0x138] sm:$0xff] }
 0x9ad   :  { %5423 = vmatprep.subr.bf16.mxu0 %v16442_v8  ;;  %5464 = vmatprep.subr.bf16.mxu1 %v16444_v9  ;;  %v16430_v8 = vcombine.high %v4547_v1, %v4555_v2  ;;  %v16432_v9 = vcombine.high %v4548_v3, %v4556_v4  ;;  %v4525_v58 = vld [vmem:[#allocation22 + $0x170] sm:$0xff]  ;;  %v4526_v60 = vld [vmem:[#allocation22 + $0x178] sm:$0xff] }
 0x9b0   :  { %5424 = vmatpush1.bf16.msra.mxu0 %v16441_v49  ;;  %5465 = vmatpush1.bf16.msra.mxu1 %v16443_v15  ;;  %v16429_v49 = vcombine.low %v4547_v1, %v4555_v2  ;;  %v16431_v15 = vcombine.low %v4548_v3, %v4556_v4  ;;  %v4533_v1 = vld [vmem:[#allocation22 + $0x1b0] sm:$0xff]  ;;  %v4534_v3 = vld [vmem:[#allocation22 + $0x1b8] sm:$0xff] }
 0x9b1   :  { %5425 = vmatprep.subr.bf16.mxu0 %v16458_v17  ;;  %5466 = vmatprep.subr.bf16.mxu1 %v16460_v6  ;;  %v16446_v17 = vcombine.high %v4563_v10, %v4571_v12  ;;  %v16448_v6 = vcombine.high %v4564_v45, %v4572_v13  ;;  %v4541_v2 = vld [vmem:[#allocation22 + $0x1f0] sm:$0xff]  ;;  %v4542_v4 = vld [vmem:[#allocation22 + $0x1f8] sm:$0xff] }
 0x9b4   :  { %5426 = vmatpush1.bf16.msra.mxu0 %v16457_v27  ;;  %5467 = vmatpush1.bf16.msra.mxu1 %v16459_v29  ;;  %v16445_v27 = vcombine.low %v4563_v10, %v4571_v12  ;;  %v16447_v29 = vcombine.low %v4564_v45, %v4572_v13  ;;  %v4549_v10 = vld [vmem:[#allocation22 + $0x230] sm:$0xff]  ;;  %v4550_v45 = vld [vmem:[#allocation22 + $0x238] sm:$0xff] }
 0x9b5   :  { %5427 = vmatprep.subr.bf16.mxu0 %v16474_v30  ;;  %5468 = vmatprep.subr.bf16.mxu1 %v16476_v11  ;;  %v16462_v30 = vcombine.high %v4579_v19, %v4587_v22  ;;  %v16464_v11 = vcombine.high %v4580_v23, %v4588_v26  ;;  %v4557_v12 = vld [vmem:[#allocation22 + $0x270] sm:$0xff]  ;;  %v4558_v13 = vld [vmem:[#allocation22 + $0x278] sm:$0xff] }
 0x9b8   :  { %5428 = vmatpush1.bf16.msra.mxu0 %v16473_v16  ;;  %5469 = vmatpush1.bf16.msra.mxu1 %v16475_v36  ;;  %v16461_v16 = vcombine.low %v4579_v19, %v4587_v22  ;;  %v16463_v36 = vcombine.low %v4580_v23, %v4588_v26  ;;  %v4565_v19 = vld [vmem:[#allocation22 + $0x2b0] sm:$0xff]  ;;  %v4566_v23 = vld [vmem:[#allocation22 + $0x2b8] sm:$0xff] }
 0x9b9   :  { %5495 = vmatprep.subr.bf16.mxu0 %v16366_v38  ;;  %5536 = vmatprep.subr.bf16.mxu1 %v16368_v50  ;;  %v16478_v38 = vcombine.high %v4595_v32, %v4603_v46  ;;  %v16480_v50 = vcombine.high %v4596_v24, %v4604_v33  ;;  %v4573_v22 = vld [vmem:[#allocation22 + $0x2f0] sm:$0xff]  ;;  %v4574_v26 = vld [vmem:[#allocation22 + $0x2f8] sm:$0xff] }
 0x9bb   :  { %5446 = vmatmul.mubr.bf16.vlgmr.msra.gmra.mrb[88].mxu0 %v21612_v37  ;;  %5487 = vmatmul.mubr.bf16.vlgmr.msra.gmra.mrb[72].mxu1 %v21612_v37 }
 0x9bc   :  { %5496 = vmatpush1.bf16.msra.mxu0 %v16365_v43  ;;  %5537 = vmatpush1.bf16.msra.mxu1 %v16367_v44  ;;  %v16477_v43 = vcombine.low %v4595_v32, %v4603_v46  ;;  %v16479_v44 = vcombine.low %v4596_v24, %v4604_v33  ;;  %v4581_v32 = vld [vmem:[#allocation22 + $0x330] sm:$0xff]  ;;  %v4582_v24 = vld [vmem:[#allocation22 + $0x338] sm:$0xff] }
 0x9bd   :  { %5497 = vmatprep.subr.bf16.mxu0 %v16382_v47  ;;  %5538 = vmatprep.subr.bf16.mxu1 %v16384_v21  ;;  %v16370_v47 = vcombine.high %v4485_v28, %v4493_v39  ;;  %v16372_v21 = vcombine.high %v4486_v40, %v4494_v41  ;;  %v4589_v46 = vld [vmem:[#allocation22 + $0x370] sm:$0xff]  ;;  %v4590_v33 = vld [vmem:[#allocation22 + $0x378] sm:$0xff] }
 0x9be   :  { %5527 = vmatprep.mubr.bf16.mxu0 %v21031_v42  ;;  %5568 = vmatprep.mubr.bf16.mxu1 %v21031_v42 }
 0x9c0   :  { %5498 = vmatpush1.bf16.msra.mxu0 %v16381_v53  ;;  %5539 = vmatpush1.bf16.msra.mxu1 %v16383_v54  ;;  %v16369_v53 = vcombine.low %v4485_v28, %v4493_v39  ;;  %v16371_v54 = vcombine.low %v4486_v40, %v4494_v41  ;;  %v4597_v28 = vld [vmem:[#allocation22 + $0x3b0] sm:$0xff]  ;;  %v4598_v40 = vld [vmem:[#allocation22 + $0x3b8] sm:$0xff] }
 0x9c1   :  { %5499 = vmatprep.subr.bf16.mxu0 %v16398_v55  ;;  %5540 = vmatprep.subr.bf16.mxu1 %v16400_v56  ;;  %v16386_v55 = vcombine.high %v4501_v48, %v4509_v51  ;;  %v16388_v56 = vcombine.high %v4502_v52, %v4510_v34  ;;  %v4605_v39 = vld [vmem:[#allocation22 + $0x3f0] sm:$0xff]  ;;  %v4606_v41 = vld [vmem:[#allocation22 + $0x3f8] sm:$0xff] }
 0x9c4   :  { %5500 = vmatpush1.bf16.msra.mxu0 %v16397_v61  ;;  %5541 = vmatpush1.bf16.msra.mxu1 %v16399_v62  ;;  %v16385_v61 = vcombine.low %v4501_v48, %v4509_v51  ;;  %v16387_v62 = vcombine.low %v4502_v52, %v4510_v34  ;;  %v16481_v48 = vcombine.low %v4597_v28, %v4605_v39 }
 0x9c5   :  { %5501 = vmatprep.subr.bf16.mxu0 %v16414_v63  ;;  %5542 = vmatprep.subr.bf16.mxu1 %v16416_v0  ;;  %v16402_v63 = vcombine.high %v4517_v57, %v4525_v58  ;;  %v16404_v0 = vcombine.high %v4518_v59, %v4526_v60  ;;  %v16483_v51 = vcombine.low %v4598_v40, %v4606_v41 }
 0x9c8   :  { %5502 = vmatpush1.bf16.msra.mxu0 %v16413_v5  ;;  %5543 = vmatpush1.bf16.msra.mxu1 %v16415_v7  ;;  %v16401_v5 = vcombine.low %v4517_v57, %v4525_v58  ;;  %v16403_v7 = vcombine.low %v4518_v59, %v4526_v60  ;;  %v4633_v59 = vsub.s32 5, %v21477_v20  ;;  %v4629_v60 = vsub.s32 4, %v21477_v20 }
 0x9c9   :  { %5503 = vmatprep.subr.bf16.mxu0 %v16430_v8  ;;  %5544 = vmatprep.subr.bf16.mxu1 %v16432_v9  ;;  %v16418_v8 = vcombine.high %v4533_v1, %v4541_v2  ;;  %v16420_v9 = vcombine.high %v4534_v3, %v4542_v4 }
 0x9cc   :  { %5504 = vmatpush1.bf16.msra.mxu0 %v16429_v49  ;;  %5545 = vmatpush1.bf16.msra.mxu1 %v16431_v15  ;;  %v16417_v49 = vcombine.low %v4533_v1, %v4541_v2  ;;  %v16419_v15 = vcombine.low %v4534_v3, %v4542_v4 }
 0x9cd   :  { %5505 = vmatprep.subr.bf16.mxu0 %v16446_v17  ;;  %5546 = vmatprep.subr.bf16.mxu1 %v16448_v6  ;;  %v16434_v17 = vcombine.high %v4549_v10, %v4557_v12  ;;  %v16436_v6 = vcombine.high %v4550_v45, %v4558_v13 }
 0x9d0   :  { %5506 = vmatpush1.bf16.msra.mxu0 %v16445_v27  ;;  %5547 = vmatpush1.bf16.msra.mxu1 %v16447_v29  ;;  %v16433_v27 = vcombine.low %v4549_v10, %v4557_v12  ;;  %v16435_v29 = vcombine.low %v4550_v45, %v4558_v13 }
 0x9d1   :  { %5507 = vmatprep.subr.bf16.mxu0 %v16462_v30  ;;  %5548 = vmatprep.subr.bf16.mxu1 %v16464_v11  ;;  %v16450_v30 = vcombine.high %v4565_v19, %v4573_v22  ;;  %v16452_v11 = vcombine.high %v4566_v23, %v4574_v26 }
 0x9d4   :  { %5508 = vmatpush1.bf16.msra.mxu0 %v16461_v16  ;;  %5549 = vmatpush1.bf16.msra.mxu1 %v16463_v36  ;;  %v16449_v16 = vcombine.low %v4565_v19, %v4573_v22  ;;  %v16451_v36 = vcombine.low %v4566_v23, %v4574_v26 }
 0x9d5   :  { %5509 = vmatprep.subr.bf16.mxu0 %v16478_v38  ;;  %5550 = vmatprep.subr.bf16.mxu1 %v16480_v50  ;;  %v16466_v38 = vcombine.high %v4581_v32, %v4589_v46  ;;  %v16468_v50 = vcombine.high %v4582_v24, %v4590_v33 }
 0x9d8   :  { %5510 = vmatpush1.bf16.msra.mxu0 %v16477_v43  ;;  %5551 = vmatpush1.bf16.msra.mxu1 %v16479_v44  ;;  %v16465_v43 = vcombine.low %v4581_v32, %v4589_v46  ;;  %v16467_v44 = vcombine.low %v4582_v24, %v4590_v33  ;;  %v4608_v32 = vld [vmem:[#allocation23 + $0x8] sm:$0xff] }
 0x9d9   :  { %5577 = vmatprep.subr.bf16.mxu0 %v16370_v47  ;;  %5618 = vmatprep.subr.bf16.mxu1 %v16372_v21  ;;  %v16482_v47 = vcombine.high %v4597_v28, %v4605_v39  ;;  %v16484_v21 = vcombine.high %v4598_v40, %v4606_v41  ;;  %v4650_v46 = vrot.slane %v4608_v32, %v21485_v35 }
 0x9da   :  { %v4646_v24 = vrot.slane %v4608_v32, %v21480_v31 }
 0x9db   :  { %5528 = vmatmul.mubr.bf16.vlgmr.msra.gmra.mrb[92].mxu0 %v21612_v37  ;;  %5569 = vmatmul.mubr.bf16.vlgmr.msra.gmra.mrb[76].mxu1 %v21612_v37 }
 0x9dc   :  { %5578 = vmatpush1.bf16.msra.mxu0 %v16369_v53  ;;  %5619 = vmatpush1.bf16.msra.mxu1 %v16371_v54 }
 0x9dd   :  { %5579 = vmatprep.subr.bf16.mxu0 %v16386_v55  ;;  %5620 = vmatprep.subr.bf16.mxu1 %v16388_v56 }
 0x9de   :  { %5609 = vmatprep.mubr.bf16.mxu0 %v21031_v42  ;;  %5650 = vmatprep.mubr.bf16.mxu1 %v21031_v42 }
 0x9e0   :  { %5580 = vmatpush1.bf16.msra.mxu0 %v16385_v61  ;;  %5621 = vmatpush1.bf16.msra.mxu1 %v16387_v62  ;;  %v4641_v61 = vsub.s32 7, %v21477_v20  ;;  %v4607_v62 = vld [vmem:[#allocation23] sm:$0xff] }
 0x9e1   :  { %5581 = vmatprep.subr.bf16.mxu0 %v16402_v63  ;;  %5622 = vmatprep.subr.bf16.mxu1 %v16404_v0  ;;  %v4634_v63 = vrot.slane %v4607_v62, %v4633_v59  ;;  %v4630_v0 = vrot.slane %v4607_v62, %v4629_v60  ;;  %v4626_v23 = vrot.slane %v4607_v62, %v21507_v18 }
 0x9e2   :  { %v4642_v3 = vrot.slane %v4607_v62, %v4641_v61 }
 0x9e4   :  { %5582 = vmatpush1.bf16.msra.mxu0 %v16401_v5  ;;  %5623 = vmatpush1.bf16.msra.mxu1 %v16403_v7 }
 0x9e5   :  { %5583 = vmatprep.subr.bf16.mxu0 %v16418_v8  ;;  %5624 = vmatprep.subr.bf16.mxu1 %v16420_v9  ;;  %v4618_v8 = vrot.slane %v4607_v62, %v21485_v35 }
 0x9e8   :  { %5584 = vmatpush1.bf16.msra.mxu0 %v16417_v49  ;;  %5625 = vmatpush1.bf16.msra.mxu1 %v16419_v15  ;;  %v5661_v15 = vld [vmem:[#allocation25 + $0x8] sm:$0xff] }
 0x9e9   :  { %5585 = vmatprep.subr.bf16.mxu0 %v16434_v17  ;;  %5626 = vmatprep.subr.bf16.mxu1 %v16436_v6  ;;  %v4614_v6 = vrot.slane %v4607_v62, %v21480_v31  ;;  %v4662_v31 = vrot.slane %v4608_v32, %v4629_v60 }
 0x9ec   :  { %5586 = vmatpush1.bf16.msra.mxu0 %v16433_v27  ;;  %5627 = vmatpush1.bf16.msra.mxu1 %v16435_v29  ;;  %v4622_v27 = vrot.slane %v4607_v62, %v21504_v14 }
 0x9ed   :  { %5587 = vmatprep.subr.bf16.mxu0 %v16450_v30  ;;  %5628 = vmatprep.subr.bf16.mxu1 %v16452_v11  ;;  %v5659_v30 = vld [vmem:[#allocation25] sm:$0xff] }
 0x9f0   :  { %5588 = vmatpush1.bf16.msra.mxu0 %v16449_v16  ;;  %5629 = vmatpush1.bf16.msra.mxu1 %v16451_v36  ;;  %v4658_v36 = vrot.slane %v4608_v32, %v21507_v18  ;;  %v4666_v18 = vrot.slane %v4608_v32, %v4633_v59 }
 0x9f1   :  { %5589 = vmatprep.subr.bf16.mxu0 %v16466_v38  ;;  %5630 = vmatprep.subr.bf16.mxu1 %v16468_v50  ;;  %v4654_v38 = vrot.slane %v4608_v32, %v21504_v14 }
 0x9f4   :  { %5590 = vmatpush1.bf16.msra.mxu0 %v16465_v43  ;;  %5631 = vmatpush1.bf16.msra.mxu1 %v16467_v44 }
 0x9f5   :  { %5591 = vmatprep.subr.bf16.mxu0 %v16482_v47  ;;  %5632 = vmatprep.subr.bf16.mxu1 %v16484_v21  ;;  %v5953_v21 = vld [vmem:[#allocation25 + $0x10] sm:$0xff] }
 0x9f8   :  { %5592 = vmatpush1.bf16.msra.mxu0 %v16481_v48  ;;  %5633 = vmatpush1.bf16.msra.mxu1 %v16483_v51  ;;  %v4674_v51 = vrot.slane %v4608_v32, %v4641_v61 }
 0x9fb   :  { %5610 = vmatmul.mubr.bf16.vlgmr.msra.gmra.mrb[96].mxu0 %v21612_v37  ;;  %5651 = vmatmul.mubr.bf16.vlgmr.msra.gmra.mrb[80].mxu1 %v21612_v37  ;;  %v4637_v37 = vsub.s32 6, %v21477_v20 }
 0x9fc   :  { %5729 = vmatprep.mubr.f32.mxu0 %v21029_v25  ;;  %6483 = vmatprep.mubr.bf16.mxu1 %v21031_v42 }
 0x9fd   :  { %v4638_v4 = vrot.slane %v4607_v62, %v4637_v37  ;;  %v4670_v14 = vrot.slane %v4608_v32, %v4637_v37  ;;  %v19782_v32 = vld [vmem:[%s23081_s11 + $0x40] sm:$0xff]  }
 0xa6e   :  { %v5365_v52 = vpop.f32.mrb[84].mxu0  ;;  %v5406_v34 = vpop.f32.mrb[68].mxu1 }
 0xa6f   :  { %v5367_v53 = vpop.f32.mrb[85].mxu0  ;;  %v5408_v54 = vpop.f32.mrb[69].mxu1  ;;  %v5366_v26 = vadd.f32 %v5365_v52, %v4614_v6  ;;  %v5407_v11 = vadd.f32 %v5406_v34, %v4622_v27  ;;  %v19775_v6 = vld [vmem:[%s23081_s11 + $0x8] sm:$0xff]   ;;  %v19778_v27 = vld [vmem:[%s23081_s11 + $0x20] sm:$0xff]  }
 0xa70   :  { %v5369_v55 = vpop.f32.mrb[86].mxu0  ;;  %v5410_v56 = vpop.f32.mrb[70].mxu1  ;;  %v5368_v22 = vadd.f32 %v5367_v53, %v4618_v8  ;;  %v5409_v29 = vadd.f32 %v5408_v54, %v4626_v23  ;;  %v19776_v23 = vld [vmem:[%s23081_s11 + $0x10] sm:$0xff]  }
 0xa71   :  { %v5370_v57 = vpop.f32.mrb[87].mxu0  ;;  %v5411_v58 = vpop.f32.mrb[71].mxu1 }
 0xa8e   :  { %v5447_v1 = vpop.f32.mrb[88].mxu0  ;;  %v5488_v2 = vpop.f32.mrb[72].mxu1 }
 0xa8f   :  { %v5449_v5 = vpop.f32.mrb[89].mxu0  ;;  %v5490_v7 = vpop.f32.mrb[73].mxu1  ;;  %v5448_v45 = vadd.f32 %v5447_v1, %v4630_v0  ;;  %v5489_v19 = vadd.f32 %v5488_v2, %v4638_v4  ;;  %v6104_v1 = vld [vmem:[#allocation25 + $0x18] sm:$0xff]  ;;  %v19788_v2 = vld [vmem:[#allocation26 + $0x140] sm:$0xff]  }
 0xa90   :  { %v5450_v9 = vadd.f32 %v5449_v5, %v4634_v63  ;;  %v5451_v10 = vpop.f32.mrb[90].mxu0  ;;  %v5492_v12 = vpop.f32.mrb[74].mxu1  ;;  %v5491_v17 = vadd.f32 %v5490_v7, %v4642_v3  ;;  %v19774_v5 = vld [vmem:[%s23081_s11] sm:$0xff]  }
 0xa91   :  { %v5452_v13 = vpop.f32.mrb[91].mxu0  ;;  %v5493_v49 = vpop.f32.mrb[75].mxu1  ;;  %v19792_v10 = vld [vmem:[#allocation26 + $0x1c0] sm:$0xff]  }
 0xa92   :  { %5665 = vmatprep.subr.mxu0 %v5450_v9  ;;  %v19790_v9 = vld [vmem:[#allocation26 + $0x100] sm:$0xff]   ;;  %v19793_v49 = vld [vmem:[#allocation26 + $0x108] sm:$0xff]  }
 0xa93   :  { %5666 = vmatpush1.msra.mxu0 %v5448_v45  ;;  %v19791_v45 = vld [vmem:[#allocation26 + $0x148] sm:$0xff]   ;;  %v19794_v13 = vld [vmem:[#allocation26 + $0x180] sm:$0xff]  }
 0xa94   :  { %16485 = vmatmul.mubr.msk.f32.vlgmr.msra.gmra.mrb[100].mxu0 %vm4026_vm11, %v5661_v15  ;;  %5736 = vmatprep.subr.mxu0 %v5491_v17  ;;  %v19795_v17 = vld [vmem:[#allocation26 + $0x150] sm:$0xff]  }
 0xa95   :  { %5737 = vmatpush1.msra.mxu0 %v5489_v19  ;;  %5800 = vmatprep.mubr.f32.mxu0 %v21029_v25  ;;  %v19799_v19 = vld [vmem:[#allocation26 + $0x188] sm:$0xff]  }
 0xa96   :  { %5810 = vmatprep.subr.mxu0 %v5368_v22  ;;  %v19798_v22 = vld [vmem:[#allocation26 + $0x110] sm:$0xff]  }
 0xa98   :  { %16486 = vmatmul.mubr.msk.f32.vlgmr.msra.gmra.mrb[102].mxu0 %vm4026_vm11, %v5661_v15  ;;  %v19796_v15 = vld [vmem:[#allocation26 + $0x1c8] sm:$0xff]  }
 0xa99   :  { %5811 = vmatpush1.msra.mxu0 %v5366_v26  ;;  %5874 = vmatprep.mubr.f32.mxu0 %v21029_v25  ;;  %v19777_v26 = vld [vmem:[%s23081_s11 + $0x18] sm:$0xff]  }
 0xa9a   :  { %5881 = vmatprep.subr.mxu0 %v5409_v29  ;;  %v19779_v29 = vld [vmem:[%s23081_s11 + $0x28] sm:$0xff]  }
 0xa9c   :  { %16487 = vmatmul.mubr.msk.f32.vlgmr.msra.gmra.mrb[100].mxu0 %vm4026_vm11, %v5659_v30 }
 0xa9d   :  { %5882 = vmatpush1.msra.mxu0 %v5407_v11  ;;  %5945 = vmatprep.mubr.f32.mxu0 %v21029_v25  ;;  %v19781_v11 = vld [vmem:[%s23081_s11 + $0x38] sm:$0xff]  }
 0xaa0   :  { %16488 = vmatmul.mubr.msk.f32.vlgmr.msra.gmra.mrb[102].mxu0 %vm4026_vm11, %v5659_v30  ;;  %v19780_v30 = vld [vmem:[%s23081_s11 + $0x30] sm:$0xff]  }
 0xaa1   :  { %6021 = vmatprep.mubr.f32.mxu0 %v21029_v25 }
 0xaae   :  { %v5529_v33 = vpop.f32.mrb[92].mxu0  ;;  %v5570_v16 = vpop.f32.mrb[76].mxu1 }
 0xaaf   :  { %v5531_v50 = vpop.f32.mrb[93].mxu0  ;;  %v5572_v28 = vpop.f32.mrb[77].mxu1  ;;  %v5530_v43 = vadd.f32 %v5529_v33, %v4646_v24  ;;  %v5571_v35 = vadd.f32 %v5570_v16, %v4654_v38  ;;  %v19784_v24 = vld [vmem:[%s23081_s11 + $0x50] sm:$0xff]   ;;  %v19785_v33 = vld [vmem:[%s23081_s11 + $0x58] sm:$0xff]  }
 0xab0   :  { %v5532_v39 = vadd.f32 %v5531_v50, %v4650_v46  ;;  %v5533_v40 = vpop.f32.mrb[94].mxu0  ;;  %v5574_v41 = vpop.f32.mrb[78].mxu1  ;;  %v5573_v48 = vadd.f32 %v5572_v28, %v4658_v36  ;;  %v19783_v46 = vld [vmem:[%s23081_s11 + $0x48] sm:$0xff]   ;;  %v19800_v16 = vld [vmem:[#allocation26 + $0x158] sm:$0xff]   ;;  %v19804_v28 = vld [vmem:[#allocation26 + $0x160] sm:$0xff]  }
 0xab1   :  { %v5534_v44 = vpop.f32.mrb[95].mxu0  ;;  %v5575_v47 = vpop.f32.mrb[79].mxu1  ;;  %v19801_v36 = vld [vmem:[#allocation26 + $0x1d0] sm:$0xff]   ;;  %v19802_v38 = vld [vmem:[#allocation26 + $0x118] sm:$0xff]   ;;  %v19807_v40 = vld [vmem:[#allocation26 + $0x120] sm:$0xff]  }
 0xab2   :  { %5957 = vmatprep.subr.mxu0 %v5532_v39  ;;  %v19803_v50 = vld [vmem:[#allocation26 + $0x190] sm:$0xff]   ;;  %v19805_v39 = vld [vmem:[#allocation26 + $0x1d8] sm:$0xff]   ;;  %v19809_v44 = vld [vmem:[#allocation26 + $0x168] sm:$0xff]  }
 0xab3   :  { %5958 = vmatpush1.msra.mxu0 %v5530_v43  ;;  %v19808_v41 = vld [vmem:[#allocation26 + $0x198] sm:$0xff]   ;;  %v19786_v43 = vld [vmem:[%s23081_s11 + $0x60] sm:$0xff]  }
 0xab4   :  { %6028 = vmatprep.subr.mxu0 %v5573_v48  ;;  %16489 = vmatmul.mubr.msk.f32.vlgmr.msra.gmra.mrb[100].mxu0 %vm4026_vm11, %v5953_v21  ;;  %v19810_v47 = vld [vmem:[#allocation26 + $0x1e0] sm:$0xff]  }
 0xab5   :  { %6029 = vmatpush1.msra.mxu0 %v5571_v35  ;;  %6092 = vmatprep.mubr.f32.mxu0 %v21029_v25  ;;  %v19812_v48 = vld [vmem:[#allocation26 + $0x1a0] sm:$0xff]   ;;  %v19813_v35 = vld [vmem:[#allocation26 + $0x170] sm:$0xff]  }
 0xab8   :  { %16490 = vmatmul.mubr.msk.f32.vlgmr.msra.gmra.mrb[102].mxu0 %vm4026_vm11, %v5953_v21  ;;  %v19811_v21 = vld [vmem:[#allocation26 + $0x128] sm:$0xff]  }
 0xab9   :  { %6172 = vmatprep.mubr.f32.mxu0 %v21029_v25 }
 0xace   :  { %v5611_v52 = vpop.f32.mrb[96].mxu0  ;;  %v5652_v34 = vpop.f32.mrb[80].mxu1 }
 0xacf   :  { %v5612_v53 = vadd.f32 %v5611_v52, %v4662_v31  ;;  %v5653_v54 = vadd.f32 %v5652_v34, %v4670_v14  ;;  %v5613_v55 = vpop.f32.mrb[97].mxu0  ;;  %v5654_v56 = vpop.f32.mrb[81].mxu1  ;;  %v19814_v31 = vld [vmem:[#allocation26 + $0x1e8] sm:$0xff]   ;;  %v19816_v14 = vld [vmem:[#allocation26 + $0x130] sm:$0xff]   ;;  %v19818_v52 = vld [vmem:[#allocation26 + $0x178] sm:$0xff]  }
 0xad0   :  { %v5614_v57 = vadd.f32 %v5613_v55, %v4666_v18  ;;  %v5655_v58 = vadd.f32 %v5654_v56, %v4674_v51  ;;  %v5615_v62 = vpop.f32.mrb[98].mxu0  ;;  %v5656_v63 = vpop.f32.mrb[82].mxu1  ;;  %v19817_v18 = vld [vmem:[#allocation26 + $0x1a8] sm:$0xff]   ;;  %v19819_v34 = vld [vmem:[#allocation26 + $0x1f0] sm:$0xff]   ;;  %v19822_v55 = vld [vmem:[#allocation26 + $0x1f8] sm:$0xff]  }
 0xad1   :  { %v5616_v60 = vpop.f32.mrb[99].mxu0  ;;  %v5657_v0 = vpop.f32.mrb[83].mxu1  ;;  %v19787_v51 = vld [vmem:[%s23081_s11 + $0x68] sm:$0xff]   ;;  %v19823_v56 = vld [vmem:[#allocation26 + $0x40] sm:$0xff]  }
 0xad2   :  { %6108 = vmatprep.subr.mxu0 %v5614_v57  ;;  %v19824_v57 = vld [vmem:[#allocation26 + $0x1b8] sm:$0xff]   ;;  %v19827_v62 = vld [vmem:[#allocation26 + $0xc0] sm:$0xff]   ;;  %v19815_v0 = vld [vmem:[%s23081_s11 + $0x88] sm:$0xff]  }
 0xad3   :  { %6109 = vmatpush1.msra.mxu0 %v5612_v53  ;;  %v19820_v53 = vld [vmem:[#allocation26 + $0x138] sm:$0xff]   ;;  %v19806_v60 = vld [vmem:[%s23081_s11 + $0x80] sm:$0xff]  }
 0xad4   :  { %16491 = vmatmul.mubr.msk.f32.vlgmr.msra.gmra.mrb[100].mxu0 %vm4026_vm11, %v6104_v1  ;;  %6179 = vmatprep.subr.mxu0 %v5655_v58  ;;  %v19789_v58 = vld [vmem:[%s23081_s11 + $0x70] sm:$0xff]   ;;  %v19797_v63 = vld [vmem:[%s23081_s11 + $0x78] sm:$0xff]  }
 0xad5   :  { %6180 = vmatpush1.msra.mxu0 %v5653_v54  ;;  %6243 = vmatprep.mubr.f32.mxu0 %v21029_v25  ;;  %v19821_v54 = vld [vmem:[#allocation26 + $0x1b0] sm:$0xff]  }
 0xad8   :  { %16492 = vmatmul.mubr.msk.f32.vlgmr.msra.gmra.mrb[102].mxu0 %vm4026_vm11, %v6104_v1 }
 0xad9   :  { %6696 = vmatprep.mubr.bf16.mxu0 %v21031_v42 }
 0xba7   :  { %v6174_v20 = vpop.f32.mrb[100].mxu0 }
 0xba8   :  { %v6254_v59 = vpack.c.bf16 %v6174_v20, %v6174_v20  ;;  %v6176_v61 = vpop.f32.mrb[101].mxu0 }
 0xba9   :  { %v6255_v37 = vpack.c.bf16 %v6176_v61, %v6176_v61 }
 0xbaa   :  { %v6440_v3 = vsel %vm6438_vm1, %v6254_v59, 0 }
 0xbab   :  { %v6245_v4 = vpop.f32.mrb[102].mxu0  ;;  %16511 = vmatprep.subr.msk.bf16.mxu1 %vm6438_vm1, %v6255_v37 }
 0xbac   :  { %v6256_v7 = vpack.c.bf16 %v6245_v4, %v6245_v4  ;;  %v6247_v8 = vpop.f32.mrb[103].mxu0  ;;  %6452 = vmatpush1.bf16.msra.mxu1 %v6440_v3 }
 0xbad   :  { %v6257_v25 = vpack.c.bf16 %v6247_v8, %v6247_v8  ;;  %17341 = vmatprep.subr.bf16.mxu1 %v19788_v2 }
 0xbae   :  { %v6446_v12 = vsel %vm6438_vm1, %v6256_v7, 0 }
 0xbaf   :  { %16512 = vmatmul.mubr.msk.bf16.vlgmr.msra.gmra.mrb[84].mxu1 %vm4026_vm11, %v19774_v5  ;;  %16530 = vmatprep.subr.msk.bf16.mxu0 %vm6438_vm1, %v6257_v25 }
 0xbb0   :  { %6665 = vmatpush1.bf16.msra.mxu0 %v6446_v12  ;;  %6493 = vmatprep.mubr.bf16.mxu1 %v21031_v42 }
 0xbb1   :  { %17342 = vmatpush3.bf16.msra.mxu1 %v19790_v9  ;;  %17369 = vmatprep.subr.bf16.mxu0 %v19792_v10 }
 0xbb2   :  { %17343 = vmatprep.subr.bf16.mxu1 %v19791_v45 }
 0xbb3   :  { %16531 = vmatmul.mubr.msk.bf16.vlgmr.msra.gmra.mrb[104].mxu0 %vm4026_vm11, %v19774_v5 }
 0xbb4   :  { %6706 = vmatprep.mubr.bf16.mxu0 %v21031_v42  ;;  %17370 = vmatpush3.bf16.msra.mxu0 %v19794_v13 }
 0xbb5   :  { %17344 = vmatpush3.bf16.msra.mxu1 %v19793_v49  ;;  %17371 = vmatprep.subr.bf16.mxu0 %v19796_v15 }
 0xbb6   :  { %17345 = vmatprep.subr.bf16.mxu1 %v19795_v17 }
 0xbb7   :  { %16513 = vmatmul.mubr.msk.bf16.gmra.mrb[88].mxu1 %vm4026_vm11, %v19775_v6 }
 0xbb8   :  { %6503 = vmatprep.mubr.bf16.mxu1 %v21031_v42  ;;  %17372 = vmatpush3.bf16.msra.mxu0 %v19799_v19 }
 0xbb9   :  { %17346 = vmatpush3.bf16.msra.mxu1 %v19798_v22  ;;  %17373 = vmatprep.subr.bf16.mxu0 %v19801_v36 }
 0xbba   :  { %17347 = vmatprep.subr.bf16.mxu1 %v19800_v16 }
 0xbbb   :  { %16532 = vmatmul.mubr.msk.bf16.gmra.mrb[108].mxu0 %vm4026_vm11, %v19775_v6 }
 0xbbc   :  { %6716 = vmatprep.mubr.bf16.mxu0 %v21031_v42  ;;  %17374 = vmatpush3.bf16.msra.mxu0 %v19803_v50 }
 0xbbd   :  { %17348 = vmatpush3.bf16.msra.mxu1 %v19802_v38  ;;  %17375 = vmatprep.subr.bf16.mxu0 %v19805_v39  ;;  %v19828_v39 = vld [vmem:[#allocation26 + $0x8] sm:$0xff]  }
 0xbbe   :  { %17349 = vmatprep.subr.bf16.mxu1 %v19804_v28 }
 0xbbf   :  { %16514 = vmatmul.mubr.msk.bf16.gmra.mrb[92].mxu1 %vm4026_vm11, %v19776_v23 }
 0xbc0   :  { %6513 = vmatprep.mubr.bf16.mxu1 %v21031_v42  ;;  %17376 = vmatpush3.bf16.msra.mxu0 %v19808_v41 }
 0xbc1   :  { %17350 = vmatpush3.bf16.msra.mxu1 %v19807_v40  ;;  %17377 = vmatprep.subr.bf16.mxu0 %v19810_v47  ;;  %v19829_v40 = vld [vmem:[#allocation26 + $0x80] sm:$0xff]  }
 0xbc2   :  { %17351 = vmatprep.subr.bf16.mxu1 %v19809_v44  ;;  %v19831_v44 = vld [vmem:[#allocation26 + $0xc8] sm:$0xff]  }
 0xbc3   :  { %16533 = vmatmul.mubr.msk.bf16.gmra.mrb[112].mxu0 %vm4026_vm11, %v19776_v23 }
 0xbc4   :  { %6726 = vmatprep.mubr.bf16.mxu0 %v21031_v42  ;;  %17378 = vmatpush3.bf16.msra.mxu0 %v19812_v48 }
 0xbc5   :  { %17352 = vmatpush3.bf16.msra.mxu1 %v19811_v21  ;;  %17379 = vmatprep.subr.bf16.mxu0 %v19814_v31 }
 0xbc6   :  { %17353 = vmatprep.subr.bf16.mxu1 %v19813_v35 }
 0xbc7   :  { %16515 = vmatmul.mubr.msk.bf16.gmra.mrb[96].mxu1 %vm4026_vm11, %v19777_v26 }
 0xbc8   :  { %6523 = vmatprep.mubr.bf16.mxu1 %v21031_v42  ;;  %17380 = vmatpush3.bf16.msra.mxu0 %v19817_v18  ;;  %v19833_v18 = vld [vmem:[#allocation26 + $0x88] sm:$0xff]  }
 0xbc9   :  { %17354 = vmatpush3.bf16.msra.mxu1 %v19816_v14  ;;  %17381 = vmatprep.subr.bf16.mxu0 %v19819_v34  ;;  %v19832_v14 = vld [vmem:[#allocation26 + $0x10] sm:$0xff]  }
 0xbca   :  { %17355 = vmatprep.subr.bf16.mxu1 %v19818_v52  ;;  %v19834_v52 = vld [vmem:[#allocation26 + $0x58] sm:$0xff]  }
 0xbcb   :  { %16534 = vmatmul.mubr.msk.bf16.gmra.mrb[116].mxu0 %vm4026_vm11, %v19777_v26 }
 0xbcc   :  { %6736 = vmatprep.mubr.bf16.mxu0 %v21031_v42  ;;  %17382 = vmatpush3.bf16.msra.mxu0 %v19821_v54 }
 0xbcd   :  { %17356 = vmatpush3.bf16.msra.mxu1 %v19820_v53  ;;  %17383 = vmatprep.subr.bf16.mxu0 %v19822_v55  ;;  %v19835_v53 = vld [vmem:[#allocation26 + $0xd0] sm:$0xff]  }
 0xbce   :  { %17397 = vmatprep.subr.bf16.mxu1 %v19823_v56 }
 0xbcf   :  { %16516 = vmatmul.mubr.msk.bf16.gmra.mrb[100].mxu1 %vm4026_vm11, %v19778_v27 }
 0xbd0   :  { %6533 = vmatprep.mubr.bf16.mxu1 %v21031_v42  ;;  %17384 = vmatpush3.bf16.msra.mxu0 %v19824_v57  ;;  %v19836_v57 = vld [vmem:[#allocation26 + $0x18] sm:$0xff]  }
 0xbd1   :  { %17425 = vmatprep.subr.bf16.mxu0 %v19827_v62 }
 0xbd3   :  { %16535 = vmatmul.mubr.msk.bf16.gmra.mrb[120].mxu0 %vm4026_vm11, %v19778_v27 }
 0xbd4   :  { %6746 = vmatprep.mubr.bf16.mxu0 %v21031_v42 }
 0xbd7   :  { %16517 = vmatmul.mubr.msk.bf16.gmra.mrb[104].mxu1 %vm4026_vm11, %v19779_v29 }
 0xbd8   :  { %6543 = vmatprep.mubr.bf16.mxu1 %v21031_v42 }
 0xbdb   :  { %16536 = vmatmul.mubr.msk.bf16.gmra.mrb[124].mxu0 %vm4026_vm11, %v19779_v29 }
 0xbdc   :  { %6756 = vmatprep.mubr.bf16.mxu0 %v21031_v42 }
 0xbdf   :  { %16518 = vmatmul.mubr.msk.bf16.gmra.mrb[108].mxu1 %vm4026_vm11, %v19780_v30 }
 0xbe0   :  { %6553 = vmatprep.mubr.bf16.mxu1 %v21031_v42 }
 0xbe3   :  { %16537 = vmatmul.mubr.msk.bf16.gmra.mrb[128].mxu0 %vm4026_vm11, %v19780_v30 }
 0xbe4   :  { %6766 = vmatprep.mubr.bf16.mxu0 %v21031_v42 }
 0xbe7   :  { %16519 = vmatmul.mubr.msk.bf16.gmra.mrb[112].mxu1 %vm4026_vm11, %v19781_v11 }
 0xbe8   :  { %6563 = vmatprep.mubr.bf16.mxu1 %v21031_v42 }
 0xbeb   :  { %16538 = vmatmul.mubr.msk.bf16.gmra.mrb[132].mxu0 %vm4026_vm11, %v19781_v11 }
 0xbec   :  { %6776 = vmatprep.mubr.bf16.mxu0 %v21031_v42 }
 0xbef   :  { %16520 = vmatmul.mubr.msk.bf16.gmra.mrb[116].mxu1 %vm4026_vm11, %v19782_v32 }
 0xbf0   :  { %6573 = vmatprep.mubr.bf16.mxu1 %v21031_v42 }
 0xbf3   :  { %16539 = vmatmul.mubr.msk.bf16.gmra.mrb[136].mxu0 %vm4026_vm11, %v19782_v32 }
 0xbf4   :  { %6786 = vmatprep.mubr.bf16.mxu0 %v21031_v42 }
 0xbf7   :  { %16521 = vmatmul.mubr.msk.bf16.gmra.mrb[120].mxu1 %vm4026_vm11, %v19783_v46 }
 0xbf8   :  { %6583 = vmatprep.mubr.bf16.mxu1 %v21031_v42 }
 0xbfb   :  { %16540 = vmatmul.mubr.msk.bf16.gmra.mrb[140].mxu0 %vm4026_vm11, %v19783_v46  ;;  %v19825_v46 = vld [vmem:[#allocation26] sm:$0xff]  }
 0xbfc   :  { %6796 = vmatprep.mubr.bf16.mxu0 %v21031_v42 }
 0xbff   :  { %16522 = vmatmul.mubr.msk.bf16.gmra.mrb[124].mxu1 %vm4026_vm11, %v19784_v24 }
 0xc00   :  { %6593 = vmatprep.mubr.bf16.mxu1 %v21031_v42 }
 0xc03   :  { %16541 = vmatmul.mubr.msk.bf16.gmra.mrb[144].mxu0 %vm4026_vm11, %v19784_v24 }
 0xc04   :  { %6806 = vmatprep.mubr.bf16.mxu0 %v21031_v42 }
 0xc07   :  { %16523 = vmatmul.mubr.msk.bf16.gmra.mrb[128].mxu1 %vm4026_vm11, %v19785_v33 }
 0xc08   :  { %6603 = vmatprep.mubr.bf16.mxu1 %v21031_v42 }
 0xc0b   :  { %16542 = vmatmul.mubr.msk.bf16.gmra.mrb[148].mxu0 %vm4026_vm11, %v19785_v33  ;;  %v19826_v33 = vld [vmem:[#allocation26 + $0x48] sm:$0xff]  }
 0xc0c   :  { %6816 = vmatprep.mubr.bf16.mxu0 %v21031_v42 }
 0xc0f   :  { %16524 = vmatmul.mubr.msk.bf16.gmra.mrb[132].mxu1 %vm4026_vm11, %v19786_v43 }
 0xc10   :  { %6613 = vmatprep.mubr.bf16.mxu1 %v21031_v42 }
 0xc13   :  { %16543 = vmatmul.mubr.msk.bf16.gmra.mrb[152].mxu0 %vm4026_vm11, %v19786_v43  ;;  %v19830_v43 = vld [vmem:[#allocation26 + $0x50] sm:$0xff]  }
 0xc14   :  { %6826 = vmatprep.mubr.bf16.mxu0 %v21031_v42 }
 0xc17   :  { %16525 = vmatmul.mubr.msk.bf16.gmra.mrb[136].mxu1 %vm4026_vm11, %v19787_v51 }
 0xc18   :  { %6623 = vmatprep.mubr.bf16.mxu1 %v21031_v42 }
 0xc1b   :  { %16544 = vmatmul.mubr.msk.bf16.gmra.mrb[156].mxu0 %vm4026_vm11, %v19787_v51 }
 0xc1c   :  { %6836 = vmatprep.mubr.bf16.mxu0 %v21031_v42 }
 0xc1f   :  { %16526 = vmatmul.mubr.msk.bf16.gmra.mrb[140].mxu1 %vm4026_vm11, %v19789_v58 }
 0xc20   :  { %6633 = vmatprep.mubr.bf16.mxu1 %v21031_v42 }
 0xc23   :  { %16545 = vmatmul.mubr.msk.bf16.gmra.mrb[160].mxu0 %vm4026_vm11, %v19789_v58  ;;  %v19837_v58 = vld [vmem:[#allocation26 + $0x90] sm:$0xff]  }
 0xc24   :  { %6846 = vmatprep.mubr.bf16.mxu0 %v21031_v42 }
 0xc27   :  { %16527 = vmatmul.mubr.msk.bf16.gmra.mrb[144].mxu1 %vm4026_vm11, %v19797_v63 }
 0xc28   :  { %6643 = vmatprep.mubr.bf16.mxu1 %v21031_v42 }
 0xc2b   :  { %16546 = vmatmul.mubr.msk.bf16.gmra.mrb[164].mxu0 %vm4026_vm11, %v19797_v63  ;;  %v19838_v63 = vld [vmem:[#allocation26 + $0x60] sm:$0xff]  }
 0xc2c   :  { %6856 = vmatprep.mubr.bf16.mxu0 %v21031_v42 }
 0xc2f   :  { %16528 = vmatmul.mubr.msk.bf16.gmra.mrb[148].mxu1 %vm4026_vm11, %v19806_v60 }
 0xc30   :  { %6653 = vmatprep.mubr.bf16.mxu1 %v21031_v42 }
 0xc33   :  { %16547 = vmatmul.mubr.msk.bf16.gmra.mrb[168].mxu0 %vm4026_vm11, %v19806_v60 }
 0xc34   :  { %6866 = vmatprep.mubr.bf16.mxu0 %v21031_v42 }
 0xc37   :  { %16529 = vmatmul.mubr.msk.bf16.gmra.mrb[152].mxu1 %vm4026_vm11, %v19815_v0 }
 0xc3b   :  { %16548 = vmatmul.mubr.msk.bf16.gmra.mrb[172].mxu0 %vm4026_vm11, %v19815_v0  ;;  %v19839_v0 = vld [vmem:[#allocation26 + $0xd8] sm:$0xff]  }
 0xc82   :  { %v21766_v1 = vpop.f32.mrb[84].mxu1 }
 0xc83   :  { %v21768_v20 = vpop.f32.mrb[85].mxu1 }
 0xc84   :  { %v21770_v59 = vpop.f32.mrb[86].mxu1 }
 0xc85   :  { %v6877_v61 = vpack.c.bf16 %v21770_v59, %v21766_v1  ;;  %v21774_v37 = vpop.f32.mrb[87].mxu1  ;;  %v19860_v1 = vld [vmem:[#allocation26 + $0x208] sm:$0xff]  }
 0xc86   :  { %v6878_v2 = vpack.c.bf16 %v21774_v37, %v21768_v20  ;;  %v21778_v3 = vpop.f32.mrb[104].mxu0  ;;  %v19841_v20 = vld [vmem:[#allocation26 + $0x98] sm:$0xff]   ;;  %v19863_v59 = vld [vmem:[#allocation26 + $0x2c8] sm:$0xff]  }
 0xc87   :  { %v21780_v42 = vpop.f32.mrb[105].mxu0 }
 0xc88   :  { %v21782_v4 = vpop.f32.mrb[106].mxu0 }
 0xc89   :  { %v6879_v5 = vpack.c.bf16 %v21782_v4, %v21778_v3  ;;  %v21786_v7 = vpop.f32.mrb[107].mxu0  ;;  %v19864_v3 = vld [vmem:[#allocation26 + $0x210] sm:$0xff]  }
 0xc8a   :  { %v6880_v8 = vpack.c.bf16 %v21786_v7, %v21780_v42  ;;  %v21790_v25 = vpop.f32.mrb[88].mxu1  ;;  %v19867_v4 = vld [vmem:[#allocation26 + $0x2d0] sm:$0xff]  }
 0xc8b   :  { %v21792_v9 = vpop.f32.mrb[89].mxu1 }
 0xc8c   :  { %v21794_v10 = vpop.f32.mrb[90].mxu1 }
 0xc8d   :  { %v6881_v12 = vpack.c.bf16 %v21794_v10, %v21790_v25  ;;  %v21798_v45 = vpop.f32.mrb[91].mxu1  ;;  %v19868_v25 = vld [vmem:[#allocation26 + $0x218] sm:$0xff]  }
 0xc8e   :  { %v6882_v13 = vpack.c.bf16 %v21798_v45, %v21792_v9  ;;  %v21802_v49 = vpop.f32.mrb[108].mxu0  ;;  %v19871_v10 = vld [vmem:[#allocation26 + $0x2d8] sm:$0xff]  }
 0xc8f   :  { %v21804_v15 = vpop.f32.mrb[109].mxu0  ;;  %v19882_v9 = vld [vmem:[#allocation26 + $0x278] sm:$0xff]  }
 0xc90   :  { %v21806_v17 = vpop.f32.mrb[110].mxu0 }
 0xc91   :  { %v6883_v6 = vpack.c.bf16 %v21806_v17, %v21802_v49  ;;  %v21810_v19 = vpop.f32.mrb[111].mxu0  ;;  %v19872_v49 = vld [vmem:[#allocation26 + $0x220] sm:$0xff]  }
 0xc92   :  { %v6884_v22 = vpack.c.bf16 %v21810_v19, %v21804_v15  ;;  %v6505_v23 = vpop.f32.mrb[92].mxu1  ;;  %v19875_v17 = vld [vmem:[#allocation26 + $0x2e0] sm:$0xff]   ;;  %v19881_v15 = vld [vmem:[#allocation26 + $0x2a8] sm:$0xff]  }
 0xc93   :  { %v6507_v26 = vpop.f32.mrb[93].mxu1 }
 0xc94   :  { %v6509_v27 = vpop.f32.mrb[94].mxu1 }
 0xc95   :  { %v6885_v29 = vpack.c.bf16 %v6509_v27, %v6505_v23  ;;  %v6511_v30 = vpop.f32.mrb[95].mxu1 }
 0xc96   :  { %v6886_v11 = vpack.c.bf16 %v6511_v30, %v6507_v26  ;;  %v6718_v32 = vpop.f32.mrb[112].mxu0  ;;  %v19842_v30 = vld [vmem:[#allocation26 + $0x68] sm:$0xff]  }
 0xc97   :  { %v6720_v24 = vpop.f32.mrb[113].mxu0 }
 0xc98   :  { %v6722_v16 = vpop.f32.mrb[114].mxu0  ;;  %7302 = vmatprep.mubr.bf16.mxu1 %v6886_v11  ;;  %v19843_v11 = vld [vmem:[#allocation26 + $0xe0] sm:$0xff]  }
 0xc99   :  { %v6887_v36 = vpack.c.bf16 %v6722_v16, %v6718_v32  ;;  %v6724_v38 = vpop.f32.mrb[115].mxu0  ;;  %7303 = vmatmul.mubr.bf16.vlgmr.msra.gmra.mrb[156].mxu1 %v6885_v29  ;;  %v19840_v29 = vld [vmem:[#allocation26 + $0x20] sm:$0xff]   ;;  %v19844_v16 = vld [vmem:[#allocation26 + $0x28] sm:$0xff]  }
 0xc9a   :  { %v6888_v50 = vpack.c.bf16 %v6724_v38, %v6720_v24  ;;  %17398 = vmatpush3.bf16.msra.mxu1 %v19825_v46  ;;  %v6515_v28 = vpop.f32.mrb[96].mxu1  ;;  %v19847_v38 = vld [vmem:[#allocation26 + $0xe8] sm:$0xff]  }
 0xc9b   :  { %v6517_v41 = vpop.f32.mrb[97].mxu1  ;;  %17399 = vmatprep.subr.bf16.mxu1 %v19826_v33  ;;  %v19895_v24 = vld [vmem:[#allocation26 + $0x3c8] sm:$0xff]  }
 0xc9c   :  { %v6519_v47 = vpop.f32.mrb[98].mxu1  ;;  %7351 = vmatprep.mubr.bf16.mxu0 %v6888_v50 }
 0xc9d   :  { %v6889_v21 = vpack.c.bf16 %v6519_v47, %v6515_v28  ;;  %v6521_v48 = vpop.f32.mrb[99].mxu1  ;;  %7352 = vmatmul.mubr.bf16.vlgmr.msra.gmra.mrb[176].mxu0 %v6887_v36  ;;  %v19845_v36 = vld [vmem:[#allocation26 + $0xa0] sm:$0xff]  }
 0xc9e   :  { %v6890_v35 = vpack.c.bf16 %v6521_v48, %v6517_v41  ;;  %17400 = vmatpush3.bf16.msra.mxu1 %v19828_v39  ;;  %17426 = vmatpush3.bf16.msra.mxu0 %v19829_v40  ;;  %v6728_v31 = vpop.f32.mrb[116].mxu0  ;;  %v19848_v41 = vld [vmem:[#allocation26 + $0x30] sm:$0xff]   ;;  %v19890_v39 = vld [vmem:[#allocation26 + $0x348] sm:$0xff]  }
 0xc9f   :  { %v6730_v51 = vpop.f32.mrb[117].mxu0  ;;  %17401 = vmatprep.subr.bf16.mxu1 %v19830_v43  ;;  %17427 = vmatprep.subr.bf16.mxu0 %v19831_v44  ;;  %v19849_v43 = vld [vmem:[#allocation26 + $0xa8] sm:$0xff]   ;;  %v19851_v48 = vld [vmem:[#allocation26 + $0xf0] sm:$0xff]  }
 0xca0   :  { %v6732_v34 = vpop.f32.mrb[118].mxu0  ;;  %7310 = vmatprep.mubr.bf16.mxu1 %v6890_v35 }
 0xca1   :  { %v6891_v54 = vpack.c.bf16 %v6732_v34, %v6728_v31  ;;  %v6734_v55 = vpop.f32.mrb[119].mxu0  ;;  %7311 = vmatmul.mubr.bf16.gmra.mrb[160].mxu1 %v6889_v21  ;;  %v19850_v21 = vld [vmem:[#allocation26 + $0x78] sm:$0xff]  }
 0xca2   :  { %v6892_v56 = vpack.c.bf16 %v6734_v55, %v6730_v51  ;;  %17402 = vmatpush3.bf16.msra.mxu1 %v19832_v14  ;;  %17428 = vmatpush3.bf16.msra.mxu0 %v19833_v18  ;;  %v21814_v62 = vpop.f32.mrb[100].mxu1  ;;  %v19852_v51 = vld [vmem:[#allocation26 + $0x38] sm:$0xff]   ;;  %v19855_v55 = vld [vmem:[#allocation26 + $0x240] sm:$0xff]  }
 0xca3   :  { %7592 = vmatprep.mubr.bf16.mxu1 %v6878_v2  ;;  %17403 = vmatprep.subr.bf16.mxu1 %v19834_v52  ;;  %v21819_v60 = vpop.f32.mrb[101].mxu1  ;;  %v19853_v52 = vld [vmem:[#allocation26 + $0xb0] sm:$0xff]   ;;  %v19888_v14 = vld [vmem:[#allocation26 + $0x2b8] sm:$0xff]  }
 0xca4   :  { %7359 = vmatprep.mubr.bf16.mxu0 %v6892_v56  ;;  %17429 = vmatprep.subr.bf16.mxu0 %v19835_v53  ;;  %v21821_v23 = vpop.f32.mrb[102].mxu1 }
 0xca5   :  { %7360 = vmatmul.mubr.bf16.gmra.mrb[180].mxu0 %v6891_v54  ;;  %v6893_v26 = vpack.c.bf16 %v21821_v23, %v21814_v62  ;;  %v21825_v27 = vpop.f32.mrb[103].mxu1  ;;  %v19854_v54 = vld [vmem:[#allocation26 + $0xf8] sm:$0xff]  }
 0xca6   :  { %17404 = vmatpush3.bf16.msra.mxu1 %v19836_v57  ;;  %17430 = vmatpush3.bf16.msra.mxu0 %v19837_v58  ;;  %v21827_v37 = vpop.f32.mrb[120].mxu0  ;;  %v6894_v2 = vpack.c.bf16 %v21825_v27, %v21819_v60  ;;  %v19887_v58 = vld [vmem:[#allocation26 + $0x340] sm:$0xff]  }
 0xca7   :  { %7641 = vmatprep.mubr.bf16.mxu0 %v6880_v8  ;;  %17405 = vmatprep.subr.bf16.mxu1 %v19838_v63  ;;  %v21834_v32 = vpop.f32.mrb[121].mxu0  ;;  %v19846_v8 = vld [vmem:[#allocation26 + $0x70] sm:$0xff]  }
 0xca8   :  { %17431 = vmatprep.subr.bf16.mxu0 %v19839_v0  ;;  %v21836_v46 = vpop.f32.mrb[122].mxu0  ;;  %v19856_v0 = vld [vmem:[#allocation26 + $0xb8] sm:$0xff]  }
 0xca9   :  { %v21840_v33 = vpop.f32.mrb[123].mxu0  ;;  %v23084_v23 = vpack.c.bf16 %v21836_v46, %v21827_v37  ;;  %v19896_v37 = vld [vmem:[#allocation26 + $0x310] sm:$0xff]  }
 0xcaa   :  { %17406 = vmatpush3.bf16.msra.mxu1 %v19840_v29  ;;  %17432 = vmatpush3.bf16.msra.mxu0 %v19841_v20  ;;  %v6896_v42 = vpack.c.bf16 %v21840_v33, %v21834_v32  ;;  %v21844_v7 = vpop.f32.mrb[104].mxu1  ;;  %v19877_v33 = vld [vmem:[#allocation26 + $0x2a0] sm:$0xff]   ;;  %v19899_v46 = vld [vmem:[#allocation26 + $0x3d0] sm:$0xff]  }
 0xcab   :  { %17407 = vmatprep.subr.bf16.mxu1 %v19842_v30  ;;  %17433 = vmatprep.subr.bf16.mxu0 %v19843_v11  ;;  %v21846_v50 = vpop.f32.mrb[105].mxu1  ;;  %v19857_v30 = vld [vmem:[#allocation26 + $0x200] sm:$0xff]  }
 0xcac   :  { %v21848_v28 = vpop.f32.mrb[106].mxu1  ;;  %v19859_v11 = vld [vmem:[#allocation26 + $0x2c0] sm:$0xff]  }
 0xcad   :  { %v21852_v40 = vpop.f32.mrb[107].mxu1  ;;  %v19891_v20 = vld [vmem:[#allocation26 + $0x3c0] sm:$0xff]  }
 0xcae   :  { %17408 = vmatpush3.bf16.msra.mxu1 %v19844_v16  ;;  %17434 = vmatpush3.bf16.msra.mxu0 %v19845_v36  ;;  %v21854_v44 = vpop.f32.mrb[124].mxu0  ;;  %v19858_v36 = vld [vmem:[#allocation26 + $0x248] sm:$0xff]  }
 0xcaf   :  { %17409 = vmatprep.subr.bf16.mxu1 %v19846_v8  ;;  %17435 = vmatprep.subr.bf16.mxu0 %v19847_v38  ;;  %v21858_v35 = vpop.f32.mrb[125].mxu0  ;;  %v19885_v38 = vld [vmem:[#allocation26 + $0x2b0] sm:$0xff]  }
 0xcb0   :  { %v21860_v31 = vpop.f32.mrb[126].mxu0 }
 0xcb1   :  { %v21864_v18 = vpop.f32.mrb[127].mxu0 }
 0xcb2   :  { %17410 = vmatpush3.bf16.msra.mxu1 %v19848_v41  ;;  %17436 = vmatpush3.bf16.msra.mxu0 %v19849_v43  ;;  %v21868_v53 = vpop.f32.mrb[108].mxu1  ;;  %v19861_v43 = vld [vmem:[#allocation26 + $0x280] sm:$0xff]  }
 0xcb3   :  { %17411 = vmatprep.subr.bf16.mxu1 %v19850_v21  ;;  %17437 = vmatprep.subr.bf16.mxu0 %v19851_v48  ;;  %v21870_v56 = vpop.f32.mrb[109].mxu1 }
 0xcb4   :  { %v21872_v57 = vpop.f32.mrb[110].mxu1 }
 0xcb5   :  { %v21876_v63 = vpop.f32.mrb[111].mxu1 }
 0xcb6   :  { %17412 = vmatpush3.bf16.msra.mxu1 %v19852_v51  ;;  %17438 = vmatpush3.bf16.msra.mxu0 %v19853_v52  ;;  %v21878_v29 = vpop.f32.mrb[128].mxu0  ;;  %v19862_v51 = vld [vmem:[#allocation26 + $0x250] sm:$0xff]  }
 0xcb7   :  { %17439 = vmatprep.subr.bf16.mxu0 %v19854_v54  ;;  %17453 = vmatprep.subr.bf16.mxu1 %v19855_v55  ;;  %v21882_v16 = vpop.f32.mrb[129].mxu0  ;;  %v19886_v55 = vld [vmem:[#allocation26 + $0x2f8] sm:$0xff]  }
 0xcb8   :  { %v21884_v8 = vpop.f32.mrb[130].mxu0 }
 0xcb9   :  { %7593 = vmatmul.mubr.bf16.vlgmr.msra.gmra.mrb[164].mxu1 %v6877_v61  ;;  %v21891_v41 = vpop.f32.mrb[131].mxu0 }
 0xcba   :  { %7600 = vmatprep.mubr.bf16.mxu1 %v6882_v13  ;;  %17440 = vmatpush3.bf16.msra.mxu0 %v19856_v0  ;;  %v21898_v48 = vpop.f32.mrb[112].mxu1  ;;  %v19865_v13 = vld [vmem:[#allocation26 + $0x288] sm:$0xff]   ;;  %v19866_v0 = vld [vmem:[#allocation26 + $0x258] sm:$0xff]  }
 0xcbb   :  { %17454 = vmatpush3.bf16.msra.mxu1 %v19857_v30  ;;  %17481 = vmatprep.subr.bf16.mxu0 %v19859_v11  ;;  %v21900_v61 = vpop.f32.mrb[113].mxu1 }
 0xcbc   :  { %17455 = vmatprep.subr.bf16.mxu1 %v19858_v36  ;;  %v21902_v52 = vpop.f32.mrb[114].mxu1 }
 0xcbd   :  { %7642 = vmatmul.mubr.bf16.vlgmr.msra.gmra.mrb[184].mxu0 %v6879_v5  ;;  %v21909_v45 = vpop.f32.mrb[115].mxu1 }
 0xcbe   :  { %7649 = vmatprep.mubr.bf16.mxu0 %v6884_v22  ;;  %17482 = vmatpush3.bf16.msra.mxu0 %v19861_v43  ;;  %v21914_v54 = vpop.f32.mrb[132].mxu0  ;;  %v19869_v22 = vld [vmem:[#allocation26 + $0x290] sm:$0xff]   ;;  %v19870_v43 = vld [vmem:[#allocation26 + $0x260] sm:$0xff]  }
 0xcbf   :  { %17456 = vmatpush3.bf16.msra.mxu1 %v19860_v1  ;;  %17483 = vmatprep.subr.bf16.mxu0 %v19863_v59  ;;  %v21918_v5 = vpop.f32.mrb[133].mxu0 }
 0xcc0   :  { %17457 = vmatprep.subr.bf16.mxu1 %v19862_v51  ;;  %v21920_v30 = vpop.f32.mrb[134].mxu0  ;;  %v19883_v51 = vld [vmem:[#allocation26 + $0x2f0] sm:$0xff]  }
 0xcc1   :  { %7601 = vmatmul.mubr.bf16.gmra.mrb[168].mxu1 %v6881_v12  ;;  %v21927_v19 = vpop.f32.mrb[135].mxu0 }
 0xcc2   :  { %17484 = vmatpush3.bf16.msra.mxu0 %v19865_v13  ;;  %7947 = vmatprep.mubr.bf16.mxu1 %v6894_v2  ;;  %v21934_v36 = vpop.f32.mrb[116].mxu1  ;;  %v19873_v2 = vld [vmem:[#allocation26 + $0x298] sm:$0xff]   ;;  %v19874_v13 = vld [vmem:[#allocation26 + $0x268] sm:$0xff]  }
 0xcc3   :  { %17458 = vmatpush3.bf16.msra.mxu1 %v19864_v3  ;;  %17485 = vmatprep.subr.bf16.mxu0 %v19867_v4  ;;  %v21936_v12 = vpop.f32.mrb[117].mxu1  ;;  %v19894_v4 = vld [vmem:[#allocation26 + $0x350] sm:$0xff]  }
 0xcc4   :  { %17459 = vmatprep.subr.bf16.mxu1 %v19866_v0  ;;  %v21938_v1 = vpop.f32.mrb[118].mxu1 }
 0xcc5   :  { %7650 = vmatmul.mubr.bf16.gmra.mrb[188].mxu0 %v6883_v6  ;;  %v21945_v27 = vpop.f32.mrb[119].mxu1 }
 0xcc6   :  { %17486 = vmatpush3.bf16.msra.mxu0 %v19869_v22  ;;  %7996 = vmatprep.mubr.bf16.mxu0 %v6896_v42  ;;  %v21950_v59 = vpop.f32.mrb[136].mxu0  ;;  %v19876_v22 = vld [vmem:[#allocation26 + $0x228] sm:$0xff]  }
 0xcc7   :  { %17460 = vmatpush3.bf16.msra.mxu1 %v19868_v25  ;;  %17487 = vmatprep.subr.bf16.mxu0 %v19871_v10  ;;  %v21954_v6 = vpop.f32.mrb[137].mxu0  ;;  %v19879_v25 = vld [vmem:[#allocation26 + $0x2e8] sm:$0xff]  }
 0xcc8   :  { %17461 = vmatprep.subr.bf16.mxu1 %v19870_v43  ;;  %v21956_v3 = vpop.f32.mrb[138].mxu0  ;;  %v19878_v43 = vld [vmem:[#allocation26 + $0x270] sm:$0xff]  }
 0xcc9   :  { %v21960_v32 = vpop.f32.mrb[139].mxu0 }
 0xcca   :  { %17488 = vmatpush3.bf16.msra.mxu0 %v19873_v2  ;;  %v21964_v0 = vpop.f32.mrb[120].mxu1 }
 0xccb   :  { %17462 = vmatpush3.bf16.msra.mxu1 %v19872_v49  ;;  %17489 = vmatprep.subr.bf16.mxu0 %v19875_v17  ;;  %v21966_v10 = vpop.f32.mrb[121].mxu1  ;;  %v19880_v17 = vld [vmem:[#allocation26 + $0x230] sm:$0xff]  }
 0xccc   :  { %17463 = vmatprep.subr.bf16.mxu1 %v19874_v13  ;;  %v21968_v60 = vpop.f32.mrb[122].mxu1 }
 0xccd   :  { %v21972_v2 = vpop.f32.mrb[123].mxu1 }
 0xcce   :  { %17490 = vmatpush3.bf16.msra.mxu0 %v19877_v33  ;;  %v21974_v42 = vpop.f32.mrb[140].mxu0 }
 0xccf   :  { %17464 = vmatpush3.bf16.msra.mxu1 %v19876_v22  ;;  %17491 = vmatprep.subr.bf16.mxu0 %v19879_v25  ;;  %v21978_v13 = vpop.f32.mrb[141].mxu0  ;;  %v19884_v25 = vld [vmem:[#allocation26 + $0x238] sm:$0xff]  }
 0xcd0   :  { %17465 = vmatprep.subr.bf16.mxu1 %v19878_v43  ;;  %v21980_v11 = vpop.f32.mrb[142].mxu0 }
 0xcd1   :  { %v21984_v33 = vpop.f32.mrb[143].mxu0 }
 0xcd2   :  { %17492 = vmatpush3.bf16.msra.mxu0 %v19881_v15  ;;  %v21988_v22 = vpop.f32.mrb[124].mxu1 }
 0xcd3   :  { %17466 = vmatpush3.bf16.msra.mxu1 %v19880_v17  ;;  %17493 = vmatprep.subr.bf16.mxu0 %v19883_v51  ;;  %v21990_v43 = vpop.f32.mrb[125].mxu1  ;;  %v19889_v17 = vld [vmem:[#allocation26 + $0x300] sm:$0xff]  }
 0xcd4   :  { %17467 = vmatprep.subr.bf16.mxu1 %v19882_v9  ;;  %v21992_v21 = vpop.f32.mrb[126].mxu1 }
 0xcd5   :  { %v21996_v15 = vpop.f32.mrb[127].mxu1 }
 0xcd6   :  { %17494 = vmatpush3.bf16.msra.mxu0 %v19885_v38  ;;  %v21998_v49 = vpop.f32.mrb[144].mxu0 }
 0xcd7   :  { %23082 = vst [vmem:[#allocation74_spill] sm:$0xff] %v21998_v49  ;;  %17468 = vmatpush3.bf16.msra.mxu1 %v19884_v25  ;;  %17495 = vmatprep.subr.bf16.mxu0 %v19886_v55  ;;  %v22002_v9 = vpop.f32.mrb[145].mxu0  ;;  %v19893_v25 = vld [vmem:[#allocation26 + $0x380] sm:$0xff]   ;;  %v23083_v49 = vpack.c.bf16 %v21852_v40, %v21846_v50 }
 0xcd8   :  { %17509 = vmatprep.subr.bf16.mxu1 %v19887_v58  ;;  %v22004_v34 = vpop.f32.mrb[146].mxu0  ;;  %v19892_v58 = vld [vmem:[#allocation26 + $0x308] sm:$0xff]  }
 0xcd9   :  { %v22008_v38 = vpop.f32.mrb[147].mxu0 }
 0xcda   :  { %7948 = vmatmul.mubr.bf16.vlgmr.msra.gmra.mrb[172].mxu1 %v6893_v26  ;;  %17496 = vmatpush3.bf16.msra.mxu0 %v19888_v14  ;;  %v22015_v51 = vpop.f32.mrb[128].mxu1  ;;  %v19903_v26 = vld [vmem:[#allocation26 + $0x3d8] sm:$0xff]  }
 0xcdb   :  { %17510 = vmatpush3.bf16.msra.mxu1 %v19889_v17  ;;  %17537 = vmatprep.subr.bf16.mxu0 %v19891_v20  ;;  %v22017_v47 = vpop.f32.mrb[129].mxu1  ;;  %v19897_v20 = vld [vmem:[#allocation26 + $0x388] sm:$0xff]  }
 0xcdc   :  { %17511 = vmatprep.subr.bf16.mxu1 %v19890_v39  ;;  %7955 = vmatprep.mubr.bf16.mxu1 %v23083_v49  ;;  %v22022_v62 = vpop.f32.mrb[130].mxu1  ;;  %v23085_v39 = vpack.c.bf16 %v21864_v18, %v21858_v35  ;;  %v19898_v49 = vld [vmem:[#allocation26 + $0x358] sm:$0xff]   ;;  %v23086_v18 = vpack.c.bf16 %v21848_v28, %v21844_v7  ;;  %v23090_v28 = vpack.c.bf16 %v21860_v31, %v21854_v44  ;;  %v19904_v44 = vld [vmem:[#allocation26 + $0x320] sm:$0xff]  }
 0xcdd   :  { %7997 = vmatmul.mubr.bf16.vlgmr.msra.gmra.mrb[192].mxu0 %v23084_v23  ;;  %v22029_v14 = vpop.f32.mrb[131].mxu1  ;;  %v19907_v31 = vld [vmem:[#allocation26 + $0x3e0] sm:$0xff]  }
 0xcde   :  { %17538 = vmatpush3.bf16.msra.mxu0 %v19893_v25  ;;  %8004 = vmatprep.mubr.bf16.mxu0 %v23085_v39  ;;  %v22034_v17 = vpop.f32.mrb[148].mxu0  ;;  %v19902_v25 = vld [vmem:[#allocation26 + $0x360] sm:$0xff]  }
 0xcdf   :  { %17512 = vmatpush3.bf16.msra.mxu1 %v19892_v58  ;;  %17539 = vmatprep.subr.bf16.mxu0 %v19895_v24  ;;  %v22038_v40 = vpop.f32.mrb[149].mxu0  ;;  %v19901_v58 = vld [vmem:[#allocation26 + $0x390] sm:$0xff]  }
 0xce0   :  { %17513 = vmatprep.subr.bf16.mxu1 %v19894_v4  ;;  %v22040_v23 = vpop.f32.mrb[150].mxu0  ;;  %v19900_v4 = vld [vmem:[#allocation26 + $0x318] sm:$0xff]  }
 0xce1   :  { %v22044_v35 = vpop.f32.mrb[151].mxu0 }
 0xce2   :  { %17540 = vmatpush3.bf16.msra.mxu0 %v19897_v20  ;;  %7956 = vmatmul.mubr.bf16.gmra.mrb[176].mxu1 %v23086_v18  ;;  %v22051_v39 = vpop.f32.mrb[132].mxu1  ;;  %v23088_v20 = vpack.c.bf16 %v21876_v63, %v21870_v56  ;;  %v19905_v18 = vld [vmem:[#allocation26 + $0x398] sm:$0xff]   ;;  %v19910_v56 = vld [vmem:[#allocation26 + $0x370] sm:$0xff]  }
 0xce3   :  { %23087 = vst [vmem:[#allocation75_spill] sm:$0xff] %v22051_v39  ;;  %17514 = vmatpush3.bf16.msra.mxu1 %v19896_v37  ;;  %17541 = vmatprep.subr.bf16.mxu0 %v19899_v46  ;;  %v22053_v50 = vpop.f32.mrb[133].mxu1  ;;  %v19911_v37 = vld [vmem:[#allocation26 + $0x3e8] sm:$0xff]   ;;  %v19914_v39 = vld [vmem:[#allocation26 + $0x378] sm:$0xff]  }
 0xce4   :  { %17515 = vmatprep.subr.bf16.mxu1 %v19898_v49  ;;  %8306 = vmatprep.mubr.bf16.mxu1 %v23088_v20  ;;  %v22058_v7 = vpop.f32.mrb[134].mxu1  ;;  %v23091_v49 = vpack.c.bf16 %v21891_v41, %v21882_v16  ;;  %v19906_v20 = vld [vmem:[#allocation26 + $0x368] sm:$0xff]   ;;  %v19909_v41 = vld [vmem:[#allocation26 + $0x3a0] sm:$0xff]  }
 0xce5   :  { %23089 = vst [vmem:[#allocation76_spill] sm:$0xff] %v22058_v7  ;;  %8005 = vmatmul.mubr.bf16.gmra.mrb[196].mxu0 %v23090_v28  ;;  %v22065_v46 = vpop.f32.mrb[135].mxu1 }
 0xce6   :  { %17542 = vmatpush3.bf16.msra.mxu0 %v19901_v58  ;;  %8355 = vmatprep.mubr.bf16.mxu0 %v23091_v49  ;;  %v22070_v24 = vpop.f32.mrb[152].mxu0  ;;  %v19926_v58 = vld [vmem:[#allocation26 + $0x450] sm:$0xff]  }
 0xce7   :  { %23092 = vst [vmem:[#allocation77_spill] sm:$0xff] %v22070_v24  ;;  %17516 = vmatpush3.bf16.msra.mxu1 %v19900_v4  ;;  %17543 = vmatprep.subr.bf16.mxu0 %v19903_v26  ;;  %v22074_v63 = vpop.f32.mrb[153].mxu0  ;;  %v19908_v26 = vld [vmem:[#allocation26 + $0x328] sm:$0xff]  }
 0xce8   :  { %17517 = vmatprep.subr.bf16.mxu1 %v19902_v25  ;;  %v22076_v28 = vpop.f32.mrb[154].mxu0  ;;  %v19913_v24 = vld [vmem:[#allocation26 + $0x3a8] sm:$0xff]  }
 0xce9   :  { %23093 = vst [vmem:[#allocation78_spill] sm:$0xff] %v22076_v28  ;;  %v22080_v16 = vpop.f32.mrb[155].mxu0  ;;  %v19915_v28 = vld [vmem:[#allocation26 + $0x3f0] sm:$0xff]  }
 0xcea   :  { %17544 = vmatpush3.bf16.msra.mxu0 %v19905_v18  ;;  %v22084_v4 = vpop.f32.mrb[136].mxu1 }
 0xceb   :  { %23094 = vst [vmem:[#allocation79_spill] sm:$0xff] %v22084_v4  ;;  %17518 = vmatpush3.bf16.msra.mxu1 %v19904_v44  ;;  %17545 = vmatprep.subr.bf16.mxu0 %v19907_v31  ;;  %v22086_v25 = vpop.f32.mrb[137].mxu1  ;;  %v19912_v31 = vld [vmem:[#allocation26 + $0x330] sm:$0xff]  }
 0xcec   :  { %23095 = vst [vmem:[#allocation80_spill] sm:$0xff] %v22086_v25  ;;  %17519 = vmatprep.subr.bf16.mxu1 %v19906_v20  ;;  %v22088_v55 = vpop.f32.mrb[138].mxu1  ;;  %v19917_v4 = vld [vmem:[#allocation26 + $0x3b0] sm:$0xff]   ;;  %v19919_v25 = vld [vmem:[#allocation26 + $0x440] sm:$0xff]  }
 0xced   :  { %23096 = vst [vmem:[#allocation81_spill] sm:$0xff] %v22088_v55  ;;  %v22092_v18 = vpop.f32.mrb[139].mxu1  ;;  %v19918_v55 = vld [vmem:[#allocation26 + $0x3f8] sm:$0xff]  }
 0xcee   :  { %23097 = vst [vmem:[#allocation82_spill] sm:$0xff] %v22092_v18  ;;  %17546 = vmatpush3.bf16.msra.mxu0 %v19909_v41  ;;  %v22094_v49 = vpop.f32.mrb[156].mxu0 }
 0xcef   :  { %23098 = vst [vmem:[#allocation83_spill] sm:$0xff] %v22094_v49  ;;  %17520 = vmatpush3.bf16.msra.mxu1 %v19908_v26  ;;  %17547 = vmatprep.subr.bf16.mxu0 %v19911_v37  ;;  %v22098_v20 = vpop.f32.mrb[157].mxu0  ;;  %v19916_v37 = vld [vmem:[#allocation26 + $0x338] sm:$0xff]  }
 0xcf0   :  { %23099 = vst [vmem:[#allocation84_spill] sm:$0xff] %v22098_v20  ;;  %17521 = vmatprep.subr.bf16.mxu1 %v19910_v56  ;;  %v22100_v7 = vpop.f32.mrb[158].mxu0  ;;  %v19920_v49 = vld [vmem:[#allocation26 + $0x3b8] sm:$0xff]   ;;  %v19922_v20 = vld [vmem:[#allocation26 + $0x448] sm:$0xff]  }
 0xcf1   :  { %23100 = vst [vmem:[#allocation85_spill] sm:$0xff] %v22100_v7  ;;  %v22104_v41 = vpop.f32.mrb[159].mxu0  ;;  %v19923_v7 = vld [vmem:[#allocation26 + $0x4c0] sm:$0xff]  }
 0xcf2   :  { %23101 = vst [vmem:[#allocation86_spill] sm:$0xff] %v22104_v41  ;;  %17548 = vmatpush3.bf16.msra.mxu0 %v19913_v24  ;;  %v22108_v26 = vpop.f32.mrb[140].mxu1 }
 0xcf3   :  { %23102 = vst [vmem:[#allocation87_spill] sm:$0xff] %v22108_v26  ;;  %17522 = vmatpush3.bf16.msra.mxu1 %v19912_v31  ;;  %17549 = vmatprep.subr.bf16.mxu0 %v19915_v28  ;;  %v22110_v56 = vpop.f32.mrb[141].mxu1  ;;  %v19921_v31 = vld [vmem:[#allocation26 + $0x400] sm:$0xff]   ;;  %v23106_v26 = vpack.c.bf16 %v21872_v57, %v21868_v53  ;;  %v23108_v57 = vpack.c.bf16 %v21884_v8, %v21878_v29  ;;  %v19928_v29 = vld [vmem:[#allocation26 + $0x410] sm:$0xff]  }
 0xcf4   :  { %23103 = vst [vmem:[#allocation88_spill] sm:$0xff] %v22110_v56  ;;  %17523 = vmatprep.subr.bf16.mxu1 %v19914_v39  ;;  %v22112_v18 = vpop.f32.mrb[142].mxu1  ;;  %v19931_v8 = vld [vmem:[#allocation26 + $0x4d0] sm:$0xff]  }
 0xcf5   :  { %23104 = vst [vmem:[#allocation89_spill] sm:$0xff] %v22112_v18  ;;  %v22116_v24 = vpop.f32.mrb[143].mxu1  ;;  %v19927_v18 = vld [vmem:[#allocation26 + $0x4c8] sm:$0xff]  }
 0xcf6   :  { %17550 = vmatpush3.bf16.msra.mxu0 %v19917_v4  ;;  %v22118_v44 = vpop.f32.mrb[160].mxu0 }
 0xcf7   :  { %23105 = vst [vmem:[#allocation90_spill] sm:$0xff] %v22118_v44  ;;  %17524 = vmatpush3.bf16.msra.mxu1 %v19916_v37  ;;  %17551 = vmatprep.subr.bf16.mxu0 %v19918_v55  ;;  %v22122_v39 = vpop.f32.mrb[161].mxu0  ;;  %v19925_v37 = vld [vmem:[#allocation26 + $0x480] sm:$0xff]   ;;  %v23107_v44 = vpack.c.bf16 %v21909_v45, %v21900_v61 }
 0xcf8   :  { %17565 = vmatprep.subr.bf16.mxu1 %v19919_v25  ;;  %v22124_v41 = vpop.f32.mrb[162].mxu0  ;;  %v19924_v25 = vld [vmem:[#allocation26 + $0x408] sm:$0xff]  }
 0xcf9   :  { %v22128_v4 = vpop.f32.mrb[163].mxu0 }
 0xcfa   :  { %8307 = vmatmul.mubr.bf16.vlgmr.msra.gmra.mrb[180].mxu1 %v23106_v26  ;;  %17552 = vmatpush3.bf16.msra.mxu0 %v19920_v49  ;;  %v22135_v28 = vpop.f32.mrb[144].mxu1  ;;  %v19929_v26 = vld [vmem:[#allocation26 + $0x488] sm:$0xff]   ;;  %v19935_v49 = vld [vmem:[#allocation26 + $0x4d8] sm:$0xff]  }
 0xcfb   :  { %17566 = vmatpush3.bf16.msra.mxu1 %v19921_v31  ;;  %17593 = vmatprep.subr.bf16.mxu0 %v19923_v7  ;;  %v22137_v56 = vpop.f32.mrb[145].mxu1 }
 0xcfc   :  { %17567 = vmatprep.subr.bf16.mxu1 %v19922_v20  ;;  %8314 = vmatprep.mubr.bf16.mxu1 %v23107_v44  ;;  %v22142_v53 = vpop.f32.mrb[146].mxu1  ;;  %v23109_v20 = vpack.c.bf16 %v21927_v19, %v21918_v5  ;;  %v19930_v44 = vld [vmem:[#allocation26 + $0x458] sm:$0xff]   ;;  %v23110_v19 = vpack.c.bf16 %v21902_v52, %v21898_v48  ;;  %v23114_v52 = vpack.c.bf16 %v21920_v30, %v21914_v54  ;;  %v19936_v54 = vld [vmem:[#allocation26 + $0x420] sm:$0xff]  }
 0xcfd   :  { %8356 = vmatmul.mubr.bf16.vlgmr.msra.gmra.mrb[200].mxu0 %v23108_v57  ;;  %v22149_v7 = vpop.f32.mrb[147].mxu1  ;;  %v19939_v30 = vld [vmem:[#allocation26 + $0x4e0] sm:$0xff]  }
 0xcfe   :  { %17594 = vmatpush3.bf16.msra.mxu0 %v19925_v37  ;;  %8363 = vmatprep.mubr.bf16.mxu0 %v23109_v20  ;;  %v22154_v31 = vpop.f32.mrb[164].mxu0  ;;  %v19934_v37 = vld [vmem:[#allocation26 + $0x460] sm:$0xff]  }
 0xcff   :  { %17568 = vmatpush3.bf16.msra.mxu1 %v19924_v25  ;;  %17595 = vmatprep.subr.bf16.mxu0 %v19927_v18  ;;  %v22158_v45 = vpop.f32.mrb[165].mxu0  ;;  %v19933_v25 = vld [vmem:[#allocation26 + $0x490] sm:$0xff]  }
 0xd00   :  { %17569 = vmatprep.subr.bf16.mxu1 %v19926_v58  ;;  %v22160_v57 = vpop.f32.mrb[166].mxu0  ;;  %v19932_v58 = vld [vmem:[#allocation26 + $0x418] sm:$0xff]  }
 0xd01   :  { %v22164_v5 = vpop.f32.mrb[167].mxu0 }
 0xd02   :  { %17596 = vmatpush3.bf16.msra.mxu0 %v19929_v26  ;;  %8315 = vmatmul.mubr.bf16.gmra.mrb[184].mxu1 %v23110_v19  ;;  %v22171_v20 = vpop.f32.mrb[148].mxu1  ;;  %v23112_v26 = vpack.c.bf16 %v21945_v27, %v21936_v12  ;;  %v19937_v19 = vld [vmem:[#allocation26 + $0x498] sm:$0xff]   ;;  %v19942_v12 = vld [vmem:[#allocation26 + $0x470] sm:$0xff]  }
 0xd03   :  { %23111 = vst [vmem:[#allocation91_spill] sm:$0xff] %v22171_v20  ;;  %17570 = vmatpush3.bf16.msra.mxu1 %v19928_v29  ;;  %17597 = vmatprep.subr.bf16.mxu0 %v19931_v8  ;;  %v22173_v61 = vpop.f32.mrb[149].mxu1  ;;  %v19943_v29 = vld [vmem:[#allocation26 + $0x4e8] sm:$0xff]   ;;  %v19946_v20 = vld [vmem:[#allocation26 + $0x478] sm:$0xff]  }
 0xd04   :  { %17571 = vmatprep.subr.bf16.mxu1 %v19930_v44  ;;  %8665 = vmatprep.mubr.bf16.mxu1 %v23112_v26  ;;  %v22178_v48 = vpop.f32.mrb[150].mxu1  ;;  %v23115_v44 = vpack.c.bf16 %v21960_v32, %v21954_v6  ;;  %v19938_v26 = vld [vmem:[#allocation26 + $0x468] sm:$0xff]   ;;  %v19941_v32 = vld [vmem:[#allocation26 + $0x4a0] sm:$0xff]  }
 0xd05   :  { %23113 = vst [vmem:[#allocation92_spill] sm:$0xff] %v22178_v48  ;;  %8364 = vmatmul.mubr.bf16.gmra.mrb[204].mxu0 %v23114_v52  ;;  %v22185_v8 = vpop.f32.mrb[151].mxu1 }
 0xd06   :  { %17598 = vmatpush3.bf16.msra.mxu0 %v19933_v25  ;;  %8714 = vmatprep.mubr.bf16.mxu0 %v23115_v44  ;;  %v22190_v18 = vpop.f32.mrb[168].mxu0  ;;  %v19954_v25 = vld [vmem:[#allocation26 + $0x548] sm:$0xff]  }
 0xd07   :  { %23116 = vst [vmem:[#allocation93_spill] sm:$0xff] %v22190_v18  ;;  %17572 = vmatpush3.bf16.msra.mxu1 %v19932_v58  ;;  %17599 = vmatprep.subr.bf16.mxu0 %v19935_v49  ;;  %v22194_v27 = vpop.f32.mrb[169].mxu0  ;;  %v19940_v49 = vld [vmem:[#allocation26 + $0x428] sm:$0xff]  }
 0xd08   :  { %17573 = vmatprep.subr.bf16.mxu1 %v19934_v37  ;;  %v22196_v52 = vpop.f32.mrb[170].mxu0  ;;  %v19945_v18 = vld [vmem:[#allocation26 + $0x4a8] sm:$0xff]  }
 0xd09   :  { %23117 = vst [vmem:[#allocation94_spill] sm:$0xff] %v22196_v52  ;;  %v22200_v6 = vpop.f32.mrb[171].mxu0  ;;  %v19947_v52 = vld [vmem:[#allocation26 + $0x4f0] sm:$0xff]  }
 0xd0a   :  { %17600 = vmatpush3.bf16.msra.mxu0 %v19937_v19  ;;  %v22204_v58 = vpop.f32.mrb[152].mxu1 }
 0xd0b   :  { %23118 = vst [vmem:[#allocation95_spill] sm:$0xff] %v22204_v58  ;;  %17574 = vmatpush3.bf16.msra.mxu1 %v19936_v54  ;;  %17601 = vmatprep.subr.bf16.mxu0 %v19939_v30  ;;  %v22206_v37 = vpop.f32.mrb[153].mxu1  ;;  %v19944_v30 = vld [vmem:[#allocation26 + $0x430] sm:$0xff]   ;;  %v19957_v54 = vld [vmem:[#allocation26 + $0x580] sm:$0xff]  }
 0xd0c   :  { %23119 = vst [vmem:[#allocation96_spill] sm:$0xff] %v22206_v37  ;;  %17575 = vmatprep.subr.bf16.mxu1 %v19938_v26  ;;  %v22208_v55 = vpop.f32.mrb[154].mxu1  ;;  %v19949_v58 = vld [vmem:[#allocation26 + $0x4b0] sm:$0xff]   ;;  %v19953_v37 = vld [vmem:[#allocation26 + $0x500] sm:$0xff]  }
 0xd0d   :  { %23120 = vst [vmem:[#allocation97_spill] sm:$0xff] %v22208_v55  ;;  %v22212_v19 = vpop.f32.mrb[155].mxu1  ;;  %v19951_v55 = vld [vmem:[#allocation26 + $0x540] sm:$0xff]  }
 0xd0e   :  { %23121 = vst [vmem:[#allocation98_spill] sm:$0xff] %v22212_v19  ;;  %17602 = vmatpush3.bf16.msra.mxu0 %v19941_v32  ;;  %v22214_v44 = vpop.f32.mrb[172].mxu0  ;;  %v19955_v19 = vld [vmem:[#allocation26 + $0x5c0] sm:$0xff]  }
 0xd0f   :  { %17576 = vmatpush3.bf16.msra.mxu1 %v19940_v49  ;;  %17603 = vmatprep.subr.bf16.mxu0 %v19943_v29  ;;  %v22218_v26 = vpop.f32.mrb[173].mxu0  ;;  %v19948_v29 = vld [vmem:[#allocation26 + $0x438] sm:$0xff]  }
 0xd10   :  { %17577 = vmatprep.subr.bf16.mxu1 %v19942_v12  ;;  %v22220_v48 = vpop.f32.mrb[174].mxu0  ;;  %v19950_v49 = vld [vmem:[#allocation26 + $0x4f8] sm:$0xff]  }
 0xd11   :  { %v22224_v32 = vpop.f32.mrb[175].mxu0  ;;  %v19952_v12 = vld [vmem:[#allocation26 + $0x4b8] sm:$0xff]  }
 0xd12   :  { %17604 = vmatpush3.bf16.msra.mxu0 %v19945_v18  ;;  %v23122_v18 = vpack.c.bf16 %v21938_v1, %v21934_v36  ;;  %v23125_v36 = vpack.c.bf16 %v21984_v33, %v21978_v13  ;;  %v19960_v1 = vld [vmem:[#allocation26 + $0x510] sm:$0xff]   ;;  %v23127_v13 = vpack.c.bf16 %v21996_v15, %v21990_v43  ;;  %v23128_v33 = vpack.c.bf16 %v21980_v11, %v21974_v42  ;;  %v19972_v43 = vld [vmem:[#allocation26 + $0x528] sm:$0xff]  }
 0xd13   :  { %17578 = vmatpush3.bf16.msra.mxu1 %v19944_v30  ;;  %17605 = vmatprep.subr.bf16.mxu0 %v19947_v52  ;;  %v19956_v52 = vld [vmem:[#allocation26 + $0x508] sm:$0xff]   ;;  %v19974_v11 = vld [vmem:[#allocation26 + $0x570] sm:$0xff]  }
 0xd14   :  { %17579 = vmatprep.subr.bf16.mxu1 %v19946_v20  ;;  %v19959_v30 = vld [vmem:[#allocation26 + $0x5c8] sm:$0xff]   ;;  %v19958_v20 = vld [vmem:[#allocation26 + $0x550] sm:$0xff]  }
 0xd15   :  { %v19975_v15 = vld [vmem:[#allocation26 + $0x5e8] sm:$0xff]  }
 0xd16   :  { %17606 = vmatpush3.bf16.msra.mxu0 %v19949_v58  ;;  %v23123_v58 = vpack.c.bf16 %v21972_v2, %v21966_v10  ;;  %v23126_v10 = vpack.c.bf16 %v21968_v60, %v21964_v0  ;;  %v19965_v2 = vld [vmem:[#allocation26 + $0x590] sm:$0xff]   ;;  %v23129_v60 = vpack.c.bf16 %v22008_v38, %v22002_v9  ;;  %v19968_v0 = vld [vmem:[#allocation26 + $0x520] sm:$0xff]   ;;  %v19977_v42 = vld [vmem:[#allocation26 + $0x5a8] sm:$0xff]  }
 0xd17   :  { %17580 = vmatpush3.bf16.msra.mxu1 %v19948_v29  ;;  %17607 = vmatprep.subr.bf16.mxu0 %v19950_v49  ;;  %v19961_v29 = vld [vmem:[#allocation26 + $0x588] sm:$0xff]   ;;  %v19971_v49 = vld [vmem:[#allocation26 + $0x5e0] sm:$0xff]   ;;  %v19976_v9 = vld [vmem:[#allocation26 + $0x530] sm:$0xff]  }
 0xd18   :  { %17621 = vmatprep.subr.bf16.mxu1 %v19951_v55  ;;  %v23124_v55 = vpack.c.bf16 %v21956_v3, %v21950_v59  ;;  %v19964_v59 = vld [vmem:[#allocation26 + $0x518] sm:$0xff]   ;;  %v19979_v38 = vld [vmem:[#allocation26 + $0x5f0] sm:$0xff]  }
 0xd19   :  { %v19967_v3 = vld [vmem:[#allocation26 + $0x5d8] sm:$0xff]  }
 0xd1a   :  { %8666 = vmatmul.mubr.bf16.vlgmr.msra.gmra.mrb[188].mxu1 %v23122_v18  ;;  %17608 = vmatpush3.bf16.msra.mxu0 %v19952_v12  ;;  %v19970_v12 = vld [vmem:[#allocation26 + $0x568] sm:$0xff]   ;;  %v19973_v18 = vld [vmem:[#allocation26 + $0x5a0] sm:$0xff]  }
 0xd1b   :  { %17622 = vmatpush3.bf16.msra.mxu1 %v19953_v37  ;;  %17649 = vmatprep.subr.bf16.mxu0 %v19955_v19  ;;  %v19963_v37 = vld [vmem:[#allocation26 + $0x5d0] sm:$0xff]   ;;  %v19966_v19 = vld [vmem:[#allocation26 + $0x560] sm:$0xff]  }
 0xd1c   :  { %17623 = vmatprep.subr.bf16.mxu1 %v19954_v25  ;;  %8673 = vmatprep.mubr.bf16.mxu1 %v23123_v58  ;;  %v19962_v25 = vld [vmem:[#allocation26 + $0x558] sm:$0xff]  }
 0xd1d   :  { %8715 = vmatmul.mubr.bf16.vlgmr.msra.gmra.mrb[208].mxu0 %v23124_v55  ;;  %v19982_v58 = vld [vmem:[#allocation26 + $0x5f8] sm:$0xff]   ;;  %v19983_v55 = vld [vmem:[#allocation26 + $0x640] sm:$0xff]  }
 0xd1e   :  { %17650 = vmatpush3.bf16.msra.mxu0 %v19957_v54  ;;  %8722 = vmatprep.mubr.bf16.mxu0 %v23125_v36  ;;  %v19969_v54 = vld [vmem:[#allocation26 + $0x598] sm:$0xff]   ;;  %v19985_v36 = vld [vmem:[#allocation26 + $0x600] sm:$0xff]  }
 0xd1f   :  { %17624 = vmatpush3.bf16.msra.mxu1 %v19956_v52  ;;  %17651 = vmatprep.subr.bf16.mxu0 %v19959_v30  ;;  %v19978_v52 = vld [vmem:[#allocation26 + $0x578] sm:$0xff]   ;;  %v19981_v30 = vld [vmem:[#allocation26 + $0x5b0] sm:$0xff]  }
 0xd20   :  { %17625 = vmatprep.subr.bf16.mxu1 %v19958_v20  ;;  %v19980_v20 = vld [vmem:[#allocation26 + $0x538] sm:$0xff]  }
 0xd22   :  { %17652 = vmatpush3.bf16.msra.mxu0 %v19961_v29  ;;  %8674 = vmatmul.mubr.bf16.gmra.mrb[192].mxu1 %v23126_v10  ;;  %v19984_v29 = vld [vmem:[#allocation26 + $0x5b8] sm:$0xff]   ;;  %v19989_v10 = vld [vmem:[#allocation26 + $0x680] sm:$0xff]  }
 0xd23   :  { %17626 = vmatpush3.bf16.msra.mxu1 %v19960_v1  ;;  %17653 = vmatprep.subr.bf16.mxu0 %v19963_v37  ;;  %v19986_v1 = vld [vmem:[#allocation26 + $0x648] sm:$0xff]   ;;  %v19987_v37 = vld [vmem:[#allocation26 + $0x6c0] sm:$0xff]  }
 0xd24   :  { %17627 = vmatprep.subr.bf16.mxu1 %v19962_v25  ;;  %9024 = vmatprep.mubr.bf16.mxu1 %v23127_v13  ;;  %v23130_v25 = vpack.c.bf16 %v21992_v21, %v21988_v22  ;;  %v23132_v13 = vld [vmem:[#allocation74_spill] sm:$0xff]  ;;  %v23134_v21 = vpack.c.bf16 %v22044_v35, %v22038_v40  ;;  %v19996_v40 = vld [vmem:[#allocation26 + $0x618] sm:$0xff]  }
 0xd25   :  { %8723 = vmatmul.mubr.bf16.gmra.mrb[212].mxu0 %v23128_v33  ;;  %v23133_v33 = vpack.c.bf16 %v22004_v34, %v23132_v13  ;;  %v19993_v22 = vld [vmem:[#allocation26 + $0x688] sm:$0xff]   ;;  %v23136_v34 = vpack.c.bf16 %v22065_v46, %v22053_v50  ;;  %v19999_v35 = vld [vmem:[#allocation26 + $0x6d8] sm:$0xff]   ;;  %v20003_v50 = vld [vmem:[#allocation26 + $0x6e0] sm:$0xff]  }
 0xd26   :  { %17654 = vmatpush3.bf16.msra.mxu0 %v19965_v2  ;;  %9073 = vmatprep.mubr.bf16.mxu0 %v23129_v60  ;;  %v23131_v2 = vpack.c.bf16 %v22029_v14, %v22017_v47  ;;  %v19994_v47 = vld [vmem:[#allocation26 + $0x658] sm:$0xff]   ;;  %v19995_v14 = vld [vmem:[#allocation26 + $0x6d0] sm:$0xff]   ;;  %v23135_v60 = vpack.c.bf16 %v22022_v62, %v22015_v51  ;;  %v23138_v51 = vpack.c.bf16 %v22080_v16, %v22074_v63  ;;  %v20002_v46 = vld [vmem:[#allocation26 + $0x668] sm:$0xff]  }
 0xd27   :  { %17628 = vmatpush3.bf16.msra.mxu1 %v19964_v59  ;;  %17655 = vmatprep.subr.bf16.mxu0 %v19967_v3  ;;  %v19988_v59 = vld [vmem:[#allocation26 + $0x608] sm:$0xff]   ;;  %v20001_v62 = vld [vmem:[#allocation26 + $0x698] sm:$0xff]   ;;  %v20008_v63 = vld [vmem:[#allocation26 + $0x630] sm:$0xff]  }
 0xd28   :  { %17629 = vmatprep.subr.bf16.mxu1 %v19966_v19  ;;  %v19991_v3 = vld [vmem:[#allocation26 + $0x6c8] sm:$0xff]   ;;  %v19990_v19 = vld [vmem:[#allocation26 + $0x650] sm:$0xff]  }
 0xd29   :  { %v20011_v16 = vld [vmem:[#allocation26 + $0x6f0] sm:$0xff]  }
 0xd2a   :  { %17656 = vmatpush3.bf16.msra.mxu0 %v19969_v54  ;;  %v19992_v54 = vld [vmem:[#allocation26 + $0x610] sm:$0xff]  }
 0xd2b   :  { %17630 = vmatpush3.bf16.msra.mxu1 %v19968_v0  ;;  %17657 = vmatprep.subr.bf16.mxu0 %v19971_v49  ;;  %v19997_v0 = vld [vmem:[#allocation26 + $0x690] sm:$0xff]   ;;  %v19998_v49 = vld [vmem:[#allocation26 + $0x660] sm:$0xff]  }
 0xd2c   :  { %17631 = vmatprep.subr.bf16.mxu1 %v19970_v12  ;;  %v23137_v12 = vpack.c.bf16 %v22040_v23, %v22034_v17  ;;  %v20006_v17 = vld [vmem:[#allocation26 + $0x670] sm:$0xff]   ;;  %v20009_v23 = vld [vmem:[#allocation26 + $0x6a8] sm:$0xff]  }
 0xd2d   :  { %v20022_v13 = vld [vmem:[#allocation26 + $0x750] sm:$0xff]  }
 0xd2e   :  { %17658 = vmatpush3.bf16.msra.mxu0 %v19973_v18  ;;  %v20000_v18 = vld [vmem:[#allocation26 + $0x620] sm:$0xff]  }
 0xd2f   :  { %17632 = vmatpush3.bf16.msra.mxu1 %v19972_v43  ;;  %17659 = vmatprep.subr.bf16.mxu0 %v19975_v15  ;;  %v20005_v43 = vld [vmem:[#allocation26 + $0x6a0] sm:$0xff]   ;;  %v20004_v15 = vld [vmem:[#allocation26 + $0x628] sm:$0xff]  }
 0xd30   :  { %17633 = vmatprep.subr.bf16.mxu1 %v19974_v11  ;;  %v20007_v11 = vld [vmem:[#allocation26 + $0x6e8] sm:$0xff]  }
 0xd32   :  { %17660 = vmatpush3.bf16.msra.mxu0 %v19977_v42  ;;  %v20010_v42 = vld [vmem:[#allocation26 + $0x678] sm:$0xff]  }
 0xd33   :  { %17634 = vmatpush3.bf16.msra.mxu1 %v19976_v9  ;;  %17661 = vmatprep.subr.bf16.mxu0 %v19979_v38  ;;  %v20013_v9 = vld [vmem:[#allocation26 + $0x6b0] sm:$0xff]   ;;  %v20012_v38 = vld [vmem:[#allocation26 + $0x638] sm:$0xff]  }
 0xd34   :  { %17635 = vmatprep.subr.bf16.mxu1 %v19978_v52  ;;  %v20014_v52 = vld [vmem:[#allocation26 + $0x6f8] sm:$0xff]  }
 0xd36   :  { %17662 = vmatpush3.bf16.msra.mxu0 %v19981_v30  ;;  %v20015_v30 = vld [vmem:[#allocation26 + $0x740] sm:$0xff]  }
 0xd37   :  { %17636 = vmatpush3.bf16.msra.mxu1 %v19980_v20  ;;  %17663 = vmatprep.subr.bf16.mxu0 %v19982_v58  ;;  %v20016_v20 = vld [vmem:[#allocation26 + $0x6b8] sm:$0xff]   ;;  %v20017_v58 = vld [vmem:[#allocation26 + $0x700] sm:$0xff]  }
 0xd38   :  { %17677 = vmatprep.subr.bf16.mxu1 %v19983_v55  ;;  %v20018_v55 = vld [vmem:[#allocation26 + $0x748] sm:$0xff]  }
 0xd3a   :  { %9025 = vmatmul.mubr.bf16.vlgmr.msra.gmra.mrb[196].mxu1 %v23130_v25  ;;  %17664 = vmatpush3.bf16.msra.mxu0 %v19984_v29  ;;  %v20019_v29 = vld [vmem:[#allocation26 + $0x7c0] sm:$0xff]  }
 0xd3b   :  { %17678 = vmatpush3.bf16.msra.mxu1 %v19985_v36  ;;  %9032 = vmatprep.mubr.bf16.mxu1 %v23131_v2  ;;  %v23139_v36 = vld [vmem:[#allocation76_spill] sm:$0xff] }
 0xd3c   :  { %17679 = vmatprep.subr.bf16.mxu1 %v19986_v1  ;;  %17705 = vmatprep.subr.bf16.mxu0 %v19987_v37  ;;  %v23140_v1 = vld [vmem:[#allocation75_spill] sm:$0xff]  ;;  %v20021_v25 = vld [vmem:[#allocation26 + $0x780] sm:$0xff]  }
 0xd3d   :  { %9074 = vmatmul.mubr.bf16.vlgmr.msra.gmra.mrb[216].mxu0 %v23133_v33  ;;  %v23141_v37 = vpack.c.bf16 %v23139_v36, %v23140_v1  ;;  %v23143_v2 = vld [vmem:[#allocation80_spill] sm:$0xff]  ;;  %v23145_v33 = vld [vmem:[#allocation78_spill] sm:$0xff] }
 0xd3e   :  { %9081 = vmatprep.mubr.bf16.mxu0 %v23134_v21  ;;  %17706 = vmatpush3.bf16.msra.mxu0 %v19989_v10  ;;  %v23142_v10 = vld [vmem:[#allocation82_spill] sm:$0xff]  ;;  %v23146_v21 = vld [vmem:[#allocation77_spill] sm:$0xff] }
 0xd3f   :  { %17680 = vmatpush3.bf16.msra.mxu1 %v19988_v59  ;;  %17707 = vmatprep.subr.bf16.mxu0 %v19991_v3  ;;  %v23144_v59 = vpack.c.bf16 %v23142_v10, %v23143_v2  ;;  %v20020_v3 = vld [vmem:[#allocation26 + $0x708] sm:$0xff]   ;;  %v20040_v36 = vld [vmem:[#allocation26 + $0x730] sm:$0xff]   ;;  %v20042_v10 = vld [vmem:[#allocation26 + $0x778] sm:$0xff]  }
 0xd40   :  { %17681 = vmatprep.subr.bf16.mxu1 %v19990_v19  ;;  %v20023_v19 = vld [vmem:[#allocation26 + $0x7c8] sm:$0xff]   ;;  %v20043_v1 = vld [vmem:[#allocation26 + $0x7f0] sm:$0xff]  }
 0xd42   :  { %9033 = vmatmul.mubr.bf16.gmra.mrb[200].mxu1 %v23135_v60  ;;  %17708 = vmatpush3.bf16.msra.mxu0 %v19993_v22  ;;  %v23147_v22 = vpack.c.bf16 %v23145_v33, %v23146_v21  ;;  %v20025_v60 = vld [vmem:[#allocation26 + $0x788] sm:$0xff]   ;;  %v20044_v33 = vld [vmem:[#allocation26 + $0x738] sm:$0xff]  }
 0xd43   :  { %17682 = vmatpush3.bf16.msra.mxu1 %v19992_v54  ;;  %9383 = vmatprep.mubr.bf16.mxu1 %v23136_v34  ;;  %v23148_v54 = vld [vmem:[#allocation86_spill] sm:$0xff]  ;;  %v20026_v34 = vld [vmem:[#allocation26 + $0x758] sm:$0xff]  }
 0xd44   :  { %17683 = vmatprep.subr.bf16.mxu1 %v19994_v47  ;;  %17709 = vmatprep.subr.bf16.mxu0 %v19995_v14  ;;  %v23149_v47 = vld [vmem:[#allocation84_spill] sm:$0xff] }
 0xd45   :  { %9082 = vmatmul.mubr.bf16.gmra.mrb[220].mxu0 %v23137_v12  ;;  %v23150_v14 = vpack.c.bf16 %v23148_v54, %v23149_v47  ;;  %v20046_v21 = vld [vmem:[#allocation26 + $0x7f8] sm:$0xff]   ;;  %v20047_v47 = vld [vmem:[#allocation26 + $0x840] sm:$0xff]  }
 0xd46   :  { %17710 = vmatpush3.bf16.msra.mxu0 %v19997_v0  ;;  %9432 = vmatprep.mubr.bf16.mxu0 %v23138_v51  ;;  %v20024_v0 = vld [vmem:[#allocation26 + $0x710] sm:$0xff]  }
 0xd47   :  { %17684 = vmatpush3.bf16.msra.mxu1 %v19996_v40  ;;  %17711 = vmatprep.subr.bf16.mxu0 %v19999_v35  ;;  %v20027_v40 = vld [vmem:[#allocation26 + $0x7d0] sm:$0xff]   ;;  %v23151_v35 = vld [vmem:[#allocation81_spill] sm:$0xff] }
 0xd48   :  { %17685 = vmatprep.subr.bf16.mxu1 %v19998_v49  ;;  %v23152_v49 = vld [vmem:[#allocation79_spill] sm:$0xff] }
 0xd49   :  { %v23153_v12 = vpack.c.bf16 %v23151_v35, %v23152_v49  ;;  %v20029_v51 = vld [vmem:[#allocation26 + $0x790] sm:$0xff]   ;;  %v20049_v49 = vld [vmem:[#allocation26 + $0x800] sm:$0xff]  }
 0xd4a   :  { %17712 = vmatpush3.bf16.msra.mxu0 %v20001_v62  ;;  %v23154_v62 = vld [vmem:[#allocation88_spill] sm:$0xff] }
 0xd4b   :  { %17686 = vmatpush3.bf16.msra.mxu1 %v20000_v18  ;;  %17713 = vmatprep.subr.bf16.mxu0 %v20003_v50  ;;  %v23155_v18 = vpack.c.bf16 %v22116_v24, %v23154_v62  ;;  %v20028_v50 = vld [vmem:[#allocation26 + $0x718] sm:$0xff]   ;;  %v20035_v24 = vld [vmem:[#allocation26 + $0x7e0] sm:$0xff]  }
 0xd4c   :  { %17687 = vmatprep.subr.bf16.mxu1 %v20002_v46  ;;  %v20031_v46 = vld [vmem:[#allocation26 + $0x7d8] sm:$0xff]   ;;  %v20051_v62 = vld [vmem:[#allocation26 + $0x8c0] sm:$0xff]  }
 0xd4e   :  { %17714 = vmatpush3.bf16.msra.mxu0 %v20005_v43  ;;  %v20030_v43 = vld [vmem:[#allocation26 + $0x760] sm:$0xff]  }
 0xd4f   :  { %17688 = vmatpush3.bf16.msra.mxu1 %v20004_v15  ;;  %17715 = vmatprep.subr.bf16.mxu0 %v20007_v11  ;;  %v23156_v15 = vld [vmem:[#allocation85_spill] sm:$0xff]  ;;  %v23157_v11 = vld [vmem:[#allocation83_spill] sm:$0xff] }
 0xd50   :  { %17689 = vmatprep.subr.bf16.mxu1 %v20006_v17  ;;  %v23158_v17 = vpack.c.bf16 %v23156_v15, %v23157_v11  ;;  %v23161_v15 = vld [vmem:[#allocation87_spill] sm:$0xff] }
 0xd52   :  { %17716 = vmatpush3.bf16.msra.mxu0 %v20009_v23  ;;  %v23159_v23 = vpack.c.bf16 %v22128_v4, %v22122_v39  ;;  %v20041_v4 = vld [vmem:[#allocation26 + $0x7a8] sm:$0xff]  }
 0xd53   :  { %17690 = vmatpush3.bf16.msra.mxu1 %v20008_v63  ;;  %17717 = vmatprep.subr.bf16.mxu0 %v20011_v16  ;;  %v20033_v63 = vld [vmem:[#allocation26 + $0x798] sm:$0xff]   ;;  %v20032_v16 = vld [vmem:[#allocation26 + $0x720] sm:$0xff]  }
 0xd54   :  { %17691 = vmatprep.subr.bf16.mxu1 %v20010_v42  ;;  %v20034_v42 = vld [vmem:[#allocation26 + $0x768] sm:$0xff]  }
 0xd56   :  { %17718 = vmatpush3.bf16.msra.mxu0 %v20013_v9  ;;  %v20037_v9 = vld [vmem:[#allocation26 + $0x7a0] sm:$0xff]  }
 0xd57   :  { %17692 = vmatpush3.bf16.msra.mxu1 %v20012_v38  ;;  %17719 = vmatprep.subr.bf16.mxu0 %v20014_v52  ;;  %v20036_v38 = vld [vmem:[#allocation26 + $0x728] sm:$0xff]  }
 0xd58   :  { %17733 = vmatprep.subr.bf16.mxu1 %v20015_v30  ;;  %v20039_v52 = vld [vmem:[#allocation26 + $0x7e8] sm:$0xff]  }
 0xd5a   :  { %9384 = vmatmul.mubr.bf16.vlgmr.msra.gmra.mrb[204].mxu1 %v23141_v37  ;;  %17720 = vmatpush3.bf16.msra.mxu0 %v20016_v20  ;;  %v20038_v20 = vld [vmem:[#allocation26 + $0x770] sm:$0xff]  }
 0xd5b   :  { %9391 = vmatprep.mubr.bf16.mxu1 %v23144_v59  ;;  %17734 = vmatpush3.bf16.msra.mxu1 %v20017_v58 }
 0xd5c   :  { %17735 = vmatprep.subr.bf16.mxu1 %v20018_v55  ;;  %17761 = vmatprep.subr.bf16.mxu0 %v20019_v29 }
 0xd5d   :  { %9433 = vmatmul.mubr.bf16.vlgmr.msra.gmra.mrb[224].mxu0 %v23147_v22 }
 0xd5e   :  { %9440 = vmatprep.mubr.bf16.mxu0 %v23150_v14  ;;  %17762 = vmatpush3.bf16.msra.mxu0 %v20021_v25 }
 0xd5f   :  { %17736 = vmatpush3.bf16.msra.mxu1 %v20020_v3  ;;  %17763 = vmatprep.subr.bf16.mxu0 %v20023_v19  ;;  %v20045_v19 = vld [vmem:[#allocation26 + $0x7b0] sm:$0xff]  }
 0xd60   :  { %17737 = vmatprep.subr.bf16.mxu1 %v20022_v13 }
 0xd62   :  { %9392 = vmatmul.mubr.bf16.gmra.mrb[208].mxu1 %v23153_v12  ;;  %17764 = vmatpush3.bf16.msra.mxu0 %v20025_v60 }
 0xd63   :  { %17738 = vmatpush3.bf16.msra.mxu1 %v20024_v0  ;;  %9742 = vmatprep.mubr.bf16.mxu1 %v23155_v18 }
 0xd64   :  { %17739 = vmatprep.subr.bf16.mxu1 %v20026_v34  ;;  %17765 = vmatprep.subr.bf16.mxu0 %v20027_v40  ;;  %v20048_v34 = vld [vmem:[#allocation26 + $0x7b8] sm:$0xff]  }
 0xd65   :  { %9441 = vmatmul.mubr.bf16.gmra.mrb[228].mxu0 %v23158_v17  ;;  %v20053_v17 = vld [vmem:[#allocation26 + $0x880] sm:$0xff]  }
 0xd66   :  { %17766 = vmatpush3.bf16.msra.mxu0 %v20029_v51  ;;  %9791 = vmatprep.mubr.bf16.mxu0 %v23159_v23  ;;  %v20050_v51 = vld [vmem:[#allocation26 + $0x848] sm:$0xff]  }
 0xd67   :  { %17740 = vmatpush3.bf16.msra.mxu1 %v20028_v50  ;;  %17767 = vmatprep.subr.bf16.mxu0 %v20031_v46 }
 0xd68   :  { %17741 = vmatprep.subr.bf16.mxu1 %v20030_v43  ;;  %v23160_v43 = vld [vmem:[#allocation89_spill] sm:$0xff] }
 0xd69   :  { %v23162_v11 = vpack.c.bf16 %v23160_v43, %v23161_v15 }
 0xd6a   :  { %17768 = vmatpush3.bf16.msra.mxu0 %v20033_v63 }
 0xd6b   :  { %17742 = vmatpush3.bf16.msra.mxu1 %v20032_v16  ;;  %17769 = vmatprep.subr.bf16.mxu0 %v20035_v24  ;;  %v23163_v16 = vpack.c.bf16 %v22149_v7, %v22137_v56  ;;  %v20052_v24 = vld [vmem:[#allocation26 + $0x808] sm:$0xff]  }
 0xd6c   :  { %v17357_v30 = vpop.f32.mrb[156].mxu1  ;;  %17743 = vmatprep.subr.bf16.mxu1 %v20034_v42  ;;  %v20055_v42 = vld [vmem:[#allocation26 + $0x8c8] sm:$0xff]  }
 0xd6d   :  { %v17358_v58 = vpop.f32.mrb[157].mxu1  ;;  %v20057_v56 = vld [vmem:[#allocation26 + $0x888] sm:$0xff]  }
 0xd6e   :  { %v17359_v55 = vadd.f32 %v17358_v58, %v17357_v30  ;;  %17770 = vmatpush3.bf16.msra.mxu0 %v20037_v9  ;;  %v17360_v39 = vpop.f32.mrb[158].mxu1 }
 0xd6f   :  { %17744 = vmatpush3.bf16.msra.mxu1 %v20036_v38  ;;  %v17361_v29 = vpop.f32.mrb[159].mxu1  ;;  %17771 = vmatprep.subr.bf16.mxu0 %v20039_v52  ;;  %v20054_v38 = vld [vmem:[#allocation26 + $0x850] sm:$0xff]  }
 0xd70   :  { %v17362_v37 = vadd.f32 %v17361_v29, %v17360_v39  ;;  %v17385_v25 = vpop.f32.mrb[176].mxu0  ;;  %17745 = vmatprep.subr.bf16.mxu1 %v20038_v20  ;;  %v23164_v20 = vld [vmem:[#allocation90_spill] sm:$0xff] }
 0xd71   :  { %v17386_v2 = vpop.f32.mrb[177].mxu0  ;;  %v23165_v58 = vpack.c.bf16 %v22124_v41, %v23164_v20  ;;  %v20056_v39 = vld [vmem:[#allocation26 + $0x810] sm:$0xff]  }
 0xd72   :  { %v17387_v59 = vadd.f32 %v17386_v2, %v17385_v25  ;;  %17772 = vmatpush3.bf16.msra.mxu0 %v20041_v4  ;;  %v17388_v3 = vpop.f32.mrb[178].mxu0  ;;  %v20058_v4 = vld [vmem:[#allocation26 + $0x858] sm:$0xff]   ;;  %v20059_v29 = vld [vmem:[#allocation26 + $0x8d0] sm:$0xff]   ;;  %v23169_v25 = vpack.c.bf16 %v22160_v57, %v22154_v31  ;;  %v20069_v2 = vld [vmem:[#allocation26 + $0x8a0] sm:$0xff]  }
 0xd73   :  { %17746 = vmatpush3.bf16.msra.mxu1 %v20040_v36  ;;  %v17389_v13 = vpop.f32.mrb[179].mxu0  ;;  %17773 = vmatprep.subr.bf16.mxu0 %v20043_v1  ;;  %v23167_v36 = vpack.c.bf16 %v22142_v53, %v22135_v28  ;;  %v20061_v41 = vld [vmem:[#allocation26 + $0x890] sm:$0xff]   ;;  %v20063_v1 = vld [vmem:[#allocation26 + $0x8d8] sm:$0xff]   ;;  %v23170_v28 = vpack.c.bf16 %v22200_v6, %v22194_v27  ;;  %v20073_v6 = vld [vmem:[#allocation26 + $0x8a8] sm:$0xff]  }
 0xd74   :  { %v22300_v22 = vadd.f32 %v17387_v59, %v17359_v55  ;;  %v17390_v54 = vadd.f32 %v17389_v13, %v17388_v3  ;;  %17747 = vmatprep.subr.bf16.mxu1 %v20042_v10  ;;  %v17363_v14 = vpop.f32.mrb[160].mxu1  ;;  %v23166_v55 = vpack.c.bf16 %v22164_v5, %v22158_v45  ;;  %v23168_v45 = vpack.c.bf16 %v22185_v8, %v22173_v61  ;;  %v20060_v5 = vld [vmem:[#allocation26 + $0x818] sm:$0xff]   ;;  %v20064_v10 = vld [vmem:[#allocation26 + $0x820] sm:$0xff]   ;;  %v20066_v8 = vld [vmem:[#allocation26 + $0x868] sm:$0xff]  }
 0xd75   :  { %v17364_v60 = vpop.f32.mrb[161].mxu1  ;;  %v20065_v53 = vld [vmem:[#allocation26 + $0x898] sm:$0xff]   ;;  %v20067_v61 = vld [vmem:[#allocation26 + $0x8e0] sm:$0xff]   ;;  %v20068_v59 = vld [vmem:[#allocation26 + $0x828] sm:$0xff]  }
 0xd76   :  { %v22302_v0 = vadd.f32 %v17390_v54, %v17362_v37  ;;  %17774 = vmatpush3.bf16.msra.mxu0 %v20045_v19  ;;  %v17365_v40 = vadd.f32 %v17364_v60, %v17363_v14  ;;  %v17366_v35 = vpop.f32.mrb[162].mxu1  ;;  %v20062_v37 = vld [vmem:[#allocation26 + $0x860] sm:$0xff]   ;;  %v20071_v3 = vld [vmem:[#allocation26 + $0x8e8] sm:$0xff]   ;;  %v20070_v57 = vld [vmem:[#allocation26 + $0x870] sm:$0xff]  }
 0xd77   :  { %17748 = vmatpush3.bf16.msra.mxu1 %v20044_v33  ;;  %17775 = vmatprep.subr.bf16.mxu0 %v20046_v21  ;;  %v17367_v12 = vpop.f32.mrb[163].mxu1  ;;  %v20072_v21 = vld [vmem:[#allocation26 + $0x830] sm:$0xff]  }
 0xd78   :  { %17789 = vmatprep.subr.bf16.mxu1 %v20047_v47  ;;  %v17391_v18 = vpop.f32.mrb[180].mxu0  ;;  %v17368_v50 = vadd.f32 %v17367_v12, %v17366_v35  ;;  %v20075_v54 = vld [vmem:[#allocation26 + $0x8f0] sm:$0xff]  }
 0xd79   :  { %v17392_v46 = vpop.f32.mrb[181].mxu0  ;;  %v23172_v20 = vld [vmem:[#allocation91_spill] sm:$0xff] }
 0xd7a   :  { %9743 = vmatmul.mubr.bf16.vlgmr.msra.gmra.mrb[212].mxu1 %v23162_v11  ;;  %17776 = vmatpush3.bf16.msra.mxu0 %v20048_v34  ;;  %v17393_v23 = vadd.f32 %v17392_v46, %v17391_v18  ;;  %v17394_v63 = vpop.f32.mrb[182].mxu0  ;;  %v20074_v34 = vld [vmem:[#allocation26 + $0x878] sm:$0xff]  }
 0xd7b   :  { %9750 = vmatprep.mubr.bf16.mxu1 %v23163_v16  ;;  %17790 = vmatpush3.bf16.msra.mxu1 %v20049_v49  ;;  %v17395_v9 = vpop.f32.mrb[183].mxu0  ;;  %v20076_v18 = vld [vmem:[#allocation26 + $0x838] sm:$0xff]  }
 0xd7c   :  { %17791 = vmatprep.subr.bf16.mxu1 %v20050_v51  ;;  %17817 = vmatprep.subr.bf16.mxu0 %v20051_v62  ;;  %v22310_v52 = vadd.f32 %v17393_v23, %v17365_v40  ;;  %v17396_v30 = vadd.f32 %v17395_v9, %v17394_v63  ;;  %v20077_v51 = vld [vmem:[#allocation26 + $0x8b0] sm:$0xff]   ;;  %v20079_v63 = vld [vmem:[#allocation26 + $0x8b8] sm:$0xff]  }
 0xd7d   :  { %9792 = vmatmul.mubr.bf16.vlgmr.msra.gmra.mrb[232].mxu0 %v23165_v58 }
 0xd7e   :  { %9799 = vmatprep.mubr.bf16.mxu0 %v23166_v55  ;;  %17818 = vmatpush3.bf16.msra.mxu0 %v20053_v17  ;;  %v22318_v7 = vadd.f32 %v17396_v30, %v17368_v50  ;;  %v20078_v50 = vld [vmem:[#allocation26 + $0x8f8] sm:$0xff]  }
 0xd7f   :  { %17792 = vmatpush3.bf16.msra.mxu1 %v20052_v24  ;;  %17819 = vmatprep.subr.bf16.mxu0 %v20055_v42  ;;  %v23171_v30 = vld [vmem:[#allocation92_spill] sm:$0xff] }
 0xd80   :  { %17793 = vmatprep.subr.bf16.mxu1 %v20054_v38  ;;  %v23173_v58 = vpack.c.bf16 %v23171_v30, %v23172_v20 }
 0xd82   :  { %9751 = vmatmul.mubr.bf16.gmra.mrb[216].mxu1 %v23167_v36  ;;  %17820 = vmatpush3.bf16.msra.mxu0 %v20057_v56 }
 0xd83   :  { %17794 = vmatpush3.bf16.msra.mxu1 %v20056_v39  ;;  %10101 = vmatprep.mubr.bf16.mxu1 %v23168_v45  ;;  %v23174_v39 = vld [vmem:[#allocation98_spill] sm:$0xff] }
 0xd84   :  { %17795 = vmatprep.subr.bf16.mxu1 %v20058_v4  ;;  %17821 = vmatprep.subr.bf16.mxu0 %v20059_v29  ;;  %v23175_v4 = vld [vmem:[#allocation96_spill] sm:$0xff] }
 0xd85   :  { %9800 = vmatmul.mubr.bf16.gmra.mrb[236].mxu0 %v23169_v25  ;;  %v23176_v29 = vpack.c.bf16 %v23174_v39, %v23175_v4  ;;  %v23180_v25 = vpack.c.bf16 %v22224_v32, %v22218_v26 }
 0xd86   :  { %17822 = vmatpush3.bf16.msra.mxu0 %v20061_v41  ;;  %10150 = vmatprep.mubr.bf16.mxu0 %v23170_v28  ;;  %v23181_v28 = vld [vmem:[#allocation97_spill] sm:$0xff] }
 0xd87   :  { %17796 = vmatpush3.bf16.msra.mxu1 %v20060_v5  ;;  %17823 = vmatprep.subr.bf16.mxu0 %v20063_v1  ;;  %v23177_v5 = vld [vmem:[#allocation94_spill] sm:$0xff]  ;;  %v23178_v1 = vld [vmem:[#allocation93_spill] sm:$0xff] }
 0xd88   :  { %17797 = vmatprep.subr.bf16.mxu1 %v20062_v37 }
 0xd8a   :  { %17824 = vmatpush3.bf16.msra.mxu0 %v20065_v53  ;;  %v23182_v53 = vld [vmem:[#allocation95_spill] sm:$0xff] }
 0xd8b   :  { %17798 = vmatpush3.bf16.msra.mxu1 %v20064_v10  ;;  %17825 = vmatprep.subr.bf16.mxu0 %v20067_v61  ;;  %v23183_v10 = vpack.c.bf16 %v23181_v28, %v23182_v53 }
 0xd8c   :  { %v17413_v31 = vpop.f32.mrb[164].mxu1  ;;  %17799 = vmatprep.subr.bf16.mxu1 %v20066_v8 }
 0xd8d   :  { %v17414_v19 = vpop.f32.mrb[165].mxu1 }
 0xd8e   :  { %v17415_v13 = vadd.f32 %v17414_v19, %v17413_v31  ;;  %v17416_v27 = vpop.f32.mrb[166].mxu1  ;;  %17826 = vmatpush3.bf16.msra.mxu0 %v20069_v2 }
 0xd8f   :  { %17800 = vmatpush3.bf16.msra.mxu1 %v20068_v59  ;;  %v17417_v33 = vpop.f32.mrb[167].mxu1  ;;  %17827 = vmatprep.subr.bf16.mxu0 %v20071_v3 }
 0xd90   :  { %v17418_v47 = vadd.f32 %v17417_v33, %v17416_v27  ;;  %v17441_v14 = vpop.f32.mrb[184].mxu0  ;;  %v7595_v60 = vadd.f32 %v17415_v13, %v22300_v22  ;;  %17801 = vmatprep.subr.bf16.mxu1 %v20070_v57 }
 0xd91   :  { %v17442_v40 = vpop.f32.mrb[185].mxu0 }
 0xd92   :  { %v17443_v35 = vadd.f32 %v17442_v40, %v17441_v14  ;;  %v17444_v49 = vpop.f32.mrb[186].mxu0  ;;  %17828 = vmatpush3.bf16.msra.mxu0 %v20073_v6  ;;  %v7598_v12 = vadd.f32 %v17418_v47, %v22302_v0 }
 0xd93   :  { %17802 = vmatpush3.bf16.msra.mxu1 %v20072_v21  ;;  %v17445_v62 = vpop.f32.mrb[187].mxu0  ;;  %17829 = vmatprep.subr.bf16.mxu0 %v20075_v54 }
 0xd94   :  { %v7644_v46 = vadd.f32 %v17443_v35, %v7595_v60  ;;  %v17446_v43 = vadd.f32 %v17445_v62, %v17444_v49  ;;  %v17419_v15 = vpop.f32.mrb[168].mxu1  ;;  %17803 = vmatprep.subr.bf16.mxu1 %v20074_v34 }
 0xd95   :  { %v17420_v11 = vpop.f32.mrb[169].mxu1 }
 0xd96   :  { %v7647_v22 = vadd.f32 %v17446_v43, %v7598_v12  ;;  %v17421_v17 = vadd.f32 %v17420_v11, %v17419_v15  ;;  %v17422_v23 = vpop.f32.mrb[170].mxu1  ;;  %17830 = vmatpush3.bf16.msra.mxu0 %v20077_v51 }
 0xd97   :  { %17804 = vmatpush3.bf16.msra.mxu1 %v20076_v18  ;;  %v17423_v16 = vpop.f32.mrb[171].mxu1  ;;  %17831 = vmatprep.subr.bf16.mxu0 %v20078_v50 }
 0xd98   :  { %v17424_v0 = vadd.f32 %v17423_v16, %v17422_v23  ;;  %v17447_v24 = vpop.f32.mrb[188].mxu0  ;;  %v7603_v42 = vadd.f32 %v17421_v17, %v22310_v52  ;;  %v23179_v52 = vpack.c.bf16 %v23177_v5, %v23178_v1 }
 0xd99   :  { %v17448_v9 = vpop.f32.mrb[189].mxu0 }
 0xd9a   :  { %v17449_v38 = vadd.f32 %v17448_v9, %v17447_v24  ;;  %10102 = vmatmul.mubr.bf16.vlgmr.msra.gmra.mrb[220].mxu1 %v23173_v58  ;;  %v17450_v55 = vpop.f32.mrb[190].mxu0  ;;  %17832 = vmatpush3.bf16.msra.mxu0 %v20079_v63  ;;  %v7606_v56 = vadd.f32 %v17424_v0, %v22318_v7  ;;  %v23184_v7 = vpack.c.bf16 %v22220_v48, %v22214_v44 }
 0xd9b   :  { %10109 = vmatprep.mubr.bf16.mxu1 %v23176_v29  ;;  %v17451_v36 = vpop.f32.mrb[191].mxu0 }
 0xd9c   :  { %v7652_v41 = vadd.f32 %v17449_v38, %v7603_v42  ;;  %v17452_v45 = vadd.f32 %v17451_v36, %v17450_v55 }
 0xd9d   :  { %10151 = vmatmul.mubr.bf16.vlgmr.msra.gmra.mrb[240].mxu0 %v23179_v52 }
 0xd9e   :  { %v7655_v37 = vadd.f32 %v17452_v45, %v7606_v56  ;;  %10158 = vmatprep.mubr.bf16.mxu0 %v23180_v25 }
 0xda2   :  { %10110 = vmatmul.mubr.bf16.gmra.mrb[224].mxu1 %v23183_v10 }
 0xda5   :  { %10159 = vmatmul.mubr.bf16.gmra.mrb[244].mxu0 %v23184_v7 }
 0xdad   :  { %v17469_v61 = vpop.f32.mrb[172].mxu1 }
 0xdae   :  { %v17470_v8 = vpop.f32.mrb[173].mxu1 }
 0xdaf   :  { %v17471_v2 = vadd.f32 %v17470_v8, %v17469_v61  ;;  %v17472_v59 = vpop.f32.mrb[174].mxu1 }
 0xdb0   :  { %v17473_v3 = vpop.f32.mrb[175].mxu1  ;;  %v17497_v31 = vpop.f32.mrb[192].mxu0 }
 0xdb1   :  { %v17474_v57 = vadd.f32 %v17473_v3, %v17472_v59  ;;  %v17498_v19 = vpop.f32.mrb[193].mxu0 }
 0xdb2   :  { %v17499_v13 = vadd.f32 %v17498_v19, %v17497_v31  ;;  %v17500_v27 = vpop.f32.mrb[194].mxu0 }
 0xdb3   :  { %v17501_v26 = vpop.f32.mrb[195].mxu0 }
 0xdb4   :  { %v7999_v32 = vadd.f32 %v17499_v13, %v17471_v2  ;;  %v17502_v6 = vadd.f32 %v17501_v26, %v17500_v27 }
 0xdb5   :  { %v17475_v33 = vpop.f32.mrb[176].mxu1 }
 0xdb6   :  { %v8013_v21 = vadd.f32 %v7999_v32, %v7644_v46  ;;  %v8002_v54 = vadd.f32 %v17502_v6, %v17474_v57  ;;  %v17476_v47 = vpop.f32.mrb[177].mxu1 }
 0xdb7   :  { %v17477_v14 = vadd.f32 %v17476_v47, %v17475_v33  ;;  %v17478_v48 = vpop.f32.mrb[178].mxu1 }
 0xdb8   :  { %v8014_v44 = vadd.f32 %v8002_v54, %v7647_v22  ;;  %v17503_v60 = vpop.f32.mrb[196].mxu0  ;;  %v17479_v34 = vpop.f32.mrb[179].mxu1 }
 0xdb9   :  { %v17504_v40 = vpop.f32.mrb[197].mxu0  ;;  %v17480_v35 = vadd.f32 %v17479_v34, %v17478_v48 }
 0xdba   :  { %v17505_v49 = vadd.f32 %v17504_v40, %v17503_v60  ;;  %v17506_v12 = vpop.f32.mrb[198].mxu0 }
 0xdbb   :  { %v17507_v51 = vpop.f32.mrb[199].mxu0 }
 0xdbc   :  { %v8007_v62 = vadd.f32 %v17505_v49, %v17477_v14  ;;  %v17508_v18 = vadd.f32 %v17507_v51, %v17506_v12 }
 0xdbe   :  { %v8015_v50 = vadd.f32 %v8007_v62, %v7652_v41  ;;  %v8010_v43 = vadd.f32 %v17508_v18, %v17480_v35 }
 0xdc0   :  { %v8016_v15 = vadd.f32 %v8010_v43, %v7655_v37 }
 0xdcd   :  { %v17525_v11 = vpop.f32.mrb[180].mxu1 }
 0xdce   :  { %v17526_v17 = vpop.f32.mrb[181].mxu1 }
 0xdcf   :  { %v17527_v46 = vadd.f32 %v17526_v17, %v17525_v11  ;;  %v17528_v23 = vpop.f32.mrb[182].mxu1 }
 0xdd0   :  { %v17529_v63 = vpop.f32.mrb[183].mxu1  ;;  %v17553_v16 = vpop.f32.mrb[200].mxu0 }
 0xdd1   :  { %v17530_v0 = vadd.f32 %v17529_v63, %v17528_v23  ;;  %v17554_v22 = vpop.f32.mrb[201].mxu0 }
 0xdd2   :  { %v17555_v24 = vadd.f32 %v17554_v22, %v17553_v16  ;;  %v17556_v42 = vpop.f32.mrb[202].mxu0 }
 0xdd3   :  { %v17557_v9 = vpop.f32.mrb[203].mxu0 }
 0xdd4   :  { %v8358_v38 = vadd.f32 %v17555_v24, %v17527_v46  ;;  %v17558_v30 = vadd.f32 %v17557_v9, %v17556_v42 }
 0xdd5   :  { %v17531_v20 = vpop.f32.mrb[184].mxu1 }
 0xdd6   :  { %v8372_v58 = vadd.f32 %v8358_v38, %v8013_v21  ;;  %v8361_v55 = vadd.f32 %v17558_v30, %v17530_v0  ;;  %v17532_v56 = vpop.f32.mrb[185].mxu1 }
 0xdd7   :  { %v17533_v39 = vadd.f32 %v17532_v56, %v17531_v20  ;;  %v17534_v4 = vpop.f32.mrb[186].mxu1 }
 0xdd8   :  { %v8373_v29 = vadd.f32 %v8361_v55, %v8014_v44  ;;  %v17559_v36 = vpop.f32.mrb[204].mxu0  ;;  %v17535_v41 = vpop.f32.mrb[187].mxu1 }
 0xdd9   :  { %v17560_v45 = vpop.f32.mrb[205].mxu0  ;;  %v17536_v5 = vadd.f32 %v17535_v41, %v17534_v4 }
 0xdda   :  { %v17561_v1 = vadd.f32 %v17560_v45, %v17559_v36  ;;  %v17562_v52 = vpop.f32.mrb[206].mxu0 }
 0xddb   :  { %v17563_v37 = vpop.f32.mrb[207].mxu0 }
 0xddc   :  { %v8366_v25 = vadd.f32 %v17561_v1, %v17533_v39  ;;  %v17564_v28 = vadd.f32 %v17563_v37, %v17562_v52 }
 0xdde   :  { %v8374_v53 = vadd.f32 %v8366_v25, %v8015_v50  ;;  %v8369_v10 = vadd.f32 %v17564_v28, %v17536_v5 }
 0xde0   :  { %v8375_v7 = vadd.f32 %v8369_v10, %v8016_v15 }
 0xded   :  { %v17581_v61 = vpop.f32.mrb[188].mxu1 }
 0xdee   :  { %v17582_v8 = vpop.f32.mrb[189].mxu1 }
 0xdef   :  { %v17583_v2 = vadd.f32 %v17582_v8, %v17581_v61  ;;  %v17584_v59 = vpop.f32.mrb[190].mxu1 }
 0xdf0   :  { %v17585_v3 = vpop.f32.mrb[191].mxu1  ;;  %v17609_v31 = vpop.f32.mrb[208].mxu0 }
 0xdf1   :  { %v17586_v57 = vadd.f32 %v17585_v3, %v17584_v59  ;;  %v17610_v19 = vpop.f32.mrb[209].mxu0 }
 0xdf2   :  { %v17611_v13 = vadd.f32 %v17610_v19, %v17609_v31  ;;  %v17612_v27 = vpop.f32.mrb[210].mxu0 }
 0xdf3   :  { %v17613_v26 = vpop.f32.mrb[211].mxu0 }
 0xdf4   :  { %v8717_v32 = vadd.f32 %v17611_v13, %v17583_v2  ;;  %v17614_v6 = vadd.f32 %v17613_v26, %v17612_v27 }
 0xdf5   :  { %v17587_v33 = vpop.f32.mrb[192].mxu1 }
 0xdf6   :  { %v8731_v21 = vadd.f32 %v8717_v32, %v8372_v58  ;;  %v8720_v54 = vadd.f32 %v17614_v6, %v17586_v57  ;;  %v17588_v47 = vpop.f32.mrb[193].mxu1 }
 0xdf7   :  { %v17589_v14 = vadd.f32 %v17588_v47, %v17587_v33  ;;  %v17590_v48 = vpop.f32.mrb[194].mxu1 }
 0xdf8   :  { %v8732_v44 = vadd.f32 %v8720_v54, %v8373_v29  ;;  %v17615_v60 = vpop.f32.mrb[212].mxu0  ;;  %v17591_v34 = vpop.f32.mrb[195].mxu1 }
 0xdf9   :  { %v17616_v40 = vpop.f32.mrb[213].mxu0  ;;  %v17592_v35 = vadd.f32 %v17591_v34, %v17590_v48 }
 0xdfa   :  { %v17617_v49 = vadd.f32 %v17616_v40, %v17615_v60  ;;  %v17618_v12 = vpop.f32.mrb[214].mxu0 }
 0xdfb   :  { %v17619_v51 = vpop.f32.mrb[215].mxu0 }
 0xdfc   :  { %v8725_v62 = vadd.f32 %v17617_v49, %v17589_v14  ;;  %v17620_v18 = vadd.f32 %v17619_v51, %v17618_v12 }
 0xdfe   :  { %v8733_v50 = vadd.f32 %v8725_v62, %v8374_v53  ;;  %v8728_v43 = vadd.f32 %v17620_v18, %v17592_v35 }
 0xe00   :  { %v8734_v15 = vadd.f32 %v8728_v43, %v8375_v7 }
 0xe0d   :  { %v17637_v11 = vpop.f32.mrb[196].mxu1 }
 0xe0e   :  { %v17638_v17 = vpop.f32.mrb[197].mxu1 }
 0xe0f   :  { %v17639_v46 = vadd.f32 %v17638_v17, %v17637_v11  ;;  %v17640_v23 = vpop.f32.mrb[198].mxu1 }
 0xe10   :  { %v17641_v63 = vpop.f32.mrb[199].mxu1  ;;  %v17665_v16 = vpop.f32.mrb[216].mxu0 }
 0xe11   :  { %v17642_v0 = vadd.f32 %v17641_v63, %v17640_v23  ;;  %v17666_v22 = vpop.f32.mrb[217].mxu0 }
 0xe12   :  { %v17667_v24 = vadd.f32 %v17666_v22, %v17665_v16  ;;  %v17668_v42 = vpop.f32.mrb[218].mxu0 }
 0xe13   :  { %v17669_v9 = vpop.f32.mrb[219].mxu0 }
 0xe14   :  { %v9076_v38 = vadd.f32 %v17667_v24, %v17639_v46  ;;  %v17670_v30 = vadd.f32 %v17669_v9, %v17668_v42 }
 0xe15   :  { %v17643_v20 = vpop.f32.mrb[200].mxu1 }
 0xe16   :  { %v9090_v58 = vadd.f32 %v9076_v38, %v8731_v21  ;;  %v9079_v55 = vadd.f32 %v17670_v30, %v17642_v0  ;;  %v17644_v56 = vpop.f32.mrb[201].mxu1  ;;  %v20080_v21 = vld [vmem:[%s23185_s15] sm:$0xff]  }
 0xe17   :  { %v17645_v39 = vadd.f32 %v17644_v56, %v17643_v20  ;;  %v17646_v4 = vpop.f32.mrb[202].mxu1  ;;  %18368 = vmatprep.mubr.msk.bf16.mxu1 %vm1579_vm6, %v20080_v21  ;;  %v16837_v21 = vld [vmem:[#allocation28] ss:$0 sm:$0xff] }
 0xe18   :  { %v9091_v29 = vadd.f32 %v9079_v55, %v8732_v44  ;;  %v17647_v36 = vpop.f32.mrb[203].mxu1  ;;  %v17671_v41 = vpop.f32.mrb[220].mxu0 }
 0xe19   :  { %v17648_v45 = vadd.f32 %v17647_v36, %v17646_v4  ;;  %v17672_v5 = vpop.f32.mrb[221].mxu0 }
 0xe1a   :  { %v17673_v1 = vadd.f32 %v17672_v5, %v17671_v41  ;;  %v17674_v52 = vpop.f32.mrb[222].mxu0 }
 0xe1b   :  { %v17675_v37 = vpop.f32.mrb[223].mxu0 }
 0xe1c   :  { %v9084_v25 = vadd.f32 %v17673_v1, %v17645_v39  ;;  %v17676_v28 = vadd.f32 %v17675_v37, %v17674_v52 }
 0xe1e   :  { %v9092_v53 = vadd.f32 %v9084_v25, %v8733_v50  ;;  %v9087_v10 = vadd.f32 %v17676_v28, %v17648_v45 }
 0xe20   :  { %v9093_v7 = vadd.f32 %v9087_v10, %v8734_v15 }
 0xe2d   :  { %v17693_v61 = vpop.f32.mrb[204].mxu1 }
 0xe2e   :  { %v17694_v8 = vpop.f32.mrb[205].mxu1 }
 0xe2f   :  { %v17695_v2 = vadd.f32 %v17694_v8, %v17693_v61  ;;  %v17696_v59 = vpop.f32.mrb[206].mxu1 }
 0xe30   :  { %v17697_v3 = vpop.f32.mrb[207].mxu1  ;;  %v17721_v31 = vpop.f32.mrb[224].mxu0 }
 0xe31   :  { %v17698_v57 = vadd.f32 %v17697_v3, %v17696_v59  ;;  %v17722_v19 = vpop.f32.mrb[225].mxu0 }
 0xe32   :  { %v17723_v13 = vadd.f32 %v17722_v19, %v17721_v31  ;;  %v17724_v27 = vpop.f32.mrb[226].mxu0 }
 0xe33   :  { %v17725_v26 = vpop.f32.mrb[227].mxu0 }
 0xe34   :  { %v9435_v32 = vadd.f32 %v17723_v13, %v17695_v2  ;;  %v17726_v6 = vadd.f32 %v17725_v26, %v17724_v27 }
 0xe35   :  { %v17699_v33 = vpop.f32.mrb[208].mxu1 }
 0xe36   :  { %v9449_v54 = vadd.f32 %v9435_v32, %v9090_v58  ;;  %v9438_v47 = vadd.f32 %v17726_v6, %v17698_v57  ;;  %v17700_v14 = vpop.f32.mrb[209].mxu1 }
 0xe37   :  { %v17701_v48 = vadd.f32 %v17700_v14, %v17699_v33  ;;  %v17702_v44 = vpop.f32.mrb[210].mxu1 }
 0xe38   :  { %v9450_v60 = vadd.f32 %v9438_v47, %v9091_v29  ;;  %v17703_v34 = vpop.f32.mrb[211].mxu1  ;;  %v17727_v40 = vpop.f32.mrb[228].mxu0 }
 0xe39   :  { %v17704_v35 = vadd.f32 %v17703_v34, %v17702_v44  ;;  %v17728_v49 = vpop.f32.mrb[229].mxu0 }
 0xe3a   :  { %v17729_v12 = vadd.f32 %v17728_v49, %v17727_v40  ;;  %v17730_v51 = vpop.f32.mrb[230].mxu0 }
 0xe3b   :  { %v17731_v62 = vpop.f32.mrb[231].mxu0 }
 0xe3c   :  { %v9443_v18 = vadd.f32 %v17729_v12, %v17701_v48  ;;  %v17732_v50 = vadd.f32 %v17731_v62, %v17730_v51 }
 0xe3e   :  { %v9451_v43 = vadd.f32 %v9443_v18, %v9092_v53  ;;  %v9446_v15 = vadd.f32 %v17732_v50, %v17704_v35 }
 0xe40   :  { %v9452_v11 = vadd.f32 %v9446_v15, %v9093_v7 }
 0xe4d   :  { %v17749_v17 = vpop.f32.mrb[212].mxu1 }
 0xe4e   :  { %v17750_v46 = vpop.f32.mrb[213].mxu1 }
 0xe4f   :  { %v17751_v23 = vadd.f32 %v17750_v46, %v17749_v17  ;;  %v17752_v63 = vpop.f32.mrb[214].mxu1 }
 0xe50   :  { %v17753_v16 = vpop.f32.mrb[215].mxu1  ;;  %v17777_v0 = vpop.f32.mrb[232].mxu0 }
 0xe51   :  { %v17754_v22 = vadd.f32 %v17753_v16, %v17752_v63  ;;  %v17778_v24 = vpop.f32.mrb[233].mxu0 }
 0xe52   :  { %v17779_v42 = vadd.f32 %v17778_v24, %v17777_v0  ;;  %v17780_v9 = vpop.f32.mrb[234].mxu0 }
 0xe53   :  { %v17781_v38 = vpop.f32.mrb[235].mxu0 }
 0xe54   :  { %v9794_v30 = vadd.f32 %v17779_v42, %v17751_v23  ;;  %v17782_v20 = vadd.f32 %v17781_v38, %v17780_v9 }
 0xe55   :  { %v17755_v58 = vpop.f32.mrb[216].mxu1 }
 0xe56   :  { %v9808_v55 = vadd.f32 %v9794_v30, %v9449_v54  ;;  %v9797_v56 = vadd.f32 %v17782_v20, %v17754_v22  ;;  %v17756_v39 = vpop.f32.mrb[217].mxu1 }
 0xe57   :  { %v17757_v4 = vadd.f32 %v17756_v39, %v17755_v58  ;;  %v17758_v29 = vpop.f32.mrb[218].mxu1 }
 0xe58   :  { %v9809_v36 = vadd.f32 %v9797_v56, %v9450_v60  ;;  %v17759_v41 = vpop.f32.mrb[219].mxu1  ;;  %v17783_v45 = vpop.f32.mrb[236].mxu0 }
 0xe59   :  { %v17760_v5 = vadd.f32 %v17759_v41, %v17758_v29  ;;  %v17784_v1 = vpop.f32.mrb[237].mxu0 }
 0xe5a   :  { %v17785_v52 = vadd.f32 %v17784_v1, %v17783_v45  ;;  %v17786_v37 = vpop.f32.mrb[238].mxu0 }
 0xe5b   :  { %v17787_v25 = vpop.f32.mrb[239].mxu0 }
 0xe5c   :  { %v9802_v28 = vadd.f32 %v17785_v52, %v17757_v4  ;;  %v17788_v53 = vadd.f32 %v17787_v25, %v17786_v37 }
 0xe5e   :  { %v9810_v10 = vadd.f32 %v9802_v28, %v9451_v43  ;;  %v9805_v7 = vadd.f32 %v17788_v53, %v17760_v5 }
 0xe60   :  { %v9811_v61 = vadd.f32 %v9805_v7, %v9452_v11 }
 0xe6d   :  { %v17805_v8 = vpop.f32.mrb[220].mxu1 }
 0xe6e   :  { %v17806_v2 = vpop.f32.mrb[221].mxu1 }
 0xe6f   :  { %v17807_v59 = vadd.f32 %v17806_v2, %v17805_v8  ;;  %v17808_v3 = vpop.f32.mrb[222].mxu1 }
 0xe70   :  { %v17809_v31 = vpop.f32.mrb[223].mxu1  ;;  %v17833_v57 = vpop.f32.mrb[240].mxu0 }
 0xe71   :  { %v17810_v19 = vadd.f32 %v17809_v31, %v17808_v3  ;;  %v17834_v13 = vpop.f32.mrb[241].mxu0 }
 0xe72   :  { %v17835_v27 = vadd.f32 %v17834_v13, %v17833_v57  ;;  %v17836_v26 = vpop.f32.mrb[242].mxu0  ;;  %v16838_v57 = vld [vmem:[#allocation29] ss:$0 sm:$0xff] }
 0xe73   :  { %v17837_v32 = vpop.f32.mrb[243].mxu0 }
 0xe74   :  { %v10153_v6 = vadd.f32 %v17835_v27, %v17807_v59  ;;  %v17838_v33 = vadd.f32 %v17837_v32, %v17836_v26  ;;  %v16839_v32 = vld [vmem:[#allocation31] ss:$0 sm:$0xff] }
 0xe75   :  { %v17811_v54 = vpop.f32.mrb[224].mxu1 }
 0xe76   :  { %v10167_v47 = vadd.f32 %v10153_v6, %v9808_v55  ;;  %v10156_v14 = vadd.f32 %v17838_v33, %v17810_v19  ;;  %v17812_v48 = vpop.f32.mrb[225].mxu1 }
 0xe77   :  { %v17813_v44 = vadd.f32 %v17812_v48, %v17811_v54  ;;  %v17814_v60 = vpop.f32.mrb[226].mxu1 }
 0xe78   :  { %v10178_v34 = vadd.f32 %v16837_v21, %v10167_v47  ;;  %v10168_v40 = vadd.f32 %v10156_v14, %v9809_v36  ;;  %v17815_v35 = vpop.f32.mrb[227].mxu1  ;;  %v17839_v49 = vpop.f32.mrb[244].mxu0 }
 0xe79   :  { %v17816_v12 = vadd.f32 %v17815_v35, %v17814_v60  ;;  %v17840_v51 = vpop.f32.mrb[245].mxu0 }
 0xe7a   :  { %v10179_v62 = vadd.f32 %v16837_v21, %v10168_v40  ;;  %v17841_v18 = vadd.f32 %v17840_v51, %v17839_v49  ;;  %v17842_v50 = vpop.f32.mrb[246].mxu0  ;;  %v10192_v43 = vmul.f32 %v10178_v34, %v10178_v34 }
 0xe7b   :  { %v17843_v15 = vpop.f32.mrb[247].mxu0 }
 0xe7c   :  { %v10182_v11 = vadd.f32 %v10179_v62, %v10178_v34  ;;  %v10193_v17 = vmul.f32 %v10179_v62, %v10179_v62  ;;  %v10161_v46 = vadd.f32 %v17841_v18, %v17813_v44  ;;  %v17844_v23 = vadd.f32 %v17843_v15, %v17842_v50  ;;  %v20082_v15 = vld [vmem:[%s23185_s15 + $0x10] sm:$0xff]  }
 0xe7e   :  { %v10196_v63 = vadd.f32 %v10193_v17, %v10192_v43  ;;  %v10169_v16 = vadd.f32 %v10161_v46, %v9810_v10  ;;  %v10164_v0 = vadd.f32 %v17844_v23, %v17816_v12  ;;  %v20081_v43 = vld [vmem:[%s23185_s15 + $0x8] sm:$0xff]   ;;  %v20084_v17 = vld [vmem:[%s23185_s15 + $0x20] sm:$0xff]   ;;  %v20086_v23 = vld [vmem:[%s23185_s15 + $0x30] sm:$0xff]  }
 0xe7f   :  { %v20085_v46 = vld [vmem:[%s23185_s15 + $0x28] sm:$0xff]  }
 0xe80   :  { %v10180_v22 = vadd.f32 %v16837_v21, %v10169_v16  ;;  %v10170_v24 = vadd.f32 %v10164_v0, %v9811_v61  ;;  %v20088_v16 = vld [vmem:[%s23185_s15 + $0x40] sm:$0xff]   ;;  %v20089_v0 = vld [vmem:[%s23185_s15 + $0x48] sm:$0xff]  }
 0xe82   :  { %v10183_v42 = vadd.f32 %v10182_v11, %v10180_v22  ;;  %v10194_v9 = vmul.f32 %v10180_v22, %v10180_v22  ;;  %v10181_v38 = vadd.f32 %v16837_v21, %v10170_v24  ;;  %v20083_v11 = vld [vmem:[%s23185_s15 + $0x18] sm:$0xff]  }
 0xe83   :  { %v20091_v24 = vld [vmem:[%s23185_s15 + $0x58] sm:$0xff]  }
 0xe84   :  { %v10197_v30 = vadd.f32 %v10196_v63, %v10194_v9  ;;  %v10184_v20 = vadd.f32 %v10183_v42, %v10181_v38  ;;  %v10195_v58 = vmul.f32 %v10181_v38, %v10181_v38  ;;  %v20087_v63 = vld [vmem:[%s23185_s15 + $0x38] sm:$0xff]   ;;  %v20092_v42 = vld [vmem:[%s23185_s15 + $0x60] sm:$0xff]   ;;  %v20093_v9 = vld [vmem:[%s23185_s15 + $0x68] sm:$0xff]  }
 0xe86   :  { %v10185_v55 = vrot.slane %v10184_v20, 4  ;;  %v10198_v56 = vadd.f32 %v10197_v30, %v10195_v58  ;;  %v20095_v30 = vld [vmem:[%s23185_s15 + $0x78] sm:$0xff]   ;;  %v20097_v58 = vld [vmem:[%s23185_s15 + $0x88] sm:$0xff]  }
 0xe88   :  { %v10186_v39 = vadd.f32 %v10185_v55, %v10184_v20  ;;  %v10199_v4 = vrot.slane %v10198_v56, 4  ;;  %v20096_v20 = vld [vmem:[%s23185_s15 + $0x80] sm:$0xff]   ;;  %v20098_v55 = vld [vmem:[%s23185_s15 + $0x90] sm:$0xff]  }
 0xe8a   :  { %v10187_v29 = vrot.slane %v10186_v39, 2  ;;  %v10200_v36 = vadd.f32 %v10199_v4, %v10198_v56  ;;  %v20099_v56 = vld [vmem:[%s23185_s15 + $0x98] sm:$0xff]   ;;  %v20101_v4 = vld [vmem:[%s23185_s15 + $0xa8] sm:$0xff]  }
 0xe8c   :  { %v10188_v41 = vadd.f32 %v10187_v29, %v10186_v39  ;;  %v10201_v45 = vrot.slane %v10200_v36, 2  ;;  %v20100_v39 = vld [vmem:[%s23185_s15 + $0xa0] sm:$0xff]   ;;  %v20102_v29 = vld [vmem:[%s23185_s15 + $0xb0] sm:$0xff]  }
 0xe8e   :  { %v10189_v5 = vrot.slane %v10188_v41, 1  ;;  %v10202_v1 = vadd.f32 %v10201_v45, %v10200_v36  ;;  %v20103_v36 = vld [vmem:[%s23185_s15 + $0xb8] sm:$0xff]   ;;  %v20105_v45 = vld [vmem:[%s23185_s15 + $0xc8] sm:$0xff]  }
 0xe90   :  { %v10190_v52 = vadd.f32 %v10189_v5, %v10188_v41  ;;  %v10203_v37 = vrot.slane %v10202_v1, 1  ;;  %v20104_v41 = vld [vmem:[%s23185_s15 + $0xc0] sm:$0xff]   ;;  %v20106_v5 = vld [vmem:[%s23185_s15 + $0xd0] sm:$0xff]  }
 0xe92   :  { %v10191_v25 = vmul.f32 0.03125, %v10190_v52  ;;  %v10204_v28 = vadd.f32 %v10203_v37, %v10202_v1  ;;  %v20107_v1 = vld [vmem:[%s23185_s15 + $0xd8] sm:$0xff]   ;;  %v20108_v52 = vld [vmem:[%s23185_s15 + $0xe0] sm:$0xff]   ;;  %v20109_v37 = vld [vmem:[%s23185_s15 + $0xe8] sm:$0xff]  }
 0xe94   :  { %v10205_v53 = vmul.f32 0.03125, %v10204_v28  ;;  %v10206_v10 = vmul.f32 %v10191_v25, %v10191_v25  ;;  %v10211_v7 = vsub.f32 %v10181_v38, %v10191_v25  ;;  %v10208_v61 = vsub.f32 %v10178_v34, %v10191_v25  ;;  %v20094_v38 = vld [vmem:[%s23185_s15 + $0x70] sm:$0xff]  }
 0xe95   :  { %v10209_v8 = vsub.f32 %v10179_v62, %v10191_v25  ;;  %v10210_v2 = vsub.f32 %v10180_v22, %v10191_v25  ;;  %v20090_v22 = vld [vmem:[%s23185_s15 + $0x50] sm:$0xff]  }
 0xe96   :  { %v10207_v59 = vsub.f32 %v10205_v53, %v10206_v10  ;;  %v20110_v25 = vld [vmem:[%s23185_s15 + $0xf0] sm:$0xff]   ;;  %v20111_v53 = vld [vmem:[%s23185_s15 + $0xf8] sm:$0xff]   ;;  %v20112_v10 = vld [vmem:[%s23185_s15 + $0x100] sm:$0xff]  }
 0xe97   :  { %v20134_v28 = vld [vmem:[#allocation32 + $0x10] sm:$0xff]  }
 0xe98   :  { %v10212_v3 = vadd.f32 1e-05, %v10207_v59  ;;  %18512 = vmatprep.subr.bf16.mxu0 %v20134_v28  ;;  %v20116_v59 = vld [vmem:[%s23185_s15 + $0x120] sm:$0xff]  }
 0xe99   :  { %18513 = vmatpush3.bf16.msra.mxu0 %v20134_v28 }
 0xe9a   :  { %20272 = vrsqrt.f32 %v10212_v3  ;;  %v20117_v3 = vld [vmem:[%s23185_s15 + $0x128] sm:$0xff]  }
 0xea4   :  { %v20273_v31 = vpop.eup %20272 }
 0xea5   :  { %v10217_v19 = vmul.f32 %v20273_v31, %v10211_v7  ;;  %v10214_v13 = vmul.f32 %v20273_v31, %v10208_v61  ;;  %v10215_v27 = vmul.f32 %v20273_v31, %v10209_v8  ;;  %v10216_v26 = vmul.f32 %v20273_v31, %v10210_v2  ;;  %v20137_v7 = vld [vmem:[#allocation32 + $0x18] sm:$0xff]   ;;  %v20113_v61 = vld [vmem:[%s23185_s15 + $0x108] sm:$0xff]   ;;  %v20114_v8 = vld [vmem:[%s23185_s15 + $0x110] sm:$0xff]  }
 0xea6   :  { %18514 = vmatprep.subr.bf16.mxu0 %v20137_v7  ;;  %v20115_v2 = vld [vmem:[%s23185_s15 + $0x118] sm:$0xff]   ;;  %v20118_v31 = vld [vmem:[%s23185_s15 + $0x130] sm:$0xff]  }
 0xea7   :  { %v10225_v6 = vmul.f32 %v16838_v57, %v10214_v13  ;;  %v10226_v33 = vmul.f32 %v16838_v57, %v10215_v27  ;;  %v10227_v21 = vmul.f32 %v16838_v57, %v10216_v26  ;;  %v10228_v54 = vmul.f32 %v16838_v57, %v10217_v19  ;;  %18515 = vmatpush3.bf16.msra.mxu0 %v20137_v7  ;;  %v22432_v57 = vld [vmem:[#allocation32] sm:$0xff]   ;;  %v20119_v19 = vld [vmem:[%s23185_s15 + $0x138] sm:$0xff]   ;;  %v20122_v26 = vld [vmem:[%s23185_s15 + $0x150] sm:$0xff]  }
 0xea8   :  { %18532 = vmatprep.subr.bf16.mxu0 %v22432_v57  ;;  %v20120_v13 = vld [vmem:[%s23185_s15 + $0x140] sm:$0xff]   ;;  %v20121_v27 = vld [vmem:[%s23185_s15 + $0x148] sm:$0xff]  }
 0xea9   :  { %v10236_v47 = vadd.f32 %v16839_v32, %v10225_v6  ;;  %v10237_v14 = vadd.f32 %v16839_v32, %v10226_v33  ;;  %v10238_v48 = vadd.f32 %v16839_v32, %v10227_v21  ;;  %v10239_v44 = vadd.f32 %v16839_v32, %v10228_v54  ;;  %v20123_v32 = vld [vmem:[%s23185_s15 + $0x158] sm:$0xff]   ;;  %v20124_v6 = vld [vmem:[%s23185_s15 + $0x160] sm:$0xff]   ;;  %v20125_v33 = vld [vmem:[%s23185_s15 + $0x168] sm:$0xff]  }
 0xeaa   :  { %v20126_v21 = vld [vmem:[%s23185_s15 + $0x170] sm:$0xff]   ;;  %v20127_v54 = vld [vmem:[%s23185_s15 + $0x178] sm:$0xff]  }
 0xeab   :  { %vm10240_vm11 = vcmp.ge.f32.partialorder %v10236_v47, 0.0  ;;  %vm10241_vm4 = vcmp.ge.f32.partialorder %v10237_v14, 0.0  ;;  %v10244_v60 = vmul.f32 0.01, %v10236_v47  ;;  %v10245_v34 = vmul.f32 0.01, %v10237_v14 }
 0xeac   :  { %vm10242_vm5 = vcmp.ge.f32.partialorder %v10238_v48, 0.0  ;;  %vm10243_vm7 = vcmp.ge.f32.partialorder %v10239_v44, 0.0  ;;  %v10246_v40 = vmul.f32 0.01, %v10238_v48  ;;  %v10247_v35 = vmul.f32 0.01, %v10239_v44 }
 0xead   :  { %v10248_v49 = vsel %vm10240_vm11, %v10236_v47, %v10244_v60  ;;  %v10249_v12 = vsel %vm10241_vm4, %v10237_v14, %v10245_v34  ;;  %v20128_v47 = vld [vmem:[%s23185_s15 + $0x180] sm:$0xff]   ;;  %v20129_v14 = vld [vmem:[%s23185_s15 + $0x188] sm:$0xff]  }
 0xeae   :  { %v10252_v51 = vpack.c.bf16 %v10249_v12, %v10248_v49  ;;  %v10250_v62 = vsel %vm10242_vm5, %v10238_v48, %v10246_v40  ;;  %v10251_v18 = vsel %vm10243_vm7, %v10239_v44, %v10247_v35  ;;  %v20130_v48 = vld [vmem:[%s23185_s15 + $0x190] sm:$0xff]   ;;  %v20131_v44 = vld [vmem:[%s23185_s15 + $0x198] sm:$0xff]   ;;  %v20132_v60 = vld [vmem:[%s23185_s15 + $0x1a0] sm:$0xff]  }
 0xeaf   :  { %v10253_v50 = vpack.c.bf16 %v10251_v18, %v10250_v62  ;;  %v20133_v34 = vld [vmem:[%s23185_s15 + $0x1a8] sm:$0xff]   ;;  %v20135_v40 = vld [vmem:[%s23185_s15 + $0x1b0] sm:$0xff]   ;;  %v20136_v12 = vld [vmem:[%s23185_s15 + $0x1b8] sm:$0xff]  }
 0xeb0   :  { %18364 = vmatprep.subr.bf16.mxu1 %v10252_v51  ;;  %v20138_v62 = vld [vmem:[%s23185_s15 + $0x1c0] sm:$0xff]   ;;  %v20147_v7 = vld [vmem:[#allocation32 + $0x8] sm:$0xff]  }
 0xeb1   :  { %18365 = vmatpush3.bf16.msra.mxu1 %v10252_v51 }
 0xeb2   :  { %18366 = vmatprep.subr.bf16.mxu1 %v10253_v50 }
 0xeb5   :  { %18367 = vmatpush3.bf16.msra.mxu1 %v10253_v50 }
 0xeb8   :  { %18369 = vmatmul.mubr.msk.bf16.vlgmr.msra.gmra.mrb[228].mxu1 %vm1579_vm6, %v20081_v43 }
 0xeb9   :  { %18372 = vmatprep.mubr.msk.bf16.mxu1 %vm1579_vm6, %v20082_v15 }
 0xec0   :  { %18373 = vmatmul.mubr.msk.bf16.gmra.mrb[232].mxu1 %vm1579_vm6, %v20083_v11 }
 0xec1   :  { %18376 = vmatprep.mubr.msk.bf16.mxu1 %vm1579_vm6, %v20084_v17  ;;  %v20139_v17 = vld [vmem:[%s23185_s15 + $0x1c8] sm:$0xff]  }
 0xec8   :  { %18377 = vmatmul.mubr.msk.bf16.gmra.mrb[236].mxu1 %vm1579_vm6, %v20085_v46 }
 0xec9   :  { %18380 = vmatprep.mubr.msk.bf16.mxu1 %vm1579_vm6, %v20086_v23  ;;  %v20140_v23 = vld [vmem:[%s23185_s15 + $0x1d0] sm:$0xff]  }
 0xed0   :  { %18381 = vmatmul.mubr.msk.bf16.gmra.mrb[240].mxu1 %vm1579_vm6, %v20087_v63 }
 0xed1   :  { %18384 = vmatprep.mubr.msk.bf16.mxu1 %vm1579_vm6, %v20088_v16 }
 0xed8   :  { %18385 = vmatmul.mubr.msk.bf16.gmra.mrb[244].mxu1 %vm1579_vm6, %v20089_v0 }
 0xed9   :  { %18388 = vmatprep.mubr.msk.bf16.mxu1 %vm1579_vm6, %v20090_v22 }
 0xee0   :  { %18389 = vmatmul.mubr.msk.bf16.gmra.mrb[248].mxu1 %vm1579_vm6, %v20091_v24 }
 0xee1   :  { %18392 = vmatprep.mubr.msk.bf16.mxu1 %vm1579_vm6, %v20092_v42  ;;  %v20141_v42 = vld [vmem:[%s23185_s15 + $0x1d8] sm:$0xff]  }
 0xee8   :  { %18393 = vmatmul.mubr.msk.bf16.gmra.mrb[252].mxu1 %vm1579_vm6, %v20093_v9 }
 0xee9   :  { %18396 = vmatprep.mubr.msk.bf16.mxu1 %vm1579_vm6, %v20094_v38  ;;  %v20142_v38 = vld [vmem:[%s23185_s15 + $0x1e0] sm:$0xff]  }
 0xef0   :  { %18397 = vmatmul.mubr.msk.bf16.gmra.mrb[0].mxu1 %vm1579_vm6, %v20095_v30 }
 0xef1   :  { %18400 = vmatprep.mubr.msk.bf16.mxu1 %vm1579_vm6, %v20096_v20 }
 0xef8   :  { %18401 = vmatmul.mubr.msk.bf16.gmra.mrb[4].mxu1 %vm1579_vm6, %v20097_v58 }
 0xef9   :  { %18404 = vmatprep.mubr.msk.bf16.mxu1 %vm1579_vm6, %v20098_v55 }
 0xf00   :  { %18405 = vmatmul.mubr.msk.bf16.gmra.mrb[8].mxu1 %vm1579_vm6, %v20099_v56 }
 0xf01   :  { %18408 = vmatprep.mubr.msk.bf16.mxu1 %vm1579_vm6, %v20100_v39  ;;  %v20143_v39 = vld [vmem:[%s23185_s15 + $0x1e8] sm:$0xff]  }
 0xf08   :  { %18409 = vmatmul.mubr.msk.bf16.gmra.mrb[12].mxu1 %vm1579_vm6, %v20101_v4 }
 0xf09   :  { %18412 = vmatprep.mubr.msk.bf16.mxu1 %vm1579_vm6, %v20102_v29  ;;  %v20145_v29 = vld [vmem:[%s23185_s15 + $0x1f0] sm:$0xff]  }
 0xf10   :  { %18413 = vmatmul.mubr.msk.bf16.gmra.mrb[16].mxu1 %vm1579_vm6, %v20103_v36 }
 0xf11   :  { %18416 = vmatprep.mubr.msk.bf16.mxu1 %vm1579_vm6, %v20104_v41 }
 0xf18   :  { %18417 = vmatmul.mubr.msk.bf16.gmra.mrb[20].mxu1 %vm1579_vm6, %v20105_v45 }
 0xf19   :  { %18420 = vmatprep.mubr.msk.bf16.mxu1 %vm1579_vm6, %v20106_v5 }
 0xf20   :  { %18421 = vmatmul.mubr.msk.bf16.gmra.mrb[24].mxu1 %vm1579_vm6, %v20107_v1 }
 0xf21   :  { %18424 = vmatprep.mubr.msk.bf16.mxu1 %vm1579_vm6, %v20108_v52  ;;  %v20146_v52 = vld [vmem:[%s23185_s15 + $0x1f8] sm:$0xff]  }
 0xf28   :  { %18425 = vmatmul.mubr.msk.bf16.gmra.mrb[28].mxu1 %vm1579_vm6, %v20109_v37 }
 0xf29   :  { %18428 = vmatprep.mubr.msk.bf16.mxu1 %vm1579_vm6, %v20110_v25  ;;  %v20148_v25 = vld [vmem:[%s23185_s15 + $0x200] sm:$0xff]  }
 0xf30   :  { %18429 = vmatmul.mubr.msk.bf16.gmra.mrb[32].mxu1 %vm1579_vm6, %v20111_v53 }
 0xf31   :  { %18432 = vmatprep.mubr.msk.bf16.mxu1 %vm1579_vm6, %v20112_v10 }
 0xf38   :  { %18433 = vmatmul.mubr.msk.bf16.gmra.mrb[36].mxu1 %vm1579_vm6, %v20113_v61 }
 0xf39   :  { %18436 = vmatprep.mubr.msk.bf16.mxu1 %vm1579_vm6, %v20114_v8 }
 0xf40   :  { %18437 = vmatmul.mubr.msk.bf16.gmra.mrb[40].mxu1 %vm1579_vm6, %v20115_v2  ;;  %v20149_v2 = vld [vmem:[%s23185_s15 + $0x208] sm:$0xff]  }
 0xf41   :  { %18440 = vmatprep.mubr.msk.bf16.mxu1 %vm1579_vm6, %v20116_v59  ;;  %v20154_v59 = vld [vmem:[#allocation32 + $0x20] sm:$0xff]  }
 0xf48   :  { %18441 = vmatmul.mubr.msk.bf16.gmra.mrb[44].mxu1 %vm1579_vm6, %v20117_v3 }
 0xf49   :  { %18444 = vmatprep.mubr.msk.bf16.mxu1 %vm1579_vm6, %v20118_v31  ;;  %v20150_v31 = vld [vmem:[%s23185_s15 + $0x210] sm:$0xff]  }
 0xf50   :  { %18445 = vmatmul.mubr.msk.bf16.gmra.mrb[48].mxu1 %vm1579_vm6, %v20119_v19 }
 0xf51   :  { %18448 = vmatprep.mubr.msk.bf16.mxu1 %vm1579_vm6, %v20120_v13 }
 0xf58   :  { %18449 = vmatmul.mubr.msk.bf16.gmra.mrb[52].mxu1 %vm1579_vm6, %v20121_v27 }
 0xf59   :  { %18452 = vmatprep.mubr.msk.bf16.mxu1 %vm1579_vm6, %v20122_v26 }
 0xf60   :  { %18453 = vmatmul.mubr.msk.bf16.gmra.mrb[56].mxu1 %vm1579_vm6, %v20123_v32  ;;  %v20151_v32 = vld [vmem:[%s23185_s15 + $0x218] sm:$0xff]  }
 0xf61   :  { %18456 = vmatprep.mubr.msk.bf16.mxu1 %vm1579_vm6, %v20124_v6 }
 0xf68   :  { %18457 = vmatmul.mubr.msk.bf16.gmra.mrb[60].mxu1 %vm1579_vm6, %v20125_v33  ;;  %v20152_v33 = vld [vmem:[%s23185_s15 + $0x220] sm:$0xff]  }
 0xf69   :  { %18460 = vmatprep.mubr.msk.bf16.mxu1 %vm1579_vm6, %v20126_v21 }
 0xf70   :  { %18461 = vmatmul.mubr.msk.bf16.gmra.mrb[64].mxu1 %vm1579_vm6, %v20127_v54 }
 0xf71   :  { %18464 = vmatprep.mubr.msk.bf16.mxu1 %vm1579_vm6, %v20128_v47 }
 0xf78   :  { %18465 = vmatmul.mubr.msk.bf16.gmra.mrb[68].mxu1 %vm1579_vm6, %v20129_v14 }
 0xf79   :  { %18468 = vmatprep.mubr.msk.bf16.mxu1 %vm1579_vm6, %v20130_v48 }
 0xf80   :  { %18469 = vmatmul.mubr.msk.bf16.gmra.mrb[72].mxu1 %vm1579_vm6, %v20131_v44  ;;  %v20153_v44 = vld [vmem:[%s23185_s15 + $0x228] sm:$0xff]  }
 0xf81   :  { %18472 = vmatprep.mubr.msk.bf16.mxu1 %vm1579_vm6, %v20132_v60 }
 0xf88   :  { %18473 = vmatmul.mubr.msk.bf16.gmra.mrb[76].mxu1 %vm1579_vm6, %v20133_v34  ;;  %v20155_v34 = vld [vmem:[%s23185_s15 + $0x230] sm:$0xff]  }
 0xf89   :  { %18476 = vmatprep.mubr.msk.bf16.mxu1 %vm1579_vm6, %v20135_v40 }
 0xf8b   :  { %v22467_v35 = vpop.f32.mrb[228].mxu1 }
 0xf8c   :  { %v22469_v49 = vpop.f32.mrb[229].mxu1 }
 0xf8d   :  { %v22472_v51 = vpop.f32.mrb[230].mxu1 }
 0xf8e   :  { %v11584_v18 = vpack.c.bf16 %v22472_v51, %v22467_v35  ;;  %v22477_v50 = vpop.f32.mrb[231].mxu1 }
 0xf8f   :  { %v11583_v43 = vpack.c.bf16 %v22477_v50, %v22469_v49 }
 0xf90   :  { %18477 = vmatmul.mubr.msk.bf16.gmra.mrb[80].mxu1 %vm1579_vm6, %v20136_v12 }
 0xf91   :  { %18480 = vmatprep.mubr.msk.bf16.mxu1 %vm1579_vm6, %v20138_v62 }
 0xf93   :  { %v22483_v15 = vpop.f32.mrb[232].mxu1 }
 0xf94   :  { %v22485_v11 = vpop.f32.mrb[233].mxu1 }
 0xf95   :  { %v22488_v46 = vpop.f32.mrb[234].mxu1 }
 0xf96   :  { %v11586_v63 = vpack.c.bf16 %v22488_v46, %v22483_v15  ;;  %v22493_v16 = vpop.f32.mrb[235].mxu1 }
 0xf97   :  { %v11585_v0 = vpack.c.bf16 %v22493_v16, %v22485_v11 }
 0xf98   :  { %18481 = vmatmul.mubr.msk.bf16.gmra.mrb[84].mxu1 %vm1579_vm6, %v20139_v17 }
 0xf99   :  { %18484 = vmatprep.mubr.msk.bf16.mxu1 %vm1579_vm6, %v20140_v23 }
 0xf9b   :  { %v22499_v22 = vpop.f32.mrb[236].mxu1 }
 0xf9c   :  { %v22501_v24 = vpop.f32.mrb[237].mxu1 }
 0xf9d   :  { %v22504_v9 = vpop.f32.mrb[238].mxu1 }
 0xf9e   :  { %v11588_v30 = vpack.c.bf16 %v22504_v9, %v22499_v22  ;;  %v22509_v20 = vpop.f32.mrb[239].mxu1 }
 0xf9f   :  { %v11587_v58 = vpack.c.bf16 %v22509_v20, %v22501_v24 }
 0xfa0   :  { %18485 = vmatmul.mubr.msk.bf16.gmra.mrb[88].mxu1 %vm1579_vm6, %v20141_v42  ;;  %v20156_v42 = vld [vmem:[%s23185_s15 + $0x238] sm:$0xff]  }
 0xfa1   :  { %18488 = vmatprep.mubr.msk.bf16.mxu1 %vm1579_vm6, %v20142_v38 }
 0xfa3   :  { %v22515_v55 = vpop.f32.mrb[240].mxu1 }
 0xfa4   :  { %v22517_v56 = vpop.f32.mrb[241].mxu1 }
 0xfa5   :  { %v22520_v4 = vpop.f32.mrb[242].mxu1 }
 0xfa6   :  { %v11590_v36 = vpack.c.bf16 %v22520_v4, %v22515_v55  ;;  %v22525_v41 = vpop.f32.mrb[243].mxu1  ;;  %v20160_v55 = vld [vmem:[#allocation32 + $0x40] sm:$0xff]  }
 0xfa7   :  { %v11589_v45 = vpack.c.bf16 %v22525_v41, %v22517_v56 }
 0xfa8   :  { %18489 = vmatmul.mubr.msk.bf16.gmra.mrb[92].mxu1 %vm1579_vm6, %v20143_v39 }
 0xfa9   :  { %18492 = vmatprep.mubr.msk.bf16.mxu1 %vm1579_vm6, %v20145_v29 }
 0xfab   :  { %v18386_v5 = vpop.f32.mrb[244].mxu1 }
 0xfac   :  { %v11072_v1 = vpop.f32.mrb[245].mxu1 }
 0xfad   :  { %v18387_v37 = vpop.f32.mrb[246].mxu1 }
 0xfae   :  { %v11592_v28 = vpack.c.bf16 %v18387_v37, %v18386_v5  ;;  %v11075_v53 = vpop.f32.mrb[247].mxu1 }
 0xfaf   :  { %v11591_v10 = vpack.c.bf16 %v11075_v53, %v11072_v1  ;;  %v20157_v1 = vld [vmem:[#allocation32 + $0x28] sm:$0xff]  }
 0xfb0   :  { %18493 = vmatmul.mubr.msk.bf16.gmra.mrb[96].mxu1 %vm1579_vm6, %v20146_v52 }
 0xfb1   :  { %18516 = vmatprep.mubr.msk.bf16.mxu0 %vm1579_vm6, %v11591_v10  ;;  %18496 = vmatprep.mubr.msk.bf16.mxu1 %vm1579_vm6, %v20148_v25 }
 0xfb2   :  { %18517 = vmatmul.mubr.msk.bf16.vlgmr.msra.gmra.mrb[248].mxu0 %vm1579_vm6, %v11592_v28 }
 0xfb3   :  { %v18390_v61 = vpop.f32.mrb[248].mxu1  ;;  %18533 = vmatpush3.bf16.msra.mxu0 %v22432_v57 }
 0xfb4   :  { %v11088_v8 = vpop.f32.mrb[249].mxu1  ;;  %18534 = vmatprep.subr.bf16.mxu0 %v20147_v7 }
 0xfb5   :  { %v18391_v3 = vpop.f32.mrb[250].mxu1 }
 0xfb6   :  { %v11594_v19 = vpack.c.bf16 %v18391_v3, %v18390_v61  ;;  %v11091_v13 = vpop.f32.mrb[251].mxu1 }
 0xfb7   :  { %v11593_v27 = vpack.c.bf16 %v11091_v13, %v11088_v8  ;;  %18535 = vmatpush3.bf16.msra.mxu0 %v20147_v7 }
 0xfb8   :  { %18497 = vmatmul.mubr.msk.bf16.gmra.mrb[100].mxu1 %vm1579_vm6, %v20149_v2  ;;  %18552 = vmatprep.subr.bf16.mxu0 %v20154_v59 }
 0xfb9   :  { %18520 = vmatprep.mubr.msk.bf16.mxu0 %vm1579_vm6, %v11593_v27  ;;  %18500 = vmatprep.mubr.msk.bf16.mxu1 %vm1579_vm6, %v20150_v31 }
 0xfba   :  { %18521 = vmatmul.mubr.msk.bf16.gmra.mrb[252].mxu0 %vm1579_vm6, %v11594_v19 }
 0xfbb   :  { %v18394_v57 = vpop.f32.mrb[252].mxu1 }
 0xfbc   :  { %v11104_v26 = vpop.f32.mrb[253].mxu1 }
 0xfbd   :  { %v18395_v6 = vpop.f32.mrb[254].mxu1 }
 0xfbe   :  { %v11596_v21 = vpack.c.bf16 %v18395_v6, %v18394_v57  ;;  %v11107_v54 = vpop.f32.mrb[255].mxu1 }
 0xfbf   :  { %v11595_v47 = vpack.c.bf16 %v11107_v54, %v11104_v26 }
 0xfc0   :  { %18501 = vmatmul.mubr.msk.bf16.gmra.mrb[104].mxu1 %vm1579_vm6, %v20151_v32 }
 0xfc1   :  { %18524 = vmatprep.mubr.msk.bf16.mxu0 %vm1579_vm6, %v11595_v47  ;;  %18504 = vmatprep.mubr.msk.bf16.mxu1 %vm1579_vm6, %v20152_v33 }
 0xfc2   :  { %18525 = vmatmul.mubr.msk.bf16.gmra.mrb[0].mxu0 %vm1579_vm6, %v11596_v21 }
 0xfc3   :  { %v18398_v14 = vpop.f32.mrb[0].mxu1 }
 0xfc4   :  { %v11120_v48 = vpop.f32.mrb[1].mxu1 }
 0xfc5   :  { %v18399_v60 = vpop.f32.mrb[2].mxu1 }
 0xfc6   :  { %v11598_v40 = vpack.c.bf16 %v18399_v60, %v18398_v14  ;;  %v11123_v12 = vpop.f32.mrb[3].mxu1  ;;  %v20161_v60 = vld [vmem:[#allocation32 + $0x48] sm:$0xff]  }
 0xfc7   :  { %v11597_v62 = vpack.c.bf16 %v11123_v12, %v11120_v48  ;;  %v20162_v12 = vld [vmem:[#allocation32 + $0x50] sm:$0xff]  }
 0xfc8   :  { %18505 = vmatmul.mubr.msk.bf16.gmra.mrb[108].mxu1 %vm1579_vm6, %v20153_v44 }
 0xfc9   :  { %18528 = vmatprep.mubr.msk.bf16.mxu0 %vm1579_vm6, %v11597_v62  ;;  %18508 = vmatprep.mubr.msk.bf16.mxu1 %vm1579_vm6, %v20155_v34 }
 0xfca   :  { %18529 = vmatmul.mubr.msk.bf16.gmra.mrb[4].mxu0 %vm1579_vm6, %v11598_v40 }
 0xfcb   :  { %18536 = vmatprep.mubr.msk.bf16.mxu0 %vm1579_vm6, %v11583_v43  ;;  %v18402_v17 = vpop.f32.mrb[4].mxu1  ;;  %v20158_v43 = vld [vmem:[#allocation32 + $0x30] sm:$0xff]  }
 0xfcc   :  { %v11136_v23 = vpop.f32.mrb[5].mxu1 }
 0xfcd   :  { %v18403_v38 = vpop.f32.mrb[6].mxu1 }
 0xfce   :  { %v11600_v39 = vpack.c.bf16 %v18403_v38, %v18402_v17  ;;  %v11139_v29 = vpop.f32.mrb[7].mxu1 }
 0xfcf   :  { %v11599_v5 = vpack.c.bf16 %v11139_v29, %v11136_v23 }
 0xfd0   :  { %18509 = vmatmul.mubr.msk.bf16.gmra.mrb[112].mxu1 %vm1579_vm6, %v20156_v42 }
 0xfd2   :  { %18537 = vmatmul.mubr.msk.bf16.vlgmr.msra.gmra.mrb[248].mxu0 %vm1579_vm6, %v11584_v18 }
 0xfd3   :  { %18540 = vmatprep.mubr.msk.bf16.mxu0 %vm1579_vm6, %v11585_v0  ;;  %18553 = vmatpush3.bf16.msra.mxu0 %v20154_v59  ;;  %v18406_v49 = vpop.f32.mrb[8].mxu1 }
 0xfd4   :  { %18554 = vmatprep.subr.bf16.mxu0 %v20157_v1  ;;  %v11152_v50 = vpop.f32.mrb[9].mxu1 }
 0xfd5   :  { %v18407_v52 = vpop.f32.mrb[10].mxu1 }
 0xfd6   :  { %v11602_v37 = vpack.c.bf16 %v18407_v52, %v18406_v49  ;;  %v11155_v25 = vpop.f32.mrb[11].mxu1 }
 0xfd7   :  { %18555 = vmatpush3.bf16.msra.mxu0 %v20157_v1  ;;  %v11601_v28 = vpack.c.bf16 %v11155_v25, %v11152_v50 }
 0xfd8   :  { %18572 = vmatprep.subr.bf16.mxu0 %v20158_v43 }
 0xfda   :  { %18541 = vmatmul.mubr.msk.bf16.gmra.mrb[252].mxu0 %vm1579_vm6, %v11586_v63 }
 0xfdb   :  { %18544 = vmatprep.mubr.msk.bf16.mxu0 %vm1579_vm6, %v11587_v58  ;;  %v18410_v35 = vpop.f32.mrb[12].mxu1 }
 0xfdc   :  { %v11168_v51 = vpop.f32.mrb[13].mxu1 }
 0xfdd   :  { %v18411_v18 = vpop.f32.mrb[14].mxu1 }
 0xfde   :  { %v11604_v11 = vpack.c.bf16 %v18411_v18, %v18410_v35  ;;  %v11171_v16 = vpop.f32.mrb[15].mxu1 }
 0xfdf   :  { %v11603_v0 = vpack.c.bf16 %v11171_v16, %v11168_v51 }
 0xfe2   :  { %18545 = vmatmul.mubr.msk.bf16.gmra.mrb[0].mxu0 %vm1579_vm6, %v11588_v30 }
 0xfe3   :  { %18548 = vmatprep.mubr.msk.bf16.mxu0 %vm1579_vm6, %v11589_v45  ;;  %v18414_v15 = vpop.f32.mrb[16].mxu1  ;;  %v20159_v45 = vld [vmem:[#allocation32 + $0x38] sm:$0xff]  }
 0xfe4   :  { %v11184_v46 = vpop.f32.mrb[17].mxu1 }
 0xfe5   :  { %v18415_v63 = vpop.f32.mrb[18].mxu1 }
 0xfe6   :  { %v11606_v24 = vpack.c.bf16 %v18415_v63, %v18414_v15  ;;  %v11187_v20 = vpop.f32.mrb[19].mxu1  ;;  %v20163_v15 = vld [vmem:[#allocation32 + $0x58] sm:$0xff]  }
 0xfe7   :  { %v11605_v58 = vpack.c.bf16 %v11187_v20, %v11184_v46 }
 0xfea   :  { %18549 = vmatmul.mubr.msk.bf16.gmra.mrb[4].mxu0 %vm1579_vm6, %v11590_v36 }
 0xfeb   :  { %18556 = vmatprep.mubr.msk.bf16.mxu0 %vm1579_vm6, %v11599_v5  ;;  %v18418_v22 = vpop.f32.mrb[20].mxu1 }
 0xfec   :  { %v11200_v9 = vpop.f32.mrb[21].mxu1 }
 0xfed   :  { %v18419_v30 = vpop.f32.mrb[22].mxu1 }
 0xfee   :  { %v11608_v53 = vpack.c.bf16 %v18419_v30, %v18418_v22  ;;  %v11203_v56 = vpop.f32.mrb[23].mxu1 }
 0xfef   :  { %v11607_v41 = vpack.c.bf16 %v11203_v56, %v11200_v9 }
 0xff2   :  { %18557 = vmatmul.mubr.msk.bf16.vlgmr.msra.gmra.mrb[248].mxu0 %vm1579_vm6, %v11600_v39 }
 0xff3   :  { %18560 = vmatprep.mubr.msk.bf16.mxu0 %vm1579_vm6, %v11601_v28  ;;  %18573 = vmatpush3.bf16.msra.mxu0 %v20158_v43  ;;  %v18422_v10 = vpop.f32.mrb[24].mxu1 }
 0xff4   :  { %18574 = vmatprep.subr.bf16.mxu0 %v20159_v45  ;;  %v11216_v7 = vpop.f32.mrb[25].mxu1 }
 0xff5   :  { %v18423_v4 = vpop.f32.mrb[26].mxu1 }
 0xff6   :  { %v11610_v36 = vpack.c.bf16 %v18423_v4, %v18422_v10  ;;  %v11219_v61 = vpop.f32.mrb[27].mxu1 }
 0xff7   :  { %18575 = vmatpush3.bf16.msra.mxu0 %v20159_v45  ;;  %v11609_v8 = vpack.c.bf16 %v11219_v61, %v11216_v7 }
 0xff8   :  { %18592 = vmatprep.subr.bf16.mxu0 %v20160_v55 }
 0xffa   :  { %18561 = vmatmul.mubr.msk.bf16.gmra.mrb[252].mxu0 %vm1579_vm6, %v11602_v37 }
 0xffb   :  { %18564 = vmatprep.mubr.msk.bf16.mxu0 %vm1579_vm6, %v11603_v0  ;;  %v18426_v2 = vpop.f32.mrb[28].mxu1 }
 0xffc   :  { %v11232_v59 = vpop.f32.mrb[29].mxu1 }
 0xffd   :  { %v18427_v3 = vpop.f32.mrb[30].mxu1 }
 0xffe   :  { %v11612_v31 = vpack.c.bf16 %v18427_v3, %v18426_v2  ;;  %v11235_v19 = vpop.f32.mrb[31].mxu1 }
 0xfff   :  { %v11611_v13 = vpack.c.bf16 %v11235_v19, %v11232_v59 }
0x1002   :  { %18565 = vmatmul.mubr.msk.bf16.gmra.mrb[0].mxu0 %vm1579_vm6, %v11604_v11 }
0x1003   :  { %18568 = vmatprep.mubr.msk.bf16.mxu0 %vm1579_vm6, %v11605_v58  ;;  %v18430_v27 = vpop.f32.mrb[32].mxu1 }
0x1004   :  { %v11248_v57 = vpop.f32.mrb[33].mxu1 }
0x1005   :  { %v18431_v26 = vpop.f32.mrb[34].mxu1 }
0x1006   :  { %v11614_v32 = vpack.c.bf16 %v18431_v26, %v18430_v27  ;;  %v11251_v6 = vpop.f32.mrb[35].mxu1  ;;  %v20165_v27 = vld [vmem:[#allocation32 + $0x68] sm:$0xff]  }
0x1007   :  { %v11613_v33 = vpack.c.bf16 %v11251_v6, %v11248_v57 }
0x100a   :  { %18569 = vmatmul.mubr.msk.bf16.gmra.mrb[4].mxu0 %vm1579_vm6, %v11606_v24  ;;  %v20164_v24 = vld [vmem:[#allocation32 + $0x60] sm:$0xff]  }
0x100b   :  { %18576 = vmatprep.mubr.msk.bf16.mxu0 %vm1579_vm6, %v11607_v41  ;;  %v18434_v21 = vpop.f32.mrb[36].mxu1 }
0x100c   :  { %v11264_v54 = vpop.f32.mrb[37].mxu1 }
0x100d   :  { %v18435_v47 = vpop.f32.mrb[38].mxu1 }
0x100e   :  { %v11616_v14 = vpack.c.bf16 %v18435_v47, %v18434_v21  ;;  %v11267_v48 = vpop.f32.mrb[39].mxu1 }
0x100f   :  { %v11615_v44 = vpack.c.bf16 %v11267_v48, %v11264_v54 }
0x1012   :  { %18577 = vmatmul.mubr.msk.bf16.vlgmr.msra.gmra.mrb[248].mxu0 %vm1579_vm6, %v11608_v53 }
0x1013   :  { %18580 = vmatprep.mubr.msk.bf16.mxu0 %vm1579_vm6, %v11609_v8  ;;  %18593 = vmatpush3.bf16.msra.mxu0 %v20160_v55  ;;  %v18438_v34 = vpop.f32.mrb[40].mxu1 }
0x1014   :  { %18594 = vmatprep.subr.bf16.mxu0 %v20161_v60  ;;  %v11280_v40 = vpop.f32.mrb[41].mxu1 }
0x1015   :  { %v18439_v62 = vpop.f32.mrb[42].mxu1 }
0x1016   :  { %v11618_v17 = vpack.c.bf16 %v18439_v62, %v18438_v34  ;;  %v11283_v23 = vpop.f32.mrb[43].mxu1 }
0x1017   :  { %18595 = vmatpush3.bf16.msra.mxu0 %v20161_v60  ;;  %v11617_v42 = vpack.c.bf16 %v11283_v23, %v11280_v40 }
0x1018   :  { %18612 = vmatprep.subr.bf16.mxu0 %v20162_v12 }
0x101a   :  { %18581 = vmatmul.mubr.msk.bf16.gmra.mrb[252].mxu0 %vm1579_vm6, %v11610_v36 }
0x101b   :  { %18584 = vmatprep.mubr.msk.bf16.mxu0 %vm1579_vm6, %v11611_v13  ;;  %v18442_v38 = vpop.f32.mrb[44].mxu1 }
0x101c   :  { %v11296_v39 = vpop.f32.mrb[45].mxu1 }
0x101d   :  { %v18443_v29 = vpop.f32.mrb[46].mxu1 }
0x101e   :  { %v11620_v5 = vpack.c.bf16 %v18443_v29, %v18442_v38  ;;  %v11299_v1 = vpop.f32.mrb[47].mxu1 }
0x101f   :  { %v11619_v49 = vpack.c.bf16 %v11299_v1, %v11296_v39 }
0x1022   :  { %18585 = vmatmul.mubr.msk.bf16.gmra.mrb[0].mxu0 %vm1579_vm6, %v11612_v31 }
0x1023   :  { %18588 = vmatprep.mubr.msk.bf16.mxu0 %vm1579_vm6, %v11613_v33  ;;  %v18446_v50 = vpop.f32.mrb[48].mxu1 }
0x1024   :  { %v11312_v43 = vpop.f32.mrb[49].mxu1 }
0x1025   :  { %v18447_v52 = vpop.f32.mrb[50].mxu1 }
0x1026   :  { %v11622_v37 = vpack.c.bf16 %v18447_v52, %v18446_v50  ;;  %v11315_v25 = vpop.f32.mrb[51].mxu1  ;;  %v20167_v50 = vld [vmem:[#allocation32 + $0x78] sm:$0xff]  }
0x1027   :  { %v11621_v28 = vpack.c.bf16 %v11315_v25, %v11312_v43 }
0x102a   :  { %18589 = vmatmul.mubr.msk.bf16.gmra.mrb[4].mxu0 %vm1579_vm6, %v11614_v32  ;;  %v20166_v32 = vld [vmem:[#allocation32 + $0x70] sm:$0xff]  }
0x102b   :  { %18596 = vmatprep.mubr.msk.bf16.mxu0 %vm1579_vm6, %v11615_v44  ;;  %v18450_v35 = vpop.f32.mrb[52].mxu1 }
0x102c   :  { %v11328_v51 = vpop.f32.mrb[53].mxu1 }
0x102d   :  { %v18451_v18 = vpop.f32.mrb[54].mxu1 }
0x102e   :  { %v11624_v11 = vpack.c.bf16 %v18451_v18, %v18450_v35  ;;  %v11331_v16 = vpop.f32.mrb[55].mxu1 }
0x102f   :  { %v11623_v0 = vpack.c.bf16 %v11331_v16, %v11328_v51 }
0x1032   :  { %18597 = vmatmul.mubr.msk.bf16.vlgmr.msra.gmra.mrb[248].mxu0 %vm1579_vm6, %v11616_v14 }
0x1033   :  { %18600 = vmatprep.mubr.msk.bf16.mxu0 %vm1579_vm6, %v11617_v42  ;;  %18613 = vmatpush3.bf16.msra.mxu0 %v20162_v12  ;;  %v18454_v46 = vpop.f32.mrb[56].mxu1 }
0x1034   :  { %18614 = vmatprep.subr.bf16.mxu0 %v20163_v15  ;;  %v11344_v63 = vpop.f32.mrb[57].mxu1 }
0x1035   :  { %v18455_v20 = vpop.f32.mrb[58].mxu1 }
0x1036   :  { %v11626_v58 = vpack.c.bf16 %v18455_v20, %v18454_v46  ;;  %v11347_v22 = vpop.f32.mrb[59].mxu1 }
0x1037   :  { %18615 = vmatpush3.bf16.msra.mxu0 %v20163_v15  ;;  %v11625_v9 = vpack.c.bf16 %v11347_v22, %v11344_v63 }
0x1038   :  { %18632 = vmatprep.subr.bf16.mxu0 %v20164_v24 }
0x103a   :  { %18601 = vmatmul.mubr.msk.bf16.gmra.mrb[252].mxu0 %vm1579_vm6, %v11618_v17 }
0x103b   :  { %18604 = vmatprep.mubr.msk.bf16.mxu0 %vm1579_vm6, %v11619_v49  ;;  %v18458_v30 = vpop.f32.mrb[60].mxu1 }
0x103c   :  { %v11360_v53 = vpop.f32.mrb[61].mxu1 }
0x103d   :  { %v18459_v56 = vpop.f32.mrb[62].mxu1 }
0x103e   :  { %v11628_v41 = vpack.c.bf16 %v18459_v56, %v18458_v30  ;;  %v11363_v45 = vpop.f32.mrb[63].mxu1 }
0x103f   :  { %v11627_v10 = vpack.c.bf16 %v11363_v45, %v11360_v53 }
0x1042   :  { %18605 = vmatmul.mubr.msk.bf16.gmra.mrb[0].mxu0 %vm1579_vm6, %v11620_v5 }
0x1043   :  { %18608 = vmatprep.mubr.msk.bf16.mxu0 %vm1579_vm6, %v11621_v28  ;;  %v18462_v7 = vpop.f32.mrb[64].mxu1 }
0x1044   :  { %v11376_v55 = vpop.f32.mrb[65].mxu1 }
0x1045   :  { %v18463_v4 = vpop.f32.mrb[66].mxu1 }
0x1046   :  { %v11630_v36 = vpack.c.bf16 %v18463_v4, %v18462_v7  ;;  %v11379_v61 = vpop.f32.mrb[67].mxu1  ;;  %v20169_v7 = vld [vmem:[#allocation32 + $0x88] sm:$0xff]  }
0x1047   :  { %v11629_v8 = vpack.c.bf16 %v11379_v61, %v11376_v55 }
0x104a   :  { %18609 = vmatmul.mubr.msk.bf16.gmra.mrb[4].mxu0 %vm1579_vm6, %v11622_v37  ;;  %v20168_v37 = vld [vmem:[#allocation32 + $0x80] sm:$0xff]  }
0x104b   :  { %18616 = vmatprep.mubr.msk.bf16.mxu0 %vm1579_vm6, %v11623_v0  ;;  %v18466_v2 = vpop.f32.mrb[68].mxu1 }
0x104c   :  { %v11392_v59 = vpop.f32.mrb[69].mxu1 }
0x104d   :  { %v18467_v3 = vpop.f32.mrb[70].mxu1 }
0x104e   :  { %v11632_v31 = vpack.c.bf16 %v18467_v3, %v18466_v2  ;;  %v11395_v19 = vpop.f32.mrb[71].mxu1 }
0x104f   :  { %v11631_v13 = vpack.c.bf16 %v11395_v19, %v11392_v59 }
0x1052   :  { %18617 = vmatmul.mubr.msk.bf16.vlgmr.msra.gmra.mrb[248].mxu0 %vm1579_vm6, %v11624_v11 }
0x1053   :  { %18620 = vmatprep.mubr.msk.bf16.mxu0 %vm1579_vm6, %v11625_v9  ;;  %18633 = vmatpush3.bf16.msra.mxu0 %v20164_v24  ;;  %v18470_v57 = vpop.f32.mrb[72].mxu1 }
0x1054   :  { %18634 = vmatprep.subr.bf16.mxu0 %v20165_v27  ;;  %v11408_v26 = vpop.f32.mrb[73].mxu1 }
0x1055   :  { %v18471_v6 = vpop.f32.mrb[74].mxu1 }
0x1056   :  { %v11634_v33 = vpack.c.bf16 %v18471_v6, %v18470_v57  ;;  %v11411_v21 = vpop.f32.mrb[75].mxu1 }
0x1057   :  { %18635 = vmatpush3.bf16.msra.mxu0 %v20165_v27  ;;  %v11633_v54 = vpack.c.bf16 %v11411_v21, %v11408_v26 }
0x1058   :  { %18652 = vmatprep.subr.bf16.mxu0 %v20166_v32 }
0x105a   :  { %18621 = vmatmul.mubr.msk.bf16.gmra.mrb[252].mxu0 %vm1579_vm6, %v11626_v58 }
0x105b   :  { %18624 = vmatprep.mubr.msk.bf16.mxu0 %vm1579_vm6, %v11627_v10  ;;  %v18474_v47 = vpop.f32.mrb[76].mxu1 }
0x105c   :  { %v11424_v14 = vpop.f32.mrb[77].mxu1 }
0x105d   :  { %v18475_v48 = vpop.f32.mrb[78].mxu1 }
0x105e   :  { %v11636_v44 = vpack.c.bf16 %v18475_v48, %v18474_v47  ;;  %v11427_v60 = vpop.f32.mrb[79].mxu1  ;;  %v22646_v47 = vld [vmem:[#allocation34] ss:$0 sm:$0xff] }
0x105f   :  { %v11635_v34 = vpack.c.bf16 %v11427_v60, %v11424_v14 }
0x1062   :  { %18625 = vmatmul.mubr.msk.bf16.gmra.mrb[0].mxu0 %vm1579_vm6, %v11628_v41 }
0x1063   :  { %18628 = vmatprep.mubr.msk.bf16.mxu0 %vm1579_vm6, %v11629_v8  ;;  %v18478_v40 = vpop.f32.mrb[80].mxu1 }
0x1064   :  { %v11440_v12 = vpop.f32.mrb[81].mxu1 }
0x1065   :  { %v18479_v62 = vpop.f32.mrb[82].mxu1 }
0x1066   :  { %v11638_v17 = vpack.c.bf16 %v18479_v62, %v18478_v40  ;;  %v11443_v23 = vpop.f32.mrb[83].mxu1 }
0x1067   :  { %v11637_v42 = vpack.c.bf16 %v11443_v23, %v11440_v12 }
0x106a   :  { %18629 = vmatmul.mubr.msk.bf16.gmra.mrb[4].mxu0 %vm1579_vm6, %v11630_v36 }
0x106b   :  { %18636 = vmatprep.mubr.msk.bf16.mxu0 %vm1579_vm6, %v11631_v13  ;;  %v18482_v38 = vpop.f32.mrb[84].mxu1 }
0x106c   :  { %v11456_v39 = vpop.f32.mrb[85].mxu1 }
0x106d   :  { %v18483_v29 = vpop.f32.mrb[86].mxu1 }
0x106e   :  { %v11640_v5 = vpack.c.bf16 %v18483_v29, %v18482_v38  ;;  %v11459_v1 = vpop.f32.mrb[87].mxu1 }
0x106f   :  { %v11639_v49 = vpack.c.bf16 %v11459_v1, %v11456_v39 }
0x1072   :  { %18637 = vmatmul.mubr.msk.bf16.vlgmr.msra.gmra.mrb[248].mxu0 %vm1579_vm6, %v11632_v31 }
0x1073   :  { %18640 = vmatprep.mubr.msk.bf16.mxu0 %vm1579_vm6, %v11633_v54  ;;  %18653 = vmatpush3.bf16.msra.mxu0 %v20166_v32  ;;  %v18486_v43 = vpop.f32.mrb[88].mxu1  ;;  %v20170_v54 = vld [vmem:[#allocation38] sm:$0xff]  }
0x1074   :  { %18654 = vmatprep.subr.bf16.mxu0 %v20167_v50  ;;  %v11472_v52 = vpop.f32.mrb[89].mxu1  ;;  %18708 = vmatprep.mubr.bf16.mxu1 %v20170_v54 }
0x1075   :  { %v18487_v25 = vpop.f32.mrb[90].mxu1 }
0x1076   :  { %v11642_v28 = vpack.c.bf16 %v18487_v25, %v18486_v43  ;;  %v11475_v35 = vpop.f32.mrb[91].mxu1 }
0x1077   :  { %18655 = vmatpush3.bf16.msra.mxu0 %v20167_v50  ;;  %v11641_v51 = vpack.c.bf16 %v11475_v35, %v11472_v52 }
0x1078   :  { %18672 = vmatprep.subr.bf16.mxu0 %v20168_v37 }
0x107a   :  { %18641 = vmatmul.mubr.msk.bf16.gmra.mrb[252].mxu0 %vm1579_vm6, %v11634_v33 }
0x107b   :  { %18644 = vmatprep.mubr.msk.bf16.mxu0 %vm1579_vm6, %v11635_v34  ;;  %v18490_v18 = vpop.f32.mrb[92].mxu1 }
0x107c   :  { %v11488_v11 = vpop.f32.mrb[93].mxu1 }
0x107d   :  { %v18491_v16 = vpop.f32.mrb[94].mxu1 }
0x107e   :  { %v11644_v0 = vpack.c.bf16 %v18491_v16, %v18490_v18  ;;  %v11491_v15 = vpop.f32.mrb[95].mxu1 }
0x107f   :  { %v11643_v46 = vpack.c.bf16 %v11491_v15, %v11488_v11 }
0x1082   :  { %18645 = vmatmul.mubr.msk.bf16.gmra.mrb[0].mxu0 %vm1579_vm6, %v11636_v44 }
0x1083   :  { %18648 = vmatprep.mubr.msk.bf16.mxu0 %vm1579_vm6, %v11637_v42  ;;  %v18494_v63 = vpop.f32.mrb[96].mxu1 }
0x1084   :  { %v11504_v24 = vpop.f32.mrb[97].mxu1 }
0x1085   :  { %v18495_v20 = vpop.f32.mrb[98].mxu1 }
0x1086   :  { %v11646_v58 = vpack.c.bf16 %v18495_v20, %v18494_v63  ;;  %v11507_v22 = vpop.f32.mrb[99].mxu1 }
0x1087   :  { %v11645_v9 = vpack.c.bf16 %v11507_v22, %v11504_v24 }
0x108a   :  { %18649 = vmatmul.mubr.msk.bf16.gmra.mrb[4].mxu0 %vm1579_vm6, %v11638_v17 }
0x108b   :  { %18656 = vmatprep.mubr.msk.bf16.mxu0 %vm1579_vm6, %v11639_v49  ;;  %v18498_v30 = vpop.f32.mrb[100].mxu1 }
0x108c   :  { %v11520_v53 = vpop.f32.mrb[101].mxu1 }
0x108d   :  { %v18499_v56 = vpop.f32.mrb[102].mxu1 }
0x108e   :  { %v11648_v41 = vpack.c.bf16 %v18499_v56, %v18498_v30  ;;  %v11523_v45 = vpop.f32.mrb[103].mxu1 }
0x108f   :  { %v11647_v10 = vpack.c.bf16 %v11523_v45, %v11520_v53 }
0x1092   :  { %18657 = vmatmul.mubr.msk.bf16.vlgmr.msra.gmra.mrb[248].mxu0 %vm1579_vm6, %v11640_v5 }
0x1093   :  { %18660 = vmatprep.mubr.msk.bf16.mxu0 %vm1579_vm6, %v11641_v51  ;;  %18673 = vmatpush3.bf16.msra.mxu0 %v20168_v37  ;;  %v18502_v55 = vpop.f32.mrb[104].mxu1 }
0x1094   :  { %18674 = vmatprep.subr.bf16.mxu0 %v20169_v7  ;;  %v11536_v4 = vpop.f32.mrb[105].mxu1 }
0x1095   :  { %v18503_v36 = vpop.f32.mrb[106].mxu1 }
0x1096   :  { %v11650_v61 = vpack.c.bf16 %v18503_v36, %v18502_v55  ;;  %v11539_v8 = vpop.f32.mrb[107].mxu1 }
0x1097   :  { %18675 = vmatpush3.bf16.msra.mxu0 %v20169_v7  ;;  %v11649_v2 = vpack.c.bf16 %v11539_v8, %v11536_v4 }
0x109a   :  { %18661 = vmatmul.mubr.msk.bf16.gmra.mrb[252].mxu0 %vm1579_vm6, %v11642_v28 }
0x109b   :  { %18664 = vmatprep.mubr.msk.bf16.mxu0 %vm1579_vm6, %v11643_v46  ;;  %v18506_v59 = vpop.f32.mrb[108].mxu1 }
0x109c   :  { %v11552_v3 = vpop.f32.mrb[109].mxu1 }
0x109d   :  { %v18507_v31 = vpop.f32.mrb[110].mxu1 }
0x109e   :  { %v11652_v19 = vpack.c.bf16 %v18507_v31, %v18506_v59  ;;  %v11555_v13 = vpop.f32.mrb[111].mxu1 }
0x109f   :  { %v11651_v27 = vpack.c.bf16 %v11555_v13, %v11552_v3 }
0x10a2   :  { %18665 = vmatmul.mubr.msk.bf16.gmra.mrb[0].mxu0 %vm1579_vm6, %v11644_v0 }
0x10a3   :  { %18668 = vmatprep.mubr.msk.bf16.mxu0 %vm1579_vm6, %v11645_v9  ;;  %v18510_v57 = vpop.f32.mrb[112].mxu1 }
0x10a4   :  { %v11568_v26 = vpop.f32.mrb[113].mxu1 }
0x10a5   :  { %v18511_v32 = vpop.f32.mrb[114].mxu1 }
0x10a6   :  { %v11654_v6 = vpack.c.bf16 %v18511_v32, %v18510_v57  ;;  %v11571_v33 = vpop.f32.mrb[115].mxu1 }
0x10a7   :  { %v11653_v21 = vpack.c.bf16 %v11571_v33, %v11568_v26 }
0x10aa   :  { %18669 = vmatmul.mubr.msk.bf16.gmra.mrb[4].mxu0 %vm1579_vm6, %v11646_v58 }
0x10ab   :  { %18676 = vmatprep.mubr.msk.bf16.mxu0 %vm1579_vm6, %v11647_v10 }
0x10b2   :  { %18677 = vmatmul.mubr.msk.bf16.vlgmr.msra.gmra.mrb[248].mxu0 %vm1579_vm6, %v11648_v41 }
0x10b3   :  { %18680 = vmatprep.mubr.msk.bf16.mxu0 %vm1579_vm6, %v11649_v2 }
0x10ba   :  { %18681 = vmatmul.mubr.msk.bf16.gmra.mrb[252].mxu0 %vm1579_vm6, %v11650_v61 }
0x10bb   :  { %18684 = vmatprep.mubr.msk.bf16.mxu0 %vm1579_vm6, %v11651_v27 }
0x10c2   :  { %18685 = vmatmul.mubr.msk.bf16.gmra.mrb[0].mxu0 %vm1579_vm6, %v11652_v19 }
0x10c3   :  { %18688 = vmatprep.mubr.msk.bf16.mxu0 %vm1579_vm6, %v11653_v21 }
0x10ca   :  { %18689 = vmatmul.mubr.msk.bf16.gmra.mrb[4].mxu0 %vm1579_vm6, %v11654_v6 }
0x1185   :  { %v18678_v14 = vpop.f32.mrb[248].mxu0 }
0x1186   :  { %v12929_v48 = vpop.f32.mrb[249].mxu0  ;;  %v22652_v40 = vadd.f32 %v18678_v14, %v22646_v47 }
0x1187   :  { %v22649_v44 = vadd.f32 %v22646_v47, %v12929_v48  ;;  %v18679_v60 = vpop.f32.mrb[250].mxu0 }
0x1188   :  { %v12932_v34 = vpop.f32.mrb[251].mxu0  ;;  %v22660_v17 = vadd.f32 %v18679_v60, %v22646_v47  ;;  %v13055_v38 = vmul.f32 %v22652_v40, %v22652_v40 }
0x1189   :  { %v22655_v12 = vadd.f32 %v22646_v47, %v12932_v34  ;;  %v13053_v62 = vmul.f32 %v22649_v44, %v22649_v44 }
0x118a   :  { %v13056_v49 = vmul.f32 %v22660_v17, %v22660_v17 }
0x118b   :  { %v13031_v23 = vadd.f32 %v22655_v12, %v22649_v44  ;;  %v13054_v42 = vmul.f32 %v22655_v12, %v22655_v12 }
0x118d   :  { %v13032_v39 = vadd.f32 %v13031_v23, %v22652_v40  ;;  %v13069_v29 = vadd.f32 %v13054_v42, %v13053_v62  ;;  %v18682_v5 = vpop.f32.mrb[252].mxu0 }
0x118e   :  { %v12945_v1 = vpop.f32.mrb[253].mxu0  ;;  %v22676_v25 = vadd.f32 %v18682_v5, %v22646_v47 }
0x118f   :  { %v13070_v50 = vadd.f32 %v13069_v29, %v13055_v38  ;;  %v22672_v43 = vadd.f32 %v22646_v47, %v12945_v1  ;;  %v13033_v52 = vadd.f32 %v13032_v39, %v22660_v17  ;;  %v18683_v37 = vpop.f32.mrb[254].mxu0 }
0x1190   :  { %v12948_v28 = vpop.f32.mrb[255].mxu0  ;;  %v22685_v0 = vadd.f32 %v18683_v37, %v22646_v47  ;;  %v13059_v63 = vmul.f32 %v22676_v25, %v22676_v25 }
0x1191   :  { %v13034_v35 = vadd.f32 %v13033_v52, %v22672_v43  ;;  %v13057_v51 = vmul.f32 %v22672_v43, %v22672_v43  ;;  %v13071_v18 = vadd.f32 %v13070_v50, %v13056_v49  ;;  %v22682_v11 = vadd.f32 %v22646_v47, %v12948_v28 }
0x1192   :  { %v13060_v9 = vmul.f32 %v22685_v0, %v22685_v0 }
0x1193   :  { %v13072_v16 = vadd.f32 %v13071_v18, %v13057_v51  ;;  %v13035_v15 = vadd.f32 %v13034_v35, %v22682_v11  ;;  %v13058_v46 = vmul.f32 %v22682_v11, %v22682_v11 }
0x1195   :  { %v13036_v24 = vadd.f32 %v13035_v15, %v22676_v25  ;;  %v13073_v20 = vadd.f32 %v13072_v16, %v13058_v46  ;;  %v18686_v58 = vpop.f32.mrb[0].mxu0 }
0x1196   :  { %v12961_v22 = vpop.f32.mrb[1].mxu0  ;;  %v22700_v45 = vadd.f32 %v18686_v58, %v22646_v47 }
0x1197   :  { %v13074_v30 = vadd.f32 %v13073_v20, %v13059_v63  ;;  %v22696_v53 = vadd.f32 %v22646_v47, %v12961_v22  ;;  %v13037_v56 = vadd.f32 %v13036_v24, %v22685_v0  ;;  %v18687_v41 = vpop.f32.mrb[2].mxu0 }
0x1198   :  { %v12964_v10 = vpop.f32.mrb[3].mxu0  ;;  %v22709_v8 = vadd.f32 %v18687_v41, %v22646_v47  ;;  %v13063_v3 = vmul.f32 %v22700_v45, %v22700_v45 }
0x1199   :  { %v13038_v7 = vadd.f32 %v13037_v56, %v22696_v53  ;;  %v13061_v55 = vmul.f32 %v22696_v53, %v22696_v53  ;;  %v13075_v4 = vadd.f32 %v13074_v30, %v13060_v9  ;;  %v22706_v36 = vadd.f32 %v22646_v47, %v12964_v10 }
0x119a   :  { %v13064_v57 = vmul.f32 %v22709_v8, %v22709_v8 }
0x119b   :  { %v13076_v61 = vadd.f32 %v13075_v4, %v13061_v55  ;;  %v13039_v2 = vadd.f32 %v13038_v7, %v22706_v36  ;;  %v13062_v59 = vmul.f32 %v22706_v36, %v22706_v36 }
0x119d   :  { %v13040_v31 = vadd.f32 %v13039_v2, %v22700_v45  ;;  %v13077_v19 = vadd.f32 %v13076_v61, %v13062_v59  ;;  %v18690_v13 = vpop.f32.mrb[4].mxu0 }
0x119e   :  { %v12977_v27 = vpop.f32.mrb[5].mxu0  ;;  %v22724_v21 = vadd.f32 %v18690_v13, %v22646_v47  ;;  %v22782_v13 = vld [vmem:[#allocation37] ss:$0 sm:$0xff] }
0x119f   :  { %v13078_v26 = vadd.f32 %v13077_v19, %v13063_v3  ;;  %v22720_v32 = vadd.f32 %v22646_v47, %v12977_v27  ;;  %v13041_v6 = vadd.f32 %v13040_v31, %v22709_v8  ;;  %v18691_v33 = vpop.f32.mrb[6].mxu0 }
0x11a0   :  { %v12980_v54 = vpop.f32.mrb[7].mxu0  ;;  %v22731_v23 = vadd.f32 %v18691_v33, %v22646_v47  ;;  %v13067_v39 = vmul.f32 %v22724_v21, %v22724_v21 }
0x11a1   :  { %v13042_v14 = vadd.f32 %v13041_v6, %v22720_v32  ;;  %v13065_v48 = vmul.f32 %v22720_v32, %v22720_v32  ;;  %v13079_v60 = vadd.f32 %v13078_v26, %v13064_v57  ;;  %v13028_v34 = vadd.f32 %v22646_v47, %v12980_v54 }
0x11a2   :  { %v13068_v1 = vmul.f32 %v22731_v23, %v22731_v23 }
0x11a3   :  { %v13080_v62 = vadd.f32 %v13079_v60, %v13065_v48  ;;  %v13043_v42 = vadd.f32 %v13042_v14, %v13028_v34  ;;  %v13066_v38 = vmul.f32 %v13028_v34, %v13028_v34 }
0x11a5   :  { %v13044_v29 = vadd.f32 %v13043_v42, %v22724_v21  ;;  %v13081_v5 = vadd.f32 %v13080_v62, %v13066_v38 }
0x11a7   :  { %v13045_v49 = vadd.f32 %v13044_v29, %v22731_v23  ;;  %v13082_v50 = vadd.f32 %v13081_v5, %v13067_v39 }
0x11a9   :  { %v13046_v52 = vrot.slane %v13045_v49, 4  ;;  %v13083_v37 = vadd.f32 %v13082_v50, %v13068_v1 }
0x11ab   :  { %v13047_v28 = vadd.f32 %v13046_v52, %v13045_v49  ;;  %v13084_v35 = vrot.slane %v13083_v37, 4 }
0x11ad   :  { %v13048_v47 = vrot.slane %v13047_v28, 2  ;;  %v13085_v51 = vadd.f32 %v13084_v35, %v13083_v37 }
0x11af   :  { %v13049_v18 = vadd.f32 %v13048_v47, %v13047_v28  ;;  %v13086_v16 = vrot.slane %v13085_v51, 2 }
0x11b1   :  { %v13050_v15 = vrot.slane %v13049_v18, 1  ;;  %v13087_v46 = vadd.f32 %v13086_v16, %v13085_v51 }
0x11b3   :  { %v13051_v63 = vadd.f32 %v13050_v15, %v13049_v18  ;;  %v13088_v24 = vrot.slane %v13087_v46, 1 }
0x11b5   :  { %v22739_v20 = vmul.f32 0.0078125, %v13051_v63  ;;  %v13089_v58 = vadd.f32 %v13088_v24, %v13087_v46 }
0x11b7   :  { %v13090_v22 = vmul.f32 0.0078125, %v13089_v58  ;;  %v13091_v9 = vmul.f32 %v22739_v20, %v22739_v20  ;;  %v13106_v30 = vsub.f32 %v13028_v34, %v22739_v20  ;;  %v13093_v56 = vsub.f32 %v22649_v44, %v22739_v20 }
0x11b8   :  { %v13094_v41 = vsub.f32 %v22655_v12, %v22739_v20  ;;  %v13095_v10 = vsub.f32 %v22652_v40, %v22739_v20  ;;  %v13096_v7 = vsub.f32 %v22660_v17, %v22739_v20  ;;  %v13097_v55 = vsub.f32 %v22672_v43, %v22739_v20 }
0x11b9   :  { %v13092_v4 = vsub.f32 %v13090_v22, %v13091_v9  ;;  %v13098_v61 = vsub.f32 %v22682_v11, %v22739_v20  ;;  %v13099_v2 = vsub.f32 %v22676_v25, %v22739_v20  ;;  %v13100_v44 = vsub.f32 %v22685_v0, %v22739_v20 }
0x11ba   :  { %v13101_v12 = vsub.f32 %v22696_v53, %v22739_v20  ;;  %v13102_v40 = vsub.f32 %v22706_v36, %v22739_v20  ;;  %v13103_v17 = vsub.f32 %v22700_v45, %v22739_v20  ;;  %v13104_v43 = vsub.f32 %v22709_v8, %v22739_v20  ;;  %v22776_v36 = vld [vmem:[#allocation35] ss:$0 sm:$0xff] }
0x11bb   :  { %v13109_v59 = vadd.f32 1e-05, %v13092_v4  ;;  %v13105_v11 = vsub.f32 %v22720_v32, %v22739_v20  ;;  %v13107_v25 = vsub.f32 %v22724_v21, %v22739_v20  ;;  %v13108_v0 = vsub.f32 %v22731_v23, %v22739_v20 }
0x11bd   :  { %20274 = vrsqrt.f32 %v13109_v59 }
0x11c7   :  { %v22774_v53 = vpop.eup %20274 }
0x11c8   :  { %v13124_v45 = vmul.f32 %v22774_v53, %v13106_v30  ;;  %v13111_v3 = vmul.f32 %v22774_v53, %v13093_v56  ;;  %v13112_v31 = vmul.f32 %v22774_v53, %v13094_v41  ;;  %v13113_v19 = vmul.f32 %v22774_v53, %v13095_v10 }
0x11c9   :  { %v13114_v27 = vmul.f32 %v22774_v53, %v13096_v7  ;;  %v13115_v57 = vmul.f32 %v22774_v53, %v13097_v55  ;;  %v13116_v26 = vmul.f32 %v22774_v53, %v13098_v61  ;;  %v13117_v6 = vmul.f32 %v22774_v53, %v13099_v2 }
0x11ca   :  { %v13147_v33 = vmul.f32 %v22776_v36, %v13124_v45  ;;  %v13134_v54 = vmul.f32 %v22776_v36, %v13111_v3  ;;  %v13135_v14 = vmul.f32 %v22776_v36, %v13112_v31  ;;  %v13136_v48 = vmul.f32 %v22776_v36, %v13113_v19 }
0x11cb   :  { %v13137_v60 = vmul.f32 %v22776_v36, %v13114_v27  ;;  %v13138_v34 = vmul.f32 %v22776_v36, %v13115_v57  ;;  %v13139_v62 = vmul.f32 %v22776_v36, %v13116_v26  ;;  %v13118_v42 = vmul.f32 %v22774_v53, %v13100_v44 }
0x11cc   :  { %v13157_v38 = vadd.f32 %v22782_v13, %v13134_v54  ;;  %v13158_v39 = vadd.f32 %v22782_v13, %v13135_v14  ;;  %v13159_v29 = vadd.f32 %v22782_v13, %v13136_v48  ;;  %v13140_v5 = vmul.f32 %v22776_v36, %v13117_v6 }
0x11cd   :  { %v13160_v1 = vadd.f32 %v22782_v13, %v13137_v60  ;;  %v13161_v49 = vadd.f32 %v22782_v13, %v13138_v34  ;;  %v13162_v50 = vadd.f32 %v22782_v13, %v13139_v62  ;;  %v13141_v52 = vmul.f32 %v22776_v36, %v13118_v42 }
0x11ce   :  { %vm13173_vm8 = vcmp.ge.f32.partialorder %v13157_v38, 0.0  ;;  %vm13174_vm9 = vcmp.ge.f32.partialorder %v13158_v39, 0.0  ;;  %v13189_v37 = vmul.f32 0.01, %v13157_v38  ;;  %v13190_v28 = vmul.f32 0.01, %v13158_v39 }
0x11cf   :  { %vm13175_vm10 = vcmp.ge.f32.partialorder %v13159_v29, 0.0  ;;  %vm13176_vm12 = vcmp.ge.f32.partialorder %v13160_v1, 0.0  ;;  %v13191_v35 = vmul.f32 0.01, %v13159_v29  ;;  %v13192_v47 = vmul.f32 0.01, %v13160_v1 }
0x11d0   :  { %v13205_v51 = vsel %vm13173_vm8, %v13157_v38, %v13189_v37  ;;  %v13206_v18 = vsel %vm13174_vm9, %v13158_v39, %v13190_v28  ;;  %vm13177_vm13 = vcmp.ge.f32.partialorder %v13161_v49, 0.0  ;;  %vm13178_vm14 = vcmp.ge.f32.partialorder %v13162_v50, 0.0 }
0x11d1   :  { %v13221_v16 = vpack.c.bf16 %v13206_v18, %v13205_v51  ;;  %v13207_v15 = vsel %vm13175_vm10, %v13159_v29, %v13191_v35  ;;  %v13208_v46 = vsel %vm13176_vm12, %v13160_v1, %v13192_v47  ;;  %v13193_v63 = vmul.f32 0.01, %v13161_v49  ;;  %v20171_v35 = vld [vmem:[#allocation38 + $0x8] sm:$0xff]   ;;  %v20173_v47 = vld [vmem:[#allocation38 + $0x18] sm:$0xff]   ;;  %v20176_v18 = vld [vmem:[#allocation38 + $0x30] sm:$0xff]  }
0x11d2   :  { %v13222_v24 = vpack.c.bf16 %v13208_v46, %v13207_v15  ;;  %v13194_v58 = vmul.f32 0.01, %v13162_v50  ;;  %v13163_v22 = vadd.f32 %v22782_v13, %v13140_v5  ;;  %v13164_v9 = vadd.f32 %v22782_v13, %v13141_v52  ;;  %v20175_v51 = vld [vmem:[#allocation38 + $0x28] sm:$0xff]   ;;  %v20178_v15 = vld [vmem:[#allocation38 + $0x40] sm:$0xff]  }
0x11d3   :  { %18692 = vmatprep.subr.bf16.mxu1 %v13221_v16  ;;  %v13209_v30 = vsel %vm13177_vm13, %v13161_v49, %v13193_v63  ;;  %v13119_v56 = vmul.f32 %v22774_v53, %v13101_v12  ;;  %v13120_v41 = vmul.f32 %v22774_v53, %v13102_v40  ;;  %v13121_v10 = vmul.f32 %v22774_v53, %v13103_v17  ;;  %v20179_v46 = vld [vmem:[#allocation38 + $0x48] sm:$0xff]   ;;  %v20180_v63 = vld [vmem:[#allocation38 + $0x50] sm:$0xff]  }
0x11d4   :  { %18693 = vmatpush3.bf16.msra.mxu1 %v13221_v16  ;;  %v13210_v7 = vsel %vm13178_vm14, %v13162_v50, %v13194_v58  ;;  %vm13179_vm15 = vcmp.ge.f32.partialorder %v13163_v22, 0.0  ;;  %vm13180_vm0 = vcmp.ge.f32.partialorder %v13164_v9, 0.0  ;;  %v13195_v55 = vmul.f32 0.01, %v13163_v22  ;;  %v20177_v16 = vld [vmem:[#allocation38 + $0x38] sm:$0xff]   ;;  %v20182_v58 = vld [vmem:[#allocation38 + $0x60] sm:$0xff]  }
0x11d5   :  { %18694 = vmatprep.subr.bf16.mxu1 %v13222_v24  ;;  %v13223_v4 = vpack.c.bf16 %v13210_v7, %v13209_v30  ;;  %v13196_v61 = vmul.f32 0.01, %v13164_v9  ;;  %v13142_v2 = vmul.f32 %v22776_v36, %v13119_v56  ;;  %v13143_v44 = vmul.f32 %v22776_v36, %v13120_v41  ;;  %v20185_v30 = vld [vmem:[#allocation38 + $0x78] sm:$0xff]   ;;  %v20186_v56 = vld [vmem:[#allocation38 + $0x80] sm:$0xff]   ;;  %v20187_v41 = vld [vmem:[#allocation38 + $0x88] sm:$0xff]  }
0x11d6   :  { %v13211_v59 = vsel %vm13179_vm15, %v13163_v22, %v13195_v55  ;;  %v13122_v12 = vmul.f32 %v22774_v53, %v13104_v43  ;;  %v13144_v40 = vmul.f32 %v22776_v36, %v13121_v10  ;;  %v13123_v17 = vmul.f32 %v22774_v53, %v13105_v11  ;;  %v20183_v22 = vld [vmem:[#allocation38 + $0x68] sm:$0xff]   ;;  %v20188_v10 = vld [vmem:[#allocation38 + $0x90] sm:$0xff]   ;;  %v20189_v7 = vld [vmem:[#allocation38 + $0x98] sm:$0xff]  }
0x11d7   :  { %v13212_v45 = vsel %vm13180_vm0, %v13164_v9, %v13196_v61  ;;  %v13165_v3 = vadd.f32 %v22782_v13, %v13142_v2  ;;  %v13166_v31 = vadd.f32 %v22782_v13, %v13143_v44  ;;  %v13170_v19 = vadd.f32 %v22782_v13, %v13147_v33  ;;  %v20184_v9 = vld [vmem:[#allocation38 + $0x70] sm:$0xff]   ;;  %v20190_v55 = vld [vmem:[#allocation38 + $0xa0] sm:$0xff]   ;;  %v20193_v2 = vld [vmem:[#allocation38 + $0xb8] sm:$0xff]  }
0x11d8   :  { %18695 = vmatpush3.bf16.msra.mxu1 %v13222_v24  ;;  %v13224_v27 = vpack.c.bf16 %v13212_v45, %v13211_v59  ;;  %v13145_v8 = vmul.f32 %v22776_v36, %v13122_v12  ;;  %v13167_v43 = vadd.f32 %v22782_v13, %v13144_v40  ;;  %v13146_v57 = vmul.f32 %v22776_v36, %v13123_v17  ;;  %v20181_v24 = vld [vmem:[#allocation38 + $0x58] sm:$0xff]   ;;  %v20192_v61 = vld [vmem:[#allocation38 + $0xb0] sm:$0xff]   ;;  %v20194_v44 = vld [vmem:[#allocation38 + $0xc0] sm:$0xff]  }
0x11d9   :  { %18696 = vmatprep.subr.bf16.mxu1 %v13223_v4  ;;  %vm13181_vm2 = vcmp.ge.f32.partialorder %v13165_v3, 0.0  ;;  %vm13182_vm3 = vcmp.ge.f32.partialorder %v13166_v31, 0.0  ;;  %v13197_v32 = vmul.f32 0.01, %v13165_v3  ;;  %v13198_v11 = vmul.f32 0.01, %v13166_v31 }
0x11da   :  { %v13168_v26 = vadd.f32 %v22782_v13, %v13145_v8  ;;  %vm13183_vm1 = vcmp.ge.f32.partialorder %v13167_v43, 0.0  ;;  %v13199_v6 = vmul.f32 0.01, %v13167_v43  ;;  %v13169_v54 = vadd.f32 %v22782_v13, %v13146_v57  ;;  %v20195_v59 = vld [vmem:[#allocation38 + $0xc8] sm:$0xff]   ;;  %v20196_v12 = vld [vmem:[#allocation38 + $0xd0] sm:$0xff]   ;;  %v20197_v40 = vld [vmem:[#allocation38 + $0xd8] sm:$0xff]  }
0x11db   :  { %v13213_v33 = vsel %vm13181_vm2, %v13165_v3, %v13197_v32  ;;  %v13214_v14 = vsel %vm13182_vm3, %v13166_v31, %v13198_v11  ;;  %vm13186_vm11 = vcmp.ge.f32.partialorder %v13170_v19, 0.0  ;;  %v13202_v48 = vmul.f32 0.01, %v13170_v19  ;;  %v20198_v17 = vld [vmem:[#allocation38 + $0xe0] sm:$0xff]   ;;  %v20199_v45 = vld [vmem:[#allocation38 + $0xe8] sm:$0xff]   ;;  %v20200_v3 = vld [vmem:[#allocation38 + $0xf0] sm:$0xff]  }
0x11dc   :  { %18697 = vmatpush3.bf16.msra.mxu1 %v13223_v4  ;;  %v13225_v60 = vpack.c.bf16 %v13214_v14, %v13213_v33  ;;  %vm13184_vm4 = vcmp.ge.f32.partialorder %v13168_v26, 0.0  ;;  %v13200_v34 = vmul.f32 0.01, %v13168_v26  ;;  %v13215_v62 = vsel %vm13183_vm1, %v13167_v43, %v13199_v6  ;;  %v20191_v4 = vld [vmem:[#allocation38 + $0xa8] sm:$0xff]   ;;  %v20224_v31 = vld [vmem:[#allocation40 + $0x10] sm:$0xff]   ;;  %v20225_v8 = vld [vmem:[#allocation40 + $0x18] sm:$0xff]  }
0x11dd   :  { %18698 = vmatprep.subr.bf16.mxu1 %v13224_v27  ;;  %vm13185_vm5 = vcmp.ge.f32.partialorder %v13169_v54, 0.0  ;;  %v13201_v42 = vmul.f32 0.01, %v13169_v54  ;;  %v13218_v38 = vsel %vm13186_vm11, %v13170_v19, %v13202_v48  ;;  %v13125_v39 = vmul.f32 %v22774_v53, %v13107_v25  ;;  %18852 = vmatprep.subr.bf16.mxu0 %v20224_v31  ;;  %v20201_v19 = vld [vmem:[#allocation38 + $0xf8] sm:$0xff]   ;;  %v20203_v43 = vld [vmem:[#allocation38 + $0x108] sm:$0xff]   ;;  %v20204_v57 = vld [vmem:[#allocation38 + $0x110] sm:$0xff]  }
0x11de   :  { %v13216_v29 = vsel %vm13184_vm4, %v13168_v26, %v13200_v34  ;;  %v13126_v5 = vmul.f32 %v22774_v53, %v13108_v0  ;;  %18853 = vmatpush3.bf16.msra.mxu0 %v20224_v31  ;;  %v20205_v32 = vld [vmem:[#allocation38 + $0x118] sm:$0xff]   ;;  %v20206_v11 = vld [vmem:[#allocation38 + $0x120] sm:$0xff]   ;;  %v20207_v26 = vld [vmem:[#allocation38 + $0x128] sm:$0xff]  }
0x11df   :  { %v13226_v1 = vpack.c.bf16 %v13216_v29, %v13215_v62  ;;  %v13217_v49 = vsel %vm13185_vm5, %v13169_v54, %v13201_v42  ;;  %v13148_v50 = vmul.f32 %v22776_v36, %v13125_v39  ;;  %18854 = vmatprep.subr.bf16.mxu0 %v20225_v8  ;;  %v20208_v6 = vld [vmem:[#allocation38 + $0x130] sm:$0xff]   ;;  %v22840_v54 = vld [vmem:[#allocation40] sm:$0xff]   ;;  %v20209_v33 = vld [vmem:[#allocation38 + $0x138] sm:$0xff]  }
0x11e0   :  { %18699 = vmatpush3.bf16.msra.mxu1 %v13224_v27  ;;  %v13227_v52 = vpack.c.bf16 %v13218_v38, %v13217_v49  ;;  %v13149_v37 = vmul.f32 %v22776_v36, %v13126_v5  ;;  %v20172_v36 = vld [vmem:[#allocation38 + $0x10] sm:$0xff]   ;;  %v20202_v27 = vld [vmem:[#allocation38 + $0x100] sm:$0xff]   ;;  %v20211_v48 = vld [vmem:[#allocation38 + $0x148] sm:$0xff]  }
0x11e1   :  { %18700 = vmatprep.subr.bf16.mxu1 %v13225_v60  ;;  %v13171_v28 = vadd.f32 %v22782_v13, %v13148_v50  ;;  %v20210_v14 = vld [vmem:[#allocation38 + $0x140] sm:$0xff]   ;;  %v20213_v34 = vld [vmem:[#allocation38 + $0x158] sm:$0xff]   ;;  %v20215_v42 = vld [vmem:[#allocation38 + $0x168] sm:$0xff]  }
0x11e2   :  { %v13172_v21 = vadd.f32 %v22782_v13, %v13149_v37  ;;  %v20174_v13 = vld [vmem:[#allocation38 + $0x20] sm:$0xff]   ;;  %18855 = vmatpush3.bf16.msra.mxu0 %v20225_v8  ;;  %v20216_v38 = vld [vmem:[#allocation38 + $0x170] sm:$0xff]   ;;  %v20217_v39 = vld [vmem:[#allocation38 + $0x178] sm:$0xff]  }
0x11e3   :  { %vm13187_vm7 = vcmp.ge.f32.partialorder %v13171_v28, 0.0  ;;  %v13203_v25 = vmul.f32 0.01, %v13171_v28  ;;  %18872 = vmatprep.subr.bf16.mxu0 %v22840_v54  ;;  %v20214_v62 = vld [vmem:[#allocation38 + $0x160] sm:$0xff]   ;;  %v20219_v5 = vld [vmem:[#allocation38 + $0x188] sm:$0xff]   ;;  %v20221_v49 = vld [vmem:[#allocation38 + $0x198] sm:$0xff]  }
0x11e4   :  { %18701 = vmatpush3.bf16.msra.mxu1 %v13225_v60  ;;  %vm13188_vm8 = vcmp.ge.f32.partialorder %v13172_v21, 0.0  ;;  %v13204_v23 = vmul.f32 0.01, %v13172_v21  ;;  %v20212_v60 = vld [vmem:[#allocation38 + $0x150] sm:$0xff]   ;;  %v20218_v29 = vld [vmem:[#allocation38 + $0x180] sm:$0xff]   ;;  %v20235_v8 = vld [vmem:[#allocation40 + $0x8] sm:$0xff]  }
0x11e5   :  { %18702 = vmatprep.subr.bf16.mxu1 %v13226_v1  ;;  %v13219_v20 = vsel %vm13187_vm7, %v13171_v28, %v13203_v25  ;;  %v20222_v50 = vld [vmem:[#allocation38 + $0x1a0] sm:$0xff]   ;;  %v20226_v37 = vld [vmem:[#allocation38 + $0x1b0] sm:$0xff]   ;;  %v20227_v25 = vld [vmem:[#allocation38 + $0x1b8] sm:$0xff]  }
0x11e6   :  { %v13220_v0 = vsel %vm13188_vm8, %v13172_v21, %v13204_v23 }
0x11e7   :  { %v13228_v53 = vpack.c.bf16 %v13220_v0, %v13219_v20  ;;  %v20228_v20 = vld [vmem:[#allocation38 + $0x1c0] sm:$0xff]  }
0x11e8   :  { %18703 = vmatpush3.bf16.msra.mxu1 %v13226_v1  ;;  %v20220_v1 = vld [vmem:[#allocation38 + $0x190] sm:$0xff]  }
0x11e9   :  { %18704 = vmatprep.subr.bf16.mxu1 %v13227_v52 }
0x11ec   :  { %18705 = vmatpush3.bf16.msra.mxu1 %v13227_v52  ;;  %v20223_v52 = vld [vmem:[#allocation38 + $0x1a8] sm:$0xff]  }
0x11ed   :  { %18706 = vmatprep.subr.bf16.mxu1 %v13228_v53 }
0x11f0   :  { %18707 = vmatpush3.bf16.msra.mxu1 %v13228_v53 }
0x11f3   :  { %18709 = vmatmul.mubr.bf16.vlgmr.msra.gmra.mrb[116].mxu1 %v20171_v35 }
0x11f4   :  { %18712 = vmatprep.mubr.bf16.mxu1 %v20172_v36 }
0x11fb   :  { %18713 = vmatmul.mubr.bf16.gmra.mrb[120].mxu1 %v20173_v47 }
0x11fc   :  { %18716 = vmatprep.mubr.bf16.mxu1 %v20174_v13  ;;  %v20229_v13 = vld [vmem:[#allocation38 + $0x1c8] sm:$0xff]  }
0x1203   :  { %18717 = vmatmul.mubr.bf16.gmra.mrb[124].mxu1 %v20175_v51 }
0x1204   :  { %18720 = vmatprep.mubr.bf16.mxu1 %v20176_v18  ;;  %v20230_v18 = vld [vmem:[#allocation38 + $0x1d0] sm:$0xff]  }
0x120b   :  { %18721 = vmatmul.mubr.bf16.gmra.mrb[128].mxu1 %v20177_v16 }
0x120c   :  { %18724 = vmatprep.mubr.bf16.mxu1 %v20178_v15 }
0x1213   :  { %18725 = vmatmul.mubr.bf16.gmra.mrb[132].mxu1 %v20179_v46 }
0x1214   :  { %18728 = vmatprep.mubr.bf16.mxu1 %v20180_v63 }
0x121b   :  { %18729 = vmatmul.mubr.bf16.gmra.mrb[136].mxu1 %v20181_v24 }
0x121c   :  { %18732 = vmatprep.mubr.bf16.mxu1 %v20182_v58  ;;  %v20231_v58 = vld [vmem:[#allocation38 + $0x1d8] sm:$0xff]  }
0x1223   :  { %18733 = vmatmul.mubr.bf16.gmra.mrb[140].mxu1 %v20183_v22 }
0x1224   :  { %18736 = vmatprep.mubr.bf16.mxu1 %v20184_v9  ;;  %v20232_v9 = vld [vmem:[#allocation38 + $0x1e0] sm:$0xff]  }
0x122b   :  { %18737 = vmatmul.mubr.bf16.gmra.mrb[144].mxu1 %v20185_v30 }
0x122c   :  { %18740 = vmatprep.mubr.bf16.mxu1 %v20186_v56 }
0x1233   :  { %18741 = vmatmul.mubr.bf16.gmra.mrb[148].mxu1 %v20187_v41 }
0x1234   :  { %18744 = vmatprep.mubr.bf16.mxu1 %v20188_v10 }
0x123b   :  { %18745 = vmatmul.mubr.bf16.gmra.mrb[152].mxu1 %v20189_v7 }
0x123c   :  { %18748 = vmatprep.mubr.bf16.mxu1 %v20190_v55  ;;  %v20233_v55 = vld [vmem:[#allocation38 + $0x1e8] sm:$0xff]  }
0x1243   :  { %18749 = vmatmul.mubr.bf16.gmra.mrb[156].mxu1 %v20191_v4 }
0x1244   :  { %18752 = vmatprep.mubr.bf16.mxu1 %v20192_v61  ;;  %v20236_v61 = vld [vmem:[#allocation38 + $0x1f0] sm:$0xff]  }
0x124b   :  { %18753 = vmatmul.mubr.bf16.gmra.mrb[160].mxu1 %v20193_v2 }
0x124c   :  { %18756 = vmatprep.mubr.bf16.mxu1 %v20194_v44 }
0x1253   :  { %18757 = vmatmul.mubr.bf16.gmra.mrb[164].mxu1 %v20195_v59 }
0x1254   :  { %18760 = vmatprep.mubr.bf16.mxu1 %v20196_v12 }
0x125b   :  { %18761 = vmatmul.mubr.bf16.gmra.mrb[168].mxu1 %v20197_v40 }
0x125c   :  { %18764 = vmatprep.mubr.bf16.mxu1 %v20198_v17  ;;  %v20237_v17 = vld [vmem:[#allocation38 + $0x1f8] sm:$0xff]  }
0x1263   :  { %18765 = vmatmul.mubr.bf16.gmra.mrb[172].mxu1 %v20199_v45 }
0x1264   :  { %18768 = vmatprep.mubr.bf16.mxu1 %v20200_v3  ;;  %v20238_v3 = vld [vmem:[#allocation38 + $0x200] sm:$0xff]  }
0x126b   :  { %18769 = vmatmul.mubr.bf16.gmra.mrb[176].mxu1 %v20201_v19 }
0x126c   :  { %18772 = vmatprep.mubr.bf16.mxu1 %v20202_v27 }
0x1273   :  { %18773 = vmatmul.mubr.bf16.gmra.mrb[180].mxu1 %v20203_v43 }
0x1274   :  { %18776 = vmatprep.mubr.bf16.mxu1 %v20204_v57 }
0x127b   :  { %18777 = vmatmul.mubr.bf16.gmra.mrb[184].mxu1 %v20205_v32  ;;  %v20239_v32 = vld [vmem:[#allocation38 + $0x208] sm:$0xff]  }
0x127c   :  { %18780 = vmatprep.mubr.bf16.mxu1 %v20206_v11  ;;  %v20244_v11 = vld [vmem:[#allocation40 + $0x20] sm:$0xff]  }
0x1283   :  { %18781 = vmatmul.mubr.bf16.gmra.mrb[188].mxu1 %v20207_v26 }
0x1284   :  { %18784 = vmatprep.mubr.bf16.mxu1 %v20208_v6  ;;  %v20240_v6 = vld [vmem:[#allocation38 + $0x210] sm:$0xff]  }
0x128b   :  { %18785 = vmatmul.mubr.bf16.gmra.mrb[192].mxu1 %v20209_v33 }
0x128c   :  { %18788 = vmatprep.mubr.bf16.mxu1 %v20210_v14 }
0x1293   :  { %18789 = vmatmul.mubr.bf16.gmra.mrb[196].mxu1 %v20211_v48 }
0x1294   :  { %18792 = vmatprep.mubr.bf16.mxu1 %v20212_v60 }
0x129b   :  { %18793 = vmatmul.mubr.bf16.gmra.mrb[200].mxu1 %v20213_v34 }
0x129c   :  { %18796 = vmatprep.mubr.bf16.mxu1 %v20214_v62 }
0x12a3   :  { %18797 = vmatmul.mubr.bf16.gmra.mrb[204].mxu1 %v20215_v42  ;;  %v20242_v42 = vld [vmem:[#allocation38 + $0x220] sm:$0xff]  }
0x12a4   :  { %18800 = vmatprep.mubr.bf16.mxu1 %v20216_v38 }
0x12ab   :  { %18801 = vmatmul.mubr.bf16.gmra.mrb[208].mxu1 %v20217_v39 }
0x12ac   :  { %18804 = vmatprep.mubr.bf16.mxu1 %v20218_v29 }
0x12b3   :  { %18805 = vmatmul.mubr.bf16.gmra.mrb[212].mxu1 %v20219_v5 }
0x12b4   :  { %18808 = vmatprep.mubr.bf16.mxu1 %v20220_v1 }
0x12bb   :  { %18809 = vmatmul.mubr.bf16.gmra.mrb[216].mxu1 %v20221_v49  ;;  %v20243_v49 = vld [vmem:[#allocation38 + $0x228] sm:$0xff]  }
0x12bc   :  { %18812 = vmatprep.mubr.bf16.mxu1 %v20222_v50 }
0x12c3   :  { %18813 = vmatmul.mubr.bf16.gmra.mrb[220].mxu1 %v20223_v52  ;;  %v20246_v52 = vld [vmem:[#allocation38 + $0x230] sm:$0xff]  }
0x12c4   :  { %18816 = vmatprep.mubr.bf16.mxu1 %v20226_v37 }
0x12c6   :  { %v22843_v28 = vpop.f32.mrb[116].mxu1 }
0x12c7   :  { %v22845_v21 = vpop.f32.mrb[117].mxu1 }
0x12c8   :  { %v22847_v23 = vpop.f32.mrb[118].mxu1 }
0x12c9   :  { %v14415_v0 = vpack.c.bf16 %v22847_v23, %v22843_v28  ;;  %v22851_v53 = vpop.f32.mrb[119].mxu1 }
0x12ca   :  { %v14414_v35 = vpack.c.bf16 %v22851_v53, %v22845_v21 }
0x12cb   :  { %18817 = vmatmul.mubr.bf16.gmra.mrb[224].mxu1 %v20227_v25 }
0x12cc   :  { %18820 = vmatprep.mubr.bf16.mxu1 %v20228_v20 }
0x12ce   :  { %v22855_v36 = vpop.f32.mrb[120].mxu1 }
0x12cf   :  { %v22857_v47 = vpop.f32.mrb[121].mxu1 }
0x12d0   :  { %v22859_v51 = vpop.f32.mrb[122].mxu1 }
0x12d1   :  { %v14417_v16 = vpack.c.bf16 %v22859_v51, %v22855_v36  ;;  %v22863_v15 = vpop.f32.mrb[123].mxu1 }
0x12d2   :  { %v14416_v46 = vpack.c.bf16 %v22863_v15, %v22857_v47 }
0x12d3   :  { %18821 = vmatmul.mubr.bf16.gmra.mrb[228].mxu1 %v20229_v13 }
0x12d4   :  { %18824 = vmatprep.mubr.bf16.mxu1 %v20230_v18 }
0x12d6   :  { %v22867_v63 = vpop.f32.mrb[124].mxu1 }
0x12d7   :  { %v22869_v24 = vpop.f32.mrb[125].mxu1 }
0x12d8   :  { %v22871_v22 = vpop.f32.mrb[126].mxu1 }
0x12d9   :  { %v14419_v30 = vpack.c.bf16 %v22871_v22, %v22867_v63  ;;  %v22875_v56 = vpop.f32.mrb[127].mxu1 }
0x12da   :  { %v14418_v41 = vpack.c.bf16 %v22875_v56, %v22869_v24 }
0x12db   :  { %18825 = vmatmul.mubr.bf16.gmra.mrb[232].mxu1 %v20231_v58  ;;  %v20247_v58 = vld [vmem:[#allocation38 + $0x238] sm:$0xff]  }
0x12dc   :  { %18828 = vmatprep.mubr.bf16.mxu1 %v20232_v9 }
0x12de   :  { %v22879_v10 = vpop.f32.mrb[128].mxu1 }
0x12df   :  { %v22881_v7 = vpop.f32.mrb[129].mxu1 }
0x12e0   :  { %v22883_v4 = vpop.f32.mrb[130].mxu1 }
0x12e1   :  { %v14421_v2 = vpack.c.bf16 %v22883_v4, %v22879_v10  ;;  %v22887_v44 = vpop.f32.mrb[131].mxu1  ;;  %v20250_v10 = vld [vmem:[#allocation40 + $0x40] sm:$0xff]  }
0x12e2   :  { %v14420_v59 = vpack.c.bf16 %v22887_v44, %v22881_v7 }
0x12e3   :  { %18829 = vmatmul.mubr.bf16.gmra.mrb[236].mxu1 %v20233_v55 }
0x12e4   :  { %18832 = vmatprep.mubr.bf16.mxu1 %v20236_v61 }
0x12e6   :  { %v18726_v12 = vpop.f32.mrb[132].mxu1 }
0x12e7   :  { %v13903_v40 = vpop.f32.mrb[133].mxu1 }
0x12e8   :  { %v18727_v45 = vpop.f32.mrb[134].mxu1 }
0x12e9   :  { %v14423_v31 = vpack.c.bf16 %v18727_v45, %v18726_v12  ;;  %v13906_v19 = vpop.f32.mrb[135].mxu1 }
0x12ea   :  { %v14422_v27 = vpack.c.bf16 %v13906_v19, %v13903_v40  ;;  %v20245_v40 = vld [vmem:[#allocation40 + $0x28] sm:$0xff]  }
0x12eb   :  { %18833 = vmatmul.mubr.bf16.gmra.mrb[240].mxu1 %v20237_v17 }
0x12ec   :  { %18856 = vmatprep.mubr.msk.bf16.mxu0 %vm1579_vm6, %v14422_v27  ;;  %18836 = vmatprep.mubr.bf16.mxu1 %v20238_v3 }
0x12ed   :  { %18857 = vmatmul.mubr.msk.bf16.vlgmr.msra.gmra.mrb[8].mxu0 %vm1579_vm6, %v14423_v31 }
0x12ee   :  { %v18730_v43 = vpop.f32.mrb[136].mxu1  ;;  %18873 = vmatpush3.bf16.msra.mxu0 %v22840_v54  ;;  %v20241_v54 = vld [vmem:[#allocation38 + $0x218] sm:$0xff]  }
0x12ef   :  { %v13919_v57 = vpop.f32.mrb[137].mxu1  ;;  %18874 = vmatprep.subr.bf16.mxu0 %v20235_v8 }
0x12f0   :  { %v18731_v26 = vpop.f32.mrb[138].mxu1 }
0x12f1   :  { %v14425_v33 = vpack.c.bf16 %v18731_v26, %v18730_v43  ;;  %v13922_v14 = vpop.f32.mrb[139].mxu1 }
0x12f2   :  { %v14424_v48 = vpack.c.bf16 %v13922_v14, %v13919_v57  ;;  %18875 = vmatpush3.bf16.msra.mxu0 %v20235_v8 }
0x12f3   :  { %18837 = vmatmul.mubr.bf16.gmra.mrb[244].mxu1 %v20239_v32  ;;  %18892 = vmatprep.subr.bf16.mxu0 %v20244_v11 }
0x12f4   :  { %18860 = vmatprep.mubr.msk.bf16.mxu0 %vm1579_vm6, %v14424_v48  ;;  %18840 = vmatprep.mubr.bf16.mxu1 %v20240_v6 }
0x12f5   :  { %18861 = vmatmul.mubr.msk.bf16.gmra.mrb[12].mxu0 %vm1579_vm6, %v14425_v33 }
0x12f6   :  { %v18734_v60 = vpop.f32.mrb[140].mxu1 }
0x12f7   :  { %v13935_v34 = vpop.f32.mrb[141].mxu1 }
0x12f8   :  { %v18735_v62 = vpop.f32.mrb[142].mxu1 }
0x12f9   :  { %v14427_v38 = vpack.c.bf16 %v18735_v62, %v18734_v60  ;;  %v13938_v39 = vpop.f32.mrb[143].mxu1 }
0x12fa   :  { %v14426_v29 = vpack.c.bf16 %v13938_v39, %v13935_v34 }
0x12fb   :  { %18841 = vmatmul.mubr.bf16.gmra.mrb[248].mxu1 %v20241_v54 }
0x12fc   :  { %18864 = vmatprep.mubr.msk.bf16.mxu0 %vm1579_vm6, %v14426_v29  ;;  %18844 = vmatprep.mubr.bf16.mxu1 %v20242_v42 }
0x12fd   :  { %18865 = vmatmul.mubr.msk.bf16.gmra.mrb[16].mxu0 %vm1579_vm6, %v14427_v38 }
0x12fe   :  { %v18738_v5 = vpop.f32.mrb[144].mxu1 }
0x12ff   :  { %v13951_v1 = vpop.f32.mrb[145].mxu1 }
0x1300   :  { %v18739_v50 = vpop.f32.mrb[146].mxu1 }
0x1301   :  { %v14429_v37 = vpack.c.bf16 %v18739_v50, %v18738_v5  ;;  %v13954_v25 = vpop.f32.mrb[147].mxu1  ;;  %v20251_v50 = vld [vmem:[#allocation40 + $0x48] sm:$0xff]  }
0x1302   :  { %v14428_v20 = vpack.c.bf16 %v13954_v25, %v13951_v1  ;;  %v20252_v25 = vld [vmem:[#allocation40 + $0x50] sm:$0xff]  }
0x1303   :  { %18845 = vmatmul.mubr.bf16.gmra.mrb[252].mxu1 %v20243_v49 }
0x1304   :  { %18868 = vmatprep.mubr.msk.bf16.mxu0 %vm1579_vm6, %v14428_v20  ;;  %18848 = vmatprep.mubr.bf16.mxu1 %v20246_v52 }
0x1305   :  { %18869 = vmatmul.mubr.msk.bf16.gmra.mrb[20].mxu0 %vm1579_vm6, %v14429_v37 }
0x1306   :  { %18876 = vmatprep.mubr.msk.bf16.mxu0 %vm1579_vm6, %v14414_v35  ;;  %v18742_v13 = vpop.f32.mrb[148].mxu1  ;;  %v20248_v35 = vld [vmem:[#allocation40 + $0x30] sm:$0xff]  }
0x1307   :  { %v13967_v18 = vpop.f32.mrb[149].mxu1 }
0x1308   :  { %v18743_v9 = vpop.f32.mrb[150].mxu1 }
0x1309   :  { %v14431_v55 = vpack.c.bf16 %v18743_v9, %v18742_v13  ;;  %v13970_v61 = vpop.f32.mrb[151].mxu1 }
0x130a   :  { %v14430_v12 = vpack.c.bf16 %v13970_v61, %v13967_v18 }
0x130b   :  { %18849 = vmatmul.mubr.bf16.gmra.mrb[0].mxu1 %v20247_v58 }
0x130d   :  { %18877 = vmatmul.mubr.msk.bf16.vlgmr.msra.gmra.mrb[8].mxu0 %vm1579_vm6, %v14415_v0 }
0x130e   :  { %18880 = vmatprep.mubr.msk.bf16.mxu0 %vm1579_vm6, %v14416_v46  ;;  %18893 = vmatpush3.bf16.msra.mxu0 %v20244_v11  ;;  %v18746_v21 = vpop.f32.mrb[152].mxu1 }
0x130f   :  { %18894 = vmatprep.subr.bf16.mxu0 %v20245_v40  ;;  %v13983_v53 = vpop.f32.mrb[153].mxu1 }
0x1310   :  { %v18747_v17 = vpop.f32.mrb[154].mxu1 }
0x1311   :  { %v14433_v45 = vpack.c.bf16 %v18747_v17, %v18746_v21  ;;  %v13986_v3 = vpop.f32.mrb[155].mxu1 }
0x1312   :  { %18895 = vmatpush3.bf16.msra.mxu0 %v20245_v40  ;;  %v14432_v31 = vpack.c.bf16 %v13986_v3, %v13983_v53 }
0x1313   :  { %18912 = vmatprep.subr.bf16.mxu0 %v20248_v35 }
0x1315   :  { %18881 = vmatmul.mubr.msk.bf16.gmra.mrb[12].mxu0 %vm1579_vm6, %v14417_v16 }
0x1316   :  { %18884 = vmatprep.mubr.msk.bf16.mxu0 %vm1579_vm6, %v14418_v41  ;;  %v18750_v28 = vpop.f32.mrb[156].mxu1 }
0x1317   :  { %v13999_v23 = vpop.f32.mrb[157].mxu1 }
0x1318   :  { %v18751_v0 = vpop.f32.mrb[158].mxu1 }
0x1319   :  { %v14435_v47 = vpack.c.bf16 %v18751_v0, %v18750_v28  ;;  %v14002_v15 = vpop.f32.mrb[159].mxu1 }
0x131a   :  { %v14434_v46 = vpack.c.bf16 %v14002_v15, %v13999_v23 }
0x131d   :  { %18885 = vmatmul.mubr.msk.bf16.gmra.mrb[16].mxu0 %vm1579_vm6, %v14419_v30 }
0x131e   :  { %18888 = vmatprep.mubr.msk.bf16.mxu0 %vm1579_vm6, %v14420_v59  ;;  %v18754_v36 = vpop.f32.mrb[160].mxu1  ;;  %v20249_v59 = vld [vmem:[#allocation40 + $0x38] sm:$0xff]  }
0x131f   :  { %v14015_v51 = vpop.f32.mrb[161].mxu1 }
0x1320   :  { %v18755_v16 = vpop.f32.mrb[162].mxu1 }
0x1321   :  { %v14437_v24 = vpack.c.bf16 %v18755_v16, %v18754_v36  ;;  %v14018_v56 = vpop.f32.mrb[163].mxu1  ;;  %v20253_v36 = vld [vmem:[#allocation40 + $0x58] sm:$0xff]  }
0x1322   :  { %v14436_v41 = vpack.c.bf16 %v14018_v56, %v14015_v51 }
0x1325   :  { %18889 = vmatmul.mubr.msk.bf16.gmra.mrb[20].mxu0 %vm1579_vm6, %v14421_v2 }
0x1326   :  { %18896 = vmatprep.mubr.msk.bf16.mxu0 %vm1579_vm6, %v14430_v12  ;;  %v18758_v63 = vpop.f32.mrb[164].mxu1 }
0x1327   :  { %v14031_v22 = vpop.f32.mrb[165].mxu1 }
0x1328   :  { %v18759_v30 = vpop.f32.mrb[166].mxu1 }
0x1329   :  { %v14439_v19 = vpack.c.bf16 %v18759_v30, %v18758_v63  ;;  %v14034_v7 = vpop.f32.mrb[167].mxu1 }
0x132a   :  { %v14438_v44 = vpack.c.bf16 %v14034_v7, %v14031_v22 }
0x132d   :  { %18897 = vmatmul.mubr.msk.bf16.vlgmr.msra.gmra.mrb[8].mxu0 %vm1579_vm6, %v14431_v55 }
0x132e   :  { %18900 = vmatprep.mubr.msk.bf16.mxu0 %vm1579_vm6, %v14432_v31  ;;  %18913 = vmatpush3.bf16.msra.mxu0 %v20248_v35  ;;  %v18762_v27 = vpop.f32.mrb[168].mxu1 }
0x132f   :  { %18914 = vmatprep.subr.bf16.mxu0 %v20249_v59  ;;  %v14047_v8 = vpop.f32.mrb[169].mxu1 }
0x1330   :  { %v18763_v4 = vpop.f32.mrb[170].mxu1 }
0x1331   :  { %v14441_v2 = vpack.c.bf16 %v18763_v4, %v18762_v27  ;;  %v14050_v43 = vpop.f32.mrb[171].mxu1 }
0x1332   :  { %18915 = vmatpush3.bf16.msra.mxu0 %v20249_v59  ;;  %v14440_v57 = vpack.c.bf16 %v14050_v43, %v14047_v8 }
0x1333   :  { %18932 = vmatprep.subr.bf16.mxu0 %v20250_v10 }
0x1335   :  { %18901 = vmatmul.mubr.msk.bf16.gmra.mrb[12].mxu0 %vm1579_vm6, %v14433_v45 }
0x1336   :  { %18904 = vmatprep.mubr.msk.bf16.mxu0 %vm1579_vm6, %v14434_v46  ;;  %v18766_v32 = vpop.f32.mrb[172].mxu1 }
0x1337   :  { %v14063_v11 = vpop.f32.mrb[173].mxu1 }
0x1338   :  { %v18767_v26 = vpop.f32.mrb[174].mxu1 }
0x1339   :  { %v14443_v6 = vpack.c.bf16 %v18767_v26, %v18766_v32  ;;  %v14066_v33 = vpop.f32.mrb[175].mxu1 }
0x133a   :  { %v14442_v14 = vpack.c.bf16 %v14066_v33, %v14063_v11 }
0x133d   :  { %18905 = vmatmul.mubr.msk.bf16.gmra.mrb[16].mxu0 %vm1579_vm6, %v14435_v47 }
0x133e   :  { %18908 = vmatprep.mubr.msk.bf16.mxu0 %vm1579_vm6, %v14436_v41  ;;  %v18770_v48 = vpop.f32.mrb[176].mxu1 }
0x133f   :  { %v14079_v60 = vpop.f32.mrb[177].mxu1 }
0x1340   :  { %v18771_v34 = vpop.f32.mrb[178].mxu1 }
0x1341   :  { %v14445_v54 = vpack.c.bf16 %v18771_v34, %v18770_v48  ;;  %v14082_v62 = vpop.f32.mrb[179].mxu1  ;;  %v20255_v48 = vld [vmem:[#allocation40 + $0x68] sm:$0xff]  }
0x1342   :  { %v14444_v42 = vpack.c.bf16 %v14082_v62, %v14079_v60 }
0x1345   :  { %18909 = vmatmul.mubr.msk.bf16.gmra.mrb[20].mxu0 %vm1579_vm6, %v14437_v24  ;;  %v20254_v24 = vld [vmem:[#allocation40 + $0x60] sm:$0xff]  }
0x1346   :  { %18916 = vmatprep.mubr.msk.bf16.mxu0 %vm1579_vm6, %v14438_v44  ;;  %v18774_v38 = vpop.f32.mrb[180].mxu1 }
0x1347   :  { %v14095_v39 = vpop.f32.mrb[181].mxu1 }
0x1348   :  { %v18775_v29 = vpop.f32.mrb[182].mxu1 }
0x1349   :  { %v14447_v5 = vpack.c.bf16 %v18775_v29, %v18774_v38  ;;  %v14098_v1 = vpop.f32.mrb[183].mxu1 }
0x134a   :  { %v14446_v49 = vpack.c.bf16 %v14098_v1, %v14095_v39 }
0x134d   :  { %18917 = vmatmul.mubr.msk.bf16.vlgmr.msra.gmra.mrb[8].mxu0 %vm1579_vm6, %v14439_v19 }
0x134e   :  { %18920 = vmatprep.mubr.msk.bf16.mxu0 %vm1579_vm6, %v14440_v57  ;;  %18933 = vmatpush3.bf16.msra.mxu0 %v20250_v10  ;;  %v18778_v52 = vpop.f32.mrb[184].mxu1 }
0x134f   :  { %18934 = vmatprep.subr.bf16.mxu0 %v20251_v50  ;;  %v14111_v37 = vpop.f32.mrb[185].mxu1 }
0x1350   :  { %v18779_v20 = vpop.f32.mrb[186].mxu1 }
0x1351   :  { %v14449_v13 = vpack.c.bf16 %v18779_v20, %v18778_v52  ;;  %v14114_v18 = vpop.f32.mrb[187].mxu1 }
0x1352   :  { %18935 = vmatpush3.bf16.msra.mxu0 %v20251_v50  ;;  %v14448_v58 = vpack.c.bf16 %v14114_v18, %v14111_v37 }
0x1353   :  { %18952 = vmatprep.subr.bf16.mxu0 %v20252_v25 }
0x1355   :  { %18921 = vmatmul.mubr.msk.bf16.gmra.mrb[12].mxu0 %vm1579_vm6, %v14441_v2 }
0x1356   :  { %18924 = vmatprep.mubr.msk.bf16.mxu0 %vm1579_vm6, %v14442_v14  ;;  %v18782_v9 = vpop.f32.mrb[188].mxu1 }
0x1357   :  { %v14127_v55 = vpop.f32.mrb[189].mxu1 }
0x1358   :  { %v18783_v61 = vpop.f32.mrb[190].mxu1 }
0x1359   :  { %v14451_v12 = vpack.c.bf16 %v18783_v61, %v18782_v9  ;;  %v14130_v40 = vpop.f32.mrb[191].mxu1 }
0x135a   :  { %v14450_v21 = vpack.c.bf16 %v14130_v40, %v14127_v55 }
0x135d   :  { %18925 = vmatmul.mubr.msk.bf16.gmra.mrb[16].mxu0 %vm1579_vm6, %v14443_v6 }
0x135e   :  { %18928 = vmatprep.mubr.msk.bf16.mxu0 %vm1579_vm6, %v14444_v42  ;;  %v18786_v53 = vpop.f32.mrb[192].mxu1 }
0x135f   :  { %v14143_v35 = vpop.f32.mrb[193].mxu1 }
0x1360   :  { %v18787_v17 = vpop.f32.mrb[194].mxu1 }
0x1361   :  { %v14453_v45 = vpack.c.bf16 %v18787_v17, %v18786_v53  ;;  %v14146_v3 = vpop.f32.mrb[195].mxu1  ;;  %v20257_v53 = vld [vmem:[#allocation40 + $0x78] sm:$0xff]  }
0x1362   :  { %v14452_v31 = vpack.c.bf16 %v14146_v3, %v14143_v35 }
0x1365   :  { %18929 = vmatmul.mubr.msk.bf16.gmra.mrb[20].mxu0 %vm1579_vm6, %v14445_v54  ;;  %v20256_v54 = vld [vmem:[#allocation40 + $0x70] sm:$0xff]  }
0x1366   :  { %18936 = vmatprep.mubr.msk.bf16.mxu0 %vm1579_vm6, %v14446_v49  ;;  %v18790_v28 = vpop.f32.mrb[196].mxu1 }
0x1367   :  { %v14159_v23 = vpop.f32.mrb[197].mxu1 }
0x1368   :  { %v18791_v0 = vpop.f32.mrb[198].mxu1 }
0x1369   :  { %v14455_v47 = vpack.c.bf16 %v18791_v0, %v18790_v28  ;;  %v14162_v15 = vpop.f32.mrb[199].mxu1 }
0x136a   :  { %v14454_v46 = vpack.c.bf16 %v14162_v15, %v14159_v23 }
0x136d   :  { %18937 = vmatmul.mubr.msk.bf16.vlgmr.msra.gmra.mrb[8].mxu0 %vm1579_vm6, %v14447_v5 }
0x136e   :  { %18940 = vmatprep.mubr.msk.bf16.mxu0 %vm1579_vm6, %v14448_v58  ;;  %18953 = vmatpush3.bf16.msra.mxu0 %v20252_v25  ;;  %v18794_v51 = vpop.f32.mrb[200].mxu1 }
0x136f   :  { %18954 = vmatprep.subr.bf16.mxu0 %v20253_v36  ;;  %v14175_v16 = vpop.f32.mrb[201].mxu1 }
0x1370   :  { %v18795_v56 = vpop.f32.mrb[202].mxu1 }
0x1371   :  { %v14457_v41 = vpack.c.bf16 %v18795_v56, %v18794_v51  ;;  %v14178_v63 = vpop.f32.mrb[203].mxu1 }
0x1372   :  { %18955 = vmatpush3.bf16.msra.mxu0 %v20253_v36  ;;  %v14456_v22 = vpack.c.bf16 %v14178_v63, %v14175_v16 }
0x1373   :  { %18972 = vmatprep.subr.bf16.mxu0 %v20254_v24 }
0x1375   :  { %18941 = vmatmul.mubr.msk.bf16.gmra.mrb[12].mxu0 %vm1579_vm6, %v14449_v13 }
0x1376   :  { %18944 = vmatprep.mubr.msk.bf16.mxu0 %vm1579_vm6, %v14450_v21  ;;  %v18798_v30 = vpop.f32.mrb[204].mxu1 }
0x1377   :  { %v14191_v19 = vpop.f32.mrb[205].mxu1 }
0x1378   :  { %v18799_v7 = vpop.f32.mrb[206].mxu1 }
0x1379   :  { %v14459_v44 = vpack.c.bf16 %v18799_v7, %v18798_v30  ;;  %v14194_v59 = vpop.f32.mrb[207].mxu1 }
0x137a   :  { %v14458_v27 = vpack.c.bf16 %v14194_v59, %v14191_v19 }
0x137d   :  { %18945 = vmatmul.mubr.msk.bf16.gmra.mrb[16].mxu0 %vm1579_vm6, %v14451_v12 }
0x137e   :  { %18948 = vmatprep.mubr.msk.bf16.mxu0 %vm1579_vm6, %v14452_v31  ;;  %v18802_v8 = vpop.f32.mrb[208].mxu1 }
0x137f   :  { %v14207_v10 = vpop.f32.mrb[209].mxu1 }
0x1380   :  { %v18803_v4 = vpop.f32.mrb[210].mxu1 }
0x1381   :  { %v14461_v2 = vpack.c.bf16 %v18803_v4, %v18802_v8  ;;  %v14210_v43 = vpop.f32.mrb[211].mxu1  ;;  %v20259_v8 = vld [vmem:[#allocation40 + $0x88] sm:$0xff]  }
0x1382   :  { %v14460_v57 = vpack.c.bf16 %v14210_v43, %v14207_v10 }
0x1385   :  { %18949 = vmatmul.mubr.msk.bf16.gmra.mrb[20].mxu0 %vm1579_vm6, %v14453_v45  ;;  %v20258_v45 = vld [vmem:[#allocation40 + $0x80] sm:$0xff]  }
0x1386   :  { %18956 = vmatprep.mubr.msk.bf16.mxu0 %vm1579_vm6, %v14454_v46  ;;  %v18806_v32 = vpop.f32.mrb[212].mxu1 }
0x1387   :  { %v14223_v11 = vpop.f32.mrb[213].mxu1 }
0x1388   :  { %v18807_v26 = vpop.f32.mrb[214].mxu1 }
0x1389   :  { %v14463_v6 = vpack.c.bf16 %v18807_v26, %v18806_v32  ;;  %v14226_v33 = vpop.f32.mrb[215].mxu1 }
0x138a   :  { %v14462_v14 = vpack.c.bf16 %v14226_v33, %v14223_v11 }
0x138d   :  { %18957 = vmatmul.mubr.msk.bf16.vlgmr.msra.gmra.mrb[8].mxu0 %vm1579_vm6, %v14455_v47 }
0x138e   :  { %18960 = vmatprep.mubr.msk.bf16.mxu0 %vm1579_vm6, %v14456_v22  ;;  %18973 = vmatpush3.bf16.msra.mxu0 %v20254_v24  ;;  %v18810_v60 = vpop.f32.mrb[216].mxu1 }
0x138f   :  { %18974 = vmatprep.subr.bf16.mxu0 %v20255_v48  ;;  %v14239_v34 = vpop.f32.mrb[217].mxu1 }
0x1390   :  { %v18811_v62 = vpop.f32.mrb[218].mxu1 }
0x1391   :  { %v14465_v42 = vpack.c.bf16 %v18811_v62, %v18810_v60  ;;  %v14242_v38 = vpop.f32.mrb[219].mxu1 }
0x1392   :  { %18975 = vmatpush3.bf16.msra.mxu0 %v20255_v48  ;;  %v14464_v39 = vpack.c.bf16 %v14242_v38, %v14239_v34 }
0x1393   :  { %18992 = vmatprep.subr.bf16.mxu0 %v20256_v54 }
0x1395   :  { %18961 = vmatmul.mubr.msk.bf16.gmra.mrb[12].mxu0 %vm1579_vm6, %v14457_v41 }
0x1396   :  { %18964 = vmatprep.mubr.msk.bf16.mxu0 %vm1579_vm6, %v14458_v27  ;;  %v18814_v29 = vpop.f32.mrb[220].mxu1 }
0x1397   :  { %v14255_v5 = vpop.f32.mrb[221].mxu1 }
0x1398   :  { %v18815_v1 = vpop.f32.mrb[222].mxu1 }
0x1399   :  { %v14467_v49 = vpack.c.bf16 %v18815_v1, %v18814_v29  ;;  %v14258_v50 = vpop.f32.mrb[223].mxu1 }
0x139a   :  { %v14466_v52 = vpack.c.bf16 %v14258_v50, %v14255_v5 }
0x139d   :  { %18965 = vmatmul.mubr.msk.bf16.gmra.mrb[16].mxu0 %vm1579_vm6, %v14459_v44 }
0x139e   :  { %18968 = vmatprep.mubr.msk.bf16.mxu0 %vm1579_vm6, %v14460_v57  ;;  %v18818_v37 = vpop.f32.mrb[224].mxu1 }
0x139f   :  { %v14271_v25 = vpop.f32.mrb[225].mxu1 }
0x13a0   :  { %v18819_v20 = vpop.f32.mrb[226].mxu1 }
0x13a1   :  { %v14469_v13 = vpack.c.bf16 %v18819_v20, %v18818_v37  ;;  %v14274_v18 = vpop.f32.mrb[227].mxu1 }
0x13a2   :  { %v14468_v58 = vpack.c.bf16 %v14274_v18, %v14271_v25 }
0x13a5   :  { %18969 = vmatmul.mubr.msk.bf16.gmra.mrb[20].mxu0 %vm1579_vm6, %v14461_v2 }
0x13a6   :  { %18976 = vmatprep.mubr.msk.bf16.mxu0 %vm1579_vm6, %v14462_v14  ;;  %v18822_v9 = vpop.f32.mrb[228].mxu1 }
0x13a7   :  { %v14287_v55 = vpop.f32.mrb[229].mxu1 }
0x13a8   :  { %v18823_v61 = vpop.f32.mrb[230].mxu1 }
0x13a9   :  { %v14471_v12 = vpack.c.bf16 %v18823_v61, %v18822_v9  ;;  %v14290_v40 = vpop.f32.mrb[231].mxu1 }
0x13aa   :  { %v14470_v21 = vpack.c.bf16 %v14290_v40, %v14287_v55 }
0x13ad   :  { %18977 = vmatmul.mubr.msk.bf16.vlgmr.msra.gmra.mrb[8].mxu0 %vm1579_vm6, %v14463_v6 }
0x13ae   :  { %18980 = vmatprep.mubr.msk.bf16.mxu0 %vm1579_vm6, %v14464_v39  ;;  %18993 = vmatpush3.bf16.msra.mxu0 %v20256_v54  ;;  %v18826_v35 = vpop.f32.mrb[232].mxu1  ;;  %v22988_v39 = vld [vmem:[#allocation41] ss:$0 sm:$0xff] }
0x13af   :  { %18994 = vmatprep.subr.bf16.mxu0 %v20257_v53  ;;  %v14303_v17 = vpop.f32.mrb[233].mxu1 }
0x13b0   :  { %v18827_v3 = vpop.f32.mrb[234].mxu1 }
0x13b1   :  { %v14473_v31 = vpack.c.bf16 %v18827_v3, %v18826_v35  ;;  %v14306_v28 = vpop.f32.mrb[235].mxu1 }
0x13b2   :  { %18995 = vmatpush3.bf16.msra.mxu0 %v20257_v53  ;;  %v14472_v23 = vpack.c.bf16 %v14306_v28, %v14303_v17 }
0x13b3   :  { %19012 = vmatprep.subr.bf16.mxu0 %v20258_v45 }
0x13b5   :  { %18981 = vmatmul.mubr.msk.bf16.gmra.mrb[12].mxu0 %vm1579_vm6, %v14465_v42 }
0x13b6   :  { %18984 = vmatprep.mubr.msk.bf16.mxu0 %vm1579_vm6, %v14466_v52  ;;  %v18830_v0 = vpop.f32.mrb[236].mxu1 }
0x13b7   :  { %v14319_v47 = vpop.f32.mrb[237].mxu1 }
0x13b8   :  { %v18831_v15 = vpop.f32.mrb[238].mxu1 }
0x13b9   :  { %v14475_v46 = vpack.c.bf16 %v18831_v15, %v18830_v0  ;;  %v14322_v36 = vpop.f32.mrb[239].mxu1 }
0x13ba   :  { %v14474_v51 = vpack.c.bf16 %v14322_v36, %v14319_v47 }
0x13bd   :  { %18985 = vmatmul.mubr.msk.bf16.gmra.mrb[16].mxu0 %vm1579_vm6, %v14467_v49 }
0x13be   :  { %18988 = vmatprep.mubr.msk.bf16.mxu0 %vm1579_vm6, %v14468_v58  ;;  %v18834_v16 = vpop.f32.mrb[240].mxu1 }
0x13bf   :  { %v14335_v24 = vpop.f32.mrb[241].mxu1 }
0x13c0   :  { %v18835_v56 = vpop.f32.mrb[242].mxu1 }
0x13c1   :  { %v14477_v41 = vpack.c.bf16 %v18835_v56, %v18834_v16  ;;  %v14338_v63 = vpop.f32.mrb[243].mxu1 }
0x13c2   :  { %v14476_v22 = vpack.c.bf16 %v14338_v63, %v14335_v24 }
0x13c5   :  { %18989 = vmatmul.mubr.msk.bf16.gmra.mrb[20].mxu0 %vm1579_vm6, %v14469_v13 }
0x13c6   :  { %18996 = vmatprep.mubr.msk.bf16.mxu0 %vm1579_vm6, %v14470_v21  ;;  %v18838_v30 = vpop.f32.mrb[244].mxu1 }
0x13c7   :  { %v14351_v19 = vpop.f32.mrb[245].mxu1 }
0x13c8   :  { %v18839_v7 = vpop.f32.mrb[246].mxu1 }
0x13c9   :  { %v14479_v44 = vpack.c.bf16 %v18839_v7, %v18838_v30  ;;  %v14354_v59 = vpop.f32.mrb[247].mxu1 }
0x13ca   :  { %v14478_v27 = vpack.c.bf16 %v14354_v59, %v14351_v19 }
0x13cd   :  { %18997 = vmatmul.mubr.msk.bf16.vlgmr.msra.gmra.mrb[8].mxu0 %vm1579_vm6, %v14471_v12 }
0x13ce   :  { %19000 = vmatprep.mubr.msk.bf16.mxu0 %vm1579_vm6, %v14472_v23  ;;  %19013 = vmatpush3.bf16.msra.mxu0 %v20258_v45  ;;  %v18842_v10 = vpop.f32.mrb[248].mxu1 }
0x13cf   :  { %19014 = vmatprep.subr.bf16.mxu0 %v20259_v8  ;;  %v14367_v4 = vpop.f32.mrb[249].mxu1 }
0x13d0   :  { %v18843_v2 = vpop.f32.mrb[250].mxu1 }
0x13d1   :  { %v14481_v43 = vpack.c.bf16 %v18843_v2, %v18842_v10  ;;  %v14370_v57 = vpop.f32.mrb[251].mxu1 }
0x13d2   :  { %19015 = vmatpush3.bf16.msra.mxu0 %v20259_v8  ;;  %v14480_v32 = vpack.c.bf16 %v14370_v57, %v14367_v4 }
0x13d5   :  { %19001 = vmatmul.mubr.msk.bf16.gmra.mrb[12].mxu0 %vm1579_vm6, %v14473_v31 }
0x13d6   :  { %19004 = vmatprep.mubr.msk.bf16.mxu0 %vm1579_vm6, %v14474_v51  ;;  %v18846_v11 = vpop.f32.mrb[252].mxu1 }
0x13d7   :  { %v14383_v26 = vpop.f32.mrb[253].mxu1 }
0x13d8   :  { %v18847_v6 = vpop.f32.mrb[254].mxu1 }
0x13d9   :  { %v14483_v33 = vpack.c.bf16 %v18847_v6, %v18846_v11  ;;  %v14386_v14 = vpop.f32.mrb[255].mxu1 }
0x13da   :  { %v14482_v48 = vpack.c.bf16 %v14386_v14, %v14383_v26 }
0x13dd   :  { %19005 = vmatmul.mubr.msk.bf16.gmra.mrb[16].mxu0 %vm1579_vm6, %v14475_v46 }
0x13de   :  { %19008 = vmatprep.mubr.msk.bf16.mxu0 %vm1579_vm6, %v14476_v22  ;;  %v18850_v60 = vpop.f32.mrb[0].mxu1 }
0x13df   :  { %v14399_v34 = vpop.f32.mrb[1].mxu1 }
0x13e0   :  { %v18851_v54 = vpop.f32.mrb[2].mxu1 }
0x13e1   :  { %v14485_v62 = vpack.c.bf16 %v18851_v54, %v18850_v60  ;;  %v14402_v42 = vpop.f32.mrb[3].mxu1 }
0x13e2   :  { %v14484_v38 = vpack.c.bf16 %v14402_v42, %v14399_v34 }
0x13e5   :  { %19009 = vmatmul.mubr.msk.bf16.gmra.mrb[20].mxu0 %vm1579_vm6, %v14477_v41 }
0x13e6   :  { %19016 = vmatprep.mubr.msk.bf16.mxu0 %vm1579_vm6, %v14478_v27 }
0x13ed   :  { %19017 = vmatmul.mubr.msk.bf16.vlgmr.msra.gmra.mrb[8].mxu0 %vm1579_vm6, %v14479_v44 }
0x13ee   :  { %19020 = vmatprep.mubr.msk.bf16.mxu0 %vm1579_vm6, %v14480_v32 }
0x13f5   :  { %19021 = vmatmul.mubr.msk.bf16.gmra.mrb[12].mxu0 %vm1579_vm6, %v14481_v43 }
0x13f6   :  { %19024 = vmatprep.mubr.msk.bf16.mxu0 %vm1579_vm6, %v14482_v48 }
0x13fd   :  { %19025 = vmatmul.mubr.msk.bf16.gmra.mrb[16].mxu0 %vm1579_vm6, %v14483_v33 }
0x13fe   :  { %19028 = vmatprep.mubr.msk.bf16.mxu0 %vm1579_vm6, %v14484_v38 }
0x1405   :  { %19029 = vmatmul.mubr.msk.bf16.gmra.mrb[20].mxu0 %vm1579_vm6, %v14485_v62 }
0x14c0   :  { %v19018_v29 = vpop.f32.mrb[8].mxu0 }
0x14c1   :  { %v15848_v5 = vadd.f32 %v19018_v29, %v22988_v39  ;;  %v15760_v1 = vpop.f32.mrb[9].mxu0 }
0x14c2   :  { %v15846_v49 = vadd.f32 %v22988_v39, %v15760_v1  ;;  %v19019_v50 = vpop.f32.mrb[10].mxu0 }
0x14c3   :  { %v17242_v52 = vmul.f32 -1.442695, %v15848_v5  ;;  %v15849_v37 = vadd.f32 %v19019_v50, %v22988_v39  ;;  %v15763_v25 = vpop.f32.mrb[11].mxu0 }
0x14c4   :  { %v17240_v20 = vmul.f32 -1.442695, %v15846_v49  ;;  %v15847_v13 = vadd.f32 %v22988_v39, %v15763_v25 }
0x14c5   :  { %20276 = vpow2.f32 %v17242_v52  ;;  %v17243_v18 = vmul.f32 -1.442695, %v15849_v37 }
0x14c6   :  { %20278 = vpow2.f32 %v17240_v20  ;;  %v17241_v58 = vmul.f32 -1.442695, %v15847_v13 }
0x14c7   :  { %20280 = vpow2.f32 %v17243_v18 }
0x14c8   :  { %20282 = vpow2.f32 %v17241_v58  ;;  %v19022_v9 = vpop.f32.mrb[12].mxu0 }
0x14c9   :  { %v15852_v55 = vadd.f32 %v19022_v9, %v22988_v39  ;;  %v15776_v61 = vpop.f32.mrb[13].mxu0 }
0x14ca   :  { %v15850_v12 = vadd.f32 %v22988_v39, %v15776_v61  ;;  %v19023_v40 = vpop.f32.mrb[14].mxu0 }
0x14cb   :  { %v17246_v21 = vmul.f32 -1.442695, %v15852_v55  ;;  %v15853_v53 = vadd.f32 %v19023_v40, %v22988_v39  ;;  %v15779_v35 = vpop.f32.mrb[15].mxu0 }
0x14cc   :  { %v17244_v17 = vmul.f32 -1.442695, %v15850_v12  ;;  %v15851_v45 = vadd.f32 %v22988_v39, %v15779_v35 }
0x14cd   :  { %20284 = vpow2.f32 %v17246_v21  ;;  %v17247_v3 = vmul.f32 -1.442695, %v15853_v53 }
0x14ce   :  { %20286 = vpow2.f32 %v17244_v17  ;;  %v17245_v31 = vmul.f32 -1.442695, %v15851_v45 }
0x14cf   :  { %v20277_v28 = vpop.eup %20276  ;;  %20288 = vpow2.f32 %v17247_v3 }
0x14d0   :  { %v20279_v23 = vpop.eup %20278  ;;  %v15912_v0 = vadd.f32 1.0, %v20277_v28  ;;  %20290 = vpow2.f32 %v17245_v31  ;;  %v19026_v47 = vpop.f32.mrb[16].mxu0 }
0x14d1   :  { %v20281_v15 = vpop.eup %20280  ;;  %v15910_v46 = vadd.f32 1.0, %v20279_v23  ;;  %v15856_v36 = vadd.f32 %v19026_v47, %v22988_v39  ;;  %v15792_v51 = vpop.f32.mrb[17].mxu0 }
0x14d2   :  { %v20283_v16 = vpop.eup %20282  ;;  %20292 = vrcp.f32 %v15912_v0  ;;  %v15913_v24 = vadd.f32 1.0, %v20281_v15  ;;  %v15854_v56 = vadd.f32 %v22988_v39, %v15792_v51  ;;  %v19027_v41 = vpop.f32.mrb[18].mxu0 }
0x14d3   :  { %20294 = vrcp.f32 %v15910_v46  ;;  %v15911_v63 = vadd.f32 1.0, %v20283_v16  ;;  %v17250_v22 = vmul.f32 -1.442695, %v15856_v36  ;;  %v15857_v30 = vadd.f32 %v19027_v41, %v22988_v39  ;;  %v15795_v19 = vpop.f32.mrb[19].mxu0 }
0x14d4   :  { %20296 = vrcp.f32 %v15913_v24  ;;  %v17248_v7 = vmul.f32 -1.442695, %v15854_v56  ;;  %v15855_v44 = vadd.f32 %v22988_v39, %v15795_v19 }
0x14d5   :  { %20298 = vrcp.f32 %v15911_v63  ;;  %v17251_v59 = vmul.f32 -1.442695, %v15857_v30 }
0x14d6   :  { %20300 = vpow2.f32 %v17250_v22  ;;  %v17249_v27 = vmul.f32 -1.442695, %v15855_v44 }
0x14d7   :  { %v20285_v8 = vpop.eup %20284  ;;  %20302 = vpow2.f32 %v17248_v7 }
0x14d8   :  { %v20287_v10 = vpop.eup %20286  ;;  %v15916_v4 = vadd.f32 1.0, %v20285_v8  ;;  %20304 = vpow2.f32 %v17251_v59  ;;  %v19030_v2 = vpop.f32.mrb[20].mxu0 }
0x14d9   :  { %v20289_v43 = vpop.eup %20288  ;;  %v15914_v57 = vadd.f32 1.0, %v20287_v10  ;;  %20306 = vpow2.f32 %v17249_v27  ;;  %v15860_v32 = vadd.f32 %v19030_v2, %v22988_v39  ;;  %v15808_v11 = vpop.f32.mrb[21].mxu0 }
0x14da   :  { %v20291_v26 = vpop.eup %20290  ;;  %20308 = vrcp.f32 %v15916_v4  ;;  %v15917_v6 = vadd.f32 1.0, %v20289_v43  ;;  %v15858_v33 = vadd.f32 %v22988_v39, %v15808_v11  ;;  %v19031_v14 = vpop.f32.mrb[22].mxu0 }
0x14db   :  { %20310 = vrcp.f32 %v15914_v57  ;;  %v15915_v48 = vadd.f32 1.0, %v20291_v26  ;;  %v17254_v60 = vmul.f32 -1.442695, %v15860_v32  ;;  %v15861_v34 = vadd.f32 %v19031_v14, %v22988_v39  ;;  %v15811_v54 = vpop.f32.mrb[23].mxu0 }
0x14dc   :  { %v20293_v62 = vpop.eup %20292  ;;  %20312 = vrcp.f32 %v15917_v6  ;;  %v17252_v42 = vmul.f32 -1.442695, %v15858_v33  ;;  %v15859_v38 = vadd.f32 %v22988_v39, %v15811_v54 }
0x14dd   :  { %v20295_v29 = vpop.eup %20294  ;;  %15960 = vst [vmem:[#allocation43 + $0x10] sm:$0xff] %v20293_v62  ;;  %20314 = vrcp.f32 %v15915_v48  ;;  %v17255_v5 = vmul.f32 -1.442695, %v15861_v34 }
0x14de   :  { %v20297_v1 = vpop.eup %20296  ;;  %15958 = vst [vmem:[#allocation43] sm:$0xff] %v20295_v29  ;;  %20316 = vpow2.f32 %v17254_v60  ;;  %v17253_v49 = vmul.f32 -1.442695, %v15859_v38 }
0x14df   :  { %v20299_v50 = vpop.eup %20298  ;;  %15961 = vst [vmem:[#allocation43 + $0x18] sm:$0xff] %v20297_v1  ;;  %20318 = vpow2.f32 %v17252_v42 }
0x14e0   :  { %v20301_v52 = vpop.eup %20300  ;;  %15959 = vst [vmem:[#allocation43 + $0x8] sm:$0xff] %v20299_v50  ;;  %20320 = vpow2.f32 %v17255_v5 }
0x14e1   :  { %v20303_v37 = vpop.eup %20302  ;;  %v15920_v25 = vadd.f32 1.0, %v20301_v52  ;;  %20322 = vpow2.f32 %v17253_v49 }
0x14e2   :  { %v20305_v20 = vpop.eup %20304  ;;  %v15918_v13 = vadd.f32 1.0, %v20303_v37 }
0x14e3   :  { %v20307_v39 = vpop.eup %20306  ;;  %20324 = vrcp.f32 %v15920_v25  ;;  %v15921_v18 = vadd.f32 1.0, %v20305_v20 }
0x14e4   :  { %v20309_v58 = vpop.eup %20308  ;;  %20326 = vrcp.f32 %v15918_v13  ;;  %v15919_v9 = vadd.f32 1.0, %v20307_v39 }
0x14e5   :  { %v20311_v55 = vpop.eup %20310  ;;  %15964 = vst [vmem:[#allocation43 + $0x30] sm:$0xff] %v20309_v58  ;;  %20328 = vrcp.f32 %v15921_v18 }
0x14e6   :  { %v20313_v61 = vpop.eup %20312  ;;  %15962 = vst [vmem:[#allocation43 + $0x20] sm:$0xff] %v20311_v55  ;;  %20330 = vrcp.f32 %v15919_v9 }
0x14e7   :  { %v20315_v12 = vpop.eup %20314  ;;  %15965 = vst [vmem:[#allocation43 + $0x38] sm:$0xff] %v20313_v61 }
0x14e8   :  { %v20317_v40 = vpop.eup %20316  ;;  %15963 = vst [vmem:[#allocation43 + $0x28] sm:$0xff] %v20315_v12 }
0x14e9   :  { %v20319_v21 = vpop.eup %20318  ;;  %v15924_v53 = vadd.f32 1.0, %v20317_v40 }
0x14ea   :  { %v20321_v35 = vpop.eup %20320  ;;  %v15922_v17 = vadd.f32 1.0, %v20319_v21 }
0x14eb   :  { %v20323_v45 = vpop.eup %20322  ;;  %20332 = vrcp.f32 %v15924_v53  ;;  %v15925_v3 = vadd.f32 1.0, %v20321_v35 }
0x14ec   :  { %20334 = vrcp.f32 %v15922_v17  ;;  %v15923_v31 = vadd.f32 1.0, %v20323_v45 }
0x14ed   :  { %v20325_v28 = vpop.eup %20324  ;;  %20336 = vrcp.f32 %v15925_v3 }
0x14ee   :  { %v20327_v23 = vpop.eup %20326  ;;  %15968 = vst [vmem:[#allocation43 + $0x50] sm:$0xff] %v20325_v28  ;;  %20338 = vrcp.f32 %v15923_v31 }
0x14ef   :  { %v20329_v0 = vpop.eup %20328  ;;  %15966 = vst [vmem:[#allocation43 + $0x40] sm:$0xff] %v20327_v23 }
0x14f0   :  { %v20331_v47 = vpop.eup %20330  ;;  %15969 = vst [vmem:[#allocation43 + $0x58] sm:$0xff] %v20329_v0 }
0x14f1   :  { %15967 = vst [vmem:[#allocation43 + $0x48] sm:$0xff] %v20331_v47 }
0x14f5   :  { %v20333_v15 = vpop.eup %20332 }
0x14f6   :  { %v20335_v46 = vpop.eup %20334  ;;  %15972 = vst [vmem:[#allocation43 + $0x70] sm:$0xff] %v20333_v15 }
0x14f7   :  { %v20337_v36 = vpop.eup %20336  ;;  %15970 = vst [vmem:[#allocation43 + $0x60] sm:$0xff] %v20335_v46 }
0x14f8   :  { %v20339_v51 = vpop.eup %20338  ;;  %15973 = vst [vmem:[#allocation43 + $0x78] sm:$0xff] %v20337_v36 }
0x14f9   :  { %15971 = vst [vmem:[#allocation43 + $0x68] sm:$0xff] %v20339_v51 }
0x14fa   :  { %20923 = shalt.err (!%p20920_p2)
}
0x14fb   :  { %s20924_s23 = scalar_lea.hbm %s21198_s20, 2048 }
0x14fc   :  { %p20925_p3 = scmp.ne.s32.totalorder %s21198_s20, %s20924_s23  ;;  %p20928_p4 = scmp.lt.u32.totalorder %s20924_s23, %s21198_s20 }
0x14fe   :  { %p20930_p5 = pnand %p20928_p4, %p20925_p3 }
0x1500   :  { %20933 = shalt.err (!%p20930_p5)
}
0x1501   :  { %15985 = dma.vmem_to_hbm [thread:$0]  %s15980_s19, 2048, %s21198_s20, [#allocation4], %s21006_s0, %s21006_s0, %s21007_s30  }
0x1502   :  { %20962 = dma.done.wait [#allocation4], 2048  }
0x1503   :  { %20963 = vsyncadd [#allocation4], 4294965248 }
0x1504   :  { %15993 = vsyncpa [#allocation3], 1 }
0x1505   :  { %15994 = vsyncpa [#allocation6], 1 }
0x1506   :  { %15995 = vsyncpa [#allocation9], 1 }
0x1507   :  { %15996 = vsyncpa [#allocation12], 1 }
0x1508   :  { %15997 = vsyncpa [#allocation15], 1 }
0x1509   :  { %15998 = vsyncpa [#allocation18], 1 }
0x150a   :  { %15999 = vsyncpa [#allocation21], 1 }
0x150b   :  { %16000 = vsyncpa [#allocation24], 1 }
0x150c   :  { %16001 = vsyncpa [#allocation27], 1 }
0x150d   :  { %16002 = vsyncpa [#allocation30], 1 }
0x150e   :  { %16003 = vsyncpa [#allocation33], 1 }
0x150f   :  { %16004 = vsyncpa [#allocation36], 1 }
0x1510   :  { %16005 = vsyncpa [#allocation39], 1 }
0x1511   :  { %16006 = vsyncpa [#allocation42], 1 }
0x1512   :  { %16007 = vsyncpa [#allocation4], 1 }

</bundles_post_ra>
